<compile_context>
chip_gen: v6e
topology: v6e:2x2x1
jax: 0.10.0
libtpu: 0.0.40
codegen_flags: <defaults>
</compile_context>

<pallas_src>
import functools

import jax
import jax.numpy as jnp
from jax.experimental import pallas as pl
from jax.experimental.pallas import tpu as pltpu

NUM_GROUPS = 32
EPS = 1e-5
LANE = 128


def _tpu_vmem_bytes():
    try:
        cap = int(pltpu.get_tpu_info().vmem_capacity_bytes)
        if cap > 0:
            return cap
    except Exception:                       # CPU / unknown backend fallback
        pass
    return 128 * 1024 * 1024


_VMEM_CAP = _tpu_vmem_bytes()
VMEM_LIMIT = int(_VMEM_CAP * 0.8)           # leave scoped-VMEM headroom
# v5e/v6e (128 MiB VMEM): 512 rows per conv tile; v7x (64 MiB): 256 rows.
MAX_TILE_ROWS = 512 if _VMEM_CAP >= 96 * 1024 * 1024 else 256
_STATS_CHUNK = 1024                         # rows per fp32 reduction chunk


# ---------------------------------------------------------------------------
# Pallas kernels
# ---------------------------------------------------------------------------
def _gn1_stats_time_kernel(x_ref, g_ref, b_ref, m_ref, t_ref, wt_ref, tb_ref,
                           sc_ref, sh_ref, bt_ref, *, inv_n):
    # x_ref: (S, Cp) bf16 = flattened zero-padded spatial x padded channels.
    # Zero padding contributes nothing to the sums; inv_n = 1/(H*W*C_per_group).
    s, cp = x_ref.shape
    s1 = jnp.zeros((1, cp), jnp.float32)
    s2 = jnp.zeros((1, cp), jnp.float32)
    for lo in range(0, s, _STATS_CHUNK):     # chunked: no full fp32 image copy
        n = min(_STATS_CHUNK, s - lo)
        xc = x_ref[lo:lo + n, :].astype(jnp.float32)
        s1 = s1 + jnp.sum(xc, axis=0, keepdims=True)
        s2 = s2 + jnp.sum(xc * xc, axis=0, keepdims=True)
    # m_ref[i, j] = 1 iff channels i, j are real and in the same group: a tiny
    # matmul broadcasts the group sums back onto per-channel lanes.
    m = m_ref[...].astype(jnp.float32)
    mean = jnp.dot(s1, m, preferred_element_type=jnp.float32) * inv_n
    ex2 = jnp.dot(s2, m, preferred_element_type=jnp.float32) * inv_n
    var = jnp.maximum(ex2 - mean * mean, 0.0)
    rstd = jax.lax.rsqrt(var + EPS)
    scale = g_ref[...] * rstd
    sc_ref[...] = scale
    sh_ref[...] = b_ref[...] - mean * scale
    # fused time path: conv_bias + lin_bias + linear_time(silu(time)); fp32.
    t = t_ref[...].astype(jnp.float32)       # (1, n_time)
    t = t * jax.nn.sigmoid(t)
    bt_ref[...] = (jnp.dot(t, wt_ref[...], preferred_element_type=jnp.float32)
                   + tb_ref[...])


def _gn2_scale_shift_kernel(ps_ref, g_ref, b_ref, m_ref, sc_ref, sh_ref,
                            *, inv_n):
    # ps_ref: (n_tiles, 2, Cp) fp32 partial (sum, sumsq) emitted by conv1.
    ps = ps_ref[...]
    s1 = jnp.sum(ps[:, 0, :], axis=0, keepdims=True)
    s2 = jnp.sum(ps[:, 1, :], axis=0, keepdims=True)
    m = m_ref[...].astype(jnp.float32)
    mean = jnp.dot(s1, m, preferred_element_type=jnp.float32) * inv_n
    ex2 = jnp.dot(s2, m, preferred_element_type=jnp.float32) * inv_n
    var = jnp.maximum(ex2 - mean * mean, 0.0)
    rstd = jax.lax.rsqrt(var + EPS)
    scale = g_ref[...] * rstd
    sc_ref[...] = scale
    sh_ref[...] = b_ref[...] - mean * scale


def _conv_core(x_ref, sc_ref, sh_ref, bias_ref, w_ref, *, tile_h, height, width):
    """GN-apply + SiLU + 3x3 'SAME' conv (+bias) for one (tile_h, width) tile."""
    t = pl.program_id(1)
    row0 = pl.multiple_of(t * tile_h, tile_h)   # halo-slab start row (padded)
    cp = x_ref.shape[-1]

    # Load the halo slab once, GN affine + SiLU in fp32.
    xh = x_ref[pl.ds(row0, tile_h + 2), :, :].astype(jnp.float32)
    a = xh * sc_ref[...] + sh_ref[...]
    a = a * jax.nn.sigmoid(a)
    # Re-zero the spatial halo (it must stay 0 *after* the activation).
    # Tiny 2-D iotas -> a single full-slab select; channel padding needs no
    # masking (scale/shift are 0 there and weight rows are 0 anyway).
    ri = jax.lax.broadcasted_iota(jnp.int32, (tile_h + 2, 1, 1), 0) + row0
    ci = jax.lax.broadcasted_iota(jnp.int32, (1, width + 2, 1), 1)
    interior = (ri >= 1) & (ri <= height) & (ci >= 1) & (ci <= width)
    a = jnp.where(interior, a, 0.0).astype(jnp.bfloat16)

    # 3x3 conv = 3 accumulating MXU matmuls: the 3 dw taps are fused along the
    # contraction dim (K = 3*Cp), cutting MRF drains / acc passes vs 9 matmuls.
    acc = jnp.zeros((tile_h * width, cp), jnp.float32)
    for dh in range(3):
        patch = jnp.concatenate(
            [a[dh:dh + tile_h, dw:dw + width, :] for dw in range(3)],
            axis=-1).reshape(tile_h * width, 3 * cp)
        acc = acc + jnp.dot(patch, w_ref[dh],
                            preferred_element_type=jnp.float32)
    return acc + bias_ref[...]                  # conv bias (+ time embedding)


def _conv1_kernel(x_ref, sc_ref, sh_ref, bt_ref, w_ref, o_ref, st_ref,
                  *, tile_h, height, width):
    # Fused: GN1-apply + SiLU + conv_features + (bias + time) + GN2 partial stats.
    acc = _conv_core(x_ref, sc_ref, sh_ref, bt_ref, w_ref,
                     tile_h=tile_h, height=height, width=width)
    cp = acc.shape[-1]
    o_ref[...] = acc.reshape(tile_h, width, cp).astype(o_ref.dtype)
    # Per-tile partial (sum, sumsq) from the fp32 accumulator (pre bf16 cast).
    s1 = jnp.sum(acc, axis=0, keepdims=True)
    s2 = jnp.sum(acc * acc, axis=0, keepdims=True)
    st_ref[...] = jnp.concatenate([s1, s2], axis=0)[None]


def _conv2_kernel(x_ref, sc_ref, sh_ref, b_ref, w_ref, res_ref, o_ref,
                  *, tile_h, height, width):
    # Fused: GN2-apply + SiLU + conv_merged + bias + residual add.
    acc = _conv_core(x_ref, sc_ref, sh_ref, b_ref, w_ref,
                     tile_h=tile_h, height=height, width=width)
    cp = acc.shape[-1]
    res = res_ref[...].astype(jnp.float32).reshape(tile_h * width, cp)
    o_ref[...] = (acc + res).reshape(tile_h, width, cp).astype(o_ref.dtype)


# ---------------------------------------------------------------------------
# Host-side helpers
# ---------------------------------------------------------------------------
def _round_up(x, m):
    return (x + m - 1) // m * m


def _pick_tile_h(height, width, max_rows=None):
    """Largest divisor of height with tile_h*width <= max_rows; prefer rows%8==0."""
    if max_rows is None:
        max_rows = MAX_TILE_ROWS
    cands = [th for th in range(1, height + 1)
             if height % th == 0 and th * width <= max_rows]
    if not cands:
        return 1
    aligned = [th for th in cands if (th * width) % 8 == 0]
    return max(aligned) if aligned else max(cands)


def _group_matrix(c_real, c_pad, groups):
    cg = c_real // groups
    ch = jnp.arange(c_pad)
    grp = jnp.where(ch < c_real, ch // cg, -1)
    same = (grp[:, None] == grp[None, :]) & (grp[:, None] >= 0)
    return same.astype(jnp.bfloat16)        # exact 0/1; halves the VMEM block


def prepare_params(p):
    """One-time weight prep: transpose / lane-pad / tap-fuse / cast everything hot."""
    cout, cin, _, _ = p["conv_feat_w"].shape
    cp = _round_up(max(cin, cout), LANE)

    def pad_c(v, c):
        return jnp.pad(v, (0, cp - c)).astype(jnp.float32)

    def conv_w(w, ci, co):
        w = jnp.transpose(w, (2, 3, 1, 0))                       # (kh,kw,Cin,Cout)
        w = jnp.pad(w, ((0, 0), (0, 0), (0, cp - ci), (0, cp - co)))
        return w.reshape(3, 3 * cp, cp).astype(jnp.bfloat16)     # dw fused into K

    wt = jnp.pad(p["lin_w"].T, ((0, 0), (0, cp - cout)))          # (n_time, Cp)

    return dict(
        cin=cin, cout=cout, cp=cp,
        w1=conv_w(p["conv_feat_w"], cin, cout),
        w2=conv_w(p["conv_merged_w"], cout, cout),
        wt=wt.astype(jnp.float32),
        tb=pad_c(p["lin_b"] + p["conv_feat_b"], cout).reshape(1, cp),
        b2=pad_c(p["conv_merged_b"], cout).reshape(1, 1, cp),
        g1=pad_c(p["gn1_w"], cin).reshape(1, cp),
        be1=pad_c(p["gn1_b"], cin).reshape(1, cp),
        g2=pad_c(p["gn2_w"], cout).reshape(1, cp),
        be2=pad_c(p["gn2_b"], cout).reshape(1, cp),
        m1=_group_matrix(cin, cp, NUM_GROUPS),
        m2=_group_matrix(cout, cp, NUM_GROUPS),
    )


# ---------------------------------------------------------------------------
# Full residual-block forward (Pallas-backed)
# ---------------------------------------------------------------------------
def unet_residual_block(feature_nchw, time_emb, pp, out_dtype=jnp.float32):
    batch, cin, height, width = feature_nchw.shape
    cout, cp = pp["cout"], pp["cp"]
    assert cin == pp["cin"] and cin % NUM_GROUPS == 0 and cout % NUM_GROUPS == 0
    assert cin == cout, "identity residual path only (cin == cout)"

    tile_h = _pick_tile_h(height, width)
    n_tiles = height // tile_h
    hp2, wp2 = height + 2, width + 2

    # Channels-last bf16; channel lane-pad + spatial halo done in ONE pad.
    # TODO(synk): keep the surrounding model NHWC to drop this transpose.
    x_nhwc = jnp.transpose(feature_nchw, (0, 2, 3, 1)).astype(jnp.bfloat16)
    x_halo = jnp.pad(x_nhwc, ((0, 0), (1, 1), (1, 1), (0, cp - cin)))
    # Channel-padded, spatially-unpadded copy for the per-tile residual read.
    # TODO(synk): residual kept in bf16 (reference adds fp32 feature).
    x_res = jnp.pad(x_nhwc, ((0, 0), (0, 0), (0, 0), (0, cp - cin)))

    small_params = pltpu.CompilerParams(
        dimension_semantics=("parallel",), vmem_limit_bytes=VMEM_LIMIT)
    conv_params = pltpu.CompilerParams(
        dimension_semantics=("parallel", "parallel"),   # batch outermost
        vmem_limit_bytes=VMEM_LIMIT)

    # ---- GN1 stats + fused SiLU(time) @ W_t + biases (tiny per-batch kernel)
    n_time = time_emb.shape[-1]
    time3 = time_emb.astype(jnp.float32).reshape(batch, 1, n_time)
    s_halo = hp2 * wp2
    inv_n1 = 1.0 / (height * width * (cin // NUM_GROUPS))
    row_out = pl.BlockSpec((None, 1, cp), lambda b: (b, 0, 0))
    sc1, sh1, bt1 = pl.pallas_call(
        functools.partial(_gn1_stats_time_kernel, inv_n=inv_n1),
        grid=(batch,),
        in_specs=[
            pl.BlockSpec((None, s_halo, cp), lambda b: (b, 0, 0)),
            pl.BlockSpec((1, cp), lambda b: (0, 0)),
            pl.BlockSpec((1, cp), lambda b: (0, 0)),
            pl.BlockSpec((cp, cp), lambda b: (0, 0)),
            pl.BlockSpec((None, 1, n_time), lambda b: (b, 0, 0)),
            pl.BlockSpec((n_time, cp), lambda b: (0, 0)),
            pl.BlockSpec((1, cp), lambda b: (0, 0)),
        ],
        out_specs=(row_out, row_out, row_out),
        out_shape=(jax.ShapeDtypeStruct((batch, 1, cp), jnp.float32),) * 3,
        compiler_params=small_params,
    )(x_halo.reshape(batch, s_halo, cp), pp["g1"], pp["be1"], pp["m1"],
      time3, pp["wt"], pp["tb"])

    # ---- shared specs for the fused conv calls
    halo_spec = pl.BlockSpec((None, hp2, wp2, cp), lambda b, t: (b, 0, 0, 0))
    brow_spec = pl.BlockSpec((None, 1, cp), lambda b, t: (b, 0, 0))
    w_spec = pl.BlockSpec((3, 3 * cp, cp), lambda b, t: (0, 0, 0))
    tile_spec = pl.BlockSpec((None, tile_h, width, cp), lambda b, t: (b, t, 0, 0))
    stat_spec = pl.BlockSpec((None, 1, 2, cp), lambda b, t: (b, t, 0, 0))

    # ---- fused GN1-apply + SiLU + conv_features + bias + time + GN2 partials
    merged, pstats = pl.pallas_call(
        functools.partial(_conv1_kernel,
                          tile_h=tile_h, height=height, width=width),
        grid=(batch, n_tiles),
        in_specs=[halo_spec, brow_spec, brow_spec, brow_spec, w_spec],
        out_specs=(tile_spec, stat_spec),
        out_shape=(jax.ShapeDtypeStruct((batch, height, width, cp), jnp.bfloat16),
                   jax.ShapeDtypeStruct((batch, n_tiles, 2, cp), jnp.float32)),
        compiler_params=conv_params,
    )(x_halo, sc1, sh1, bt1, pp["w1"])

    # ---- GN2 scale/shift from fused partial stats (no re-read of `merged`)
    inv_n2 = 1.0 / (height * width * (cout // NUM_GROUPS))
    sc2, sh2 = pl.pallas_call(
        functools.partial(_gn2_scale_shift_kernel, inv_n=inv_n2),
        grid=(batch,),
        in_specs=[
            pl.BlockSpec((None, n_tiles, 2, cp), lambda b: (b, 0, 0, 0)),
            pl.BlockSpec((1, cp), lambda b: (0, 0)),
            pl.BlockSpec((1, cp), lambda b: (0, 0)),
            pl.BlockSpec((cp, cp), lambda b: (0, 0)),
        ],
        out_specs=(row_out, row_out),
        out_shape=(jax.ShapeDtypeStruct((batch, 1, cp), jnp.float32),) * 2,
        compiler_params=small_params,
    )(pstats, pp["g2"], pp["be2"], pp["m2"])

    # TODO(synk): remaining HBM round trip — write conv1 output directly into
    # the interior of a pre-padded buffer instead of this jnp.pad.
    merged_halo = jnp.pad(merged, ((0, 0), (1, 1), (1, 1), (0, 0)))

    # ---- fused GN2-apply + SiLU + conv_merged + bias + residual
    b2_spec = pl.BlockSpec((None, 1, cp), lambda b, t: (0, 0, 0))
    out = pl.pallas_call(
        functools.partial(_conv2_kernel,
                          tile_h=tile_h, height=height, width=width),
        grid=(batch, n_tiles),
        in_specs=[halo_spec, brow_spec, brow_spec, b2_spec, w_spec, tile_spec],
        out_specs=tile_spec,
        out_shape=jax.ShapeDtypeStruct((batch, height, width, cp), out_dtype),
        compiler_params=conv_params,
    )(merged_halo, sc2, sh2, pp["b2"], pp["w2"], x_res)

    return jnp.transpose(out[..., :cout], (0, 3, 1, 2))      # back to NCHW


# ---------------------------------------------------------------------------
# Pure-JAX reference (canonical semantics) for the correctness check
# ---------------------------------------------------------------------------
def _ref_groupnorm(x, w, b, groups):
    B, C, H, W = x.shape
    xg = x.reshape(B, groups, (C // groups) * H * W)
    mean = xg.mean(-1, keepdims=True)
    var = ((xg - mean) ** 2).mean(-1, keepdims=True)
    xn = ((xg - mean) / jnp.sqrt(var + EPS)).reshape(B, C, H, W)
    return xn * w[None, :, None, None] + b[None, :, None, None]


def _ref_conv(x, w, b):
    y = jax.lax.conv_general_dilated(
        x, w, (1, 1), "SAME", dimension_numbers=("NCHW", "OIHW", "NCHW"))
    return y + b[None, :, None, None]


def reference_forward(feature, time_emb, p):
    x = jax.nn.silu(_ref_groupnorm(feature, p["gn1_w"], p["gn1_b"], NUM_GROUPS))
    x = _ref_conv(x, p["conv_feat_w"], p["conv_feat_b"])
    t = jax.nn.silu(time_emb) @ p["lin_w"].T + p["lin_b"]
    m = x + t[:, :, None, None]
    m = jax.nn.silu(_ref_groupnorm(m, p["gn2_w"], p["gn2_b"], NUM_GROUPS))
    m = _ref_conv(m, p["conv_merged_w"], p["conv_merged_b"])
    return m + feature


# ---------------------------------------------------------------------------
if __name__ == "__main__":
    B, Cin, Cout, H, W, N_TIME = 2, 32, 32, 16, 16, 128

    key = jax.random.PRNGKey(0)
    ks = jax.random.split(key, 12)
    params = {
        "gn1_w": 1.0 + 0.1 * jax.random.normal(ks[0], (Cin,), jnp.float32),
        "gn1_b": 0.05 * jax.random.normal(ks[1], (Cin,), jnp.float32),
        "conv_feat_w": 0.05 * jax.random.normal(ks[2], (Cout, Cin, 3, 3), jnp.float32),
        "conv_feat_b": 0.05 * jax.random.normal(ks[3], (Cout,), jnp.float32),
        "lin_w": 0.05 * jax.random.normal(ks[4], (Cout, N_TIME), jnp.float32),
        "lin_b": 0.05 * jax.random.normal(ks[5], (Cout,), jnp.float32),
        "gn2_w": 1.0 + 0.1 * jax.random.normal(ks[6], (Cout,), jnp.float32),
        "gn2_b": 0.05 * jax.random.normal(ks[7], (Cout,), jnp.float32),
        "conv_merged_w": 0.05 * jax.random.normal(ks[8], (Cout, Cout, 3, 3), jnp.float32),
        "conv_merged_b": 0.05 * jax.random.normal(ks[9], (Cout,), jnp.float32),
    }
    feature = jax.random.normal(ks[10], (B, Cin, H, W), jnp.float32)
    time_emb = jax.random.normal(ks[11], (B, N_TIME), jnp.float32)

    pp = prepare_params(params)
    fwd = jax.jit(lambda f, t: unet_residual_block(f, t, pp))
    out = jax.block_until_ready(fwd(feature, time_emb))
    ref = jax.block_until_ready(reference_forward(feature, time_emb, params))

    assert out.shape == (B, Cout, H, W), out.shape
    err = float(jnp.max(jnp.abs(out - ref)))
    # bf16 activations/weights with fp32 accumulation -> ~1e-2 worst-case abs err.
    assert err < 5e-2, "mismatch, max abs err = %g" % err
    print("KERNEL_OK")
</pallas_src>

<mosaic_0001>
module attributes {stable_mosaic.version = 11 : i64} {
  func.func @_gn1_stats_time_kernel(%arg0: i32, %arg1: memref<1x324x128xbf16, #tpu.memory_space<vmem>>, %arg2: memref<1x128xf32, #tpu.memory_space<vmem>>, %arg3: memref<1x128xf32, #tpu.memory_space<vmem>>, %arg4: memref<128x128xbf16, #tpu.memory_space<vmem>>, %arg5: memref<1x1x128xf32, #tpu.memory_space<vmem>>, %arg6: memref<128x128xf32, #tpu.memory_space<vmem>>, %arg7: memref<1x128xf32, #tpu.memory_space<vmem>>, %arg8: memref<1x1x128xf32, #tpu.memory_space<vmem>>, %arg9: memref<1x1x128xf32, #tpu.memory_space<vmem>>, %arg10: memref<1x1x128xf32, #tpu.memory_space<vmem>>) attributes {dimension_semantics = [#tpu.dimension_semantics<parallel>], iteration_bounds = array<i64: 2>, scalar_prefetch = 0 : i64, scratch_operands = 0 : i64, tpu.core_type = #tpu.core_type<tc>, window_params = [{transform_indices = @transform_0, window_bounds = array<i64: 1, 324, 128>}, {pipeline_mode = #tpu.pipeline_mode<synchronous>, transform_indices = @transform_1, window_bounds = array<i64: 1, 128>}, {pipeline_mode = #tpu.pipeline_mode<synchronous>, transform_indices = @transform_2, window_bounds = array<i64: 1, 128>}, {pipeline_mode = #tpu.pipeline_mode<synchronous>, transform_indices = @transform_3, window_bounds = array<i64: 128, 128>}, {transform_indices = @transform_4, window_bounds = array<i64: 1, 1, 128>}, {pipeline_mode = #tpu.pipeline_mode<synchronous>, transform_indices = @transform_5, window_bounds = array<i64: 128, 128>}, {pipeline_mode = #tpu.pipeline_mode<synchronous>, transform_indices = @transform_6, window_bounds = array<i64: 1, 128>}, {transform_indices = @transform_7, window_bounds = array<i64: 1, 1, 128>}, {transform_indices = @transform_8, window_bounds = array<i64: 1, 1, 128>}, {transform_indices = @transform_9, window_bounds = array<i64: 1, 1, 128>}]} {
    %cst = arith.constant 0.000000e+00 : f32
    %0 = vector.broadcast %cst : f32 to vector<1x128xf32>
    %cst_0 = arith.constant 0.000000e+00 : f32
    %1 = vector.broadcast %cst_0 : f32 to vector<1x128xf32>
    %c0 = arith.constant 0 : index
    %c0_1 = arith.constant 0 : index
    %c0_2 = arith.constant 0 : index
    %2 = vector.load %arg1[%c0, %c0_1, %c0_2] : memref<1x324x128xbf16, #tpu.memory_space<vmem>>, vector<1x324x128xbf16>
    %3 = vector.shape_cast %2 : vector<1x324x128xbf16> to vector<324x128xbf16>
    %4 = arith.extf %3 : vector<324x128xbf16> to vector<324x128xf32>
    %cst_3 = arith.constant dense<0.000000e+00> : vector<128xf32>
    %5 = vector.multi_reduction <add>, %4, %cst_3 [0] : vector<324x128xf32> to vector<128xf32>
    %6 = vector.shape_cast %5 : vector<128xf32> to vector<1x128xf32>
    %7 = arith.addf %0, %6 : vector<1x128xf32>
    %8 = arith.mulf %4, %4 : vector<324x128xf32>
    %cst_4 = arith.constant dense<0.000000e+00> : vector<128xf32>
    %9 = vector.multi_reduction <add>, %8, %cst_4 [0] : vector<324x128xf32> to vector<128xf32>
    %10 = vector.shape_cast %9 : vector<128xf32> to vector<1x128xf32>
    %11 = arith.addf %1, %10 : vector<1x128xf32>
    %c0_5 = arith.constant 0 : index
    %c0_6 = arith.constant 0 : index
    %12 = vector.load %arg4[%c0_5, %c0_6] : memref<128x128xbf16, #tpu.memory_space<vmem>>, vector<128x128xbf16>
    %13 = arith.extf %12 : vector<128x128xbf16> to vector<128x128xf32>
    %cst_7 = arith.constant dense<0.000000e+00> : vector<1x128xf32>
    %14 = tpu.matmul %7, %13, %cst_7 {dimension_numbers = #tpu.dot_dimension_numbers<[1], [0], [0], [1], [0, 0, 1, 1], [], []>} : vector<1x128xf32>, vector<128x128xf32>, vector<1x128xf32> -> vector<1x128xf32>
    %cst_8 = arith.constant 3.906250e-03 : f32
    %15 = vector.broadcast %cst_8 : f32 to vector<1x128xf32>
    %16 = arith.mulf %14, %15 : vector<1x128xf32>
    %cst_9 = arith.constant dense<0.000000e+00> : vector<1x128xf32>
    %17 = tpu.matmul %11, %13, %cst_9 {dimension_numbers = #tpu.dot_dimension_numbers<[1], [0], [0], [1], [0, 0, 1, 1], [], []>} : vector<1x128xf32>, vector<128x128xf32>, vector<1x128xf32> -> vector<1x128xf32>
    %cst_10 = arith.constant 3.906250e-03 : f32
    %18 = vector.broadcast %cst_10 : f32 to vector<1x128xf32>
    %19 = arith.mulf %17, %18 : vector<1x128xf32>
    %20 = arith.mulf %16, %16 : vector<1x128xf32>
    %21 = arith.subf %19, %20 : vector<1x128xf32>
    %cst_11 = arith.constant 0.000000e+00 : f32
    %22 = vector.broadcast %cst_11 : f32 to vector<1x128xf32>
    %23 = arith.maximumf %21, %22 : vector<1x128xf32>
    %cst_12 = arith.constant 9.99999974E-6 : f32
    %24 = vector.broadcast %cst_12 : f32 to vector<1x128xf32>
    %25 = arith.addf %23, %24 : vector<1x128xf32>
    %26 = math.rsqrt %25 : vector<1x128xf32>
    %c0_13 = arith.constant 0 : index
    %c0_14 = arith.constant 0 : index
    %27 = vector.load %arg2[%c0_13, %c0_14] : memref<1x128xf32, #tpu.memory_space<vmem>>, vector<1x128xf32>
    %28 = arith.mulf %27, %26 : vector<1x128xf32>
    %c0_15 = arith.constant 0 : index
    %c0_16 = arith.constant 0 : index
    %c0_17 = arith.constant 0 : index
    %29 = vector.load %arg8[%c0_15, %c0_16, %c0_17] : memref<1x1x128xf32, #tpu.memory_space<vmem>>, vector<1x1x128xf32>
    %30 = vector.shape_cast %29 : vector<1x1x128xf32> to vector<1x128xf32>
    %31 = vector.shape_cast %28 : vector<1x128xf32> to vector<1x1x128xf32>
    tpu.vector_store %arg8[%c0_15, %c0_16, %c0_17], %31 {strides = array<i32>} : memref<1x1x128xf32, #tpu.memory_space<vmem>>, vector<1x1x128xf32>,
    %c0_18 = arith.constant 0 : index
    %c0_19 = arith.constant 0 : index
    %32 = vector.load %arg3[%c0_18, %c0_19] : memref<1x128xf32, #tpu.memory_space<vmem>>, vector<1x128xf32>
    %33 = arith.mulf %16, %28 : vector<1x128xf32>
    %34 = arith.subf %32, %33 : vector<1x128xf32>
    %c0_20 = arith.constant 0 : index
    %c0_21 = arith.constant 0 : index
    %c0_22 = arith.constant 0 : index
    %35 = vector.load %arg9[%c0_20, %c0_21, %c0_22] : memref<1x1x128xf32, #tpu.memory_space<vmem>>, vector<1x1x128xf32>
    %36 = vector.shape_cast %35 : vector<1x1x128xf32> to vector<1x128xf32>
    %37 = vector.shape_cast %34 : vector<1x128xf32> to vector<1x1x128xf32>
    tpu.vector_store %arg9[%c0_20, %c0_21, %c0_22], %37 {strides = array<i32>} : memref<1x1x128xf32, #tpu.memory_space<vmem>>, vector<1x1x128xf32>,
    %c0_23 = arith.constant 0 : index
    %c0_24 = arith.constant 0 : index
    %c0_25 = arith.constant 0 : index
    %38 = vector.load %arg5[%c0_23, %c0_24, %c0_25] : memref<1x1x128xf32, #tpu.memory_space<vmem>>, vector<1x1x128xf32>
    %39 = vector.shape_cast %38 : vector<1x1x128xf32> to vector<1x128xf32>
    %40 = arith.negf %39 : vector<1x128xf32>
    %41 = math.exp %40 : vector<1x128xf32>
    %cst_26 = arith.constant 1.000000e+00 : f32
    %42 = vector.broadcast %cst_26 : f32 to vector<1x128xf32>
    %43 = arith.addf %42, %41 : vector<1x128xf32>
    %44 = arith.divf %42, %43 : vector<1x128xf32>
    %45 = arith.mulf %39, %44 : vector<1x128xf32>
    %c0_27 = arith.constant 0 : index
    %c0_28 = arith.constant 0 : index
    %46 = vector.load %arg6[%c0_27, %c0_28] : memref<128x128xf32, #tpu.memory_space<vmem>>, vector<128x128xf32>
    %cst_29 = arith.constant dense<0.000000e+00> : vector<1x128xf32>
    %47 = tpu.matmul %45, %46, %cst_29 {dimension_numbers = #tpu.dot_dimension_numbers<[1], [0], [0], [1], [0, 0, 1, 1], [], []>} : vector<1x128xf32>, vector<128x128xf32>, vector<1x128xf32> -> vector<1x128xf32>
    %c0_30 = arith.constant 0 : index
    %c0_31 = arith.constant 0 : index
    %48 = vector.load %arg7[%c0_30, %c0_31] : memref<1x128xf32, #tpu.memory_space<vmem>>, vector<1x128xf32>
    %49 = arith.addf %47, %48 : vector<1x128xf32>
    %c0_32 = arith.constant 0 : index
    %c0_33 = arith.constant 0 : index
    %c0_34 = arith.constant 0 : index
    %50 = vector.load %arg10[%c0_32, %c0_33, %c0_34] : memref<1x1x128xf32, #tpu.memory_space<vmem>>, vector<1x1x128xf32>
    %51 = vector.shape_cast %50 : vector<1x1x128xf32> to vector<1x128xf32>
    %52 = vector.shape_cast %49 : vector<1x128xf32> to vector<1x1x128xf32>
    tpu.vector_store %arg10[%c0_32, %c0_33, %c0_34], %52 {strides = array<i32>} : memref<1x1x128xf32, #tpu.memory_space<vmem>>, vector<1x1x128xf32>,
    return
  }
  func.func @transform_0(%arg0: i32) -> (i32, i32, i32) {
    %c0_i32 = arith.constant 0 : i32
    %c0_i32_0 = arith.constant 0 : i32
    %c0_i32_1 = arith.constant 0 : i32
    return %arg0, %c0_i32, %c0_i32_0 : i32, i32, i32
  }
  func.func @transform_1(%arg0: i32) -> (i32, i32) {
    %c0_i32 = arith.constant 0 : i32
    %c0_i32_0 = arith.constant 0 : i32
    %c0_i32_1 = arith.constant 0 : i32
    return %c0_i32, %c0_i32_0 : i32, i32
  }
  func.func @transform_2(%arg0: i32) -> (i32, i32) {
    %c0_i32 = arith.constant 0 : i32
    %c0_i32_0 = arith.constant 0 : i32
    %c0_i32_1 = arith.constant 0 : i32
    return %c0_i32, %c0_i32_0 : i32, i32
  }
  func.func @transform_3(%arg0: i32) -> (i32, i32) {
    %c0_i32 = arith.constant 0 : i32
    %c0_i32_0 = arith.constant 0 : i32
    %c0_i32_1 = arith.constant 0 : i32
    return %c0_i32, %c0_i32_0 : i32, i32
  }
  func.func @transform_4(%arg0: i32) -> (i32, i32, i32) {
    %c0_i32 = arith.constant 0 : i32
    %c0_i32_0 = arith.constant 0 : i32
    %c0_i32_1 = arith.constant 0 : i32
    return %arg0, %c0_i32, %c0_i32_0 : i32, i32, i32
  }
  func.func @transform_5(%arg0: i32) -> (i32, i32) {
    %c0_i32 = arith.constant 0 : i32
    %c0_i32_0 = arith.constant 0 : i32
    %c0_i32_1 = arith.constant 0 : i32
    return %c0_i32, %c0_i32_0 : i32, i32
  }
  func.func @transform_6(%arg0: i32) -> (i32, i32) {
    %c0_i32 = arith.constant 0 : i32
    %c0_i32_0 = arith.constant 0 : i32
    %c0_i32_1 = arith.constant 0 : i32
    return %c0_i32, %c0_i32_0 : i32, i32
  }
  func.func @transform_7(%arg0: i32) -> (i32, i32, i32) {
    %c0_i32 = arith.constant 0 : i32
    %c0_i32_0 = arith.constant 0 : i32
    %c0_i32_1 = arith.constant 0 : i32
    return %arg0, %c0_i32, %c0_i32_0 : i32, i32, i32
  }
  func.func @transform_8(%arg0: i32) -> (i32, i32, i32) {
    %c0_i32 = arith.constant 0 : i32
    %c0_i32_0 = arith.constant 0 : i32
    %c0_i32_1 = arith.constant 0 : i32
    return %arg0, %c0_i32, %c0_i32_0 : i32, i32, i32
  }
  func.func @transform_9(%arg0: i32) -> (i32, i32, i32) {
    %c0_i32 = arith.constant 0 : i32
    %c0_i32_0 = arith.constant 0 : i32
    %c0_i32_1 = arith.constant 0 : i32
    return %arg0, %c0_i32, %c0_i32_0 : i32, i32, i32
  }
}

module attributes {stable_mosaic.version = 11 : i64} {
  func.func @_conv1_kernel(%arg0: i32, %arg1: i32, %arg2: memref<1x18x18x128xbf16, #tpu.memory_space<vmem>>, %arg3: memref<1x1x128xf32, #tpu.memory_space<vmem>>, %arg4: memref<1x1x128xf32, #tpu.memory_space<vmem>>, %arg5: memref<1x1x128xf32, #tpu.memory_space<vmem>>, %arg6: memref<3x384x128xbf16, #tpu.memory_space<vmem>>, %arg7: memref<1x16x16x128xbf16, #tpu.memory_space<vmem>>, %arg8: memref<1x1x2x128xf32, #tpu.memory_space<vmem>>) attributes {dimension_semantics = [#tpu.dimension_semantics<parallel>, #tpu.dimension_semantics<parallel>], iteration_bounds = array<i64: 2, 1>, scalar_prefetch = 0 : i64, scratch_operands = 0 : i64, tpu.core_type = #tpu.core_type<tc>, window_params = [{transform_indices = @transform_0, window_bounds = array<i64: 1, 18, 18, 128>}, {transform_indices = @transform_1, window_bounds = array<i64: 1, 1, 128>}, {transform_indices = @transform_2, window_bounds = array<i64: 1, 1, 128>}, {transform_indices = @transform_3, window_bounds = array<i64: 1, 1, 128>}, {pipeline_mode = #tpu.pipeline_mode<synchronous>, transform_indices = @transform_4, window_bounds = array<i64: 3, 384, 128>}, {transform_indices = @transform_5, window_bounds = array<i64: 1, 16, 16, 128>}, {transform_indices = @transform_6, window_bounds = array<i64: 1, 1, 2, 128>}]} {
    %c16_i32 = arith.constant 16 : i32
    %0 = arith.muli %arg1, %c16_i32 : i32
    %1 = tpu.assume_multiple %0, 16 : i32
    %c0 = arith.constant 0 : index
    %2 = arith.index_cast %1 : i32 to index
    %c0_0 = arith.constant 0 : index
    %c0_1 = arith.constant 0 : index
    %3 = vector.load %arg2[%c0, %2, %c0_0, %c0_1] : memref<1x18x18x128xbf16, #tpu.memory_space<vmem>>, vector<1x18x18x128xbf16>
    %4 = vector.shape_cast %3 : vector<1x18x18x128xbf16> to vector<18x18x128xbf16>
    %5 = arith.extf %4 : vector<18x18x128xbf16> to vector<18x18x128xf32>
    %c0_2 = arith.constant 0 : index
    %c0_3 = arith.constant 0 : index
    %c0_4 = arith.constant 0 : index
    %6 = vector.load %arg3[%c0_2, %c0_3, %c0_4] : memref<1x1x128xf32, #tpu.memory_space<vmem>>, vector<1x1x128xf32>
    %7 = vector.shape_cast %6 : vector<1x1x128xf32> to vector<1x128xf32>
    %8 = vector.shape_cast %7 : vector<1x128xf32> to vector<1x1x128xf32>
    %9 = vector.broadcast %8 : vector<1x1x128xf32> to vector<18x18x128xf32>
    %10 = arith.mulf %5, %9 : vector<18x18x128xf32>
    %c0_5 = arith.constant 0 : index
    %c0_6 = arith.constant 0 : index
    %c0_7 = arith.constant 0 : index
    %11 = vector.load %arg4[%c0_5, %c0_6, %c0_7] : memref<1x1x128xf32, #tpu.memory_space<vmem>>, vector<1x1x128xf32>
    %12 = vector.shape_cast %11 : vector<1x1x128xf32> to vector<1x128xf32>
    %13 = vector.shape_cast %12 : vector<1x128xf32> to vector<1x1x128xf32>
    %14 = vector.broadcast %13 : vector<1x1x128xf32> to vector<18x18x128xf32>
    %15 = arith.addf %10, %14 : vector<18x18x128xf32>
    %16 = arith.negf %15 : vector<18x18x128xf32>
    %17 = math.exp %16 : vector<18x18x128xf32>
    %cst = arith.constant 1.000000e+00 : f32
    %18 = vector.broadcast %cst : f32 to vector<18x18x128xf32>
    %19 = arith.addf %18, %17 : vector<18x18x128xf32>
    %20 = arith.divf %18, %19 : vector<18x18x128xf32>
    %21 = arith.mulf %15, %20 : vector<18x18x128xf32>
    %22 = tpu.iota {dimensions = array<i32: 0>} : vector<18x1x1xi32>
    %23 = vector.broadcast %1 : i32 to vector<18x1x1xi32>
    %24 = arith.addi %22, %23 : vector<18x1x1xi32>
    %25 = tpu.iota {dimensions = array<i32: 1>} : vector<1x18x1xi32>
    %c1_i32 = arith.constant 1 : i32
    %26 = vector.broadcast %c1_i32 : i32 to vector<18x1x1xi32>
    %27 = arith.cmpi sge, %24, %26 : vector<18x1x1xi32>
    %c16_i32_8 = arith.constant 16 : i32
    %28 = vector.broadcast %c16_i32_8 : i32 to vector<18x1x1xi32>
    %29 = arith.cmpi sle, %24, %28 : vector<18x1x1xi32>
    %30 = arith.andi %27, %29 : vector<18x1x1xi1>
    %c1_i32_9 = arith.constant 1 : i32
    %31 = vector.broadcast %c1_i32_9 : i32 to vector<1x18x1xi32>
    %32 = arith.cmpi sge, %25, %31 : vector<1x18x1xi32>
    %33 = vector.broadcast %30 : vector<18x1x1xi1> to vector<18x18x1xi1>
    %34 = vector.broadcast %32 : vector<1x18x1xi1> to vector<18x18x1xi1>
    %35 = arith.andi %33, %34 : vector<18x18x1xi1>
    %c16_i32_10 = arith.constant 16 : i32
    %36 = vector.broadcast %c16_i32_10 : i32 to vector<1x18x1xi32>
    %37 = arith.cmpi sle, %25, %36 : vector<1x18x1xi32>
    %38 = vector.broadcast %37 : vector<1x18x1xi1> to vector<18x18x1xi1>
    %39 = arith.andi %35, %38 : vector<18x18x1xi1>
    %cst_11 = arith.constant 0.000000e+00 : f32
    %40 = vector.shape_cast %39 : vector<18x18x1xi1> to vector<18x18x1xi1>
    %41 = vector.broadcast %40 : vector<18x18x1xi1> to vector<18x18x128xi1>
    %42 = vector.broadcast %cst_11 : f32 to vector<18x18x128xf32>
    %43 = arith.select %41, %21, %42 : vector<18x18x128xi1>, vector<18x18x128xf32>
    %44 = arith.truncf %43 : vector<18x18x128xf32> to vector<18x18x128xbf16>
    %cst_12 = arith.constant 0.000000e+00 : f32
    %45 = vector.broadcast %cst_12 : f32 to vector<256x128xf32>
    %46 = vector.extract_strided_slice %44 {offsets = [0, 0, 0], sizes = [16, 16, 128], strides = [1, 1, 1]} : vector<18x18x128xbf16> to vector<16x16x128xbf16>
    %47 = vector.extract_strided_slice %44 {offsets = [0, 1, 0], sizes = [16, 16, 128], strides = [1, 1, 1]} : vector<18x18x128xbf16> to vector<16x16x128xbf16>
    %48 = vector.extract_strided_slice %44 {offsets = [0, 2, 0], sizes = [16, 16, 128], strides = [1, 1, 1]} : vector<18x18x128xbf16> to vector<16x16x128xbf16>
    %49 = tpu.concatenate %46, %47, %48 in 2 : vector<16x16x128xbf16>, vector<16x16x128xbf16>, vector<16x16x128xbf16> -> vector<16x16x384xbf16>
    %50 = vector.shape_cast %49 : vector<16x16x384xbf16> to vector<256x384xbf16>
    %c0_13 = arith.constant 0 : index
    %c0_14 = arith.constant 0 : index
    %c0_15 = arith.constant 0 : index
    %51 = vector.load %arg6[%c0_13, %c0_14, %c0_15] : memref<3x384x128xbf16, #tpu.memory_space<vmem>>, vector<1x384x128xbf16>
    %52 = vector.shape_cast %51 : vector<1x384x128xbf16> to vector<384x128xbf16>
    %cst_16 = arith.constant dense<0.000000e+00> : vector<256x128xf32>
    %53 = tpu.matmul %50, %52, %cst_16 {dimension_numbers = #tpu.dot_dimension_numbers<[1], [0], [0], [1], [0, 0, 1, 1], [], []>} : vector<256x384xbf16>, vector<384x128xbf16>, vector<256x128xf32> -> vector<256x128xf32>
    %54 = arith.addf %45, %53 : vector<256x128xf32>
    %55 = vector.extract_strided_slice %44 {offsets = [1, 0, 0], sizes = [16, 16, 128], strides = [1, 1, 1]} : vector<18x18x128xbf16> to vector<16x16x128xbf16>
    %56 = vector.extract_strided_slice %44 {offsets = [1, 1, 0], sizes = [16, 16, 128], strides = [1, 1, 1]} : vector<18x18x128xbf16> to vector<16x16x128xbf16>
    %57 = vector.extract_strided_slice %44 {offsets = [1, 2, 0], sizes = [16, 16, 128], strides = [1, 1, 1]} : vector<18x18x128xbf16> to vector<16x16x128xbf16>
    %58 = tpu.concatenate %55, %56, %57 in 2 : vector<16x16x128xbf16>, vector<16x16x128xbf16>, vector<16x16x128xbf16> -> vector<16x16x384xbf16>
    %59 = vector.shape_cast %58 : vector<16x16x384xbf16> to vector<256x384xbf16>
    %c1 = arith.constant 1 : index
    %c0_17 = arith.constant 0 : index
    %c0_18 = arith.constant 0 : index
    %60 = vector.load %arg6[%c1, %c0_17, %c0_18] : memref<3x384x128xbf16, #tpu.memory_space<vmem>>, vector<1x384x128xbf16>
    %61 = vector.shape_cast %60 : vector<1x384x128xbf16> to vector<384x128xbf16>
    %cst_19 = arith.constant dense<0.000000e+00> : vector<256x128xf32>
    %62 = tpu.matmul %59, %61, %cst_19 {dimension_numbers = #tpu.dot_dimension_numbers<[1], [0], [0], [1], [0, 0, 1, 1], [], []>} : vector<256x384xbf16>, vector<384x128xbf16>, vector<256x128xf32> -> vector<256x128xf32>
    %63 = arith.addf %54, %62 : vector<256x128xf32>
    %64 = vector.extract_strided_slice %44 {offsets = [2, 0, 0], sizes = [16, 16, 128], strides = [1, 1, 1]} : vector<18x18x128xbf16> to vector<16x16x128xbf16>
    %65 = vector.extract_strided_slice %44 {offsets = [2, 1, 0], sizes = [16, 16, 128], strides = [1, 1, 1]} : vector<18x18x128xbf16> to vector<16x16x128xbf16>
    %66 = vector.extract_strided_slice %44 {offsets = [2, 2, 0], sizes = [16, 16, 128], strides = [1, 1, 1]} : vector<18x18x128xbf16> to vector<16x16x128xbf16>
    %67 = tpu.concatenate %64, %65, %66 in 2 : vector<16x16x128xbf16>, vector<16x16x128xbf16>, vector<16x16x128xbf16> -> vector<16x16x384xbf16>
    %68 = vector.shape_cast %67 : vector<16x16x384xbf16> to vector<256x384xbf16>
    %c2 = arith.constant 2 : index
    %c0_20 = arith.constant 0 : index
    %c0_21 = arith.constant 0 : index
    %69 = vector.load %arg6[%c2, %c0_20, %c0_21] : memref<3x384x128xbf16, #tpu.memory_space<vmem>>, vector<1x384x128xbf16>
    %70 = vector.shape_cast %69 : vector<1x384x128xbf16> to vector<384x128xbf16>
    %cst_22 = arith.constant dense<0.000000e+00> : vector<256x128xf32>
    %71 = tpu.matmul %68, %70, %cst_22 {dimension_numbers = #tpu.dot_dimension_numbers<[1], [0], [0], [1], [0, 0, 1, 1], [], []>} : vector<256x384xbf16>, vector<384x128xbf16>, vector<256x128xf32> -> vector<256x128xf32>
    %72 = arith.addf %63, %71 : vector<256x128xf32>
    %c0_23 = arith.constant 0 : index
    %c0_24 = arith.constant 0 : index
    %c0_25 = arith.constant 0 : index
    %73 = vector.load %arg5[%c0_23, %c0_24, %c0_25] : memref<1x1x128xf32, #tpu.memory_space<vmem>>, vector<1x1x128xf32>
    %74 = vector.shape_cast %73 : vector<1x1x128xf32> to vector<1x128xf32>
    %75 = vector.broadcast %74 : vector<1x128xf32> to vector<256x128xf32>
    %76 = arith.addf %72, %75 : vector<256x128xf32>
    %77 = vector.shape_cast %76 : vector<256x128xf32> to vector<16x16x128xf32>
    %78 = arith.truncf %77 : vector<16x16x128xf32> to vector<16x16x128xbf16>
    %c0_26 = arith.constant 0 : index
    %c0_27 = arith.constant 0 : index
    %c0_28 = arith.constant 0 : index
    %c0_29 = arith.constant 0 : index
    %79 = vector.load %arg7[%c0_26, %c0_27, %c0_28, %c0_29] : memref<1x16x16x128xbf16, #tpu.memory_space<vmem>>, vector<1x16x16x128xbf16>
    %80 = vector.shape_cast %79 : vector<1x16x16x128xbf16> to vector<16x16x128xbf16>
    %81 = vector.shape_cast %78 : vector<16x16x128xbf16> to vector<1x16x16x128xbf16>
    tpu.vector_store %arg7[%c0_26, %c0_27, %c0_28, %c0_29], %81 {strides = array<i32>} : memref<1x16x16x128xbf16, #tpu.memory_space<vmem>>, vector<1x16x16x128xbf16>,
    %cst_30 = arith.constant dense<0.000000e+00> : vector<128xf32>
    %82 = vector.multi_reduction <add>, %76, %cst_30 [0] : vector<256x128xf32> to vector<128xf32>
    %83 = vector.shape_cast %82 : vector<128xf32> to vector<1x128xf32>
    %84 = arith.mulf %76, %76 : vector<256x128xf32>
    %cst_31 = arith.constant dense<0.000000e+00> : vector<128xf32>
    %85 = vector.multi_reduction <add>, %84, %cst_31 [0] : vector<256x128xf32> to vector<128xf32>
    %86 = vector.shape_cast %85 : vector<128xf32> to vector<1x128xf32>
    %87 = tpu.concatenate %83, %86 in 0 : vector<1x128xf32>, vector<1x128xf32> -> vector<2x128xf32>
    %88 = vector.shape_cast %87 : vector<2x128xf32> to vector<1x2x128xf32>
    %c0_32 = arith.constant 0 : index
    %c0_33 = arith.constant 0 : index
    %c0_34 = arith.constant 0 : index
    %c0_35 = arith.constant 0 : index
    %89 = vector.load %arg8[%c0_32, %c0_33, %c0_34, %c0_35] : memref<1x1x2x128xf32, #tpu.memory_space<vmem>>, vector<1x1x2x128xf32>
    %90 = vector.shape_cast %89 : vector<1x1x2x128xf32> to vector<1x2x128xf32>
    %91 = vector.shape_cast %88 : vector<1x2x128xf32> to vector<1x1x2x128xf32>
    tpu.vector_store %arg8[%c0_32, %c0_33, %c0_34, %c0_35], %91 {strides = array<i32>} : memref<1x1x2x128xf32, #tpu.memory_space<vmem>>, vector<1x1x2x128xf32>,
    return
  }
  func.func @transform_0(%arg0: i32, %arg1: i32) -> (i32, i32, i32, i32) {
    %c0_i32 = arith.constant 0 : i32
    %c0_i32_0 = arith.constant 0 : i32
    %c0_i32_1 = arith.constant 0 : i32
    %c0_i32_2 = arith.constant 0 : i32
    return %arg0, %c0_i32, %c0_i32_0, %c0_i32_1 : i32, i32, i32, i32
  }
  func.func @transform_1(%arg0: i32, %arg1: i32) -> (i32, i32, i32) {
    %c0_i32 = arith.constant 0 : i32
    %c0_i32_0 = arith.constant 0 : i32
    %c0_i32_1 = arith.constant 0 : i32
    return %arg0, %c0_i32, %c0_i32_0 : i32, i32, i32
  }
  func.func @transform_2(%arg0: i32, %arg1: i32) -> (i32, i32, i32) {
    %c0_i32 = arith.constant 0 : i32
    %c0_i32_0 = arith.constant 0 : i32
    %c0_i32_1 = arith.constant 0 : i32
    return %arg0, %c0_i32, %c0_i32_0 : i32, i32, i32
  }
  func.func @transform_3(%arg0: i32, %arg1: i32) -> (i32, i32, i32) {
    %c0_i32 = arith.constant 0 : i32
    %c0_i32_0 = arith.constant 0 : i32
    %c0_i32_1 = arith.constant 0 : i32
    return %arg0, %c0_i32, %c0_i32_0 : i32, i32, i32
  }
  func.func @transform_4(%arg0: i32, %arg1: i32) -> (i32, i32, i32) {
    %c0_i32 = arith.constant 0 : i32
    %c0_i32_0 = arith.constant 0 : i32
    %c0_i32_1 = arith.constant 0 : i32
    %c0_i32_2 = arith.constant 0 : i32
    return %c0_i32, %c0_i32_0, %c0_i32_1 : i32, i32, i32
  }
  func.func @transform_5(%arg0: i32, %arg1: i32) -> (i32, i32, i32, i32) {
    %c0_i32 = arith.constant 0 : i32
    %c0_i32_0 = arith.constant 0 : i32
    %c0_i32_1 = arith.constant 0 : i32
    return %arg0, %arg1, %c0_i32, %c0_i32_0 : i32, i32, i32, i32
  }
  func.func @transform_6(%arg0: i32, %arg1: i32) -> (i32, i32, i32, i32) {
    %c0_i32 = arith.constant 0 : i32
    %c0_i32_0 = arith.constant 0 : i32
    %c0_i32_1 = arith.constant 0 : i32
    return %arg0, %arg1, %c0_i32, %c0_i32_0 : i32, i32, i32, i32
  }
}

module attributes {stable_mosaic.version = 11 : i64} {
  func.func @_gn2_scale_shift_kernel(%arg0: i32, %arg1: memref<1x1x2x128xf32, #tpu.memory_space<vmem>>, %arg2: memref<1x128xf32, #tpu.memory_space<vmem>>, %arg3: memref<1x128xf32, #tpu.memory_space<vmem>>, %arg4: memref<128x128xbf16, #tpu.memory_space<vmem>>, %arg5: memref<1x1x128xf32, #tpu.memory_space<vmem>>, %arg6: memref<1x1x128xf32, #tpu.memory_space<vmem>>) attributes {dimension_semantics = [#tpu.dimension_semantics<parallel>], iteration_bounds = array<i64: 2>, scalar_prefetch = 0 : i64, scratch_operands = 0 : i64, tpu.core_type = #tpu.core_type<tc>, window_params = [{transform_indices = @transform_0, window_bounds = array<i64: 1, 1, 2, 128>}, {pipeline_mode = #tpu.pipeline_mode<synchronous>, transform_indices = @transform_1, window_bounds = array<i64: 1, 128>}, {pipeline_mode = #tpu.pipeline_mode<synchronous>, transform_indices = @transform_2, window_bounds = array<i64: 1, 128>}, {pipeline_mode = #tpu.pipeline_mode<synchronous>, transform_indices = @transform_3, window_bounds = array<i64: 128, 128>}, {transform_indices = @transform_4, window_bounds = array<i64: 1, 1, 128>}, {transform_indices = @transform_5, window_bounds = array<i64: 1, 1, 128>}]} {
    %c0 = arith.constant 0 : index
    %c0_0 = arith.constant 0 : index
    %c0_1 = arith.constant 0 : index
    %c0_2 = arith.constant 0 : index
    %0 = vector.load %arg1[%c0, %c0_0, %c0_1, %c0_2] : memref<1x1x2x128xf32, #tpu.memory_space<vmem>>, vector<1x1x2x128xf32>
    %1 = vector.shape_cast %0 : vector<1x1x2x128xf32> to vector<1x2x128xf32>
    %2 = vector.extract_strided_slice %1 {offsets = [0, 0, 0], sizes = [1, 1, 128], strides = [1, 1, 1]} : vector<1x2x128xf32> to vector<1x1x128xf32>
    %3 = vector.shape_cast %2 : vector<1x1x128xf32> to vector<1x128xf32>
    %cst = arith.constant dense<0.000000e+00> : vector<128xf32>
    %4 = vector.multi_reduction <add>, %3, %cst [0] : vector<1x128xf32> to vector<128xf32>
    %5 = vector.shape_cast %4 : vector<128xf32> to vector<1x128xf32>
    %6 = vector.extract_strided_slice %1 {offsets = [0, 1, 0], sizes = [1, 1, 128], strides = [1, 1, 1]} : vector<1x2x128xf32> to vector<1x1x128xf32>
    %7 = vector.shape_cast %6 : vector<1x1x128xf32> to vector<1x128xf32>
    %cst_3 = arith.constant dense<0.000000e+00> : vector<128xf32>
    %8 = vector.multi_reduction <add>, %7, %cst_3 [0] : vector<1x128xf32> to vector<128xf32>
    %9 = vector.shape_cast %8 : vector<128xf32> to vector<1x128xf32>
    %c0_4 = arith.constant 0 : index
    %c0_5 = arith.constant 0 : index
    %10 = vector.load %arg4[%c0_4, %c0_5] : memref<128x128xbf16, #tpu.memory_space<vmem>>, vector<128x128xbf16>
    %11 = arith.extf %10 : vector<128x128xbf16> to vector<128x128xf32>
    %cst_6 = arith.constant dense<0.000000e+00> : vector<1x128xf32>
    %12 = tpu.matmul %5, %11, %cst_6 {dimension_numbers = #tpu.dot_dimension_numbers<[1], [0], [0], [1], [0, 0, 1, 1], [], []>} : vector<1x128xf32>, vector<128x128xf32>, vector<1x128xf32> -> vector<1x128xf32>
    %cst_7 = arith.constant 3.906250e-03 : f32
    %13 = vector.broadcast %cst_7 : f32 to vector<1x128xf32>
    %14 = arith.mulf %12, %13 : vector<1x128xf32>
    %cst_8 = arith.constant dense<0.000000e+00> : vector<1x128xf32>
    %15 = tpu.matmul %9, %11, %cst_8 {dimension_numbers = #tpu.dot_dimension_numbers<[1], [0], [0], [1], [0, 0, 1, 1], [], []>} : vector<1x128xf32>, vector<128x128xf32>, vector<1x128xf32> -> vector<1x128xf32>
    %cst_9 = arith.constant 3.906250e-03 : f32
    %16 = vector.broadcast %cst_9 : f32 to vector<1x128xf32>
    %17 = arith.mulf %15, %16 : vector<1x128xf32>
    %18 = arith.mulf %14, %14 : vector<1x128xf32>
    %19 = arith.subf %17, %18 : vector<1x128xf32>
    %cst_10 = arith.constant 0.000000e+00 : f32
    %20 = vector.broadcast %cst_10 : f32 to vector<1x128xf32>
    %21 = arith.maximumf %19, %20 : vector<1x128xf32>
    %cst_11 = arith.constant 9.99999974E-6 : f32
    %22 = vector.broadcast %cst_11 : f32 to vector<1x128xf32>
    %23 = arith.addf %21, %22 : vector<1x128xf32>
    %24 = math.rsqrt %23 : vector<1x128xf32>
    %c0_12 = arith.constant 0 : index
    %c0_13 = arith.constant 0 : index
    %25 = vector.load %arg2[%c0_12, %c0_13] : memref<1x128xf32, #tpu.memory_space<vmem>>, vector<1x128xf32>
    %26 = arith.mulf %25, %24 : vector<1x128xf32>
    %c0_14 = arith.constant 0 : index
    %c0_15 = arith.constant 0 : index
    %c0_16 = arith.constant 0 : index
    %27 = vector.load %arg5[%c0_14, %c0_15, %c0_16] : memref<1x1x128xf32, #tpu.memory_space<vmem>>, vector<1x1x128xf32>
    %28 = vector.shape_cast %27 : vector<1x1x128xf32> to vector<1x128xf32>
    %29 = vector.shape_cast %26 : vector<1x128xf32> to vector<1x1x128xf32>
    tpu.vector_store %arg5[%c0_14, %c0_15, %c0_16], %29 {strides = array<i32>} : memref<1x1x128xf32, #tpu.memory_space<vmem>>, vector<1x1x128xf32>,
    %c0_17 = arith.constant 0 : index
    %c0_18 = arith.constant 0 : index
    %30 = vector.load %arg3[%c0_17, %c0_18] : memref<1x128xf32, #tpu.memory_space<vmem>>, vector<1x128xf32>
    %31 = arith.mulf %14, %26 : vector<1x128xf32>
    %32 = arith.subf %30, %31 : vector<1x128xf32>
    %c0_19 = arith.constant 0 : index
    %c0_20 = arith.constant 0 : index
    %c0_21 = arith.constant 0 : index
    %33 = vector.load %arg6[%c0_19, %c0_20, %c0_21] : memref<1x1x128xf32, #tpu.memory_space<vmem>>, vector<1x1x128xf32>
    %34 = vector.shape_cast %33 : vector<1x1x128xf32> to vector<1x128xf32>
    %35 = vector.shape_cast %32 : vector<1x128xf32> to vector<1x1x128xf32>
    tpu.vector_store %arg6[%c0_19, %c0_20, %c0_21], %35 {strides = array<i32>} : memref<1x1x128xf32, #tpu.memory_space<vmem>>, vector<1x1x128xf32>,
    return
  }
  func.func @transform_0(%arg0: i32) -> (i32, i32, i32, i32) {
    %c0_i32 = arith.constant 0 : i32
    %c0_i32_0 = arith.constant 0 : i32
    %c0_i32_1 = arith.constant 0 : i32
    %c0_i32_2 = arith.constant 0 : i32
    return %arg0, %c0_i32, %c0_i32_0, %c0_i32_1 : i32, i32, i32, i32
  }
  func.func @transform_1(%arg0: i32) -> (i32, i32) {
    %c0_i32 = arith.constant 0 : i32
    %c0_i32_0 = arith.constant 0 : i32
    %c0_i32_1 = arith.constant 0 : i32
    return %c0_i32, %c0_i32_0 : i32, i32
  }
  func.func @transform_2(%arg0: i32) -> (i32, i32) {
    %c0_i32 = arith.constant 0 : i32
    %c0_i32_0 = arith.constant 0 : i32
    %c0_i32_1 = arith.constant 0 : i32
    return %c0_i32, %c0_i32_0 : i32, i32
  }
  func.func @transform_3(%arg0: i32) -> (i32, i32) {
    %c0_i32 = arith.constant 0 : i32
    %c0_i32_0 = arith.constant 0 : i32
    %c0_i32_1 = arith.constant 0 : i32
    return %c0_i32, %c0_i32_0 : i32, i32
  }
  func.func @transform_4(%arg0: i32) -> (i32, i32, i32) {
    %c0_i32 = arith.constant 0 : i32
    %c0_i32_0 = arith.constant 0 : i32
    %c0_i32_1 = arith.constant 0 : i32
    return %arg0, %c0_i32, %c0_i32_0 : i32, i32, i32
  }
  func.func @transform_5(%arg0: i32) -> (i32, i32, i32) {
    %c0_i32 = arith.constant 0 : i32
    %c0_i32_0 = arith.constant 0 : i32
    %c0_i32_1 = arith.constant 0 : i32
    return %arg0, %c0_i32, %c0_i32_0 : i32, i32, i32
  }
}

module attributes {stable_mosaic.version = 11 : i64} {
  func.func @_conv2_kernel(%arg0: i32, %arg1: i32, %arg2: memref<1x18x18x128xbf16, #tpu.memory_space<vmem>>, %arg3: memref<1x1x128xf32, #tpu.memory_space<vmem>>, %arg4: memref<1x1x128xf32, #tpu.memory_space<vmem>>, %arg5: memref<1x1x128xf32, #tpu.memory_space<vmem>>, %arg6: memref<3x384x128xbf16, #tpu.memory_space<vmem>>, %arg7: memref<1x16x16x128xbf16, #tpu.memory_space<vmem>>, %arg8: memref<1x16x16x128xf32, #tpu.memory_space<vmem>>) attributes {dimension_semantics = [#tpu.dimension_semantics<parallel>, #tpu.dimension_semantics<parallel>], iteration_bounds = array<i64: 2, 1>, scalar_prefetch = 0 : i64, scratch_operands = 0 : i64, tpu.core_type = #tpu.core_type<tc>, window_params = [{transform_indices = @transform_0, window_bounds = array<i64: 1, 18, 18, 128>}, {transform_indices = @transform_1, window_bounds = array<i64: 1, 1, 128>}, {transform_indices = @transform_2, window_bounds = array<i64: 1, 1, 128>}, {pipeline_mode = #tpu.pipeline_mode<synchronous>, transform_indices = @transform_3, window_bounds = array<i64: 1, 1, 128>}, {pipeline_mode = #tpu.pipeline_mode<synchronous>, transform_indices = @transform_4, window_bounds = array<i64: 3, 384, 128>}, {transform_indices = @transform_5, window_bounds = array<i64: 1, 16, 16, 128>}, {transform_indices = @transform_6, window_bounds = array<i64: 1, 16, 16, 128>}]} {
    %c16_i32 = arith.constant 16 : i32
    %0 = arith.muli %arg1, %c16_i32 : i32
    %1 = tpu.assume_multiple %0, 16 : i32
    %c0 = arith.constant 0 : index
    %2 = arith.index_cast %1 : i32 to index
    %c0_0 = arith.constant 0 : index
    %c0_1 = arith.constant 0 : index
    %3 = vector.load %arg2[%c0, %2, %c0_0, %c0_1] : memref<1x18x18x128xbf16, #tpu.memory_space<vmem>>, vector<1x18x18x128xbf16>
    %4 = vector.shape_cast %3 : vector<1x18x18x128xbf16> to vector<18x18x128xbf16>
    %5 = arith.extf %4 : vector<18x18x128xbf16> to vector<18x18x128xf32>
    %c0_2 = arith.constant 0 : index
    %c0_3 = arith.constant 0 : index
    %c0_4 = arith.constant 0 : index
    %6 = vector.load %arg3[%c0_2, %c0_3, %c0_4] : memref<1x1x128xf32, #tpu.memory_space<vmem>>, vector<1x1x128xf32>
    %7 = vector.shape_cast %6 : vector<1x1x128xf32> to vector<1x128xf32>
    %8 = vector.shape_cast %7 : vector<1x128xf32> to vector<1x1x128xf32>
    %9 = vector.broadcast %8 : vector<1x1x128xf32> to vector<18x18x128xf32>
    %10 = arith.mulf %5, %9 : vector<18x18x128xf32>
    %c0_5 = arith.constant 0 : index
    %c0_6 = arith.constant 0 : index
    %c0_7 = arith.constant 0 : index
    %11 = vector.load %arg4[%c0_5, %c0_6, %c0_7] : memref<1x1x128xf32, #tpu.memory_space<vmem>>, vector<1x1x128xf32>
    %12 = vector.shape_cast %11 : vector<1x1x128xf32> to vector<1x128xf32>
    %13 = vector.shape_cast %12 : vector<1x128xf32> to vector<1x1x128xf32>
    %14 = vector.broadcast %13 : vector<1x1x128xf32> to vector<18x18x128xf32>
    %15 = arith.addf %10, %14 : vector<18x18x128xf32>
    %16 = arith.negf %15 : vector<18x18x128xf32>
    %17 = math.exp %16 : vector<18x18x128xf32>
    %cst = arith.constant 1.000000e+00 : f32
    %18 = vector.broadcast %cst : f32 to vector<18x18x128xf32>
    %19 = arith.addf %18, %17 : vector<18x18x128xf32>
    %20 = arith.divf %18, %19 : vector<18x18x128xf32>
    %21 = arith.mulf %15, %20 : vector<18x18x128xf32>
    %22 = tpu.iota {dimensions = array<i32: 0>} : vector<18x1x1xi32>
    %23 = vector.broadcast %1 : i32 to vector<18x1x1xi32>
    %24 = arith.addi %22, %23 : vector<18x1x1xi32>
    %25 = tpu.iota {dimensions = array<i32: 1>} : vector<1x18x1xi32>
    %c1_i32 = arith.constant 1 : i32
    %26 = vector.broadcast %c1_i32 : i32 to vector<18x1x1xi32>
    %27 = arith.cmpi sge, %24, %26 : vector<18x1x1xi32>
    %c16_i32_8 = arith.constant 16 : i32
    %28 = vector.broadcast %c16_i32_8 : i32 to vector<18x1x1xi32>
    %29 = arith.cmpi sle, %24, %28 : vector<18x1x1xi32>
    %30 = arith.andi %27, %29 : vector<18x1x1xi1>
    %c1_i32_9 = arith.constant 1 : i32
    %31 = vector.broadcast %c1_i32_9 : i32 to vector<1x18x1xi32>
    %32 = arith.cmpi sge, %25, %31 : vector<1x18x1xi32>
    %33 = vector.broadcast %30 : vector<18x1x1xi1> to vector<18x18x1xi1>
    %34 = vector.broadcast %32 : vector<1x18x1xi1> to vector<18x18x1xi1>
    %35 = arith.andi %33, %34 : vector<18x18x1xi1>
    %c16_i32_10 = arith.constant 16 : i32
    %36 = vector.broadcast %c16_i32_10 : i32 to vector<1x18x1xi32>
    %37 = arith.cmpi sle, %25, %36 : vector<1x18x1xi32>
    %38 = vector.broadcast %37 : vector<1x18x1xi1> to vector<18x18x1xi1>
    %39 = arith.andi %35, %38 : vector<18x18x1xi1>
    %cst_11 = arith.constant 0.000000e+00 : f32
    %40 = vector.shape_cast %39 : vector<18x18x1xi1> to vector<18x18x1xi1>
    %41 = vector.broadcast %40 : vector<18x18x1xi1> to vector<18x18x128xi1>
    %42 = vector.broadcast %cst_11 : f32 to vector<18x18x128xf32>
    %43 = arith.select %41, %21, %42 : vector<18x18x128xi1>, vector<18x18x128xf32>
    %44 = arith.truncf %43 : vector<18x18x128xf32> to vector<18x18x128xbf16>
    %cst_12 = arith.constant 0.000000e+00 : f32
    %45 = vector.broadcast %cst_12 : f32 to vector<256x128xf32>
    %46 = vector.extract_strided_slice %44 {offsets = [0, 0, 0], sizes = [16, 16, 128], strides = [1, 1, 1]} : vector<18x18x128xbf16> to vector<16x16x128xbf16>
    %47 = vector.extract_strided_slice %44 {offsets = [0, 1, 0], sizes = [16, 16, 128], strides = [1, 1, 1]} : vector<18x18x128xbf16> to vector<16x16x128xbf16>
    %48 = vector.extract_strided_slice %44 {offsets = [0, 2, 0], sizes = [16, 16, 128], strides = [1, 1, 1]} : vector<18x18x128xbf16> to vector<16x16x128xbf16>
    %49 = tpu.concatenate %46, %47, %48 in 2 : vector<16x16x128xbf16>, vector<16x16x128xbf16>, vector<16x16x128xbf16> -> vector<16x16x384xbf16>
    %50 = vector.shape_cast %49 : vector<16x16x384xbf16> to vector<256x384xbf16>
    %c0_13 = arith.constant 0 : index
    %c0_14 = arith.constant 0 : index
    %c0_15 = arith.constant 0 : index
    %51 = vector.load %arg6[%c0_13, %c0_14, %c0_15] : memref<3x384x128xbf16, #tpu.memory_space<vmem>>, vector<1x384x128xbf16>
    %52 = vector.shape_cast %51 : vector<1x384x128xbf16> to vector<384x128xbf16>
    %cst_16 = arith.constant dense<0.000000e+00> : vector<256x128xf32>
    %53 = tpu.matmul %50, %52, %cst_16 {dimension_numbers = #tpu.dot_dimension_numbers<[1], [0], [0], [1], [0, 0, 1, 1], [], []>} : vector<256x384xbf16>, vector<384x128xbf16>, vector<256x128xf32> -> vector<256x128xf32>
    %54 = arith.addf %45, %53 : vector<256x128xf32>
    %55 = vector.extract_strided_slice %44 {offsets = [1, 0, 0], sizes = [16, 16, 128], strides = [1, 1, 1]} : vector<18x18x128xbf16> to vector<16x16x128xbf16>
    %56 = vector.extract_strided_slice %44 {offsets = [1, 1, 0], sizes = [16, 16, 128], strides = [1, 1, 1]} : vector<18x18x128xbf16> to vector<16x16x128xbf16>
    %57 = vector.extract_strided_slice %44 {offsets = [1, 2, 0], sizes = [16, 16, 128], strides = [1, 1, 1]} : vector<18x18x128xbf16> to vector<16x16x128xbf16>
    %58 = tpu.concatenate %55, %56, %57 in 2 : vector<16x16x128xbf16>, vector<16x16x128xbf16>, vector<16x16x128xbf16> -> vector<16x16x384xbf16>
    %59 = vector.shape_cast %58 : vector<16x16x384xbf16> to vector<256x384xbf16>
    %c1 = arith.constant 1 : index
    %c0_17 = arith.constant 0 : index
    %c0_18 = arith.constant 0 : index
    %60 = vector.load %arg6[%c1, %c0_17, %c0_18] : memref<3x384x128xbf16, #tpu.memory_space<vmem>>, vector<1x384x128xbf16>
    %61 = vector.shape_cast %60 : vector<1x384x128xbf16> to vector<384x128xbf16>
    %cst_19 = arith.constant dense<0.000000e+00> : vector<256x128xf32>
    %62 = tpu.matmul %59, %61, %cst_19 {dimension_numbers = #tpu.dot_dimension_numbers<[1], [0], [0], [1], [0, 0, 1, 1], [], []>} : vector<256x384xbf16>, vector<384x128xbf16>, vector<256x128xf32> -> vector<256x128xf32>
    %63 = arith.addf %54, %62 : vector<256x128xf32>
    %64 = vector.extract_strided_slice %44 {offsets = [2, 0, 0], sizes = [16, 16, 128], strides = [1, 1, 1]} : vector<18x18x128xbf16> to vector<16x16x128xbf16>
    %65 = vector.extract_strided_slice %44 {offsets = [2, 1, 0], sizes = [16, 16, 128], strides = [1, 1, 1]} : vector<18x18x128xbf16> to vector<16x16x128xbf16>
    %66 = vector.extract_strided_slice %44 {offsets = [2, 2, 0], sizes = [16, 16, 128], strides = [1, 1, 1]} : vector<18x18x128xbf16> to vector<16x16x128xbf16>
    %67 = tpu.concatenate %64, %65, %66 in 2 : vector<16x16x128xbf16>, vector<16x16x128xbf16>, vector<16x16x128xbf16> -> vector<16x16x384xbf16>
    %68 = vector.shape_cast %67 : vector<16x16x384xbf16> to vector<256x384xbf16>
    %c2 = arith.constant 2 : index
    %c0_20 = arith.constant 0 : index
    %c0_21 = arith.constant 0 : index
    %69 = vector.load %arg6[%c2, %c0_20, %c0_21] : memref<3x384x128xbf16, #tpu.memory_space<vmem>>, vector<1x384x128xbf16>
    %70 = vector.shape_cast %69 : vector<1x384x128xbf16> to vector<384x128xbf16>
    %cst_22 = arith.constant dense<0.000000e+00> : vector<256x128xf32>
    %71 = tpu.matmul %68, %70, %cst_22 {dimension_numbers = #tpu.dot_dimension_numbers<[1], [0], [0], [1], [0, 0, 1, 1], [], []>} : vector<256x384xbf16>, vector<384x128xbf16>, vector<256x128xf32> -> vector<256x128xf32>
    %72 = arith.addf %63, %71 : vector<256x128xf32>
    %c0_23 = arith.constant 0 : index
    %c0_24 = arith.constant 0 : index
    %c0_25 = arith.constant 0 : index
    %73 = vector.load %arg5[%c0_23, %c0_24, %c0_25] : memref<1x1x128xf32, #tpu.memory_space<vmem>>, vector<1x1x128xf32>
    %74 = vector.shape_cast %73 : vector<1x1x128xf32> to vector<1x128xf32>
    %75 = vector.broadcast %74 : vector<1x128xf32> to vector<256x128xf32>
    %76 = arith.addf %72, %75 : vector<256x128xf32>
    %c0_26 = arith.constant 0 : index
    %c0_27 = arith.constant 0 : index
    %c0_28 = arith.constant 0 : index
    %c0_29 = arith.constant 0 : index
    %77 = vector.load %arg7[%c0_26, %c0_27, %c0_28, %c0_29] : memref<1x16x16x128xbf16, #tpu.memory_space<vmem>>, vector<1x16x16x128xbf16>
    %78 = vector.shape_cast %77 : vector<1x16x16x128xbf16> to vector<16x16x128xbf16>
    %79 = arith.extf %78 : vector<16x16x128xbf16> to vector<16x16x128xf32>
    %80 = vector.shape_cast %79 : vector<16x16x128xf32> to vector<256x128xf32>
    %81 = arith.addf %76, %80 : vector<256x128xf32>
    %82 = vector.shape_cast %81 : vector<256x128xf32> to vector<16x16x128xf32>
    %c0_30 = arith.constant 0 : index
    %c0_31 = arith.constant 0 : index
    %c0_32 = arith.constant 0 : index
    %c0_33 = arith.constant 0 : index
    %83 = vector.load %arg8[%c0_30, %c0_31, %c0_32, %c0_33] : memref<1x16x16x128xf32, #tpu.memory_space<vmem>>, vector<1x16x16x128xf32>
    %84 = vector.shape_cast %83 : vector<1x16x16x128xf32> to vector<16x16x128xf32>
    %85 = vector.shape_cast %82 : vector<16x16x128xf32> to vector<1x16x16x128xf32>
    tpu.vector_store %arg8[%c0_30, %c0_31, %c0_32, %c0_33], %85 {strides = array<i32>} : memref<1x16x16x128xf32, #tpu.memory_space<vmem>>, vector<1x16x16x128xf32>,
    return
  }
  func.func @transform_0(%arg0: i32, %arg1: i32) -> (i32, i32, i32, i32) {
    %c0_i32 = arith.constant 0 : i32
    %c0_i32_0 = arith.constant 0 : i32
    %c0_i32_1 = arith.constant 0 : i32
    %c0_i32_2 = arith.constant 0 : i32
    return %arg0, %c0_i32, %c0_i32_0, %c0_i32_1 : i32, i32, i32, i32
  }
  func.func @transform_1(%arg0: i32, %arg1: i32) -> (i32, i32, i32) {
    %c0_i32 = arith.constant 0 : i32
    %c0_i32_0 = arith.constant 0 : i32
    %c0_i32_1 = arith.constant 0 : i32
    return %arg0, %c0_i32, %c0_i32_0 : i32, i32, i32
  }
  func.func @transform_2(%arg0: i32, %arg1: i32) -> (i32, i32, i32) {
    %c0_i32 = arith.constant 0 : i32
    %c0_i32_0 = arith.constant 0 : i32
    %c0_i32_1 = arith.constant 0 : i32
    return %arg0, %c0_i32, %c0_i32_0 : i32, i32, i32
  }
  func.func @transform_3(%arg0: i32, %arg1: i32) -> (i32, i32, i32) {
    %c0_i32 = arith.constant 0 : i32
    %c0_i32_0 = arith.constant 0 : i32
    %c0_i32_1 = arith.constant 0 : i32
    %c0_i32_2 = arith.constant 0 : i32
    return %c0_i32, %c0_i32_0, %c0_i32_1 : i32, i32, i32
  }
  func.func @transform_4(%arg0: i32, %arg1: i32) -> (i32, i32, i32) {
    %c0_i32 = arith.constant 0 : i32
    %c0_i32_0 = arith.constant 0 : i32
    %c0_i32_1 = arith.constant 0 : i32
    %c0_i32_2 = arith.constant 0 : i32
    return %c0_i32, %c0_i32_0, %c0_i32_1 : i32, i32, i32
  }
  func.func @transform_5(%arg0: i32, %arg1: i32) -> (i32, i32, i32, i32) {
    %c0_i32 = arith.constant 0 : i32
    %c0_i32_0 = arith.constant 0 : i32
    %c0_i32_1 = arith.constant 0 : i32
    return %arg0, %arg1, %c0_i32, %c0_i32_0 : i32, i32, i32, i32
  }
  func.func @transform_6(%arg0: i32, %arg1: i32) -> (i32, i32, i32, i32) {
    %c0_i32 = arith.constant 0 : i32
    %c0_i32_0 = arith.constant 0 : i32
    %c0_i32_1 = arith.constant 0 : i32
    return %arg0, %arg1, %c0_i32, %c0_i32_0 : i32, i32, i32, i32
  }
}

</mosaic_0001>

<bundles_post_ra>
// kernel: _lambda_.6
= control target key start
LH: loop header
LB: loop body
LE: loop exit
PB: predicated region body
PF: predicated region fallthrough
CT: control target
= control target key end

     0   :  { %s693_s18 = smov 0   ;;  %s786_s0 = inlined_call_operand.vmem [shape: f32[2,1,2,128], index: 0, kind: input, shape index: {}]   ;;  %s787_s1 = inlined_call_operand.vmem [shape: f32[1,128], index: 1, kind: input, shape index: {}]   ;;  %s788_s2 = inlined_call_operand.vmem [shape: f32[1,128], index: 2, kind: input, shape index: {}]   ;;  %s789_s3 = inlined_call_operand.vmem [shape: bf16[128,128], index: 3, kind: input, shape index: {}]   ;;  %s790_s4 = inlined_call_operand.vmem [shape: f32[2,1,128], index: 4, kind: output, shape index: {0}]   ;;  %s791_s5 = inlined_call_operand.vmem [shape: f32[2,1,128], index: 5, kind: output, shape index: {1}]  }
   0x1 LB: > { %s490_s19 = sadd.s32 4294967295, %s659_s18   ;;  %p494_p0 = scmp.ge.s32.totalorder %s659_s18, 1  ;;  %s659_s18 = sphi %s693_s18, %s16_s18  }
   0x2   : > { %p189_p1 = scmp.lt.s32.totalorder %s659_s18, 3 }
   0x4   : > { %p190_p2 = pnand %p494_p0, %p189_p1 }
   0x5   : > { %p217_p3 = scmp.lt.s32.totalorder (!%p190_p2), %s490_s19, 1 }
   0x6   : > { %193 = sbr.rel (%p190_p2) target bundleno = 269 (0x10d), region = 36 }
   0xb   : > { %v536_v0 = vld [vmem:[%s789_s3 + $0x38] sm:$0xff]   ;;  %v535_v1 = vld [vmem:[%s789_s3 + $0x30] sm:$0xff]   ;;  %v661_v2 = vmov 0.0   ;;  %vm662_vm0 = vmmov 0   ;;  %v534_v6 = vld [vmem:[%s789_s3 + $0x28] sm:$0xff]   ;;  %s793_s19 = smov (!%p217_p3, %s490_s19), 1 }
   0xc   : > { %571 = vmatprep.subr.mxu0 %v661_v2  ;;  %606 = vmatprep.subr.mxu1 %v661_v2  ;;  %v528_v3 = vunpack.c.l.bf16 %v536_v0  ;;  %v529_v4 = vunpack.c.h.bf16 %v536_v0  ;;  %v525_v5 = vunpack.c.h.bf16 %v535_v1  ;;  %v524_v7 = vunpack.c.l.bf16 %v535_v1  ;;  %v533_v9 = vld [vmem:[%s789_s3 + $0x20] sm:$0xff]   ;;  %v532_v12 = vld [vmem:[%s789_s3 + $0x18] sm:$0xff]   ;;  %v531_v15 = vld [vmem:[%s789_s3 + $0x10] sm:$0xff]   ;;  %s495_s9 = sshll.u32 %s793_s19, 1  ;;  %s223_s21 = scalar_lea.vmem %s790_s4, %s793_s19 }
   0xd   : > { %603 = vmatprep.mubr.msk.f32.mxu0 %vm662_vm0, %v661_v2  ;;  %638 = vmatprep.mubr.msk.f32.mxu1 %vm662_vm0, %v661_v2  ;;  %v521_v8 = vunpack.c.h.bf16 %v534_v6  ;;  %v520_v10 = vunpack.c.l.bf16 %v534_v6  ;;  %v517_v11 = vunpack.c.h.bf16 %v533_v9  ;;  %v516_v13 = vunpack.c.l.bf16 %v533_v9  ;;  %v530_v18 = vld [vmem:[%s789_s3 + $0x8] sm:$0xff]   ;;  %v499_v21 = vld [vmem:[%s789_s3] sm:$0xff]   ;;  %s220_s14 = scalar_lea.vmem %s786_s0, %s495_s9  ;;  %s226_s26 = scalar_lea.vmem %s791_s5, %s793_s19 }
   0xe   : > { %572 = vmatpush3.msra.mxu0 %v529_v4  ;;  %607 = vmatpush3.msra.mxu1 %v529_v4  ;;  %v513_v14 = vunpack.c.h.bf16 %v532_v12  ;;  %v512_v16 = vunpack.c.l.bf16 %v532_v12  ;;  %v509_v17 = vunpack.c.h.bf16 %v531_v15  ;;  %v508_v19 = vunpack.c.l.bf16 %v531_v15  ;;  %v227_v24 = vld [vmem:[%s220_s14] sm:$0x3] }
   0xf   : > { %573 = vmatprep.subr.mxu0 %v661_v2  ;;  %608 = vmatprep.subr.mxu1 %v661_v2  ;;  %v505_v20 = vunpack.c.h.bf16 %v530_v18  ;;  %v504_v22 = vunpack.c.l.bf16 %v530_v18  ;;  %v501_v23 = vunpack.c.h.bf16 %v499_v21  ;;  %v500_v25 = vunpack.c.l.bf16 %v499_v21  ;;  %v411_v37 = vld [vmem:[%s787_s1] sm:$0x1] }
  0x10   : > { %574 = vmatpush3.msra.mxu0 %v528_v3  ;;  %609 = vmatpush3.msra.mxu1 %v528_v3  ;;  %v333_v26 = vrot.slane %v227_v24, 1  ;;  %v414_v40 = vld [vmem:[%s788_s2] sm:$0x1] }
  0x11   : > { %575 = vmatprep.subr.mxu0 %v661_v2  ;;  %610 = vmatprep.subr.mxu1 %v661_v2 }
  0x12   : > { %576 = vmatpush3.msra.mxu0 %v525_v5  ;;  %611 = vmatpush3.msra.mxu1 %v525_v5 }
  0x13   : > { %577 = vmatprep.subr.mxu0 %v661_v2  ;;  %612 = vmatprep.subr.mxu1 %v661_v2 }
  0x14   : > { %578 = vmatpush3.msra.mxu0 %v524_v7  ;;  %613 = vmatpush3.msra.mxu1 %v524_v7 }
  0x15   : > { %579 = vmatprep.subr.mxu0 %v661_v2  ;;  %614 = vmatprep.subr.mxu1 %v661_v2 }
  0x16   : > { %580 = vmatpush3.msra.mxu0 %v521_v8  ;;  %615 = vmatpush3.msra.mxu1 %v521_v8 }
  0x17   : > { %581 = vmatprep.subr.mxu0 %v661_v2  ;;  %616 = vmatprep.subr.mxu1 %v661_v2 }
  0x18   : > { %582 = vmatpush3.msra.mxu0 %v520_v10  ;;  %617 = vmatpush3.msra.mxu1 %v520_v10 }
  0x19   : > { %583 = vmatprep.subr.mxu0 %v661_v2  ;;  %618 = vmatprep.subr.mxu1 %v661_v2 }
  0x1a   : > { %584 = vmatpush3.msra.mxu0 %v517_v11  ;;  %619 = vmatpush3.msra.mxu1 %v517_v11 }
  0x1b   : > { %585 = vmatprep.subr.mxu0 %v661_v2  ;;  %620 = vmatprep.subr.mxu1 %v661_v2 }
  0x1c   : > { %586 = vmatpush3.msra.mxu0 %v516_v13  ;;  %621 = vmatpush3.msra.mxu1 %v516_v13 }
  0x1d   : > { %587 = vmatprep.subr.mxu0 %v661_v2  ;;  %622 = vmatprep.subr.mxu1 %v661_v2 }
  0x1e   : > { %588 = vmatpush3.msra.mxu0 %v513_v14  ;;  %623 = vmatpush3.msra.mxu1 %v513_v14 }
  0x1f   : > { %589 = vmatprep.subr.mxu0 %v661_v2  ;;  %624 = vmatprep.subr.mxu1 %v661_v2 }
  0x20   : > { %590 = vmatpush3.msra.mxu0 %v512_v16  ;;  %625 = vmatpush3.msra.mxu1 %v512_v16 }
  0x21   : > { %591 = vmatprep.subr.mxu0 %v661_v2  ;;  %626 = vmatprep.subr.mxu1 %v661_v2 }
  0x22   : > { %592 = vmatpush3.msra.mxu0 %v509_v17  ;;  %627 = vmatpush3.msra.mxu1 %v509_v17 }
  0x23   : > { %593 = vmatprep.subr.mxu0 %v661_v2  ;;  %628 = vmatprep.subr.mxu1 %v661_v2 }
  0x24   : > { %594 = vmatpush3.msra.mxu0 %v508_v19  ;;  %629 = vmatpush3.msra.mxu1 %v508_v19 }
  0x25   : > { %595 = vmatprep.subr.mxu0 %v661_v2  ;;  %630 = vmatprep.subr.mxu1 %v661_v2 }
  0x26   : > { %596 = vmatpush3.msra.mxu0 %v505_v20  ;;  %631 = vmatpush3.msra.mxu1 %v505_v20 }
  0x27   : > { %597 = vmatprep.subr.mxu0 %v661_v2  ;;  %632 = vmatprep.subr.mxu1 %v661_v2 }
  0x28   : > { %598 = vmatpush3.msra.mxu0 %v504_v22  ;;  %633 = vmatpush3.msra.mxu1 %v504_v22 }
  0x29   : > { %599 = vmatprep.subr.mxu0 %v661_v2  ;;  %634 = vmatprep.subr.mxu1 %v661_v2 }
  0x2a   : > { %600 = vmatpush3.msra.mxu0 %v501_v23  ;;  %635 = vmatpush3.msra.mxu1 %v501_v23 }
  0x2b   : > { %601 = vmatprep.subr.mxu0 %v661_v2  ;;  %636 = vmatprep.subr.mxu1 %v661_v2 }
  0x2c   : > { %602 = vmatpush3.msra.mxu0 %v500_v25  ;;  %637 = vmatpush3.msra.mxu1 %v500_v25 }
  0x2d   : > { %604 = vmatmul.mubr.f32.vlgmr.msra.gmra.mxu0 %v227_v24  ;;  %639 = vmatmul.mubr.f32.vlgmr.msra.gmra.mxu1 %v333_v26 }
  0xed   : > { %v327_v27 = vpop.f32.mrf.mxu0  ;;  %v401_v28 = vpop.f32.mrf.mxu1 }
  0xee   : > { %v331_v29 = vmul.f32 0.00390625, %v327_v27  ;;  %v405_v30 = vmul.f32 0.00390625, %v401_v28 }
  0xef   : > { %v605_v31 = vpop.f32.mrf.mxu0  ;;  %v640_v32 = vpop.f32.mrf.mxu1 }
  0xf0   : > { %v406_v33 = vmul.f32 %v331_v29, %v331_v29 }
  0xf2   : > { %v407_v34 = vsub.f32 %v405_v30, %v406_v33 }
  0xf4   : > { %v408_v35 = vmax.f32 %v407_v34, 0.0 }
  0xf6   : > { %v409_v36 = vadd.f32 1e-05, %v408_v35 }
  0xf8   : > { %651 = vrsqrt.f32 %v409_v36 }
 0x105   : > { %v652_v38 = vpop.eup %651 }
 0x106   : > { %v412_v39 = vmul.f32 %v652_v38, %v411_v37 }
 0x108   : > { %413 = vst [vmem:[%s223_s21] sm:$0x1] %v412_v39  ;;  %v415_v41 = vmul.f32 %v412_v39, %v331_v29 }
 0x10a   : > { %v416_v42 = vsub.f32 %v414_v40, %v415_v41 }
 0x10c   : > { %417 = vst [vmem:[%s226_s26] sm:$0x1] %v416_v42 }
 0x10d PF: > { %s16_s18 = sadd.s32 1, %s659_s18  }
 0x10e   : > { %p13_p4 = scmp.ge.s32.totalorder %s16_s18, 4  }
 0x110   :  { %15 = sbr.rel (!%p13_p4) target bundleno = 1 (0x1), region = 78 }

// kernel: _lambda_.4
= control target key start
LH: loop header
LB: loop body
LE: loop exit
PB: predicated region body
PF: predicated region fallthrough
CT: control target
= control target key end

     0   :  { %s1348_s30 = smov 0   ;;  %s1565_s0 = inlined_call_operand.vmem [shape: bf16[2,324,128], index: 0, kind: input, shape index: {}]   ;;  %s1566_s1 = inlined_call_operand.vmem [shape: f32[1,128], index: 1, kind: input, shape index: {}]   ;;  %s1567_s2 = inlined_call_operand.vmem [shape: f32[1,128], index: 2, kind: input, shape index: {}]   ;;  %s1568_s3 = inlined_call_operand.vmem [shape: bf16[128,128], index: 3, kind: input, shape index: {}]   ;;  %s1569_s4 = inlined_call_operand.vmem [shape: f32[2,1,128], index: 4, kind: input, shape index: {}]   ;;  %s1570_s5 = inlined_call_operand.vmem [shape: f32[128,128], index: 5, kind: input, shape index: {}]   ;;  %s1571_s6 = inlined_call_operand.vmem [shape: f32[1,128], index: 6, kind: input, shape index: {}]   ;;  %s1572_s7 = inlined_call_operand.vmem [shape: f32[2,1,128], index: 7, kind: output, shape index: {0}]   ;;  %s1573_s8 = inlined_call_operand.vmem [shape: f32[2,1,128], index: 8, kind: output, shape index: {1}]   ;;  %s1574_s9 = inlined_call_operand.vmem [shape: f32[2,1,128], index: 9, kind: output, shape index: {2}]  }
   0x1 LB: > { %s968_s10 = sadd.s32 4294967295, %s1294_s30   ;;  %p972_p0 = scmp.ge.s32.totalorder %s1294_s30, 1  ;;  %s1294_s30 = sphi %s1348_s30, %s20_s30  }
   0x2   : > { %p300_p1 = scmp.lt.s32.totalorder %s1294_s30, 3 }
   0x4   : > { %p301_p2 = pnand %p972_p0, %p300_p1 }
   0x5   : > { %p343_p3 = scmp.lt.s32.totalorder (!%p301_p2), %s968_s10, 1 }
   0x6   : > { %304 = sbr.rel (%p301_p2) target bundleno = 338 (0x152), region = 48 }
   0xb   : > { %v1114_v0 = vld [vmem:[%s1568_s3 + $0x38] sm:$0xff]   ;;  %v1113_v1 = vld [vmem:[%s1568_s3 + $0x30] sm:$0xff]   ;;  %v1296_v2 = vmov 0.0   ;;  %vm1297_vm0 = vmmov 0   ;;  %s1576_s10 = smov (!%p343_p3, %s968_s10), 1  ;;  %v1112_v6 = vld [vmem:[%s1568_s3 + $0x28] sm:$0xff]  }
   0xc   : > { %1166 = vmatprep.subr.mxu0 %v1296_v2  ;;  %v1087_v3 = vunpack.c.l.bf16 %v1114_v0  ;;  %v1088_v4 = vunpack.c.h.bf16 %v1114_v0  ;;  %1201 = vmatprep.subr.mxu1 %v1296_v2  ;;  %v1084_v5 = vunpack.c.h.bf16 %v1113_v1  ;;  %s1271_s17 = smul.u32 164, %s1576_s10  ;;  %v1083_v7 = vunpack.c.l.bf16 %v1113_v1  ;;  %v1111_v9 = vld [vmem:[%s1568_s3 + $0x20] sm:$0xff]   ;;  %v1110_v13 = vld [vmem:[%s1568_s3 + $0x18] sm:$0xff]   ;;  %v1109_v19 = vld [vmem:[%s1568_s3 + $0x10] sm:$0xff]   ;;  %s350_s14 = scalar_lea.vmem %s1569_s4, %s1576_s10 }
   0xd   : > { %1198 = vmatprep.mubr.msk.f32.mxu0 %vm1297_vm0, %v1296_v2  ;;  %1233 = vmatprep.mubr.msk.f32.mxu1 %vm1297_vm0, %v1296_v2  ;;  %v1080_v8 = vunpack.c.h.bf16 %v1112_v6  ;;  %v1079_v10 = vunpack.c.l.bf16 %v1112_v6  ;;  %v1076_v11 = vunpack.c.h.bf16 %v1111_v9  ;;  %v1075_v14 = vunpack.c.l.bf16 %v1111_v9  ;;  %v1108_v26 = vld [vmem:[%s1568_s3 + $0x8] sm:$0xff]   ;;  %v1058_v34 = vld [vmem:[%s1568_s3] sm:$0xff]   ;;  %s359_s13 = scalar_lea.vmem %s1574_s9, %s1576_s10  ;;  %s353_s18 = scalar_lea.vmem %s1572_s7, %s1576_s10 }
   0xe   : > { %1167 = vmatpush3.msra.mxu0 %v1088_v4  ;;  %1202 = vmatpush3.msra.mxu1 %v1088_v4  ;;  %s1386_s22 = scalar_lea.vmem %s1565_s0, %s1271_s17  ;;  %v1072_v18 = vunpack.c.h.bf16 %v1110_v13  ;;  %v1071_v21 = vunpack.c.l.bf16 %v1110_v13  ;;  %v1068_v25 = vunpack.c.h.bf16 %v1109_v19  ;;  %v1067_v29 = vunpack.c.l.bf16 %v1109_v19  ;;  %s356_s23 = scalar_lea.vmem %s1573_s8, %s1576_s10 }
   0xf   : > { %1168 = vmatprep.subr.mxu0 %v1296_v2  ;;  %1203 = vmatprep.subr.mxu1 %v1296_v2  ;;  %v978_v12 = vld [vmem:[%s1386_s22] sm:$0xff]   ;;  %v1089_v15 = vld [vmem:[%s1386_s22 + $0x8] sm:$0xff]   ;;  %v1090_v22 = vld [vmem:[%s1386_s22 + $0x10] sm:$0xff]   ;;  %v1064_v33 = vunpack.c.h.bf16 %v1108_v26  ;;  %v1063_v37 = vunpack.c.l.bf16 %v1108_v26  ;;  %v1060_v41 = vunpack.c.h.bf16 %v1058_v34  ;;  %v1059_v44 = vunpack.c.l.bf16 %v1058_v34 }
  0x10   : > { %1169 = vmatpush3.msra.mxu0 %v1087_v3  ;;  %1204 = vmatpush3.msra.mxu1 %v1087_v3  ;;  %v1399_v16 = vunpack.c.l.bf16 %v978_v12  ;;  %v1401_v17 = vunpack.c.h.bf16 %v978_v12  ;;  %v1408_v20 = vunpack.c.l.bf16 %v1089_v15  ;;  %v1413_v23 = vunpack.c.h.bf16 %v1089_v15  ;;  %v1091_v30 = vld [vmem:[%s1386_s22 + $0x18] sm:$0xff]   ;;  %v1092_v38 = vld [vmem:[%s1386_s22 + $0x20] sm:$0xff]   ;;  %v1093_v45 = vld [vmem:[%s1386_s22 + $0x28] sm:$0xff]  }
  0x11   : > { %1170 = vmatprep.subr.mxu0 %v1296_v2  ;;  %1205 = vmatprep.subr.mxu1 %v1296_v2  ;;  %v987_v27 = vunpack.c.l.bf16 %v1090_v22  ;;  %v988_v31 = vunpack.c.h.bf16 %v1090_v22  ;;  %v991_v35 = vunpack.c.l.bf16 %v1091_v30  ;;  %v992_v39 = vunpack.c.h.bf16 %v1091_v30  ;;  %v1094_v53 = vld [vmem:[%s1386_s22 + $0x30] sm:$0xff]   ;;  %v1095_v62 = vld [vmem:[%s1386_s22 + $0x38] sm:$0xff]  }
  0x12   : > { %1171 = vmatpush3.msra.mxu0 %v1084_v5  ;;  %1206 = vmatpush3.msra.mxu1 %v1084_v5  ;;  %v442_v24 = vadd.f32 %v1401_v17, %v1399_v16  ;;  %v995_v42 = vunpack.c.l.bf16 %v1092_v38  ;;  %v996_v46 = vunpack.c.h.bf16 %v1092_v38  ;;  %v491_v48 = vmul.f32 %v1399_v16, %v1399_v16  ;;  %v1098_v26 = vld [vmem:[%s1386_s22 + $0x50] sm:$0xff]  }
  0x13   : > { %1172 = vmatprep.subr.mxu0 %v1296_v2  ;;  %1207 = vmatprep.subr.mxu1 %v1296_v2  ;;  %v492_v49 = vmul.f32 %v1401_v17, %v1401_v17  ;;  %v999_v50 = vunpack.c.l.bf16 %v1093_v45  ;;  %v493_v52 = vmul.f32 %v1408_v20, %v1408_v20  ;;  %v1000_v54 = vunpack.c.h.bf16 %v1093_v45  ;;  %v1097_v17 = vld [vmem:[%s1386_s22 + $0x48] sm:$0xff]  }
  0x14   : > { %1173 = vmatpush3.msra.mxu0 %v1083_v7  ;;  %1208 = vmatpush3.msra.mxu1 %v1083_v7  ;;  %v443_v28 = vadd.f32 %v1408_v20, %v442_v24  ;;  %v494_v56 = vmul.f32 %v1413_v23, %v1413_v23  ;;  %v1003_v58 = vunpack.c.l.bf16 %v1094_v53  ;;  %v495_v60 = vmul.f32 %v987_v27, %v987_v27 }
  0x15   : > { %1174 = vmatprep.subr.mxu0 %v1296_v2  ;;  %1209 = vmatprep.subr.mxu1 %v1296_v2  ;;  %v532_v57 = vadd.f32 %v492_v49, %v491_v48  ;;  %v1004_v63 = vunpack.c.h.bf16 %v1094_v53  ;;  %v496_v1 = vmul.f32 %v988_v31, %v988_v31  ;;  %v1007_v4 = vunpack.c.l.bf16 %v1095_v62  ;;  %v1101_v53 = vld [vmem:[%s1386_s22 + $0x68] sm:$0xff]  }
  0x16   : > { %1175 = vmatpush3.msra.mxu0 %v1080_v8  ;;  %1210 = vmatpush3.msra.mxu1 %v1080_v8  ;;  %v444_v32 = vadd.f32 %v1413_v23, %v443_v28  ;;  %v497_v6 = vmul.f32 %v991_v35, %v991_v35  ;;  %v1096_v8 = vld [vmem:[%s1386_s22 + $0x40] sm:$0xff]   ;;  %v1008_v9 = vunpack.c.h.bf16 %v1095_v62  ;;  %v499_v15 = vmul.f32 %v995_v42, %v995_v42  ;;  %v1102_v62 = vld [vmem:[%s1386_s22 + $0x70] sm:$0xff]  }
  0x17   : > { %1176 = vmatprep.subr.mxu0 %v1296_v2  ;;  %1211 = vmatprep.subr.mxu1 %v1296_v2  ;;  %v533_v61 = vadd.f32 %v532_v57, %v493_v52  ;;  %v1011_v13 = vunpack.c.l.bf16 %v1096_v8  ;;  %v500_v20 = vmul.f32 %v996_v46, %v996_v46  ;;  %v1015_v22 = vunpack.c.l.bf16 %v1097_v17 }
  0x18   : > { %1177 = vmatpush3.msra.mxu0 %v1079_v10  ;;  %1212 = vmatpush3.msra.mxu1 %v1079_v10  ;;  %v445_v36 = vadd.f32 %v987_v27, %v444_v32  ;;  %v501_v24 = vmul.f32 %v999_v50, %v999_v50  ;;  %v1016_v27 = vunpack.c.h.bf16 %v1097_v17  ;;  %v504_v38 = vmul.f32 %v1004_v63, %v1004_v63  ;;  %v1104_v17 = vld [vmem:[%s1386_s22 + $0x80] sm:$0xff]  }
  0x19   : > { %1178 = vmatprep.subr.mxu0 %v1296_v2  ;;  %1213 = vmatprep.subr.mxu1 %v1296_v2  ;;  %v534_v3 = vadd.f32 %v533_v61, %v494_v56  ;;  %vm481_vm1 = vcmask 1043456  }
  0x1a   : > { %1179 = vmatpush3.msra.mxu0 %v1076_v11  ;;  %1214 = vmatpush3.msra.mxu1 %v1076_v11  ;;  %v446_v40 = vadd.f32 %v988_v31, %v445_v36  ;;  %v498_v11 = vmul.f32 %v992_v39, %v992_v39  ;;  %v1019_v31 = vunpack.c.l.bf16 %v1098_v26  ;;  %v1020_v36 = vunpack.c.h.bf16 %v1098_v26  ;;  %v1105_v26 = vld [vmem:[%s1386_s22 + $0x88] sm:$0xff]  }
  0x1b   : > { %1180 = vmatprep.subr.mxu0 %v1296_v2  ;;  %1215 = vmatprep.subr.mxu1 %v1296_v2  ;;  %v535_v7 = vadd.f32 %v534_v3, %v495_v60  ;;  %v509_v60 = vmul.f32 %v1015_v22, %v1015_v22 }
  0x1c   : > { %1181 = vmatpush3.msra.mxu0 %v1075_v14  ;;  %1216 = vmatpush3.msra.mxu1 %v1075_v14  ;;  %v447_v43 = vadd.f32 %v991_v35, %v446_v40  ;;  %v1099_v35 = vld [vmem:[%s1386_s22 + $0x58] sm:$0xff]  }
  0x1d   : > { %1182 = vmatprep.subr.mxu0 %v1296_v2  ;;  %1217 = vmatprep.subr.mxu1 %v1296_v2  ;;  %v536_v12 = vadd.f32 %v535_v7, %v496_v1  ;;  %v1023_v40 = vunpack.c.l.bf16 %v1099_v35  ;;  %v1024_v45 = vunpack.c.h.bf16 %v1099_v35  ;;  %v510_v1 = vmul.f32 %v1016_v27, %v1016_v27  ;;  %v1106_v35 = vld [vmem:[%s1386_s22 + $0x90] sm:$0xff]  }
  0x1e   : > { %1183 = vmatpush3.msra.mxu0 %v1072_v18  ;;  %1218 = vmatpush3.msra.mxu1 %v1072_v18  ;;  %v448_v47 = vadd.f32 %v992_v39, %v447_v43  ;;  %v1012_v18 = vunpack.c.h.bf16 %v1096_v8  ;;  %v1103_v8 = vld [vmem:[%s1386_s22 + $0x78] sm:$0xff]  }
  0x1f   : > { %1184 = vmatprep.subr.mxu0 %v1296_v2  ;;  %1219 = vmatprep.subr.mxu1 %v1296_v2  ;;  %v537_v16 = vadd.f32 %v536_v12, %v497_v6  ;;  %v511_v6 = vmul.f32 %v1019_v31, %v1019_v31 }
  0x20   : > { %1185 = vmatpush3.msra.mxu0 %v1071_v21  ;;  %1220 = vmatpush3.msra.mxu1 %v1071_v21  ;;  %v449_v51 = vadd.f32 %v995_v42, %v448_v47  ;;  %v505_v42 = vmul.f32 %v1007_v4, %v1007_v4  ;;  %v506_v47 = vmul.f32 %v1008_v9, %v1008_v9 }
  0x21   : > { %1186 = vmatprep.subr.mxu0 %v1296_v2  ;;  %1221 = vmatprep.subr.mxu1 %v1296_v2  ;;  %v538_v21 = vadd.f32 %v537_v16, %v498_v11  ;;  %v508_v56 = vmul.f32 %v1012_v18, %v1012_v18  ;;  %v512_v11 = vmul.f32 %v1020_v36, %v1020_v36 }
  0x22   : > { %1187 = vmatpush3.msra.mxu0 %v1068_v25  ;;  %1222 = vmatpush3.msra.mxu1 %v1068_v25  ;;  %v450_v55 = vadd.f32 %v996_v46, %v449_v51  ;;  %v507_v51 = vmul.f32 %v1011_v13, %v1011_v13 }
  0x23   : > { %1188 = vmatprep.subr.mxu0 %v1296_v2  ;;  %1223 = vmatprep.subr.mxu1 %v1296_v2  ;;  %v539_v25 = vadd.f32 %v538_v21, %v499_v15  ;;  %v513_v15 = vmul.f32 %v1023_v40, %v1023_v40 }
  0x24   : > { %1189 = vmatpush3.msra.mxu0 %v1067_v29  ;;  %1224 = vmatpush3.msra.mxu1 %v1067_v29  ;;  %v451_v59 = vadd.f32 %v999_v50, %v450_v55  ;;  %v502_v29 = vmul.f32 %v1000_v54, %v1000_v54 }
  0x25   : > { %1190 = vmatprep.subr.mxu0 %v1296_v2  ;;  %1225 = vmatprep.subr.mxu1 %v1296_v2  ;;  %v540_v30 = vadd.f32 %v539_v25, %v500_v20  ;;  %v514_v20 = vmul.f32 %v1024_v45, %v1024_v45 }
  0x26   : > { %1191 = vmatpush3.msra.mxu0 %v1064_v33  ;;  %1226 = vmatpush3.msra.mxu1 %v1064_v33  ;;  %v452_v0 = vadd.f32 %v1000_v54, %v451_v59  ;;  %v503_v33 = vmul.f32 %v1003_v58, %v1003_v58 }
  0x27   : > { %1192 = vmatprep.subr.mxu0 %v1296_v2  ;;  %1227 = vmatprep.subr.mxu1 %v1296_v2  ;;  %v541_v34 = vadd.f32 %v540_v30, %v501_v24 }
  0x28   : > { %1193 = vmatpush3.msra.mxu0 %v1063_v37  ;;  %1228 = vmatpush3.msra.mxu1 %v1063_v37  ;;  %v453_v5 = vadd.f32 %v1003_v58, %v452_v0  ;;  %v1031_v58 = vunpack.c.l.bf16 %v1101_v53 }
  0x29   : > { %1194 = vmatprep.subr.mxu0 %v1296_v2  ;;  %1229 = vmatprep.subr.mxu1 %v1296_v2  ;;  %v542_v39 = vadd.f32 %v541_v34, %v502_v29 }
  0x2a   : > { %1195 = vmatpush3.msra.mxu0 %v1060_v41  ;;  %1230 = vmatpush3.msra.mxu1 %v1060_v41  ;;  %v454_v10 = vadd.f32 %v1004_v63, %v453_v5  ;;  %v1032_v63 = vunpack.c.h.bf16 %v1101_v53 }
  0x2b   : > { %1196 = vmatprep.subr.mxu0 %v1296_v2  ;;  %1231 = vmatprep.subr.mxu1 %v1296_v2  ;;  %v543_v43 = vadd.f32 %v542_v39, %v503_v33  ;;  %v517_v33 = vmul.f32 %v1031_v58, %v1031_v58 }
  0x2c   : > { %1197 = vmatpush3.msra.mxu0 %v1059_v44  ;;  %1232 = vmatpush3.msra.mxu1 %v1059_v44  ;;  %v455_v14 = vadd.f32 %v1007_v4, %v454_v10  ;;  %v1100_v44 = vld [vmem:[%s1386_s22 + $0x60] sm:$0xff]   ;;  %v1035_v4 = vunpack.c.l.bf16 %v1102_v62 }
  0x2d   : > { %1236 = vmatprep.subr.mxu0 %v1296_v2  ;;  %v544_v48 = vadd.f32 %v543_v43, %v504_v38  ;;  %v1027_v49 = vunpack.c.l.bf16 %v1100_v44  ;;  %v1028_v54 = vunpack.c.h.bf16 %v1100_v44  ;;  %v518_v38 = vmul.f32 %v1032_v63, %v1032_v63  ;;  %v1107_v44 = vld [vmem:[%s1386_s22 + $0x98] sm:$0xff]  }
  0x2e   : > { %v456_v19 = vadd.f32 %v1008_v9, %v455_v14  ;;  %v1036_v9 = vunpack.c.h.bf16 %v1102_v62 }
  0x2f   : > { %v545_v52 = vadd.f32 %v544_v48, %v505_v42  ;;  %v515_v24 = vmul.f32 %v1027_v49, %v1027_v49  ;;  %v516_v29 = vmul.f32 %v1028_v54, %v1028_v54  ;;  %v519_v42 = vmul.f32 %v1035_v4, %v1035_v4 }
  0x30   : > { %v457_v23 = vadd.f32 %v1011_v13, %v456_v19  ;;  %v1039_v13 = vunpack.c.l.bf16 %v1103_v8  ;;  %v520_v48 = vmul.f32 %v1036_v9, %v1036_v9 }
  0x31   : > { %v546_v57 = vadd.f32 %v545_v52, %v506_v47 }
  0x32   : > { %v458_v28 = vadd.f32 %v1012_v18, %v457_v23  ;;  %v1040_v18 = vunpack.c.h.bf16 %v1103_v8  ;;  %v521_v52 = vmul.f32 %v1039_v13, %v1039_v13 }
  0x33   : > { %v547_v61 = vadd.f32 %v546_v57, %v507_v51 }
  0x34   : > { %v459_v32 = vadd.f32 %v1015_v22, %v458_v28  ;;  %v1043_v22 = vunpack.c.l.bf16 %v1104_v17  ;;  %v522_v57 = vmul.f32 %v1040_v18, %v1040_v18 }
  0x35   : > { %v548_v3 = vadd.f32 %v547_v61, %v508_v56 }
  0x36   : > { %v460_v37 = vadd.f32 %v1016_v27, %v459_v32  ;;  %v1044_v27 = vunpack.c.h.bf16 %v1104_v17 }
  0x37   : > { %v549_v7 = vadd.f32 %v548_v3, %v509_v60  ;;  %v523_v60 = vmul.f32 %v1043_v22, %v1043_v22  ;;  %v1471_v3 = vld [vmem:[%s350_s14] sm:$0x1] }
  0x38   : > { %v461_v41 = vadd.f32 %v1019_v31, %v460_v37  ;;  %v1047_v31 = vunpack.c.l.bf16 %v1105_v26 }
  0x39   : > { %v550_v12 = vadd.f32 %v549_v7, %v510_v1 }
  0x3a   : > { %v462_v46 = vadd.f32 %v1020_v36, %v461_v41  ;;  %v1048_v36 = vunpack.c.h.bf16 %v1105_v26 }
  0x3b   : > { %v551_v16 = vadd.f32 %v550_v12, %v511_v6 }
  0x3c   : > { %v463_v50 = vadd.f32 %v1023_v40, %v462_v46  ;;  %v1051_v40 = vunpack.c.l.bf16 %v1106_v35  ;;  %v400_v46 = vld [vmem:[%s1386_s22 + $0xa0] sm:$0x3]  ;;  %v526_v8 = vmul.f32 %v1048_v36, %v1048_v36 }
  0x3d   : > { %v552_v21 = vadd.f32 %v551_v16, %v512_v11 }
  0x3e   : > { %v464_v55 = vadd.f32 %v1024_v45, %v463_v50  ;;  %v1052_v45 = vunpack.c.h.bf16 %v1106_v35  ;;  %v1055_v50 = vunpack.c.l.bf16 %v1107_v44  ;;  %v527_v12 = vmul.f32 %v1051_v40, %v1051_v40 }
  0x3f   : > { %v553_v25 = vadd.f32 %v552_v21, %v513_v15 }
  0x40   : > { %v465_v59 = vadd.f32 %v1027_v49, %v464_v55  ;;  %v1056_v55 = vunpack.c.h.bf16 %v1107_v44  ;;  %v528_v15 = vmul.f32 %v1052_v45, %v1052_v45 }
  0x41   : > { %v554_v30 = vadd.f32 %v553_v25, %v514_v20  ;;  %v789_v25 = vld [vmem:[%s1570_s5 + $0x78] sm:$0xff] }
  0x42   : > { %v466_v0 = vadd.f32 %v1028_v54, %v465_v59  ;;  %v441_v54 = vunpack.c.l.bf16 %v400_v46  ;;  %v780_v46 = vld [vmem:[%s1570_s5 + $0x30] sm:$0xff] }
  0x43   : > { %v555_v34 = vadd.f32 %v554_v30, %v515_v24 }
  0x44   : > { %v467_v5 = vadd.f32 %v1031_v58, %v466_v0  ;;  %v482_v62 = vsel %vm481_vm1, %v441_v54, 0.0  ;;  %v524_v0 = vmul.f32 %v1044_v27, %v1044_v27  ;;  %v531_v20 = vmul.f32 %v441_v54, %v441_v54 }
  0x45   : > { %v556_v39 = vadd.f32 %v555_v34, %v516_v29  ;;  %v788_v29 = vld [vmem:[%s1570_s5 + $0x70] sm:$0xff] }
  0x46   : > { %v468_v10 = vadd.f32 %v1032_v63, %v467_v5  ;;  %v525_v5 = vmul.f32 %v1047_v31, %v1047_v31 }
  0x47   : > { %v557_v43 = vadd.f32 %v556_v39, %v517_v33  ;;  %v786_v33 = vld [vmem:[%s1570_s5 + $0x60] sm:$0xff] }
  0x48   : > { %v469_v14 = vadd.f32 %v1035_v4, %v468_v10  ;;  %v974_v10 = vmul.f32 -1.442695, %v1471_v3 }
  0x49   : > { %v558_v49 = vadd.f32 %v557_v43, %v518_v38  ;;  %v784_v38 = vld [vmem:[%s1570_s5 + $0x50] sm:$0xff]  ;;  %v782_v43 = vld [vmem:[%s1570_s5 + $0x40] sm:$0xff] }
  0x4a   : > { %v470_v19 = vadd.f32 %v1036_v9, %v469_v14  ;;  %1282 = vpow2.f32 %v974_v10 }
  0x4b   : > { %v559_v53 = vadd.f32 %v558_v49, %v519_v42  ;;  %v777_v49 = vld [vmem:[%s1570_s5 + $0x18] sm:$0xff] }
  0x4c   : > { %v471_v23 = vadd.f32 %v1039_v13, %v470_v19 }
  0x4d   : > { %v560_v58 = vadd.f32 %v559_v53, %v520_v48  ;;  %v778_v48 = vld [vmem:[%s1570_s5 + $0x20] sm:$0xff] }
  0x4e   : > { %v472_v28 = vadd.f32 %v1040_v18, %v471_v23  ;;  %v529_v18 = vmul.f32 %v1055_v50, %v1055_v50  ;;  %v774_v53 = vld [vmem:[%s1570_s5] sm:$0xff] }
  0x4f   : > { %v561_v61 = vadd.f32 %v560_v58, %v521_v52  ;;  %v775_v52 = vld [vmem:[%s1570_s5 + $0x8] sm:$0xff] }
  0x50   : > { %v473_v32 = vadd.f32 %v1043_v22, %v472_v28  ;;  %v530_v22 = vmul.f32 %v1056_v55, %v1056_v55 }
  0x51   : > { %v562_v1 = vadd.f32 %v561_v61, %v522_v57 }
  0x52   : > { %v474_v37 = vadd.f32 %v1044_v27, %v473_v32  ;;  %v571_v27 = vsel %vm481_vm1, %v531_v20, 0.0 }
  0x53   : > { %v563_v6 = vadd.f32 %v562_v1, %v523_v60  ;;  %v790_v1 = vld [vmem:[%s1571_s6] sm:$0x1] }
  0x54   : > { %v475_v41 = vadd.f32 %v1047_v31, %v474_v37  ;;  %v787_v31 = vld [vmem:[%s1570_s5 + $0x68] sm:$0xff] }
  0x55   : > { %v564_v9 = vadd.f32 %v563_v6, %v524_v0 }
  0x56   : > { %v476_v47 = vadd.f32 %v1048_v36, %v475_v41  ;;  %v785_v36 = vld [vmem:[%s1570_s5 + $0x58] sm:$0xff]  ;;  %v783_v41 = vld [vmem:[%s1570_s5 + $0x48] sm:$0xff] }
  0x57   : > { %v565_v13 = vadd.f32 %v564_v9, %v525_v5  ;;  %v1283_v34 = vpop.eup %1282  ;;  %v759_v5 = vld [vmem:[%s1566_s1] sm:$0x1] }
  0x58   : > { %v477_v51 = vadd.f32 %v1051_v40, %v476_v47  ;;  %v770_v39 = vadd.f32 1.0, %v1283_v34  ;;  %v779_v47 = vld [vmem:[%s1570_s5 + $0x28] sm:$0xff] }
  0x59   : > { %v566_v16 = vadd.f32 %v565_v13, %v526_v8  ;;  %v762_v8 = vld [vmem:[%s1567_s2] sm:$0x1] }
  0x5a   : > { %v478_v56 = vadd.f32 %v1052_v45, %v477_v51  ;;  %1284 = vrcp.f32 %v770_v39  ;;  %v781_v45 = vld [vmem:[%s1570_s5 + $0x38] sm:$0xff] }
  0x5b   : > { %v567_v19 = vadd.f32 %v566_v16, %v527_v12 }
  0x5c   : > { %v479_v59 = vadd.f32 %v1055_v50, %v478_v56  ;;  %v776_v50 = vld [vmem:[%s1570_s5 + $0x10] sm:$0xff] }
  0x5d   : > { %v568_v23 = vadd.f32 %v567_v19, %v528_v15 }
  0x5e   : > { %v480_v63 = vadd.f32 %v1056_v55, %v479_v59 }
  0x5f   : > { %v569_v26 = vadd.f32 %v568_v23, %v529_v18 }
  0x60   : > { %v483_v4 = vadd.f32 %v482_v62, %v480_v63 }
  0x61   : > { %v570_v28 = vadd.f32 %v569_v26, %v530_v22 }
  0x62   : > { %v484_v7 = vrot.slane %v483_v4, 4 }
  0x63   : > { %v572_v30 = vadd.f32 %v571_v27, %v570_v28 }
  0x64   : > { %v485_v11 = vadd.f32 %v484_v7, %v483_v4 }
  0x65   : > { %v573_v32 = vrot.slane %v572_v30, 4 }
  0x66   : > { %v486_v14 = vrot.slane %v485_v11, 2 }
  0x67   : > { %v574_v35 = vadd.f32 %v573_v32, %v572_v30  ;;  %v1285_v51 = vpop.eup %1284 }
  0x68   : > { %v487_v17 = vadd.f32 %v486_v14, %v485_v11  ;;  %v773_v54 = vmul.f32 %v1285_v51, %v1471_v3 }
  0x69   : > { %v575_v37 = vrot.slane %v574_v35, 2 }
  0x6a   : > { %v488_v21 = vrot.slane %v487_v17, 1 }
  0x6b   : > { %v576_v40 = vadd.f32 %v575_v37, %v574_v35 }
  0x6c   : > { %v489_v24 = vadd.f32 %v488_v21, %v487_v17 }
  0x6d   : > { %v577_v42 = vrot.slane %v576_v40, 1 }
  0x6e   : > { %1199 = vmatmul.mubr.f32.vlgmr.msra.gmra.mxu0 %v489_v24 }
  0x6f   : > { %1237 = vmatpush3.msra.mxu0 %v789_v25  ;;  %1268 = vmatprep.mubr.msk.f32.mxu0 %vm1297_vm0, %v1296_v2  ;;  %v578_v44 = vadd.f32 %v577_v42, %v576_v40 }
  0x70   : > { %1238 = vmatprep.subr.mxu0 %v1296_v2 }
  0x71   : > { %1239 = vmatpush3.msra.mxu0 %v788_v29  ;;  %1234 = vmatmul.mubr.f32.vlgmr.msra.gmra.mxu1 %v578_v44 }
  0x72   : > { %1240 = vmatprep.subr.mxu0 %v1296_v2 }
  0x73   : > { %1241 = vmatpush3.msra.mxu0 %v787_v31 }
  0x74   : > { %1242 = vmatprep.subr.mxu0 %v1296_v2 }
  0x75   : > { %1243 = vmatpush3.msra.mxu0 %v786_v33 }
  0x76   : > { %1244 = vmatprep.subr.mxu0 %v1296_v2 }
  0x77   : > { %1245 = vmatpush3.msra.mxu0 %v785_v36 }
  0x78   : > { %1246 = vmatprep.subr.mxu0 %v1296_v2 }
  0x79   : > { %1247 = vmatpush3.msra.mxu0 %v784_v38 }
  0x7a   : > { %1248 = vmatprep.subr.mxu0 %v1296_v2 }
  0x7b   : > { %1249 = vmatpush3.msra.mxu0 %v783_v41 }
  0x7c   : > { %1250 = vmatprep.subr.mxu0 %v1296_v2 }
  0x7d   : > { %1251 = vmatpush3.msra.mxu0 %v782_v43 }
  0x7e   : > { %1252 = vmatprep.subr.mxu0 %v1296_v2 }
  0x7f   : > { %1253 = vmatpush3.msra.mxu0 %v781_v45 }
  0x80   : > { %1254 = vmatprep.subr.mxu0 %v1296_v2 }
  0x81   : > { %1255 = vmatpush3.msra.mxu0 %v780_v46 }
  0x82   : > { %1256 = vmatprep.subr.mxu0 %v1296_v2 }
  0x83   : > { %1257 = vmatpush3.msra.mxu0 %v779_v47 }
  0x84   : > { %1258 = vmatprep.subr.mxu0 %v1296_v2 }
  0x85   : > { %1259 = vmatpush3.msra.mxu0 %v778_v48 }
  0x86   : > { %1260 = vmatprep.subr.mxu0 %v1296_v2 }
  0x87   : > { %1261 = vmatpush3.msra.mxu0 %v777_v49 }
  0x88   : > { %1262 = vmatprep.subr.mxu0 %v1296_v2 }
  0x89   : > { %1263 = vmatpush3.msra.mxu0 %v776_v50 }
  0x8a   : > { %1264 = vmatprep.subr.mxu0 %v1296_v2 }
  0x8b   : > { %1265 = vmatpush3.msra.mxu0 %v775_v52 }
  0x8c   : > { %1266 = vmatprep.subr.mxu0 %v1296_v2 }
  0x8d   : > { %1267 = vmatpush3.msra.mxu0 %v774_v53 }
  0x8e   : > { %1269 = vmatmul.mubr.f32.vlgmr.msra.gmra.mxu0 %v773_v54 }
 0x12e   : > { %v678_v55 = vpop.f32.mrf.mxu0 }
 0x12f   : > { %v682_v57 = vmul.f32 0.00390625, %v678_v55 }
 0x130   : > { %v1200_v56 = vpop.f32.mrf.mxu0 }
 0x131   : > { %v754_v58 = vmul.f32 %v682_v57, %v682_v57  ;;  %v749_v59 = vpop.f32.mrf.mxu1 }
 0x132   : > { %v753_v60 = vmul.f32 0.00390625, %v749_v59 }
 0x133   : > { %v1235_v61 = vpop.f32.mrf.mxu1 }
 0x134   : > { %v755_v62 = vsub.f32 %v753_v60, %v754_v58 }
 0x136   : > { %v756_v63 = vmax.f32 %v755_v62, 0.0 }
 0x138   : > { %v757_v0 = vadd.f32 1e-05, %v756_v63 }
 0x13a   : > { %1286 = vrsqrt.f32 %v757_v0 }
 0x147   : > { %v1287_v6 = vpop.eup %1286 }
 0x148   : > { %v760_v7 = vmul.f32 %v1287_v6, %v759_v5 }
 0x14a   : > { %761 = vst [vmem:[%s353_s18] sm:$0x1] %v760_v7  ;;  %v763_v9 = vmul.f32 %v760_v7, %v682_v57 }
 0x14c   : > { %v764_v10 = vsub.f32 %v762_v8, %v763_v9 }
 0x14e   : > { %v857_v2 = vpop.f32.mrf.mxu0  ;;  %765 = vst [vmem:[%s356_s23] sm:$0x1] %v764_v10 }
 0x14f   : > { %v858_v3 = vadd.f32 %v857_v2, %v790_v1 }
 0x150   : > { %v1270_v4 = vpop.f32.mrf.mxu0 }
 0x151   : > { %861 = vst [vmem:[%s359_s13] sm:$0x1] %v858_v3 }
 0x152 PF: > { %s20_s30 = sadd.s32 1, %s1294_s30  }
 0x153   : > { %p17_p4 = scmp.ge.s32.totalorder %s20_s30, 4  }
 0x155   :  { %19 = sbr.rel (!%p17_p4) target bundleno = 1 (0x1), region = 105 }

// kernel: _lambda_.5
= control target key start
LH: loop header
LB: loop body
LE: loop exit
PB: predicated region body
PF: predicated region fallthrough
CT: control target
= control target key end

     0   :  { %s5270_s21 = smov 0   ;;  %s5272_s22 = smov 0   ;;  %s7023_s0 = inlined_call_operand.vmem [shape: bf16[2,18,18,128], index: 0, kind: input, shape index: {}]   ;;  %s7024_s1 = inlined_call_operand.vmem [shape: f32[2,1,128], index: 1, kind: input, shape index: {}]   ;;  %s7025_s2 = inlined_call_operand.vmem [shape: f32[2,1,128], index: 2, kind: input, shape index: {}]   ;;  %s7026_s3 = inlined_call_operand.vmem [shape: f32[2,1,128], index: 3, kind: input, shape index: {}]   ;;  %s7027_s4 = inlined_call_operand.vmem [shape: bf16[3,384,128], index: 4, kind: input, shape index: {}]   ;;  %s7028_s5 = inlined_call_operand.vmem [shape: bf16[2,16,16,128], index: 5, kind: output, shape index: {0}]   ;;  %s7029_s6 = inlined_call_operand.vmem [shape: f32[2,1,2,128], index: 6, kind: output, shape index: {1}]  }
   0x1   :  { %s5274_s23 = smov 0  }
   0x2 LB: > { %s29_s24 = sadd.s32 1, %s5226_s22  ;;  %p3776_p0 = scmp.ge.s32.totalorder %s5230_s23, 1  ;;  %s5230_s23 = sphi %s5274_s23, %s17_s23   ;;  %s5226_s22 = sphi %s5272_s22, %s7119_s22   ;;  %s5222_s21 = sphi %s5270_s21, %s7118_s21  }
   0x3   : > { %p31_p1 = scmp.ge.s32.totalorder %s29_s24, 2  ;;  %p255_p2 = scmp.lt.s32.totalorder %s5230_s23, 3 }
   0x5   : > { %s7121_s24 = smov (%p31_p1, %s29_s24), 0  ;;  %p256_p3 = pnand %p3776_p0, %p255_p2 }
   0x7   : > { %259 = sbr.rel (%p256_p3) target bundleno = 623 (0x26f), region = 40 }
   0xc   : > { %v4942_v0 = vld [vmem:[%s7027_s4 + $0x138] sm:$0xff]   ;;  %p306_p4 = scmp.lt.s32.totalorder %s5222_s21, 1  ;;  %v4944_v2 = vld [vmem:[%s7027_s4 + $0x130] sm:$0xff]   ;;  %v4946_v4 = vld [vmem:[%s7027_s4 + $0x128] sm:$0xff]   ;;  %v969_v14 = vlaneseq  ;;  %vm1387_vm2 = vsmask.f32 7424 }
   0xd   : > { %v4943_v1 = vld [vmem:[%s7027_s4 + $0xf8] sm:$0xff]   ;;  %4898 = vmatprep.subr.bf16.mxu1 %v4942_v0  ;;  %4346 = vmatprep.subr.bf16.mxu0 %v4942_v0  ;;  %v4945_v3 = vld [vmem:[%s7027_s4 + $0xf0] sm:$0xff]   ;;  %v4947_v5 = vld [vmem:[%s7027_s4 + $0xe8] sm:$0xff]   ;;  %vm5232_vm3 = vmmov 1   ;;  %vm1628_vm5 = vcmask 1046528   ;;  %vm3612_vm6 = vcmask 1040384  }
   0xe   : > { %4906 = vmatpush3.bf16.msra.mxu1 %v4943_v1  ;;  %4347 = vmatpush3.bf16.msra.mxu0 %v4943_v1  ;;  %s7123_s21 = smov (!%p306_p4, %s5222_s21), 1  ;;  %v4948_v6 = vld [vmem:[%s7027_s4 + $0x120] sm:$0xff]   ;;  %v4950_v8 = vld [vmem:[%s7027_s4 + $0x118] sm:$0xff]   ;;  %v4952_v10 = vld [vmem:[%s7027_s4 + $0x110] sm:$0xff]   ;;  %v5360_v29 = vshrl.u32 %v969_v14, 7 }
   0xf   : > { %4899 = vmatprep.subr.bf16.mxu1 %v4944_v2  ;;  %4348 = vmatprep.subr.bf16.mxu0 %v4944_v2  ;;  %s4914_s15 = smul.u32 216, %s7123_s21  ;;  %v4949_v7 = vld [vmem:[%s7027_s4 + $0xe0] sm:$0xff]   ;;  %s5327_s29 = scalar_lea.vmem %s7024_s1, %s7123_s21  ;;  %v4951_v9 = vld [vmem:[%s7027_s4 + $0xd8] sm:$0xff]   ;;  %v4953_v23 = vld [vmem:[%s7027_s4 + $0xd0] sm:$0xff]  }
  0x10   : > { %s5336_s10 = scalar_lea.vmem %s7025_s2, %s7123_s21  ;;  %v5344_v13 = vld [vmem:[%s5327_s29] ss:$0 sm:$0xff]  ;;  %v4954_v28 = vld [vmem:[%s7027_s4 + $0x108] sm:$0xff]   ;;  %v5411_v61 = vld [vmem:[%s7027_s4 + $0x178] sm:$0xff]   ;;  %vm1027_vm0 = vcmp.ge.s32.totalorder %v5360_v29, 1  ;;  %s319_s27 = scalar_lea.vmem %s7026_s3, %s7123_s21 }
  0x11   : > { %s5321_s26 = scalar_lea.vmem %s7023_s0, %s4914_s15  ;;  %v5347_v18 = vld [vmem:[%s5336_s10] ss:$0 sm:$0xff]  ;;  %v4955_v32 = vld [vmem:[%s7027_s4 + $0xc8] sm:$0xff]   ;;  %v5421_v2 = vld [vmem:[%s7027_s4 + $0xb8] sm:$0xff]   ;;  %s3780_s8 = sshll.u32 %s7123_s21, 1 }
  0x12   : > { %4907 = vmatpush3.bf16.msra.mxu1 %v4945_v3  ;;  %4349 = vmatpush3.bf16.msra.mxu0 %v4945_v3  ;;  %v346_v11 = vld [vmem:[%s5321_s26 + $0xc] sm:$0xff]   ;;  %v348_v12 = vld [vmem:[%s5321_s26 + $0x14] sm:$0x1]  ;;  %v382_v19 = vld [vmem:[%s5321_s26 + $0x9c] sm:$0xff]   ;;  %s337_s12 = scalar_lea.vmem %s7029_s6, %s3780_s8 }
  0x13   : > { %4900 = vmatprep.subr.bf16.mxu1 %v4946_v4  ;;  %4350 = vmatprep.subr.bf16.mxu0 %v4946_v4  ;;  %v400_v15 = vunpack.c.l.bf16 %v346_v11  ;;  %v401_v16 = vunpack.c.h.bf16 %v346_v11  ;;  %v402_v17 = vunpack.c.l.bf16 %v348_v12  ;;  %v384_v20 = vld [vmem:[%s5321_s26 + $0xa4] sm:$0x1]  ;;  %v436_v21 = vunpack.c.l.bf16 %v382_v19  ;;  %v4323_v37 = vld [vmem:[%s5321_s26 + $0x18] sm:$0xff]   ;;  %v351_v38 = vld [vmem:[%s5321_s26 + $0x20] sm:$0x1] }
  0x14   : > { %v437_v22 = vunpack.c.h.bf16 %v382_v19  ;;  %v438_v27 = vunpack.c.l.bf16 %v384_v20  ;;  %v4956_v39 = vld [vmem:[%s7027_s4 + $0x100] sm:$0xff]   ;;  %v4213_v42 = vunpack.c.l.bf16 %v4323_v37  ;;  %v4214_v43 = vunpack.c.h.bf16 %v4323_v37  ;;  %v4329_v44 = vld [vmem:[%s5321_s26 + $0xa8] sm:$0xff]   ;;  %v387_v45 = vld [vmem:[%s5321_s26 + $0xb0] sm:$0x1] }
  0x15   : > { %v461_v24 = vmul.f32 %v5344_v13, %v400_v15  ;;  %v462_v25 = vmul.f32 %v5344_v13, %v401_v16  ;;  %v463_v26 = vmul.f32 %v5344_v13, %v402_v17  ;;  %v497_v30 = vmul.f32 %v5344_v13, %v436_v21  ;;  %v4957_v60 = vld [vmem:[%s7027_s4 + $0xc0] sm:$0xff]   ;;  %vm5600_vm4 = vmpackc.low %vm5232_vm3, %vm1027_vm0 }
  0x16   : > { %4908 = vmatpush3.bf16.msra.mxu1 %v4947_v5  ;;  %4351 = vmatpush3.bf16.msra.mxu0 %v4947_v5  ;;  %v498_v31 = vmul.f32 %v5344_v13, %v437_v22  ;;  %v499_v36 = vmul.f32 %v5344_v13, %v438_v27  ;;  %v405_v52 = vunpack.c.l.bf16 %v351_v38  ;;  %v464_v53 = vmul.f32 %v4213_v42, %v5344_v13  ;;  %v352_v1 = vld [vmem:[%s5321_s26 + $0x24] sm:$0xff]   ;;  %v390_v22 = vld [vmem:[%s5321_s26 + $0xbc] sm:$0x1]  ;;  %v357_v42 = vld [vmem:[%s5321_s26 + $0x38] sm:$0x1] }
  0x17   : > { %4901 = vmatprep.subr.bf16.mxu1 %v4948_v6  ;;  %4352 = vmatprep.subr.bf16.mxu0 %v4948_v6  ;;  %v5368_v33 = vadd.f32 %v5347_v18, %v461_v24  ;;  %v5371_v34 = vadd.f32 %v5347_v18, %v462_v25  ;;  %v5374_v35 = vadd.f32 %v5347_v18, %v463_v26  ;;  %v4237_v56 = vunpack.c.l.bf16 %v4329_v44  ;;  %v354_v6 = vld [vmem:[%s5321_s26 + $0x2c] sm:$0x1] }
  0x18   : > { %v5383_v40 = vadd.f32 %v5347_v18, %v497_v30  ;;  %v5386_v41 = vadd.f32 %v5347_v18, %v498_v31  ;;  %v5394_v49 = vadd.f32 %v5347_v18, %v499_v36  ;;  %v465_v55 = vmul.f32 %v4214_v43, %v5344_v13  ;;  %v4324_v30 = vld [vmem:[%s5321_s26 + $0x30] sm:$0xff]  }
  0x19   : > { %v3786_v46 = vmul.f32 -1.442695, %v5368_v33  ;;  %v3787_v47 = vmul.f32 -1.442695, %v5371_v34  ;;  %v3788_v48 = vmul.f32 -1.442695, %v5374_v35  ;;  %v466_v57 = vmul.f32 %v5344_v13, %v405_v52 }
  0x1a   : > { %4909 = vmatpush3.bf16.msra.mxu1 %v4949_v7  ;;  %4353 = vmatpush3.bf16.msra.mxu0 %v4949_v7  ;;  %v3822_v50 = vmul.f32 -1.442695, %v5383_v40  ;;  %v3823_v51 = vmul.f32 -1.442695, %v5386_v41  ;;  %v3824_v54 = vmul.f32 -1.442695, %v5394_v49  ;;  %v5403_v58 = vadd.f32 %v5347_v18, %v464_v53 }
  0x1b   : > { %4902 = vmatprep.subr.bf16.mxu1 %v4950_v8  ;;  %4354 = vmatprep.subr.bf16.mxu0 %v4950_v8  ;;  %5014 = vpow2.f32 %v3786_v46  ;;  %v4238_v59 = vunpack.c.h.bf16 %v4329_v44  ;;  %v5414_v62 = vadd.f32 %v5347_v18, %v465_v55  ;;  %v441_v63 = vunpack.c.l.bf16 %v387_v45  ;;  %v388_v7 = vld [vmem:[%s5321_s26 + $0xb4] sm:$0xff]  }
  0x1c   : > { %5016 = vpow2.f32 %v3787_v47  ;;  %v500_v0 = vmul.f32 %v4237_v56, %v5344_v13  ;;  %v5424_v3 = vadd.f32 %v5347_v18, %v466_v57  ;;  %v3789_v4 = vmul.f32 -1.442695, %v5403_v58 }
  0x1d   : > { %5018 = vpow2.f32 %v3788_v48  ;;  %v501_v5 = vmul.f32 %v4238_v59, %v5344_v13  ;;  %v3790_v8 = vmul.f32 -1.442695, %v5414_v62  ;;  %v406_v14 = vunpack.c.l.bf16 %v352_v1 }
  0x1e   : > { %4910 = vmatpush3.bf16.msra.mxu1 %v4951_v9  ;;  %4355 = vmatpush3.bf16.msra.mxu0 %v4951_v9  ;;  %5020 = vpow2.f32 %v3822_v50  ;;  %v502_v9 = vmul.f32 %v5344_v13, %v441_v63  ;;  %v3791_v11 = vmul.f32 -1.442695, %v5424_v3  ;;  %v407_v17 = vunpack.c.h.bf16 %v352_v1  ;;  %v4330_v63 = vld [vmem:[%s5321_s26 + $0xc0] sm:$0xff]  }
  0x1f   : > { %4903 = vmatprep.subr.bf16.mxu1 %v4952_v10  ;;  %4356 = vmatprep.subr.bf16.mxu0 %v4952_v10  ;;  %5022 = vpow2.f32 %v3823_v51  ;;  %v5433_v10 = vadd.f32 %v5347_v18, %v500_v0  ;;  %v5437_v12 = vadd.f32 %v5347_v18, %v501_v5  ;;  %v408_v20 = vunpack.c.l.bf16 %v354_v6 }
  0x20   : > { %5024 = vpow2.f32 %v3824_v54  ;;  %v5440_v15 = vadd.f32 %v5347_v18, %v502_v9  ;;  %v467_v21 = vmul.f32 %v5344_v13, %v406_v14  ;;  %v468_v24 = vmul.f32 %v5344_v13, %v407_v17 }
  0x21   : > { %5026 = vpow2.f32 %v3789_v4  ;;  %v3825_v16 = vmul.f32 -1.442695, %v5433_v10  ;;  %v3826_v19 = vmul.f32 -1.442695, %v5437_v12  ;;  %v442_v25 = vunpack.c.l.bf16 %v388_v7 }
  0x22   : > { %4911 = vmatpush3.bf16.msra.mxu1 %v4953_v23  ;;  %4357 = vmatpush3.bf16.msra.mxu0 %v4953_v23  ;;  %5028 = vpow2.f32 %v3790_v8  ;;  %v3827_v23 = vmul.f32 -1.442695, %v5440_v15  ;;  %v469_v26 = vmul.f32 %v5344_v13, %v408_v20  ;;  %v5452_v27 = vadd.f32 %v5347_v18, %v467_v21 }
  0x23   : > { %4904 = vmatprep.subr.bf16.mxu1 %v4954_v28  ;;  %4358 = vmatprep.subr.bf16.mxu0 %v4954_v28  ;;  %5030 = vpow2.f32 %v3791_v11  ;;  %v443_v28 = vunpack.c.h.bf16 %v388_v7  ;;  %v5456_v31 = vadd.f32 %v5347_v18, %v468_v24  ;;  %v503_v36 = vmul.f32 %v5344_v13, %v442_v25  ;;  %v393_v11 = vld [vmem:[%s5321_s26 + $0xc8] sm:$0x1] }
  0x24   : > { %5032 = vpow2.f32 %v3825_v16  ;;  %v5460_v37 = vadd.f32 %v5347_v18, %v469_v26  ;;  %v3792_v38 = vmul.f32 -1.442695, %v5452_v27  ;;  %v4217_v46 = vunpack.c.l.bf16 %v4324_v30 }
  0x25   : > { %5034 = vpow2.f32 %v3826_v19  ;;  %v3793_v43 = vmul.f32 -1.442695, %v5456_v31  ;;  %v5468_v45 = vadd.f32 %v5347_v18, %v503_v36  ;;  %v4218_v51 = vunpack.c.h.bf16 %v4324_v30  ;;  %v358_v30 = vld [vmem:[%s5321_s26 + $0x3c] sm:$0xff]  }
  0x26   : > { %4912 = vmatpush3.bf16.msra.mxu1 %v4955_v32  ;;  %4359 = vmatpush3.bf16.msra.mxu0 %v4955_v32  ;;  %v444_v32 = vunpack.c.l.bf16 %v390_v22  ;;  %5036 = vpow2.f32 %v3827_v23  ;;  %v3794_v48 = vmul.f32 -1.442695, %v5460_v37  ;;  %v5475_v54 = vadd.s32 16, %v5360_v29 }
  0x27   : > { %4905 = vmatprep.subr.bf16.mxu1 %v4956_v39  ;;  %4360 = vmatprep.subr.bf16.mxu0 %v4956_v39  ;;  %v504_v39 = vmul.f32 %v5344_v13, %v443_v28  ;;  %5038 = vpow2.f32 %v3792_v38  ;;  %v5481_v59 = vmul.f32 -1.442695, %v5468_v45  ;;  %v470_v5 = vmul.f32 %v4217_v46, %v5344_v13 }
  0x28   : > { %v505_v44 = vmul.f32 %v5344_v13, %v444_v32  ;;  %v5015_v47 = vpop.eup %5014  ;;  %5040 = vpow2.f32 %v3793_v43  ;;  %v471_v8 = vmul.f32 %v4218_v51, %v5344_v13  ;;  %v4241_v19 = vunpack.c.l.bf16 %v4330_v63 }
  0x29   : > { %v5472_v50 = vadd.f32 %v5347_v18, %v504_v39  ;;  %v5017_v52 = vpop.eup %5016  ;;  %v738_v53 = vadd.f32 1.0, %v5015_v47  ;;  %5042 = vpow2.f32 %v3794_v48  ;;  %v5492_v17 = vadd.f32 %v5347_v18, %v470_v5 }
  0x2a   : > { %4913 = vmatpush3.bf16.msra.mxu1 %v4957_v60  ;;  %4361 = vmatpush3.bf16.msra.mxu0 %v4957_v60  ;;  %v5478_v55 = vadd.f32 %v5347_v18, %v505_v44  ;;  %v5019_v56 = vpop.eup %5018  ;;  %v739_v57 = vadd.f32 1.0, %v5017_v52  ;;  %v411_v60 = vunpack.c.l.bf16 %v357_v42  ;;  %v5498_v23 = vadd.f32 %v5347_v18, %v471_v8  ;;  %v360_v42 = vld [vmem:[%s5321_s26 + $0x44] sm:$0x1] }
  0x2b   : > { %4754 = vmatprep.subr.bf16.mxu1 %v5411_v61  ;;  %4802 = vmatprep.subr.bf16.mxu0 %v5421_v2  ;;  %v5021_v0 = vpop.eup %5020  ;;  %v740_v1 = vadd.f32 1.0, %v5019_v56  ;;  %5044 = vrcp.f32 %v738_v53  ;;  %v5485_v4 = vmul.f32 -1.442695, %v5472_v50  ;;  %v4242_v28 = vunpack.c.h.bf16 %v4330_v63 }
  0x2c   : > { %v5023_v6 = vpop.eup %5022  ;;  %5046 = vrcp.f32 %v739_v57  ;;  %v774_v7 = vadd.f32 1.0, %v5021_v0  ;;  %v472_v9 = vmul.f32 %v5344_v13, %v411_v60  ;;  %v5495_v22 = vmul.f32 -1.442695, %v5478_v55 }
  0x2d   : > { %v5025_v14 = vpop.eup %5024  ;;  %5048 = vrcp.f32 %v740_v1  ;;  %v775_v16 = vadd.f32 1.0, %v5023_v6  ;;  %v5506_v38 = vmul.f32 -1.442695, %v5492_v17  ;;  %v5509_v39 = vmul.f32 -1.442695, %v5498_v23 }
  0x2e   : > { %v5027_v20 = vpop.eup %5026  ;;  %v776_v21 = vadd.f32 1.0, %v5025_v14  ;;  %5050 = vrcp.f32 %v774_v7  ;;  %v5501_v26 = vadd.f32 %v5347_v18, %v472_v9  ;;  %v447_v46 = vunpack.c.l.bf16 %v393_v11 }
  0x2f   : > { %v5029_v24 = vpop.eup %5028  ;;  %5052 = vrcp.f32 %v775_v16  ;;  %v741_v25 = vadd.f32 1.0, %v5027_v20  ;;  %v506_v47 = vmul.f32 %v4241_v19, %v5344_v13  ;;  %v507_v52 = vmul.f32 %v4242_v28, %v5344_v13 }
  0x30   : > { %v5031_v32 = vpop.eup %5030  ;;  %5054 = vrcp.f32 %v776_v21  ;;  %v742_v36 = vadd.f32 1.0, %v5029_v24  ;;  %v412_v53 = vunpack.c.l.bf16 %v358_v30  ;;  %v508_v60 = vmul.f32 %v5344_v13, %v447_v46 }
  0x31   : > { %v5033_v43 = vpop.eup %5032  ;;  %v743_v44 = vadd.f32 1.0, %v5031_v32  ;;  %5056 = vrcp.f32 %v741_v25  ;;  %v5516_v63 = vadd.f32 %v5347_v18, %v506_v47  ;;  %vm1128_vm1 = vcmp.le.s32.totalorder %v5475_v54, 16  ;;  %v5535_v25 = vld [vmem:[%s5321_s26 + $0x48] sm:$0xff]  }
  0x32   : > { %v5035_v48 = vpop.eup %5034  ;;  %5058 = vrcp.f32 %v742_v36  ;;  %v777_v51 = vadd.f32 1.0, %v5033_v43  ;;  %v413_v1 = vunpack.c.h.bf16 %v358_v30  ;;  %v5520_v6 = vmul.f32 -1.442695, %v5501_v26 }
  0x33   : > { %v5037_v56 = vpop.eup %5036  ;;  %5060 = vrcp.f32 %v743_v44  ;;  %v778_v57 = vadd.f32 1.0, %v5035_v48  ;;  %v5523_v7 = vadd.f32 %v5347_v18, %v507_v52  ;;  %v414_v8 = vunpack.c.l.bf16 %v360_v42 }
  0x34   : > { %v779_v0 = vadd.f32 1.0, %v5037_v56  ;;  %5062 = vrcp.f32 %v777_v51  ;;  %v5039_v5 = vpop.eup %5038  ;;  %v5526_v14 = vadd.f32 %v5347_v18, %v508_v60  ;;  %v473_v16 = vmul.f32 %v5344_v13, %v412_v53 }
  0x35   : > { %5064 = vrcp.f32 %v778_v57  ;;  %v5041_v9 = vpop.eup %5040  ;;  %v744_v11 = vadd.f32 1.0, %v5039_v5  ;;  %v5531_v21 = vmul.f32 -1.442695, %v5516_v63  ;;  %v474_v24 = vmul.f32 %v5344_v13, %v413_v1 }
  0x36   : > { %5066 = vrcp.f32 %v779_v0  ;;  %v5043_v19 = vpop.eup %5042  ;;  %v745_v20 = vadd.f32 1.0, %v5041_v9  ;;  %v475_v32 = vmul.f32 %v5344_v13, %v414_v8  ;;  %v5539_v36 = vadd.f32 %v5347_v18, %v473_v16 }
  0x37   : > { %5068 = vpow2.f32 %v5481_v59  ;;  %v746_v30 = vadd.f32 1.0, %v5043_v19  ;;  %v5543_v59 = vmul.f32 -1.442695, %v5523_v7  ;;  %v5546_v44 = vadd.f32 %v5347_v18, %v474_v24 }
  0x38   : > { %v5045_v28 = vpop.eup %5044  ;;  %5070 = vrcp.f32 %v744_v11  ;;  %v5550_v48 = vmul.f32 -1.442695, %v5526_v14  ;;  %v5558_v56 = vadd.f32 %v5347_v18, %v475_v32  ;;  %v5565_v0 = vmul.f32 -1.442695, %v5539_v36 }
  0x39   : > { %v5047_v42 = vpop.eup %5046  ;;  %v900_v43 = vmul.f32 %v5045_v28, %v5368_v33  ;;  %5072 = vrcp.f32 %v745_v20 }
  0x3a   : > { %v5049_v46 = vpop.eup %5048  ;;  %v901_v47 = vmul.f32 %v5047_v42, %v5371_v34  ;;  %5074 = vrcp.f32 %v746_v30 }
  0x3b   : > { %v5051_v52 = vpop.eup %5050  ;;  %v902_v33 = vmul.f32 %v5049_v46, %v5374_v35  ;;  %v1300_v53 = vsel %vm1027_vm0, %v900_v43, 0.0  ;;  %5076 = vpow2.f32 %v5485_v4  ;;  %v5572_v4 = vmul.f32 -1.442695, %v5546_v44 }
  0x3c   : > { %v5053_v57 = vpop.eup %5052  ;;  %v5560_v60 = vpack.c.bf16 %v901_v47, %v1300_v53  ;;  %v936_v34 = vmul.f32 %v5051_v52, %v5383_v40  ;;  %5078 = vpow2.f32 %v5495_v22  ;;  %v5581_v20 = vpack.c.bf16 %v901_v47, %v900_v43 }
  0x3d   : > { %v5055_v1 = vpop.eup %5054  ;;  %v1302_v35 = vsel %vm1128_vm1, %v902_v33, 0.0  ;;  %v937_v5 = vmul.f32 %v5053_v57, %v5386_v41  ;;  %5080 = vpow2.f32 %v5506_v38 }
  0x3e   : > { %v5057_v8 = vpop.eup %5056  ;;  %v5574_v9 = vpack.c.bf16 %v1302_v35, %v1302_v35  ;;  %v1401_v40 = vshrl.u32 %v5560_v60, 16  ;;  %v1403_v22 = vshll.u32 %v5560_v60, 16  ;;  %v938_v11 = vmul.f32 %v5055_v1, %v5394_v49 }
  0x3f   : > { %v5059_v16 = vpop.eup %5058  ;;  %v1336_v19 = vsel %vm1027_vm0, %v936_v34, 0.0  ;;  %v903_v41 = vmul.f32 %v5057_v8, %v5403_v58  ;;  %5082 = vpow2.f32 %v5509_v39 }
  0x40   : > { %v5061_v38 = vpop.eup %5060  ;;  %v1405_v24 = vrot.slane %v1403_v22, 1  ;;  %v1408_v28 = vshll.u32 %v5574_v9, 16  ;;  %v1338_v30 = vsel %vm1128_vm1, %v938_v11, 0.0  ;;  %v5588_v32 = vpack.c.bf16 %v937_v5, %v1336_v19 }
  0x41   : > { %v5063_v49 = vpop.eup %5062  ;;  %v5590_v42 = vpack.c.bf16 %v1338_v30, %v1338_v30  ;;  %v904_v46 = vmul.f32 %v5059_v16, %v5414_v62  ;;  %v905_v43 = vmul.f32 %v5061_v38, %v5424_v3  ;;  %v1303_v58 = vsel %vm1027_vm0, %v903_v41, 0.0  ;;  %v4963_v38 = vld [vmem:[%s7027_s4 + $0xb0] sm:$0xff]  }
  0x42   : > { %v5065_v39 = vpop.eup %5064  ;;  %v1406_v47 = vor.u32 %v1405_v24, %v1401_v40  ;;  %v1410_v52 = vrot.slane %v1408_v28, 1  ;;  %v1545_v33 = vshrl.u32 %v5588_v32, 16  ;;  %v1547_v53 = vshll.u32 %v5588_v32, 16 }
  0x43   : > { %v5067_v57 = vpop.eup %5066  ;;  %v1552_v62 = vshll.u32 %v5590_v42, 16  ;;  %v1305_v3 = vsel %vm1128_vm1, %v905_v43, 0.0  ;;  %v5607_v35 = vpack.c.bf16 %v904_v46, %v1303_v58  ;;  %v5610_v8 = vmul.f32 %v5063_v49, %v5433_v10 }
  0x44   : > { %v5069_v40 = vpop.eup %5068  ;;  %v5613_v22 = vsel %vm1387_vm2, %v1406_v47, %v1410_v52  ;;  %v1549_v11 = vrot.slane %v1547_v53, 1  ;;  %v5615_v16 = vpack.c.bf16 %v1305_v3, %v1305_v3  ;;  %v940_v19 = vmul.f32 %v5065_v39, %v5437_v12  ;;  %v4960_v39 = vld [vmem:[%s7027_s4 + $0x170] sm:$0xff]  }
  0x45   : > { %v5071_v24 = vpop.eup %5070  ;;  %1985 = vmatprep.mubr.bf16.mxu0 %v5613_v22  ;;  %v1554_v28 = vrot.slane %v1552_v62, 1  ;;  %v1413_v10 = vshrl.u32 %v5607_v35, 16  ;;  %v1415_v30 = vshll.u32 %v5607_v35, 16  ;;  %v941_v49 = vmul.f32 %v5067_v57, %v5440_v15 }
  0x46   : > { %v5073_v43 = vpop.eup %5072  ;;  %v1550_v58 = vor.u32 %v1549_v11, %v1545_v33  ;;  %3911 = vmatmul.mubr.msk.bf16.vlgmr.msra.gmra.mxu0 %vm5600_vm4, %v5581_v20  ;;  %v5628_v12 = vpack.c.bf16 %v937_v5, %v936_v34  ;;  %v1420_v47 = vshll.u32 %v5615_v16, 16  ;;  %v1339_v52 = vsel %vm1027_vm0, %v5610_v8, 0.0 }
  0x47   : > { %v5075_v53 = vpop.eup %5074  ;;  %4803 = vmatpush3.bf16.msra.mxu0 %v5421_v2  ;;  %v1417_v15 = vrot.slane %v1415_v30, 1  ;;  %v1341_v33 = vsel %vm1128_vm1, %v941_v49, 0.0  ;;  %v5640_v57 = vpack.c.bf16 %v940_v19, %v1339_v52  ;;  %v5642_v34 = vpack.c.bf16 %v904_v46, %v903_v41  ;;  %v4967_v2 = vld [vmem:[%s7027_s4 + $0xa8] sm:$0xff]  }
  0x48   : > { %7053 = vst [vmem:[#allocation2_spill] sm:$0xff] %v5628_v12  ;;  %v5077_v5 = vpop.eup %5076  ;;  %v5645_v62 = vsel %vm1387_vm2, %v1550_v58, %v1554_v28  ;;  %v1422_v3 = vrot.slane %v1420_v47, 1  ;;  %v5647_v11 = vpack.c.bf16 %v1341_v33, %v1341_v33  ;;  %4804 = vmatprep.subr.bf16.mxu0 %v4963_v38  ;;  %v906_v51 = vmul.f32 %v5071_v24, %v5452_v27 }
  0x49   : > { %7054 = vst [vmem:[#allocation3_spill] sm:$0xff] %v5645_v62  ;;  %v5079_v30 = vpop.eup %5078  ;;  %2081 = vmatprep.mubr.bf16.mxu1 %v5645_v62  ;;  %v1418_v49 = vor.u32 %v1417_v15, %v1413_v10  ;;  %v1557_v41 = vshrl.u32 %v5640_v57, 16  ;;  %v1559_v46 = vshll.u32 %v5640_v57, 16  ;;  %v907_v28 = vmul.f32 %v5073_v43, %v5456_v31  ;;  %v4961_v31 = vld [vmem:[%s7027_s4 + $0x168] sm:$0xff]  }
  0x4a   : > { %v5081_v58 = vpop.eup %5080  ;;  %3947 = vmatmul.mubr.msk.bf16.vlgmr.msra.gmra.mxu1 %vm5600_vm4, %v5628_v12  ;;  %v1564_v27 = vshll.u32 %v5647_v11, 16  ;;  %v908_v24 = vmul.f32 %v5075_v53, %v5460_v37  ;;  %v1306_v47 = vsel %vm1027_vm0, %v906_v51, 0.0  ;;  %v780_v52 = vadd.f32 1.0, %v5069_v40 }
  0x4b   : > { %4755 = vmatpush3.bf16.msra.mxu1 %v5411_v61  ;;  %v5666_v10 = vsel %vm1387_vm2, %v1418_v49, %v1422_v3  ;;  %v1561_v15 = vrot.slane %v1559_v46, 1  ;;  %4805 = vmatpush3.bf16.msra.mxu0 %v4963_v38  ;;  %v5671_v43 = vpack.c.bf16 %v907_v28, %v1306_v47  ;;  %v781_v33 = vadd.f32 1.0, %v5077_v5  ;;  %v4971_v3 = vld [vmem:[%s7027_s4 + $0xa0] sm:$0xff]   ;;  %v363_v47 = vld [vmem:[%s5321_s26 + $0x50] sm:$0x1] }
  0x4c   : > { %v5083_v37 = vpop.eup %5082  ;;  %4756 = vmatprep.subr.bf16.mxu1 %v4960_v39  ;;  %1993 = vmatprep.mubr.bf16.mxu0 %v5666_v10  ;;  %v1566_v40 = vrot.slane %v1564_v27, 1  ;;  %v1308_v61 = vsel %vm1128_vm1, %v908_v24, 0.0  ;;  %v782_v53 = vadd.f32 1.0, %v5079_v30  ;;  %5084 = vrcp.f32 %v780_v52  ;;  %v4962_v27 = vld [vmem:[%s7027_s4 + $0x160] sm:$0xff]  }
  0x4d   : > { %v1562_v49 = vor.u32 %v1561_v15, %v1557_v41  ;;  %v5679_v38 = vpack.c.bf16 %v1308_v61, %v1308_v61  ;;  %v1425_v46 = vshrl.u32 %v5671_v43, 16  ;;  %v1427_v5 = vshll.u32 %v5671_v43, 16  ;;  %4806 = vmatprep.subr.bf16.mxu0 %v4967_v2 }
  0x4e   : > { %3914 = vmatmul.mubr.msk.bf16.gmra.mxu0 %vm5600_vm4, %v5642_v34  ;;  %v5688_v30 = vpack.c.bf16 %v940_v19, %v5610_v8  ;;  %5086 = vrcp.f32 %v781_v33  ;;  %v747_v41 = vadd.f32 1.0, %v5081_v58  ;;  %v748_v24 = vadd.f32 1.0, %v5083_v37  ;;  %v364_v58 = vld [vmem:[%s5321_s26 + $0x54] sm:$0xff]  }
  0x4f   : > { %4757 = vmatpush3.bf16.msra.mxu1 %v4960_v39  ;;  %v5694_v52 = vsel %vm1387_vm2, %v1562_v49, %v1566_v40  ;;  %v1429_v15 = vrot.slane %v1427_v5, 1  ;;  %v1432_v61 = vshll.u32 %v5679_v38, 16  ;;  %5088 = vrcp.f32 %v782_v53  ;;  %4807 = vmatpush3.bf16.msra.mxu0 %v4967_v2  ;;  %v4976_v39 = vld [vmem:[%s7027_s4 + $0x98] sm:$0xff]  }
  0x50   : > { %7055 = vst [vmem:[#allocation4_spill] sm:$0xff] %v5688_v30  ;;  %7056 = vst [vmem:[#allocation5_spill] sm:$0xff] %v5694_v52  ;;  %2089 = vmatprep.mubr.bf16.mxu1 %v5694_v52  ;;  %4758 = vmatprep.subr.bf16.mxu1 %v4961_v31  ;;  %5090 = vpow2.f32 %v5520_v6  ;;  %v3800_v8 = vmul.f32 -1.442695, %v5558_v56  ;;  %v1632_v19 = vrot.slane %v5560_v60, 1  ;;  %v1633_v40 = vrot.slane %v5574_v9, 1 }
  0x51   : > { %v1430_v33 = vor.u32 %v1429_v15, %v1425_v46  ;;  %v1434_v37 = vrot.slane %v1432_v61, 1  ;;  %5092 = vrcp.f32 %v747_v41  ;;  %4808 = vmatprep.subr.bf16.mxu0 %v4971_v3  ;;  %v4964_v6 = vld [vmem:[%s7027_s4 + $0x158] sm:$0xff]   ;;  %v5712_v60 = vpack.c.bf16 %v907_v28, %v906_v51  ;;  %v4984_v41 = vld [vmem:[%s7027_s4 + $0x88] sm:$0xff]  }
  0x52   : > { %3950 = vmatmul.mubr.msk.bf16.gmra.mxu1 %vm5600_vm4, %v5688_v30  ;;  %5094 = vrcp.f32 %v748_v24  ;;  %v4222_v2 = vunpack.c.h.bf16 %v5535_v25  ;;  %v417_v53 = vunpack.c.l.bf16 %v363_v47  ;;  %v7057_v9 = vunpack.c.l.bf16 %v5535_v25  ;;  %v366_v5 = vld [vmem:[%s5321_s26 + $0x5c] sm:$0x1] }
  0x53   : > { %4759 = vmatpush3.bf16.msra.mxu1 %v4961_v31  ;;  %v5716_v49 = vsel %vm1387_vm2, %v1430_v33, %v1434_v37  ;;  %5096 = vpow2.f32 %v5531_v21  ;;  %4809 = vmatpush3.bf16.msra.mxu0 %v4971_v3  ;;  %v1635_v51 = vrot.slane %v5607_v35, 1  ;;  %v4979_v21 = vld [vmem:[%s7027_s4 + $0x90] sm:$0xff]   ;;  %v1636_v25 = vrot.slane %v5615_v16, 1 }
  0x54   : > { %v476_v46 = vmul.f32 %v7057_v9, %v5344_v13  ;;  %4760 = vmatprep.subr.bf16.mxu1 %v4962_v27  ;;  %2001 = vmatprep.mubr.bf16.mxu0 %v5716_v49  ;;  %5098 = vpow2.f32 %v5543_v59  ;;  %v477_v28 = vmul.f32 %v4222_v2, %v5344_v13  ;;  %v478_v31 = vmul.f32 %v5344_v13, %v417_v53  ;;  %v4965_v59 = vld [vmem:[%s7027_s4 + $0x150] sm:$0xff]   ;;  %v4966_v2 = vld [vmem:[%s7027_s4 + $0x148] sm:$0xff]  }
  0x55   : > { %5100 = vpow2.f32 %v5550_v48  ;;  %v418_v47 = vunpack.c.l.bf16 %v364_v58  ;;  %4810 = vmatprep.subr.bf16.mxu0 %v4976_v39  ;;  %v419_v16 = vunpack.c.h.bf16 %v364_v58  ;;  %v420_v15 = vunpack.c.l.bf16 %v366_v5  ;;  %v5758_v58 = vld [vmem:[%s5321_s26 + $0x60] sm:$0xff]  }
  0x56   : > { %v5734_v3 = vadd.f32 %v5347_v18, %v476_v46  ;;  %3917 = vmatmul.mubr.msk.bf16.gmra.mxu0 %vm5600_vm4, %v5712_v60  ;;  %5102 = vpow2.f32 %v5565_v0  ;;  %v5744_v48 = vadd.f32 %v5347_v18, %v477_v28  ;;  %v5747_v35 = vadd.f32 %v5347_v18, %v478_v31  ;;  %v5786_v28 = vld [vmem:[%s5321_s26 + $0x68] sm:$0x1] }
  0x57   : > { %4761 = vmatpush3.bf16.msra.mxu1 %v4962_v27  ;;  %5104 = vpow2.f32 %v5572_v4  ;;  %4811 = vmatpush3.bf16.msra.mxu0 %v4976_v39  ;;  %v479_v33 = vmul.f32 %v5344_v13, %v418_v47  ;;  %v5761_v27 = vsel %vm1628_vm5, %v1632_v19, %v1633_v40  ;;  %v480_v4 = vmul.f32 %v5344_v13, %v419_v16  ;;  %v5825_v40 = vld [vmem:[%s5327_s29] ss:$0 sm:$0xff]  ;;  %s4178_s29 = sshll.u32 %s7123_s21, 7 }
  0x58   : > { %v3801_v24 = vmul.f32 -1.442695, %v5734_v3  ;;  %4762 = vmatprep.subr.bf16.mxu1 %v4964_v6  ;;  %5106 = vpow2.f32 %v3800_v8  ;;  %v3802_v0 = vmul.f32 -1.442695, %v5744_v48  ;;  %v3803_v61 = vmul.f32 -1.442695, %v5747_v35  ;;  %4812 = vmatprep.subr.bf16.mxu0 %v4979_v21  ;;  %s6863_s7 = scalar_lea.vmem %s7028_s5, %s4178_s29 }
  0x59   : > { %v5085_v37 = vpop.eup %5084  ;;  %v481_v8 = vmul.f32 %v5344_v13, %v420_v15  ;;  %v5770_v53 = vsel %vm1628_vm5, %v1635_v51, %v1636_v25  ;;  %v5773_v9 = vadd.f32 %v5347_v18, %v479_v33  ;;  %v5777_v13 = vadd.f32 %v5347_v18, %v480_v4  ;;  %v4987_v51 = vld [vmem:[%s7027_s4 + $0x80] sm:$0xff]  }
  0x5a   : > { %5108 = vpow2.f32 %v3801_v24  ;;  %v942_v39 = vmul.f32 %v5085_v37, %v5468_v45  ;;  %v5780_v45 = vld [vmem:[%s5336_s10] ss:$0 sm:$0xff]  ;;  %v4225_v15 = vunpack.c.l.bf16 %v5758_v58  ;;  %v4226_v37 = vunpack.c.h.bf16 %v5758_v58 }
  0x5b   : > { %5110 = vpow2.f32 %v3802_v0  ;;  %v5087_v19 = vpop.eup %5086  ;;  %4763 = vmatpush3.bf16.msra.mxu1 %v4964_v6  ;;  %v5783_v46 = vadd.f32 %v5780_v45, %v481_v8  ;;  %4813 = vmatpush3.bf16.msra.mxu0 %v4979_v21  ;;  %v3804_v25 = vmul.f32 -1.442695, %v5773_v9  ;;  %v3805_v21 = vmul.f32 -1.442695, %v5777_v13  ;;  %v4968_v33 = vld [vmem:[%s7027_s4 + $0x140] sm:$0xff]  }
  0x5c   : > { %5112 = vpow2.f32 %v3803_v61  ;;  %v5089_v31 = vpop.eup %5088  ;;  %v943_v6 = vmul.f32 %v5087_v19, %v5472_v50  ;;  %v1342_v5 = vsel %vm1027_vm0, %v942_v39, 0.0  ;;  %4764 = vmatprep.subr.bf16.mxu1 %v4965_v59  ;;  %4814 = vmatprep.subr.bf16.mxu0 %v4984_v41  ;;  %v423_v19 = vunpack.c.l.bf16 %v5786_v28 }
  0x5d   : > { %v5091_v47 = vpop.eup %5090  ;;  %v944_v16 = vmul.f32 %v5089_v31, %v5478_v55  ;;  %v3806_v24 = vmul.f32 -1.442695, %v5783_v46  ;;  %5114 = vpow2.f32 %v3804_v25  ;;  %v4991_v31 = vld [vmem:[%s7027_s4 + $0x1f8] sm:$0xff]  }
  0x5e   : > { %v5093_v0 = vpop.eup %5092  ;;  %v5800_v50 = vpack.c.bf16 %v943_v6, %v1342_v5  ;;  %v749_v61 = vadd.f32 1.0, %v5091_v47  ;;  %5116 = vpow2.f32 %v3805_v21  ;;  %v5828_v30 = vpack.c.bf16 %v943_v6, %v942_v39 }
  0x5f   : > { %v5095_v4 = vpop.eup %5094  ;;  %v1344_v55 = vsel %vm1128_vm1, %v944_v16, 0.0  ;;  %4765 = vmatpush3.bf16.msra.mxu1 %v4965_v59  ;;  %v5809_v8 = vmul.f32 %v5093_v0, %v5492_v17  ;;  %4815 = vmatpush3.bf16.msra.mxu0 %v4984_v41 }
  0x60   : > { %v5097_v5 = vpop.eup %5096  ;;  %v5815_v25 = vpack.c.bf16 %v1344_v55, %v1344_v55  ;;  %v1569_v58 = vshrl.u32 %v5800_v50, 16  ;;  %v1571_v47 = vshll.u32 %v5800_v50, 16  ;;  %5118 = vrcp.f32 %v749_v61  ;;  %4766 = vmatprep.subr.bf16.mxu1 %v4966_v2  ;;  %4816 = vmatprep.subr.bf16.mxu0 %v4987_v51  ;;  %7058 = vst [vmem:[#allocation6_spill] sm:$0xff] %v5828_v30 }
  0x61   : > { %v5099_v17 = vpop.eup %5098  ;;  %v910_v59 = vmul.f32 %v5095_v4, %v5498_v23  ;;  %v1309_v41 = vsel %vm1027_vm0, %v5809_v8, 0.0  ;;  %v783_v28 = vadd.f32 1.0, %v5097_v5  ;;  %5120 = vpow2.f32 %v3806_v24 }
  0x62   : > { %v5101_v16 = vpop.eup %5100  ;;  %v1573_v21 = vrot.slane %v1571_v47, 1  ;;  %v1576_v0 = vshll.u32 %v5815_v25, 16  ;;  %v784_v55 = vadd.f32 1.0, %v5099_v17  ;;  %v482_v61 = vmul.f32 %v5825_v40, %v4225_v15  ;;  %v4969_v17 = vld [vmem:[%s7027_s4 + $0x78] sm:$0xff]  }
  0x63   : > { %v5103_v18 = vpop.eup %5102  ;;  %v5830_v52 = vpack.c.bf16 %v910_v59, %v1309_v41  ;;  %v785_v23 = vadd.f32 1.0, %v5101_v16  ;;  %5122 = vrcp.f32 %v783_v28  ;;  %4767 = vmatpush3.bf16.msra.mxu1 %v4966_v2  ;;  %4817 = vmatpush3.bf16.msra.mxu0 %v4987_v51  ;;  %v483_v2 = vmul.f32 %v5825_v40, %v4226_v37 }
  0x64   : > { %v5105_v4 = vpop.eup %5104  ;;  %v1574_v24 = vor.u32 %v1573_v21, %v1569_v58  ;;  %v1578_v5 = vrot.slane %v1576_v0, 1  ;;  %5124 = vrcp.f32 %v784_v55  ;;  %4768 = vmatprep.subr.bf16.mxu1 %v4968_v33  ;;  %v750_v47 = vadd.f32 1.0, %v5103_v18  ;;  %4618 = vmatprep.subr.bf16.mxu0 %v4991_v31  ;;  %v370_v55 = vld [vmem:[%s5321_s26 + $0x6c] sm:$0xff]  }
  0x65   : > { %v5107_v15 = vpop.eup %5106  ;;  %v1439_v39 = vshll.u32 %v5830_v52, 16  ;;  %5126 = vrcp.f32 %v785_v23  ;;  %v751_v6 = vadd.f32 1.0, %v5105_v4  ;;  %v7060_v18 = vrot.slane %v5679_v38, 1  ;;  %v372_v4 = vld [vmem:[%s5321_s26 + $0x74] sm:$0x1] }
  0x66   : > { %v5838_v58 = vsel %vm1387_vm2, %v1574_v24, %v1578_v5  ;;  %v752_v41 = vadd.f32 1.0, %v5107_v15  ;;  %5128 = vrcp.f32 %v750_v47  ;;  %v7061_v28 = vrot.slane %v5671_v43, 1 }
  0x67   : > { %v5109_v51 = vpop.eup %5108  ;;  %7059 = vst [vmem:[#allocation7_spill] sm:$0xff] %v5838_v58  ;;  %2097 = vmatprep.mubr.bf16.mxu1 %v5838_v58  ;;  %4769 = vmatpush3.bf16.msra.mxu1 %v4968_v33  ;;  %5130 = vrcp.f32 %v751_v6  ;;  %v484_v21 = vmul.f32 %v5825_v40, %v423_v19  ;;  %v5850_v0 = vadd.f32 %v5780_v45, %v482_v61  ;;  %v1437_v43 = vshrl.u32 %v5830_v52, 16  ;;  %v5866_v6 = vld [vmem:[%s5321_s26 + $0x78] sm:$0xff]  }
  0x68   : > { %v5845_v31 = vsel %vm1628_vm5, %v7061_v28, %v7060_v18  ;;  %v5111_v16 = vpop.eup %5110  ;;  %v753_v37 = vadd.f32 1.0, %v5109_v51  ;;  %3953 = vmatmul.mubr.msk.bf16.gmra.mxu1 %vm5600_vm4, %v5828_v30  ;;  %v1441_v38 = vrot.slane %v1439_v39, 1  ;;  %5132 = vrcp.f32 %v752_v41  ;;  %4482 = vmatprep.subr.bf16.mxu1 %v4969_v17 }
  0x69   : > { %v5113_v23 = vpop.eup %5112  ;;  %v754_v33 = vadd.f32 1.0, %v5111_v16  ;;  %v5859_v24 = vpack.c.bf16 %v910_v59, %v5809_v8  ;;  %v5862_v61 = vadd.f32 %v5780_v45, %v483_v2  ;;  %v424_v47 = vunpack.c.l.bf16 %v370_v55 }
  0x6a   : > { %v755_v19 = vadd.f32 1.0, %v5113_v23  ;;  %5134 = vrcp.f32 %v753_v37  ;;  %v425_v15 = vunpack.c.h.bf16 %v370_v55  ;;  %v5115_v39 = vpop.eup %5114  ;;  %v5869_v17 = vadd.f32 %v5780_v45, %v484_v21 }
  0x6b   : > { %7062 = vst [vmem:[#allocation8_spill] sm:$0xff] %v5859_v24  ;;  %5136 = vrcp.f32 %v754_v33  ;;  %v3807_v8 = vmul.f32 -1.442695, %v5850_v0  ;;  %v426_v59 = vunpack.c.l.bf16 %v372_v4  ;;  %v5117_v51 = vpop.eup %5116  ;;  %v1442_v41 = vor.u32 %v1441_v38, %v1437_v43 }
  0x6c   : > { %5138 = vrcp.f32 %v755_v19  ;;  %v756_v18 = vadd.f32 1.0, %v5115_v39  ;;  %v485_v2 = vmul.f32 %v5825_v40, %v424_v47  ;;  %v486_v28 = vmul.f32 %v5825_v40, %v425_v15  ;;  %v5887_v39 = vld [vmem:[%s5321_s26 + $0x80] sm:$0x1] }
  0x6d   : > { %v5119_v16 = vpop.eup %5118  ;;  %v757_v37 = vadd.f32 1.0, %v5117_v51  ;;  %v3808_v55 = vmul.f32 -1.442695, %v5862_v61  ;;  %v487_v23 = vmul.f32 %v5825_v40, %v426_v59  ;;  %v4229_v21 = vunpack.c.l.bf16 %v5866_v6 }
  0x6e   : > { %v5121_v33 = vpop.eup %5120  ;;  %v911_v19 = vmul.f32 %v5119_v16, %v5501_v26  ;;  %5140 = vrcp.f32 %v756_v18  ;;  %v5879_v43 = vadd.f32 %v5780_v45, %v485_v2  ;;  %v5882_v38 = vadd.f32 %v5780_v45, %v486_v28 }
  0x6f   : > { %v758_v4 = vadd.f32 1.0, %v5121_v33  ;;  %5142 = vrcp.f32 %v757_v37  ;;  %v3809_v47 = vmul.f32 -1.442695, %v5869_v17  ;;  %v5892_v26 = vadd.f32 %v5780_v45, %v487_v23 }
  0x70   : > { %v5123_v59 = vpop.eup %5122  ;;  %v1311_v51 = vsel %vm1128_vm1, %v911_v19, 0.0  ;;  %5144 = vpow2.f32 %v3807_v8  ;;  %v3810_v18 = vmul.f32 -1.442695, %v5879_v43  ;;  %v3811_v37 = vmul.f32 -1.442695, %v5882_v38 }
  0x71   : > { %v5125_v2 = vpop.eup %5124  ;;  %v5895_v28 = vpack.c.bf16 %v1311_v51, %v1311_v51  ;;  %v945_v16 = vmul.f32 %v5123_v59, %v5516_v63  ;;  %5146 = vrcp.f32 %v758_v4  ;;  %v5902_v8 = vmul.f32 %v5825_v40, %v4229_v21 }
  0x72   : > { %v5127_v33 = vpop.eup %5126  ;;  %v946_v5 = vmul.f32 %v5125_v2, %v5523_v7  ;;  %5148 = vpow2.f32 %v3808_v55  ;;  %v5912_v55 = vmul.f32 -1.442695, %v5892_v26 }
  0x73   : > { %v5129_v23 = vpop.eup %5128  ;;  %v1444_v15 = vshll.u32 %v5895_v28, 16  ;;  %v947_v51 = vmul.f32 %v5127_v33, %v5526_v14  ;;  %v1345_v63 = vsel %vm1027_vm0, %v945_v16, 0.0  ;;  %5150 = vpow2.f32 %v3809_v47 }
  0x74   : > { %v5131_v4 = vpop.eup %5130  ;;  %v5908_v59 = vpack.c.bf16 %v946_v5, %v1345_v63  ;;  %v912_v7 = vmul.f32 %v5129_v23, %v5539_v36  ;;  %5152 = vpow2.f32 %v3810_v18 }
  0x75   : > { %v5133_v21 = vpop.eup %5132  ;;  %v1446_v2 = vrot.slane %v1444_v15, 1  ;;  %v1347_v19 = vsel %vm1128_vm1, %v947_v51, 0.0  ;;  %v913_v14 = vmul.f32 %v5131_v4, %v5546_v44  ;;  %5154 = vpow2.f32 %v3811_v37 }
  0x76   : > { %v5917_v30 = vpack.c.bf16 %v1347_v19, %v1347_v19  ;;  %v1742_v47 = vshrl.u32 %v5908_v59, 16  ;;  %v1744_v63 = vshll.u32 %v5908_v59, 16  ;;  %v914_v36 = vmul.f32 %v5133_v21, %v5558_v56 }
  0x77   : > { %v5135_v33 = vpop.eup %5134  ;;  %v5923_v23 = vsel %vm1387_vm2, %v1442_v41, %v1446_v2  ;;  %v5925_v15 = vpack.c.bf16 %v946_v5, %v945_v16  ;;  %v1312_v51 = vsel %vm1027_vm0, %v912_v7, 0.0 }
  0x78   : > { %v5137_v18 = vpop.eup %5136  ;;  %v5930_v44 = vmul.f32 %v5135_v33, %v5734_v3  ;;  %2009 = vmatprep.mubr.bf16.mxu0 %v5923_v23  ;;  %v1746_v19 = vrot.slane %v1744_v63, 1  ;;  %v1749_v4 = vshll.u32 %v5917_v30, 16  ;;  %v1314_v56 = vsel %vm1128_vm1, %v914_v36, 0.0 }
  0x79   : > { %7063 = vst [vmem:[#allocation9_spill] sm:$0xff] %v5925_v15  ;;  %v5139_v37 = vpop.eup %5138  ;;  %v5936_v21 = vpack.c.bf16 %v913_v14, %v1312_v51  ;;  %3920 = vmatmul.mubr.msk.bf16.gmra.mxu0 %vm5600_vm4, %v5859_v24  ;;  %v5941_v5 = vpack.c.bf16 %v1314_v56, %v1314_v56  ;;  %v916_v3 = vmul.f32 %v5137_v18, %v5744_v48  ;;  %v1642_v48 = vrot.slane %v5895_v28, 1 }
  0x7a   : > { %v917_v41 = vmul.f32 %v5139_v37, %v5747_v35  ;;  %v1315_v16 = vsel %vm1027_vm0, %v5930_v44, 0.0  ;;  %v1747_v2 = vor.u32 %v1746_v19, %v1742_v47  ;;  %v1751_v33 = vrot.slane %v1749_v4, 1 }
  0x7b   : > { %v1449_v63 = vshrl.u32 %v5936_v21, 16  ;;  %v1451_v36 = vshll.u32 %v5936_v21, 16  ;;  %v5141_v51 = vpop.eup %5140  ;;  %v1456_v58 = vshll.u32 %v5941_v5, 16  ;;  %v5953_v12 = vpack.c.bf16 %v916_v3, %v1315_v16 }
  0x7c   : > { %v1317_v56 = vsel %vm1128_vm1, %v917_v41, 0.0  ;;  %v5143_v35 = vpop.eup %5142  ;;  %v5957_v18 = vsel %vm1387_vm2, %v1747_v2, %v1751_v33  ;;  %v918_v19 = vmul.f32 %v5141_v51, %v5773_v9  ;;  %v5969_v33 = vpack.c.bf16 %v913_v14, %v912_v7 }
  0x7d   : > { %7064 = vst [vmem:[#allocation10_spill] sm:$0xff] %v5957_v18  ;;  %v1453_v47 = vrot.slane %v1451_v36, 1  ;;  %v5959_v37 = vpack.c.bf16 %v1317_v56, %v1317_v56  ;;  %v5145_v4 = vpop.eup %5144  ;;  %2105 = vmatprep.mubr.bf16.mxu1 %v5957_v18  ;;  %v1458_v62 = vrot.slane %v1456_v58, 1  ;;  %v1461_v24 = vshrl.u32 %v5953_v12, 16 }
  0x7e   : > { %v1463_v41 = vshll.u32 %v5953_v12, 16  ;;  %v919_v16 = vmul.f32 %v5143_v35, %v5777_v13  ;;  %v5147_v28 = vpop.eup %5146  ;;  %3956 = vmatmul.mubr.msk.bf16.gmra.mxu1 %vm5600_vm4, %v5925_v15  ;;  %7065 = vst [vmem:[#allocation11_spill] sm:$0xff] %v5969_v33  ;;  %v1318_v36 = vsel %vm1027_vm0, %v918_v19, 0.0  ;;  %v7066_v35 = vunpack.c.h.bf16 %v5866_v6 }
  0x7f   : > { %v1454_v2 = vor.u32 %v1453_v47, %v1449_v63  ;;  %v1468_v9 = vshll.u32 %v5959_v37, 16  ;;  %v5149_v58 = vpop.eup %5148  ;;  %4770 = vmatprep.mubr.bf16.mxu1 %v5761_v27  ;;  %v920_v56 = vmul.f32 %v5147_v28, %v5783_v46  ;;  %v7067_v47 = vrot.slane %v5830_v52, 1 }
  0x80   : > { %v1465_v51 = vrot.slane %v1463_v41, 1  ;;  %v5976_v13 = vpack.c.bf16 %v919_v16, %v1318_v36  ;;  %v489_v15 = vmul.f32 %v5825_v40, %v7066_v35  ;;  %v5151_v63 = vpop.eup %5150  ;;  %v7068_v41 = vunpack.c.l.bf16 %v5887_v39 }
  0x81   : > { %v5982_v7 = vsel %vm1387_vm2, %v1454_v2, %v1458_v62  ;;  %v1470_v14 = vrot.slane %v1468_v9, 1  ;;  %v5987_v18 = vsel %vm1628_vm5, %v7067_v47, %v1642_v48  ;;  %v5153_v28 = vpop.eup %5152  ;;  %v1320_v36 = vsel %vm1128_vm1, %v920_v56, 0.0 }
  0x82   : > { %v490_v46 = vmul.f32 %v5825_v40, %v7068_v41  ;;  %2017 = vmatprep.mubr.bf16.mxu0 %v5982_v7  ;;  %v1466_v6 = vor.u32 %v1465_v51, %v1461_v24  ;;  %v1473_v62 = vshrl.u32 %v5976_v13, 16  ;;  %v1475_v2 = vshll.u32 %v5976_v13, 16  ;;  %v5155_v9 = vpop.eup %5154  ;;  %v4970_v24 = vld [vmem:[%s7027_s4 + $0x38] sm:$0xff]  }
  0x83   : > { %3923 = vmatmul.mubr.msk.bf16.gmra.mxu0 %vm5600_vm4, %v5969_v33  ;;  %v6000_v52 = vpack.c.bf16 %v1320_v36, %v1320_v36  ;;  %v1644_v39 = vrot.slane %v5936_v21, 1  ;;  %v1645_v48 = vrot.slane %v5941_v5, 1  ;;  %v759_v35 = vadd.f32 1.0, %v5145_v4  ;;  %v4972_v21 = vld [vmem:[%s7027_s4 + $0x70] sm:$0xff]  }
  0x84   : > { %v6008_v51 = vsel %vm1387_vm2, %v1466_v6, %v1470_v14  ;;  %v1477_v56 = vrot.slane %v1475_v2, 1  ;;  %v760_v47 = vadd.f32 1.0, %v5149_v58  ;;  %v761_v41 = vadd.f32 1.0, %v5151_v63  ;;  %v376_v63 = vld [vmem:[%s5321_s26 + $0x84] sm:$0xff]  }
  0x85   : > { %2025 = vmatprep.mubr.bf16.mxu0 %v6008_v51  ;;  %v6015_v5 = vpack.c.bf16 %v916_v3, %v5930_v44  ;;  %v1480_v4 = vshll.u32 %v6000_v52, 16  ;;  %v6018_v36 = vpack.c.bf16 %v919_v16, %v918_v19  ;;  %5156 = vrcp.f32 %v759_v35  ;;  %v4973_v3 = vld [vmem:[%s7027_s4 + $0x30] sm:$0xff]   ;;  %v4974_v35 = vld [vmem:[%s7027_s4 + $0x68] sm:$0xff]  }
  0x86   : > { %v1478_v33 = vor.u32 %v1477_v56, %v1473_v62  ;;  %v1647_v14 = vrot.slane %v5953_v12, 1  ;;  %5158 = vrcp.f32 %v760_v47  ;;  %v762_v58 = vadd.f32 1.0, %v5153_v28  ;;  %4771 = vmatmul.mubr.bf16.vlgmr.msra.gmra.mxu1 %v5770_v53  ;;  %v4328_v62 = vld [vmem:[%s5321_s26 + $0x90] sm:$0xff]  }
  0x87   : > { %7069 = vst [vmem:[#allocation12_spill] sm:$0xff] %v6018_v36  ;;  %v1482_v6 = vrot.slane %v1480_v4, 1  ;;  %5160 = vrcp.f32 %v761_v41  ;;  %v763_v2 = vadd.f32 1.0, %v5155_v9  ;;  %v6025_v44 = vadd.f32 %v5780_v45, %v5902_v8  ;;  %4483 = vmatpush3.bf16.msra.mxu1 %v4970_v24  ;;  %4774 = vmatprep.mubr.bf16.mxu1 %v5845_v31  ;;  %v378_v8 = vld [vmem:[%s5321_s26 + $0x8c] sm:$0x1] }
  0x88   : > { %v6032_v19 = vsel %vm1628_vm5, %v1644_v39, %v1645_v48  ;;  %5162 = vpow2.f32 %v5912_v55  ;;  %v6036_v16 = vadd.f32 %v5780_v45, %v489_v15  ;;  %v6039_v28 = vadd.f32 %v5780_v45, %v490_v46  ;;  %4484 = vmatprep.subr.bf16.mxu1 %v4972_v21  ;;  %v381_v48 = vld [vmem:[%s5321_s26 + $0x98] sm:$0x1]  ;;  %v4975_v41 = vld [vmem:[%s7027_s4 + $0x28] sm:$0xff]  }
  0x89   : > { %v6044_v9 = vsel %vm1387_vm2, %v1478_v33, %v1482_v6  ;;  %5164 = vrcp.f32 %v762_v58  ;;  %v3813_v39 = vmul.f32 -1.442695, %v6025_v44  ;;  %v430_v55 = vunpack.c.l.bf16 %v376_v63 }
  0x8a   : > { %5166 = vrcp.f32 %v763_v2  ;;  %v3814_v15 = vmul.f32 -1.442695, %v6036_v16  ;;  %v3815_v46 = vmul.f32 -1.442695, %v6039_v28  ;;  %v431_v24 = vunpack.c.h.bf16 %v376_v63  ;;  %v4977_v63 = vld [vmem:[%s7027_s4 + $0x60] sm:$0xff]  }
  0x8b   : > { %3926 = vmatmul.mubr.msk.bf16.gmra.mxu0 %vm5600_vm4, %v6015_v5  ;;  %5168 = vpow2.f32 %v3813_v39  ;;  %v432_v33 = vunpack.c.l.bf16 %v378_v8  ;;  %v491_v56 = vmul.f32 %v5825_v40, %v430_v55  ;;  %v4233_v47 = vunpack.c.l.bf16 %v4328_v62  ;;  %4485 = vmatpush3.bf16.msra.mxu1 %v4973_v3 }
  0x8c   : > { %2033 = vmatprep.mubr.bf16.mxu0 %v6044_v9  ;;  %5170 = vpow2.f32 %v3814_v15  ;;  %v492_v21 = vmul.f32 %v5825_v40, %v431_v24  ;;  %v4234_v4 = vunpack.c.h.bf16 %v4328_v62  ;;  %v435_v58 = vunpack.c.l.bf16 %v381_v48  ;;  %4486 = vmatprep.subr.bf16.mxu1 %v4974_v35 }
  0x8d   : > { %5172 = vpow2.f32 %v3815_v46  ;;  %v493_v6 = vmul.f32 %v5825_v40, %v432_v33  ;;  %v6067_v2 = vadd.f32 %v5780_v45, %v491_v56  ;;  %v494_v3 = vmul.f32 %v5825_v40, %v4233_v47  ;;  %v4980_v56 = vld [vmem:[%s7027_s4 + $0x58] sm:$0xff]  }
  0x8e   : > { %v1648_v8 = vrot.slane %v5959_v37, 1  ;;  %v6072_v39 = vadd.f32 %v5780_v45, %v492_v21  ;;  %v495_v62 = vmul.f32 %v5825_v40, %v4234_v4  ;;  %v496_v35 = vmul.f32 %v5825_v40, %v435_v58  ;;  %4775 = vmatmul.mubr.bf16.gmra.mxu1 %v5987_v18  ;;  %v4978_v40 = vld [vmem:[%s7027_s4 + $0x20] sm:$0xff]  }
  0x8f   : > { %v1650_v55 = vrot.slane %v5976_v13, 1  ;;  %v6079_v48 = vadd.f32 %v5780_v45, %v493_v6  ;;  %v3816_v15 = vmul.f32 -1.442695, %v6067_v2  ;;  %v6083_v46 = vadd.f32 %v5780_v45, %v494_v3  ;;  %4778 = vmatprep.mubr.bf16.mxu1 %v6032_v19  ;;  %4487 = vmatpush3.bf16.msra.mxu1 %v4975_v41 }
  0x90   : > { %v1651_v37 = vrot.slane %v6000_v52, 1  ;;  %v3817_v24 = vmul.f32 -1.442695, %v6072_v39  ;;  %v6092_v13 = vadd.f32 %v5780_v45, %v495_v62  ;;  %v6095_v33 = vadd.f32 %v5780_v45, %v496_v35  ;;  %4488 = vmatprep.subr.bf16.mxu1 %v4977_v63 }
  0x91   : > { %5174 = vpow2.f32 %v3816_v15  ;;  %v3818_v52 = vmul.f32 -1.442695, %v6079_v48  ;;  %v3819_v47 = vmul.f32 -1.442695, %v6083_v46  ;;  %v1674_v63 = vrot.slane %v5800_v50, 1 }
  0x92   : > { %v5157_v41 = vpop.eup %5156  ;;  %5176 = vpow2.f32 %v3817_v24  ;;  %v3820_v21 = vmul.f32 -1.442695, %v6092_v13  ;;  %v3821_v4 = vmul.f32 -1.442695, %v6095_v33  ;;  %v1675_v6 = vrot.slane %v5815_v25, 1 }
  0x93   : > { %v5159_v58 = vpop.eup %5158  ;;  %3929 = vmatmul.mubr.msk.bf16.gmra.mxu0 %vm5600_vm4, %v6018_v36  ;;  %v921_v45 = vmul.f32 %v5157_v41, %v5850_v0  ;;  %5178 = vpow2.f32 %v3818_v52  ;;  %v6113_v62 = vsel %vm1628_vm5, %v1647_v14, %v1648_v8  ;;  %v6117_v15 = vsel %vm1628_vm5, %v1650_v55, %v1651_v37  ;;  %4489 = vmatpush3.bf16.msra.mxu1 %v4978_v40  ;;  %v4981_v0 = vld [vmem:[%s7027_s4 + $0x18] sm:$0xff]  }
  0x94   : > { %v5161_v3 = vpop.eup %5160  ;;  %v922_v35 = vmul.f32 %v5159_v58, %v5862_v61  ;;  %5180 = vpow2.f32 %v3819_v47  ;;  %4490 = vmatprep.subr.bf16.mxu1 %v4980_v56  ;;  %v4982_v61 = vld [vmem:[%s7027_s4 + $0x50] sm:$0xff]   ;;  %v6129_v14 = vsel %vm1628_vm5, %v1674_v63, %v1675_v6  ;;  %v1756_v24 = vrot.slane %v5908_v59, 1  ;;  %v4985_v59 = vld [vmem:[%s7027_s4 + $0x48] sm:$0xff]  }
  0x95   : > { %v5163_v50 = vpop.eup %5162  ;;  %v923_v25 = vmul.f32 %v5161_v3, %v5869_v17  ;;  %v1321_v12 = vsel %vm1027_vm0, %v921_v45, 0.0  ;;  %5182 = vpow2.f32 %v3820_v21  ;;  %v1757_v3 = vrot.slane %v5917_v30, 1  ;;  %v4986_v30 = vld [vmem:[%s7027_s4 + $0x8] sm:$0xff]  }
  0x96   : > { %v5165_v8 = vpop.eup %5164  ;;  %v1367_v55 = vpack.c.bf16 %v922_v35, %v1321_v12  ;;  %v764_v37 = vadd.f32 1.0, %v5163_v50  ;;  %5184 = vpow2.f32 %v3821_v4  ;;  %4779 = vmatmul.mubr.bf16.gmra.mxu1 %v6113_v62  ;;  %v4983_v4 = vld [vmem:[%s7027_s4 + $0x10] sm:$0xff]  }
  0x97   : > { %v5167_v40 = vpop.eup %5166  ;;  %v1323_v17 = vsel %vm1128_vm1, %v923_v25, 0.0  ;;  %4782 = vmatprep.mubr.bf16.mxu1 %v6117_v15  ;;  %4491 = vmatpush3.bf16.msra.mxu1 %v4981_v0  ;;  %v6140_v63 = vmul.f32 %v5165_v8, %v5879_v43 }
  0x98   : > { %v5169_v56 = vpop.eup %5168  ;;  %v1368_v52 = vpack.c.bf16 %v1323_v17, %v1323_v17  ;;  %v1485_v47 = vshrl.u32 %v1367_v55, 16  ;;  %v1487_v41 = vshll.u32 %v1367_v55, 16  ;;  %v1653_v21 = vrot.slane %v1367_v55, 1  ;;  %4492 = vmatprep.subr.bf16.mxu1 %v4982_v61 }
  0x99   : > { %v5171_v58 = vpop.eup %5170  ;;  %5186 = vrcp.f32 %v764_v37  ;;  %v765_v6 = vadd.f32 1.0, %v5169_v56  ;;  %v6146_v17 = vpack.c.bf16 %v922_v35, %v921_v45  ;;  %v925_v37 = vmul.f32 %v5167_v40, %v5882_v38  ;;  %v4988_v38 = vld [vmem:[%s7027_s4 + $0x40] sm:$0xff]  }
  0x9a   : > { %v5173_v50 = vpop.eup %5172  ;;  %v1489_v25 = vrot.slane %v1487_v41, 1  ;;  %v1492_v0 = vshll.u32 %v1368_v52, 16  ;;  %v1654_v12 = vrot.slane %v1368_v52, 1  ;;  %v766_v55 = vadd.f32 1.0, %v5171_v58 }
  0x9b   : > { %v767_v36 = vadd.f32 1.0, %v5173_v50  ;;  %5188 = vrcp.f32 %v765_v6  ;;  %4493 = vmatpush3.bf16.msra.mxu1 %v4983_v4  ;;  %v1324_v45 = vsel %vm1027_vm0, %v6140_v63, 0.0  ;;  %v6165_v56 = vsel %vm1628_vm5, %v1756_v24, %v1757_v3  ;;  %v4989_v4 = vld [vmem:[%s7027_s4] sm:$0xff]   ;;  %v6178_v6 = vld [vmem:[%s7027_s4 + $0x238] sm:$0xff]  }
  0x9c   : > { %v1490_v43 = vor.u32 %v1489_v25, %v1485_v47  ;;  %v1494_v8 = vrot.slane %v1492_v0, 1  ;;  %v6150_v61 = vsel %vm1628_vm5, %v1653_v21, %v1654_v12  ;;  %5190 = vrcp.f32 %v766_v55  ;;  %4494 = vmatprep.subr.bf16.mxu1 %v4985_v59 }
  0x9d   : > { %5192 = vrcp.f32 %v767_v36  ;;  %v1369_v36 = vpack.c.bf16 %v925_v37, %v1324_v45 }
  0x9e   : > { %v5175_v35 = vpop.eup %5174  ;;  %v6162_v40 = vsel %vm1387_vm2, %v1490_v43, %v1494_v8  ;;  %4783 = vmatmul.mubr.bf16.gmra.mxu1 %v6150_v61 }
  0x9f   : > { %v5177_v52 = vpop.eup %5176  ;;  %2041 = vmatprep.mubr.bf16.mxu0 %v6162_v40  ;;  %v768_v47 = vadd.f32 1.0, %v5175_v35  ;;  %4495 = vmatpush3.bf16.msra.mxu1 %v4986_v30  ;;  %v1499_v0 = vshll.u32 %v1369_v36, 16  ;;  %v1497_v30 = vshrl.u32 %v1369_v36, 16 }
  0xa0   : > { %v5179_v41 = vpop.eup %5178  ;;  %3932 = vmatmul.mubr.msk.bf16.gmra.mxu0 %vm5600_vm4, %v6146_v17  ;;  %v769_v21 = vadd.f32 1.0, %v5177_v52  ;;  %4496 = vmatprep.subr.bf16.mxu1 %v4988_v38 }
  0xa1   : > { %v5181_v24 = vpop.eup %5180  ;;  %v770_v58 = vadd.f32 1.0, %v5179_v41  ;;  %5194 = vrcp.f32 %v768_v47  ;;  %v1501_v45 = vrot.slane %v1499_v0, 1 }
  0xa2   : > { %v5183_v59 = vpop.eup %5182  ;;  %5196 = vrcp.f32 %v769_v21  ;;  %v771_v3 = vadd.f32 1.0, %v5181_v24  ;;  %v1656_v21 = vrot.slane %v1369_v36, 1 }
  0xa3   : > { %v5185_v50 = vpop.eup %5184  ;;  %5198 = vrcp.f32 %v770_v58  ;;  %v772_v25 = vadd.f32 1.0, %v5183_v59  ;;  %4497 = vmatpush3.bf16.msra.mxu1 %v4989_v4 }
  0xa4   : > { %v773_v12 = vadd.f32 1.0, %v5185_v50  ;;  %5200 = vrcp.f32 %v771_v3  ;;  %4850 = vmatprep.subr.bf16.mxu1 %v6178_v6 }
  0xa5   : > { %5202 = vrcp.f32 %v772_v25  ;;  %v6190_v25 = vpack.c.bf16 %v925_v37, %v6140_v63 }
  0xa6   : > { %v5187_v55 = vpop.eup %5186  ;;  %5204 = vrcp.f32 %v773_v12 }
  0xa7   : > { %v926_v43 = vmul.f32 %v5187_v55, %v5892_v26  ;;  %v1502_v26 = vor.u32 %v1501_v45, %v1497_v30 }
  0xa8   : > { %v5189_v8 = vpop.eup %5188 }
  0xa9   : > { %v5191_v38 = vpop.eup %5190  ;;  %v1326_v35 = vsel %vm1128_vm1, %v926_v43, 0.0  ;;  %v927_v52 = vmul.f32 %v5189_v8, %v6025_v44 }
  0xaa   : > { %v5193_v47 = vpop.eup %5192  ;;  %v1370_v41 = vpack.c.bf16 %v1326_v35, %v1326_v35  ;;  %v928_v4 = vmul.f32 %v5191_v38, %v6036_v16 }
  0xab   : > { %v929_v24 = vmul.f32 %v5193_v47, %v6039_v28  ;;  %v1327_v58 = vsel %vm1027_vm0, %v927_v52, 0.0 }
  0xac   : > { %v1504_v59 = vshll.u32 %v1370_v41, 16  ;;  %v1657_v3 = vrot.slane %v1370_v41, 1  ;;  %v1371_v50 = vpack.c.bf16 %v928_v4, %v1327_v58  ;;  %v1668_v58 = vrot.slane %v5588_v32, 1 }
  0xad   : > { %v1329_v44 = vsel %vm1128_vm1, %v929_v24, 0.0 }
  0xae   : > { %v5195_v0 = vpop.eup %5194  ;;  %v1506_v12 = vrot.slane %v1504_v59, 1  ;;  %v6195_v36 = vsel %vm1628_vm5, %v1656_v21, %v1657_v3  ;;  %v1372_v16 = vpack.c.bf16 %v1329_v44, %v1329_v44  ;;  %v1659_v28 = vrot.slane %v1371_v50, 1 }
  0xaf   : > { %v5197_v55 = vpop.eup %5196  ;;  %4786 = vmatprep.mubr.bf16.mxu1 %v6195_v36  ;;  %v1509_v43 = vshrl.u32 %v1371_v50, 16  ;;  %v1511_v8 = vshll.u32 %v1371_v50, 16  ;;  %v930_v30 = vmul.f32 %v5195_v0, %v6067_v2  ;;  %v1669_v0 = vrot.slane %v5590_v42, 1 }
  0xb0   : > { %v5199_v45 = vpop.eup %5198  ;;  %v6200_v63 = vsel %vm1387_vm2, %v1502_v26, %v1506_v12  ;;  %v1660_v37 = vrot.slane %v1372_v16, 1  ;;  %v1516_v38 = vshll.u32 %v1372_v16, 16  ;;  %v931_v35 = vmul.f32 %v5197_v55, %v6072_v39 }
  0xb1   : > { %v5201_v47 = vpop.eup %5200  ;;  %2049 = vmatprep.mubr.bf16.mxu0 %v6200_v63  ;;  %v1513_v41 = vrot.slane %v1511_v8, 1  ;;  %v932_v21 = vmul.f32 %v5199_v45, %v6079_v48  ;;  %v1330_v24 = vsel %vm1027_vm0, %v930_v30, 0.0  ;;  %v6239_v54 = vsel %vm1628_vm5, %v1668_v58, %v1669_v0 }
  0xb2   : > { %v5203_v2 = vpop.eup %5202  ;;  %3935 = vmatmul.mubr.msk.bf16.gmra.mxu0 %vm5600_vm4, %v6190_v25  ;;  %v6212_v26 = vsel %vm1628_vm5, %v1659_v28, %v1660_v37  ;;  %v1518_v39 = vrot.slane %v1516_v38, 1  ;;  %v1373_v59 = vpack.c.bf16 %v931_v35, %v1330_v24  ;;  %v933_v3 = vmul.f32 %v5201_v47, %v6083_v46 }
  0xb3   : > { %v5205_v50 = vpop.eup %5204  ;;  %4787 = vmatmul.mubr.bf16.gmra.mxu1 %v6212_v26  ;;  %v1514_v48 = vor.u32 %v1513_v41, %v1509_v43  ;;  %v1332_v44 = vsel %vm1128_vm1, %v932_v21, 0.0  ;;  %v934_v32 = vmul.f32 %v5203_v2, %v6092_v13  ;;  %v6227_v38 = vpack.c.bf16 %v928_v4, %v927_v52 }
  0xb4   : > { %v1374_v12 = vpack.c.bf16 %v1332_v44, %v1332_v44  ;;  %v1662_v16 = vrot.slane %v1373_v59, 1  ;;  %v935_v28 = vmul.f32 %v5205_v50, %v6095_v33  ;;  %v1333_v55 = vsel %vm1027_vm0, %v933_v3, 0.0 }
  0xb5   : > { %v6224_v46 = vsel %vm1387_vm2, %v1514_v48, %v1518_v39  ;;  %v1375_v8 = vpack.c.bf16 %v934_v32, %v1333_v55  ;;  %v1521_v45 = vshrl.u32 %v1373_v59, 16  ;;  %v1523_v43 = vshll.u32 %v1373_v59, 16 }
  0xb6   : > { %2057 = vmatprep.mubr.bf16.mxu0 %v6224_v46  ;;  %v1663_v37 = vrot.slane %v1374_v12, 1  ;;  %v1335_v42 = vsel %vm1128_vm1, %v935_v28, 0.0  ;;  %v1528_v13 = vshll.u32 %v1374_v12, 16  ;;  %v1672_v58 = vrot.slane %v5647_v11, 1 }
  0xb7   : > { %v1376_v47 = vpack.c.bf16 %v1335_v42, %v1335_v42  ;;  %v1665_v33 = vrot.slane %v1375_v8, 1  ;;  %v1525_v41 = vrot.slane %v1523_v43, 1  ;;  %v1533_v24 = vshrl.u32 %v1375_v8, 16  ;;  %v4994_v43 = vld [vmem:[%s7027_s4 + $0x1b0] sm:$0xff]   ;;  %v4997_v42 = vld [vmem:[%s7027_s4 + $0x1a8] sm:$0xff]  }
  0xb8   : > { %v6232_v29 = vsel %vm1628_vm5, %v1662_v16, %v1663_v37  ;;  %v1530_v21 = vrot.slane %v1528_v13, 1  ;;  %v1535_v2 = vshll.u32 %v1375_v8, 16  ;;  %v1671_v16 = vrot.slane %v5640_v57, 1  ;;  %v4996_v37 = vld [vmem:[%s7027_s4 + $0x1e8] sm:$0xff]   ;;  %v4998_v13 = vld [vmem:[%s7027_s4 + $0x1e0] sm:$0xff]  }
  0xb9   : > { %4790 = vmatprep.mubr.bf16.mxu1 %v6232_v29  ;;  %v1666_v39 = vrot.slane %v1376_v47, 1  ;;  %v1526_v59 = vor.u32 %v1525_v41, %v1521_v45  ;;  %v1540_v50 = vshll.u32 %v1376_v47, 16  ;;  %v6252_v0 = vpack.c.bf16 %v931_v35, %v930_v30  ;;  %v4995_v45 = vld [vmem:[%s7027_s4 + $0x230] sm:$0xff]   ;;  %v5001_v47 = vld [vmem:[%s7027_s4 + $0x1d8] sm:$0xff]  }
  0xba   : > { %3938 = vmatmul.mubr.msk.bf16.gmra.mxu0 %vm5600_vm4, %v6227_v38  ;;  %v1537_v52 = vrot.slane %v1535_v2, 1  ;;  %v6258_v55 = vsel %vm1628_vm5, %v1671_v16, %v1672_v58  ;;  %v6266_v57 = vpack.c.bf16 %v934_v32, %v933_v3  ;;  %v7050_v11 = vmov 0.0|0.0   ;;  %v4992_v3 = vld [vmem:[%s7027_s4 + $0x1b8] sm:$0xff]   ;;  %v4993_v32 = vld [vmem:[%s7027_s4 + $0x1f0] sm:$0xff]   ;;  %v5006_v2 = vld [vmem:[%s7027_s4 + $0x1c8] sm:$0xff]  }
  0xbb   : > { %v6242_v4 = vsel %vm1628_vm5, %v1665_v33, %v1666_v39  ;;  %v6245_v48 = vsel %vm1387_vm2, %v1526_v59, %v1530_v21  ;;  %v1542_v12 = vrot.slane %v1540_v50, 1  ;;  %v6269_v30 = vrot.slane %v7050_v11, 1  ;;  %v5010_v33 = vld [vmem:[%s7027_s4 + $0x218] sm:$0xff]   ;;  %v5011_v21 = vld [vmem:[%s7027_s4 + $0x210] sm:$0xff]   ;;  %v5012_v39 = vld [vmem:[%s7027_s4 + $0x208] sm:$0xff]  }
  0xbc   : > { %4791 = vmatmul.mubr.bf16.gmra.mxu1 %v6242_v4  ;;  %2065 = vmatprep.mubr.bf16.mxu0 %v6245_v48  ;;  %v1538_v44 = vor.u32 %v1537_v52, %v1533_v24  ;;  %v5234_v35 = vmov 0   ;;  %v5002_v41 = vld [vmem:[%s7027_s4 + $0x198] sm:$0xff]   ;;  %v5004_v24 = vld [vmem:[%s7027_s4 + $0x190] sm:$0xff]   ;;  %v5007_v59 = vld [vmem:[%s7027_s4 + $0x188] sm:$0xff]  }
  0xbd   : > { %4794 = vmatprep.mubr.bf16.mxu1 %v6239_v54  ;;  %v6271_v8 = vrot.slane %v5234_v35, 1  ;;  %v5008_v50 = vld [vmem:[%s7027_s4 + $0x1c0] sm:$0xff]   ;;  %v7071_v16 = vld [vmem:[#allocation11_spill] sm:$0xff] }
  0xbe   : > { %v6255_v28 = vsel %vm1387_vm2, %v1538_v44, %v1542_v12  ;;  %v5013_v52 = vld [vmem:[%s7027_s4 + $0x200] sm:$0xff]   ;;  %v7070_v12 = vld [vmem:[#allocation8_spill] sm:$0xff] }
  0xbf   : > { %v5009_v44 = vld [vmem:[%s7027_s4 + $0x180] sm:$0xff]  }
  0xc2   : > { %3941 = vmatmul.mubr.msk.bf16.gmra.mxu0 %vm5600_vm4, %v6252_v0 }
  0xc3   : > { %2073 = vmatprep.mubr.bf16.mxu0 %v6255_v28 }
  0xc4   : > { %4795 = vmatmul.mubr.bf16.gmra.mxu1 %v6258_v55 }
  0xc5   : > { %4798 = vmatprep.mubr.bf16.mxu1 %v6129_v14 }
  0xca   : > { %3944 = vmatmul.mubr.msk.bf16.gmra.mxu0 %vm5600_vm4, %v6266_v57 }
  0xcb   : > { %4818 = vmatprep.mubr.bf16.mxu0 %v6269_v30 }
  0xcc   : > { %4799 = vmatmul.mubr.bf16.gmra.mxu1 %v6165_v56 }
  0xcd   : > { %2451 = vmatprep.mubr.bf16.mxu1 %v6271_v8 }
  0xd2   : > { %4819 = vmatmul.mubr.bf16.vlgmr.msra.gmra.mxu0 %v5761_v27  ;;  %v5000_v27 = vld [vmem:[%s7027_s4 + $0x228] sm:$0xff]  }
  0xd3   : > { %4619 = vmatpush3.bf16.msra.mxu0 %v4992_v3  ;;  %4822 = vmatprep.mubr.bf16.mxu0 %v5770_v53 }
  0xd4   : > { %2452 = vmatmul.mubr.bf16.vlgmr.msra.gmra.mxu1 %v7050_v11  ;;  %4620 = vmatprep.subr.bf16.mxu0 %v4993_v32 }
  0xd5   : > { %4851 = vmatpush3.bf16.msra.mxu1 %v6178_v6  ;;  %2459 = vmatprep.mubr.bf16.mxu1 %v5613_v22  ;;  %v5005_v22 = vld [vmem:[%s7027_s4 + $0x220] sm:$0xff]  }
  0xd6   : > { %4852 = vmatprep.subr.bf16.mxu1 %v4995_v45  ;;  %v4999_v6 = vld [vmem:[%s7027_s4 + $0x1a0] sm:$0xff]  }
  0xd7   : > { %4621 = vmatpush3.bf16.msra.mxu0 %v4994_v43  ;;  %v7072_v43 = vld [vmem:[#allocation12_spill] sm:$0xff] }
  0xd8   : > { %4622 = vmatprep.subr.bf16.mxu0 %v4996_v37 }
  0xd9   : > { %4853 = vmatpush3.bf16.msra.mxu1 %v4995_v45 }
  0xda   : > { %4823 = vmatmul.mubr.bf16.gmra.mxu0 %v5845_v31  ;;  %4854 = vmatprep.subr.bf16.mxu1 %v5000_v27 }
  0xdb   : > { %4826 = vmatprep.mubr.bf16.mxu0 %v5987_v18  ;;  %4623 = vmatpush3.bf16.msra.mxu0 %v4997_v42 }
  0xdc   : > { %3983 = vmatmul.mubr.msk.bf16.gmra.mxu1 %vm5600_vm4, %v5581_v20  ;;  %4624 = vmatprep.subr.bf16.mxu0 %v4998_v13  ;;  %v5003_v20 = vld [vmem:[%s7027_s4 + $0x1d0] sm:$0xff]  }
  0xdd   : > { %2467 = vmatprep.mubr.bf16.mxu1 %v5666_v10  ;;  %4855 = vmatpush3.bf16.msra.mxu1 %v5000_v27 }
  0xde   : > { %4856 = vmatprep.subr.bf16.mxu1 %v5005_v22 }
  0xdf   : > { %4625 = vmatpush3.bf16.msra.mxu0 %v4999_v6 }
  0xe0   : > { %4626 = vmatprep.subr.bf16.mxu0 %v5001_v47 }
  0xe1   : > { %4857 = vmatpush3.bf16.msra.mxu1 %v5005_v22 }
  0xe2   : > { %4827 = vmatmul.mubr.bf16.gmra.mxu0 %v6032_v19  ;;  %4858 = vmatprep.subr.bf16.mxu1 %v5010_v33 }
  0xe3   : > { %4830 = vmatprep.mubr.bf16.mxu0 %v6113_v62  ;;  %4627 = vmatpush3.bf16.msra.mxu0 %v5002_v41 }
  0xe4   : > { %3986 = vmatmul.mubr.msk.bf16.gmra.mxu1 %vm5600_vm4, %v5642_v34  ;;  %4628 = vmatprep.subr.bf16.mxu0 %v5003_v20 }
  0xe5   : > { %2475 = vmatprep.mubr.bf16.mxu1 %v5716_v49  ;;  %4859 = vmatpush3.bf16.msra.mxu1 %v5010_v33 }
  0xe6   : > { %4860 = vmatprep.subr.bf16.mxu1 %v5011_v21 }
  0xe7   : > { %4629 = vmatpush3.bf16.msra.mxu0 %v5004_v24 }
  0xe8   : > { %4630 = vmatprep.subr.bf16.mxu0 %v5006_v2 }
  0xe9   : > { %4861 = vmatpush3.bf16.msra.mxu1 %v5011_v21 }
  0xea   : > { %4831 = vmatmul.mubr.bf16.gmra.mxu0 %v6117_v15  ;;  %4862 = vmatprep.subr.bf16.mxu1 %v5012_v39 }
  0xeb   : > { %4834 = vmatprep.mubr.bf16.mxu0 %v6150_v61  ;;  %4631 = vmatpush3.bf16.msra.mxu0 %v5007_v59 }
  0xec   : > { %3989 = vmatmul.mubr.msk.bf16.gmra.mxu1 %vm5600_vm4, %v5712_v60  ;;  %4632 = vmatprep.subr.bf16.mxu0 %v5008_v50 }
  0xed   : > { %2483 = vmatprep.mubr.bf16.mxu1 %v5923_v23  ;;  %4863 = vmatpush3.bf16.msra.mxu1 %v5012_v39 }
  0xee   : > { %4864 = vmatprep.subr.bf16.mxu1 %v5013_v52 }
  0xef   : > { %4633 = vmatpush3.bf16.msra.mxu0 %v5009_v44 }
  0xf1   : > { %4865 = vmatpush3.bf16.msra.mxu1 %v5013_v52 }
  0xf2   : > { %4835 = vmatmul.mubr.bf16.gmra.mxu0 %v6195_v36 }
  0xf3   : > { %4838 = vmatprep.mubr.bf16.mxu0 %v6212_v26 }
  0xf4   : > { %3992 = vmatmul.mubr.msk.bf16.gmra.mxu1 %vm5600_vm4, %v7070_v12 }
  0xf5   : > { %2491 = vmatprep.mubr.bf16.mxu1 %v5982_v7 }
  0xfa   : > { %4839 = vmatmul.mubr.bf16.gmra.mxu0 %v6232_v29 }
  0xfb   : > { %4842 = vmatprep.mubr.bf16.mxu0 %v6242_v4 }
  0xfc   : > { %3995 = vmatmul.mubr.msk.bf16.gmra.mxu1 %vm5600_vm4, %v7071_v16 }
  0xfd   : > { %2499 = vmatprep.mubr.bf16.mxu1 %v6008_v51 }
 0x102   : > { %4843 = vmatmul.mubr.bf16.gmra.mxu0 %v6239_v54 }
 0x103   : > { %4846 = vmatprep.mubr.bf16.mxu0 %v6258_v55 }
 0x104   : > { %3998 = vmatmul.mubr.msk.bf16.gmra.mxu1 %vm5600_vm4, %v6015_v5 }
 0x105   : > { %2507 = vmatprep.mubr.bf16.mxu1 %v6044_v9 }
 0x106   : > { %v4362_v58 = vpop.f32.mrf.mxu0 }
 0x108   : > { %v4363_v35 = vpop.f32.mrf.mxu0 }
 0x109   : > { %v6387_v3 = vadd.f32 %v4363_v35, %v4362_v58  ;;  %v7074_v35 = vld [vmem:[#allocation2_spill] sm:$0xff] }
 0x10a   : > { %4847 = vmatmul.mubr.bf16.gmra.mxu0 %v6129_v14  ;;  %v4434_v32 = vpop.f32.mrf.mxu1  ;;  %v6390_v45 = vpop.f32.mrf.mxu0 }
 0x10b   : > { %2985 = vmatprep.mubr.bf16.mxu0 %v5666_v10 }
 0x10c   : > { %4001 = vmatmul.mubr.msk.bf16.gmra.mxu1 %vm5600_vm4, %v7072_v43  ;;  %v4435_v37 = vpop.f32.mrf.mxu1  ;;  %v6396_v27 = vpop.f32.mrf.mxu0 }
 0x10d   : > { %2515 = vmatprep.mubr.bf16.mxu1 %v6162_v40  ;;  %v6398_v42 = vadd.f32 %v4435_v37, %v4434_v32 }
 0x10e   : > { %v6400_v13 = vpop.f32.mrf.mxu1  ;;  %v4368_v22 = vpop.f32.mrf.mxu0 }
 0x110   : > { %v6402_v6 = vpop.f32.mrf.mxu1  ;;  %v4369_v10 = vpop.f32.mrf.mxu0 }
 0x111   : > { %v6407_v47 = vadd.f32 %v4369_v10, %v4368_v22 }
 0x112   : > { %4100 = vmatmul.mubr.msk.bf16.vlgmr.msra.gmra.mxu0 %vm5600_vm4, %v5642_v34  ;;  %v4440_v33 = vpop.f32.mrf.mxu1  ;;  %v6410_v41 = vpop.f32.mrf.mxu0 }
 0x113   : > { %2993 = vmatprep.mubr.bf16.mxu0 %v5716_v49 }
 0x114   : > { %4004 = vmatmul.mubr.msk.bf16.gmra.mxu1 %vm5600_vm4, %v6146_v17  ;;  %v4441_v20 = vpop.f32.mrf.mxu1  ;;  %v4372_v21 = vpop.f32.mrf.mxu0 }
 0x115   : > { %2523 = vmatprep.mubr.bf16.mxu1 %v6200_v63  ;;  %v6416_v24 = vadd.f32 %v4441_v20, %v4440_v33 }
 0x116   : > { %v4374_v2 = vpop.f32.mrf.mxu0  ;;  %v6428_v49 = vpop.f32.mrf.mxu1 }
 0x118   : > { %v4375_v39 = vpop.f32.mrf.mxu0 }
 0x119   : > { %v6421_v34 = vadd.f32 %v4375_v39, %v4374_v2  ;;  %v7076_v39 = vld [vmem:[#allocation4_spill] sm:$0xff] }
 0x11a   : > { %4103 = vmatmul.mubr.msk.bf16.gmra.mxu0 %vm5600_vm4, %v5712_v60  ;;  %v6438_v60 = vpop.f32.mrf.mxu1 }
 0x11b   : > { %3001 = vmatprep.mubr.bf16.mxu0 %v5923_v23  ;;  %v4445_v1 = vadd.f32 %v6438_v60, %v6428_v49 }
 0x11c   : > { %4007 = vmatmul.mubr.msk.bf16.gmra.mxu1 %vm5600_vm4, %v6190_v25 }
 0x11d   : > { %2531 = vmatprep.mubr.bf16.mxu1 %v6224_v46 }
 0x122   : > { %4106 = vmatmul.mubr.msk.bf16.gmra.mxu0 %vm5600_vm4, %v7070_v12  ;;  %v4377_v12 = vpop.f32.mrf.mxu0 }
 0x123   : > { %3009 = vmatprep.mubr.bf16.mxu0 %v5982_v7 }
 0x124   : > { %4010 = vmatmul.mubr.msk.bf16.gmra.mxu1 %vm5600_vm4, %v6227_v38 }
 0x125   : > { %2539 = vmatprep.mubr.bf16.mxu1 %v6245_v48 }
 0x128   : > { %v4446_v23 = vpop.f32.mrf.mxu1 }
 0x12a   : > { %4109 = vmatmul.mubr.msk.bf16.gmra.mxu0 %vm5600_vm4, %v7071_v16  ;;  %v4447_v59 = vpop.f32.mrf.mxu1  ;;  %v4378_v16 = vpop.f32.mrf.mxu0 }
 0x12b   : > { %3017 = vmatprep.mubr.bf16.mxu0 %v6008_v51  ;;  %v6447_v7 = vadd.f32 %v4447_v59, %v4446_v23  ;;  %v7073_v51 = vld [vmem:[#allocation3_spill] sm:$0xff] }
 0x12c   : > { %4013 = vmatmul.mubr.msk.bf16.gmra.mxu1 %vm5600_vm4, %v6252_v0  ;;  %v4449_v50 = vpop.f32.mrf.mxu1  ;;  %v7077_v23 = vld [vmem:[#allocation7_spill] sm:$0xff] }
 0x12d   : > { %2547 = vmatprep.mubr.bf16.mxu1 %v6255_v28 }
 0x12e   : > { %v4450_v52 = vpop.f32.mrf.mxu1 }
 0x12f   : > { %v6450_v44 = vadd.f32 %v4450_v52, %v4449_v50 }
 0x132   : > { %4112 = vmatmul.mubr.msk.bf16.gmra.mxu0 %vm5600_vm4, %v6015_v5 }
 0x133   : > { %3025 = vmatprep.mubr.bf16.mxu0 %v6044_v9  ;;  %v7075_v9 = vld [vmem:[#allocation5_spill] sm:$0xff] }
 0x134   : > { %4016 = vmatmul.mubr.msk.bf16.gmra.mxu1 %vm5600_vm4, %v6266_v57 }
 0x135   : > { %2555 = vmatprep.mubr.bf16.mxu1 %v7073_v51 }
 0x139   : > { %v4380_v58 = vpop.f32.mrf.mxu0 }
 0x13a   : > { %4115 = vmatmul.mubr.msk.bf16.gmra.mxu0 %vm5600_vm4, %v7072_v43 }
 0x13b   : > { %3033 = vmatprep.mubr.bf16.mxu0 %v6162_v40  ;;  %v4381_v5 = vpop.f32.mrf.mxu0 }
 0x13c   : > { %4019 = vmatmul.mubr.msk.bf16.gmra.mxu1 %vm5600_vm4, %v7074_v35  ;;  %v4382_v32 = vadd.f32 %v4381_v5, %v4380_v58 }
 0x13d   : > { %2563 = vmatprep.mubr.bf16.mxu1 %v7075_v9  ;;  %v4383_v37 = vpop.f32.mrf.mxu0 }
 0x13e   : > { %v4452_v22 = vpop.f32.mrf.mxu1 }
 0x13f   : > { %v4384_v10 = vpop.f32.mrf.mxu0 }
 0x140   : > { %v4453_v33 = vpop.f32.mrf.mxu1  ;;  %v4385_v20 = vadd.f32 %v4384_v10, %v4383_v37  ;;  %v4373_v10 = vadd.f32 %v4372_v21, %v6410_v41 }
 0x141   : > { %v6471_v43 = vadd.f32 %v4453_v33, %v4452_v22 }
 0x142   : > { %4118 = vmatmul.mubr.msk.bf16.gmra.mxu0 %vm5600_vm4, %v6146_v17  ;;  %v4455_v40 = vpop.f32.mrf.mxu1 }
 0x143   : > { %3041 = vmatprep.mubr.bf16.mxu0 %v6200_v63  ;;  %v4386_v2 = vpop.f32.mrf.mxu0 }
 0x144   : > { %4022 = vmatmul.mubr.msk.bf16.gmra.mxu1 %vm5600_vm4, %v7076_v39  ;;  %v4456_v59 = vpop.f32.mrf.mxu1 }
 0x145   : > { %2571 = vmatprep.mubr.bf16.mxu1 %v7077_v23  ;;  %v4387_v50 = vpop.f32.mrf.mxu0  ;;  %v6478_v52 = vadd.f32 %v4456_v59, %v4455_v40  ;;  %v7078_v59 = vld [vmem:[#allocation6_spill] sm:$0xff] }
 0x146   : > { %v4388_v58 = vadd.f32 %v4387_v50, %v4386_v2  ;;  %v4772_v5 = vpop.f32.mrf.mxu1 }
 0x147   : > { %v4389_v37 = vpop.f32.mrf.mxu0  ;;  %v6481_v17 = vadd.f32 %v4772_v5, %v6407_v47  ;;  %v4367_v47 = vadd.f32 %v6396_v27, %v6390_v45 }
 0x148   : > { %v2148_v22 = vpop.f32.mrf.mxu1 }
 0x149   : > { %v4390_v63 = vpop.f32.mrf.mxu0  ;;  %v6488_v33 = vadd.f32 %v6387_v3, %v2148_v22 }
 0x14a   : > { %4121 = vmatmul.mubr.msk.bf16.gmra.mxu0 %vm5600_vm4, %v6190_v25  ;;  %v4391_v11 = vadd.f32 %v4390_v63, %v4389_v37  ;;  %v4773_v40 = vpop.f32.mrf.mxu1 }
 0x14b   : > { %3049 = vmatprep.mubr.bf16.mxu0 %v6224_v46  ;;  %v4392_v2 = vpop.f32.mrf.mxu0  ;;  %v6496_v41 = vadd.f32 %v4773_v40, %v4373_v10  ;;  %v4379_v40 = vadd.f32 %v4378_v16, %v4377_v12 }
 0x14c   : > { %4025 = vmatmul.mubr.msk.bf16.gmra.mxu1 %vm5600_vm4, %v7078_v59  ;;  %v2151_v25 = vpop.f32.mrf.mxu1 }
 0x14d   : > { %4866 = vmatprep.mubr.bf16.mxu1 %v5770_v53  ;;  %v4393_v21 = vpop.f32.mrf.mxu0  ;;  %v6499_v3 = vadd.f32 %v4367_v47, %v2151_v25 }
 0x14e   : > { %v4394_v50 = vadd.f32 %v4393_v21, %v4392_v2  ;;  %v4776_v5 = vpop.f32.mrf.mxu1 }
 0x14f   : > { %v4395_v46 = vpop.f32.mrf.mxu0  ;;  %v6501_v37 = vadd.f32 %v4776_v5, %v4382_v32 }
 0x150   : > { %v2164_v22 = vpop.f32.mrf.mxu1 }
 0x151   : > { %v4396_v63 = vpop.f32.mrf.mxu0  ;;  %v6507_v45 = vadd.f32 %v6421_v34, %v2164_v22 }
 0x152   : > { %4124 = vmatmul.mubr.msk.bf16.gmra.mxu0 %vm5600_vm4, %v6227_v38  ;;  %v4397_v27 = vadd.f32 %v4396_v63, %v4395_v46  ;;  %v4777_v53 = vpop.f32.mrf.mxu1 }
 0x153   : > { %3057 = vmatprep.mubr.bf16.mxu0 %v6245_v48  ;;  %v4398_v10 = vpop.f32.mrf.mxu0  ;;  %v6511_v2 = vadd.f32 %v4777_v53, %v4385_v20 }
 0x154   : > { %4867 = vmatmul.mubr.bf16.vlgmr.msra.gmra.mxu1 %v5845_v31  ;;  %v2167_v32 = vpop.f32.mrf.mxu1 }
 0x155   : > { %4870 = vmatprep.mubr.bf16.mxu1 %v5987_v18  ;;  %v4399_v47 = vpop.f32.mrf.mxu0  ;;  %v6514_v25 = vadd.f32 %v4379_v40, %v2167_v32 }
 0x156   : > { %v4400_v38 = vadd.f32 %v4399_v47, %v4398_v10  ;;  %v4780_v21 = vpop.f32.mrf.mxu1 }
 0x157   : > { %v4401_v34 = vpop.f32.mrf.mxu0  ;;  %v6516_v5 = vadd.f32 %v4780_v21, %v4394_v50 }
 0x158   : > { %v2180_v46 = vpop.f32.mrf.mxu1 }
 0x159   : > { %v4402_v48 = vpop.f32.mrf.mxu0  ;;  %v6521_v31 = vadd.f32 %v4388_v58, %v2180_v46 }
 0x15a   : > { %4127 = vmatmul.mubr.msk.bf16.gmra.mxu0 %vm5600_vm4, %v6252_v0  ;;  %v4403_v12 = vadd.f32 %v4402_v48, %v4401_v34  ;;  %v4781_v18 = vpop.f32.mrf.mxu1 }
 0x15b   : > { %3065 = vmatprep.mubr.bf16.mxu0 %v6255_v28  ;;  %v6525_v16 = vadd.f32 %v4781_v18, %v4397_v27 }
 0x15c   : > { %4871 = vmatmul.mubr.bf16.gmra.mxu1 %v6032_v19  ;;  %v2183_v20 = vpop.f32.mrf.mxu1 }
 0x15d   : > { %4874 = vmatprep.mubr.bf16.mxu1 %v6113_v62  ;;  %v6528_v50 = vadd.f32 %v4391_v11, %v2183_v20 }
 0x15e   : > { %v4784_v22 = vpop.f32.mrf.mxu1 }
 0x160   : > { %v4404_v63 = vpop.f32.mrf.mxu0  ;;  %v2196_v53 = vpop.f32.mrf.mxu1 }
 0x161   : > { %v6533_v58 = vadd.f32 %v4400_v38, %v2196_v53 }
 0x162   : > { %4130 = vmatmul.mubr.msk.bf16.gmra.mxu0 %vm5600_vm4, %v6266_v57  ;;  %v4405_v0 = vpop.f32.mrf.mxu0  ;;  %v4785_v28 = vpop.f32.mrf.mxu1 }
 0x163   : > { %3073 = vmatprep.mubr.bf16.mxu0 %v7073_v51  ;;  %v4406_v19 = vadd.f32 %v4405_v0, %v4404_v63 }
 0x164   : > { %4875 = vmatmul.mubr.bf16.gmra.mxu1 %v6117_v15  ;;  %v4407_v62 = vpop.f32.mrf.mxu0  ;;  %v2199_v27 = vpop.f32.mrf.mxu1 }
 0x165   : > { %4878 = vmatprep.mubr.bf16.mxu1 %v6150_v61  ;;  %v6538_v11 = vadd.f32 %v4784_v22, %v4406_v19  ;;  %v6540_v40 = vadd.f32 %v4403_v12, %v2199_v27  ;;  %v7080_v19 = vld [vmem:[#allocation9_spill] sm:$0xff] }
 0x166   : > { %v4408_v10 = vpop.f32.mrf.mxu0 }
 0x167   : > { %v4409_v32 = vadd.f32 %v4408_v10, %v4407_v62 }
 0x169   : > { %v6542_v57 = vadd.f32 %v4785_v28, %v4409_v32 }
 0x16a   : > { %4133 = vmatmul.mubr.msk.bf16.gmra.mxu0 %vm5600_vm4, %v7074_v35 }
 0x16b   : > { %3081 = vmatprep.mubr.bf16.mxu0 %v7075_v9 }
 0x16c   : > { %4879 = vmatmul.mubr.bf16.gmra.mxu1 %v6195_v36 }
 0x16d   : > { %4882 = vmatprep.mubr.bf16.mxu1 %v6212_v26 }
 0x172   : > { %v4410_v15 = vpop.f32.mrf.mxu0  ;;  %4136 = vmatmul.mubr.msk.bf16.gmra.mxu0 %vm5600_vm4, %v7076_v39 }
 0x173   : > { %v4788_v61 = vpop.f32.mrf.mxu1  ;;  %3089 = vmatprep.mubr.bf16.mxu0 %v7077_v23 }
 0x174   : > { %4883 = vmatmul.mubr.bf16.gmra.mxu1 %v6232_v29  ;;  %v4411_v51 = vpop.f32.mrf.mxu0  ;;  %v7079_v29 = vld [vmem:[#allocation10_spill] sm:$0xff] }
 0x175   : > { %v4412_v47 = vadd.f32 %v4411_v51, %v4410_v15  ;;  %v2212_v38 = vpop.f32.mrf.mxu1  ;;  %4886 = vmatprep.mubr.bf16.mxu1 %v6242_v4 }
 0x176   : > { %v4413_v35 = vpop.f32.mrf.mxu0 }
 0x177   : > { %v6556_v9 = vadd.f32 %v4412_v47, %v2212_v38  ;;  %v4789_v36 = vpop.f32.mrf.mxu1 }
 0x178   : > { %v4414_v26 = vpop.f32.mrf.mxu0 }
 0x179   : > { %v4415_v21 = vadd.f32 %v4414_v26, %v4413_v35  ;;  %v2215_v34 = vpop.f32.mrf.mxu1  ;;  %v7081_v35 = vmov 0.0|0.0  }
 0x17a   : > { %v4416_v46 = vpop.f32.mrf.mxu0  ;;  %4139 = vmatmul.mubr.msk.bf16.gmra.mxu0 %vm5600_vm4, %v7078_v59 }
 0x17b   : > { %v6561_v39 = vadd.f32 %v4415_v21, %v2215_v34  ;;  %3097 = vmatprep.mubr.bf16.mxu0 %v7079_v29 }
 0x17c   : > { %v4792_v23 = vpop.f32.mrf.mxu1  ;;  %4887 = vmatmul.mubr.bf16.gmra.mxu1 %v6239_v54  ;;  %v4417_v4 = vpop.f32.mrf.mxu0 }
 0x17d   : > { %v4418_v48 = vadd.f32 %v4417_v4, %v4416_v46  ;;  %4890 = vmatprep.mubr.bf16.mxu1 %v6258_v55 }
 0x17e   : > { %v2228_v12 = vpop.f32.mrf.mxu1  ;;  %v4419_v18 = vpop.f32.mrf.mxu0 }
 0x17f   : > { %v6566_v20 = vadd.f32 %v4788_v61, %v4418_v48 }
 0x180   : > { %v4793_v22 = vpop.f32.mrf.mxu1  ;;  %v4420_v63 = vpop.f32.mrf.mxu0 }
 0x181   : > { %v4421_v53 = vadd.f32 %v4420_v63, %v4419_v18 }
 0x182   : > { %v2231_v0 = vpop.f32.mrf.mxu1  ;;  %v4422_v59 = vpop.f32.mrf.mxu0  ;;  %4142 = vmatmul.mubr.msk.bf16.gmra.mxu0 %vm5600_vm4, %v7080_v19 }
 0x183   : > { %v6571_v28 = vadd.f32 %v4789_v36, %v4421_v53  ;;  %3105 = vmatprep.mubr.bf16.mxu0 %v6271_v8 }
 0x184   : > { %v4796_v54 = vpop.f32.mrf.mxu1  ;;  %4891 = vmatmul.mubr.bf16.gmra.mxu1 %v6129_v14  ;;  %v4423_v55 = vpop.f32.mrf.mxu0  ;;  %v4439_v14 = vadd.f32 %v6402_v6, %v6400_v13 }
 0x185   : > { %v6576_v62 = vadd.f32 %v4796_v54, %v6416_v24  ;;  %v4424_v27 = vadd.f32 %v4423_v55, %v4422_v59  ;;  %4894 = vmatprep.mubr.bf16.mxu1 %v6165_v56 }
 0x186   : > { %v2244_v10 = vpop.f32.mrf.mxu1  ;;  %v4425_v32 = vpop.f32.mrf.mxu0 }
 0x187   : > { %v6581_v15 = vadd.f32 %v4424_v27, %v2228_v12  ;;  %v6584_v61 = vadd.f32 %v6398_v42, %v2244_v10 }
 0x188   : > { %v4797_v8 = vpop.f32.mrf.mxu1  ;;  %v4426_v51 = vpop.f32.mrf.mxu0 }
 0x189   : > { %v6588_v24 = vadd.f32 %v4797_v8, %v4445_v1  ;;  %v4427_v47 = vadd.f32 %v4426_v51, %v4425_v32 }
 0x18a   : > { %v2247_v38 = vpop.f32.mrf.mxu1  ;;  %v4428_v56 = vpop.f32.mrf.mxu0  ;;  %3106 = vmatmul.mubr.bf16.gmra.mxu0 %v7081_v35 }
 0x18b   : > { %v6591_v36 = vadd.f32 %v4427_v47, %v2231_v0  ;;  %v6593_v49 = vadd.f32 %v4439_v14, %v2247_v38 }
 0x18c   : > { %v4800_v60 = vpop.f32.mrf.mxu1  ;;  %4895 = vmatmul.mubr.bf16.gmra.mxu1 %v6269_v30  ;;  %v4429_v42 = vpop.f32.mrf.mxu0 }
 0x18d   : > { %v6597_v26 = vadd.f32 %v4800_v60, %v6471_v43  ;;  %v4430_v21 = vadd.f32 %v4429_v42, %v4428_v56 }
 0x18e   : > { %v2260_v13 = vpop.f32.mrf.mxu1  ;;  %v4431_v6 = vpop.f32.mrf.mxu0 }
 0x18f   : > { %v6599_v34 = vadd.f32 %v4792_v23, %v4430_v21  ;;  %v6602_v46 = vadd.f32 %v6447_v7, %v2260_v13 }
 0x190   : > { %v4801_v29 = vpop.f32.mrf.mxu1  ;;  %v4432_v4 = vpop.f32.mrf.mxu0 }
 0x191   : > { %v6605_v48 = vadd.f32 %v4801_v29, %v6478_v52  ;;  %v4433_v12 = vadd.f32 %v4432_v4, %v4431_v6 }
 0x192   : > { %v2263_v18 = vpop.f32.mrf.mxu1  ;;  %v4820_v30 = vpop.f32.mrf.mxu0 }
 0x193   : > { %7082 = vst [vmem:[#allocation8_spill] sm:$0xff] %v6605_v48  ;;  %v6607_v63 = vadd.f32 %v4793_v22, %v4433_v12  ;;  %v6610_v43 = vadd.f32 %v6450_v44, %v2263_v18 }
 0x194   : > { %v4498_v53 = vpop.f32.mrf.mxu1  ;;  %v2614_v0 = vpop.f32.mrf.mxu0 }
 0x196   : > { %v4499_v23 = vpop.f32.mrf.mxu1  ;;  %v4821_v59 = vpop.f32.mrf.mxu0 }
 0x197   : > { %v4500_v19 = vadd.f32 %v4499_v23, %v4498_v53 }
 0x198   : > { %v4501_v7 = vpop.f32.mrf.mxu1  ;;  %v2617_v54 = vpop.f32.mrf.mxu0 }
 0x199   : > { %v2454_v55 = vadd.f32 %v4500_v19, %v6488_v33 }
 0x19a   : > { %v4502_v27 = vpop.f32.mrf.mxu1  ;;  %v4824_v52 = vpop.f32.mrf.mxu0 }
 0x19b   : > { %v6613_v10 = vadd.f32 %v2614_v0, %v2454_v55  ;;  %v4503_v32 = vadd.f32 %v4502_v27, %v4501_v7 }
 0x19c   : > { %v4504_v1 = vpop.f32.mrf.mxu1  ;;  %v2630_v22 = vpop.f32.mrf.mxu0 }
 0x19d   : > { %v2457_v8 = vadd.f32 %v4503_v32, %v6499_v3 }
 0x19e   : > { %v4505_v44 = vpop.f32.mrf.mxu1  ;;  %v4825_v51 = vpop.f32.mrf.mxu0 }
 0x19f   : > { %v6616_v14 = vadd.f32 %v2617_v54, %v2457_v8  ;;  %v4506_v47 = vadd.f32 %v4505_v44, %v4504_v1 }
 0x1a0   : > { %v4507_v38 = vpop.f32.mrf.mxu1  ;;  %v2633_v56 = vpop.f32.mrf.mxu0 }
 0x1a1   : > { %v2462_v35 = vadd.f32 %v4506_v47, %v6481_v17 }
 0x1a2   : > { %v4508_v60 = vpop.f32.mrf.mxu1  ;;  %v4828_v33 = vpop.f32.mrf.mxu0 }
 0x1a3   : > { %v4509_v42 = vadd.f32 %v4508_v60, %v4507_v38  ;;  %v6619_v21 = vadd.f32 %v4820_v30, %v2462_v35 }
 0x1a4   : > { %v4510_v13 = vpop.f32.mrf.mxu1  ;;  %v2646_v6 = vpop.f32.mrf.mxu0 }
 0x1a5   : > { %v2465_v29 = vadd.f32 %v4509_v42, %v6496_v41 }
 0x1a6   : > { %v4511_v4 = vpop.f32.mrf.mxu1  ;;  %v4829_v3 = vpop.f32.mrf.mxu0 }
 0x1a7   : > { %v4512_v12 = vadd.f32 %v4511_v4, %v4510_v13  ;;  %v6622_v18 = vadd.f32 %v4821_v59, %v2465_v29 }
 0x1a8   : > { %v4513_v53 = vpop.f32.mrf.mxu1  ;;  %v2649_v0 = vpop.f32.mrf.mxu0 }
 0x1a9   : > { %v2470_v23 = vadd.f32 %v4512_v12, %v6507_v45 }
 0x1aa   : > { %v4514_v19 = vpop.f32.mrf.mxu1  ;;  %v6625_v17 = vpop.f32.mrf.mxu0 }
 0x1ab   : > { %v4515_v7 = vadd.f32 %v4514_v19, %v4513_v53  ;;  %v6627_v54 = vadd.f32 %v2630_v22, %v2470_v23 }
 0x1ac   : > { %v4516_v30 = vpop.f32.mrf.mxu1  ;;  %v2662_v55 = vpop.f32.mrf.mxu0 }
 0x1ad   : > { %v2473_v27 = vadd.f32 %v4515_v7, %v6514_v25 }
 0x1ae   : > { %v4517_v41 = vpop.f32.mrf.mxu1  ;;  %v6630_v32 = vpop.f32.mrf.mxu0 }
 0x1af   : > { %v4518_v1 = vadd.f32 %v4517_v41, %v4516_v30  ;;  %v6632_v59 = vadd.f32 %v2633_v56, %v2473_v27 }
 0x1b0   : > { %v4519_v8 = vpop.f32.mrf.mxu1  ;;  %v2665_v44 = vpop.f32.mrf.mxu0 }
 0x1b1   : > { %v2478_v45 = vadd.f32 %v4518_v1, %v6501_v37 }
 0x1b2   : > { %v4520_v47 = vpop.f32.mrf.mxu1  ;;  %v6635_v38 = vpop.f32.mrf.mxu0 }
 0x1b3   : > { %v4521_v35 = vadd.f32 %v4520_v47, %v4519_v8  ;;  %v6637_v22 = vadd.f32 %v4824_v52, %v2478_v45 }
 0x1b4   : > { %v4522_v60 = vpop.f32.mrf.mxu1  ;;  %v6639_v42 = vpop.f32.mrf.mxu0 }
 0x1b5   : > { %v2481_v25 = vadd.f32 %v4521_v35, %v6511_v2 }
 0x1b6   : > { %v4523_v13 = vpop.f32.mrf.mxu1  ;;  %v6642_v29 = vpop.f32.mrf.mxu0 }
 0x1b7   : > { %v4524_v56 = vadd.f32 %v4523_v13, %v4522_v60  ;;  %v6644_v4 = vadd.f32 %v4825_v51, %v2481_v25 }
 0x1b8   : > { %v4525_v12 = vpop.f32.mrf.mxu1  ;;  %v6646_v53 = vpop.f32.mrf.mxu0 }
 0x1b9   : > { %v2486_v37 = vadd.f32 %v4524_v56, %v6521_v31 }
 0x1ba   : > { %v4526_v23 = vpop.f32.mrf.mxu1  ;;  %v6649_v19 = vpop.f32.mrf.mxu0 }
 0x1bb   : > { %v4527_v52 = vadd.f32 %v4526_v23, %v4525_v12  ;;  %v6651_v7 = vadd.f32 %v2646_v6, %v2486_v37 }
 0x1bc   : > { %v4528_v30 = vpop.f32.mrf.mxu1  ;;  %v6653_v27 = vpop.f32.mrf.mxu0 }
 0x1bd   : > { %v2489_v2 = vadd.f32 %v4527_v52, %v6528_v50 }
 0x1be   : > { %v4529_v41 = vpop.f32.mrf.mxu1  ;;  %v6656_v1 = vpop.f32.mrf.mxu0 }
 0x1bf   : > { %v4530_v51 = vadd.f32 %v4529_v41, %v4528_v30  ;;  %v6658_v8 = vadd.f32 %v2649_v0, %v2489_v2 }
 0x1c0   : > { %v4531_v45 = vpop.f32.mrf.mxu1  ;;  %v6660_v47 = vpop.f32.mrf.mxu0 }
 0x1c1   : > { %v2494_v31 = vadd.f32 %v4530_v51, %v6516_v5 }
 0x1c2   : > { %v4532_v35 = vpop.f32.mrf.mxu1  ;;  %v6663_v60 = vpop.f32.mrf.mxu0 }
 0x1c3   : > { %v4533_v6 = vadd.f32 %v4532_v35, %v4531_v45  ;;  %v6665_v25 = vadd.f32 %v4828_v33, %v2494_v31 }
 0x1c4   : > { %v4534_v13 = vpop.f32.mrf.mxu1  ;;  %v6667_v56 = vpop.f32.mrf.mxu0 }
 0x1c5   : > { %v2497_v50 = vadd.f32 %v4533_v6, %v6525_v16 }
 0x1c6   : > { %v4535_v12 = vpop.f32.mrf.mxu1  ;;  %v6670_v37 = vpop.f32.mrf.mxu0 }
 0x1c7   : > { %v4536_v0 = vadd.f32 %v4535_v12, %v4534_v13  ;;  %v6672_v23 = vadd.f32 %v4829_v3, %v2497_v50 }
 0x1c8   : > { %v4537_v52 = vpop.f32.mrf.mxu1  ;;  %v6674_v30 = vpop.f32.mrf.mxu0 }
 0x1c9   : > { %v2502_v5 = vadd.f32 %v4536_v0, %v6533_v58 }
 0x1ca   : > { %v4538_v2 = vpop.f32.mrf.mxu1  ;;  %v6677_v41 = vpop.f32.mrf.mxu0 }
 0x1cb   : > { %7083 = vst [vmem:[#allocation11_spill] sm:$0xff] %v6677_v41  ;;  %v4539_v33 = vadd.f32 %v4538_v2, %v4537_v52  ;;  %v6679_v51 = vadd.f32 %v2662_v55, %v2502_v5 }
 0x1cc   : > { %v4540_v45 = vpop.f32.mrf.mxu1  ;;  %v6681_v31 = vpop.f32.mrf.mxu0 }
 0x1cd   : > { %v2505_v16 = vadd.f32 %v4539_v33, %v6540_v40 }
 0x1ce   : > { %v4541_v35 = vpop.f32.mrf.mxu1  ;;  %v6684_v6 = vpop.f32.mrf.mxu0 }
 0x1cf   : > { %7084 = vst [vmem:[#allocation12_spill] sm:$0xff] %v6684_v6  ;;  %v4542_v3 = vadd.f32 %v4541_v35, %v4540_v45  ;;  %v6686_v13 = vadd.f32 %v2665_v44, %v2505_v16 }
 0x1d0   : > { %v4543_v50 = vpop.f32.mrf.mxu1  ;;  %v6688_v12 = vpop.f32.mrf.mxu0 }
 0x1d1   : > { %v2510_v58 = vadd.f32 %v4542_v3, %v6538_v11 }
 0x1d2   : > { %v4544_v0 = vpop.f32.mrf.mxu1  ;;  %v4634_v52 = vpop.f32.mrf.mxu0 }
 0x1d3   : > { %v4545_v55 = vadd.f32 %v4544_v0, %v4543_v50  ;;  %v6692_v5 = vadd.f32 %v6625_v17, %v2510_v58 }
 0x1d4   : > { %v4546_v2 = vpop.f32.mrf.mxu1  ;;  %v4635_v48 = vpop.f32.mrf.mxu0 }
 0x1d5   : > { %v2513_v40 = vadd.f32 %v4545_v55, %v6542_v57  ;;  %v6695_v33 = vadd.f32 %v4635_v48, %v4634_v52 }
 0x1d6   : > { %v4547_v45 = vpop.f32.mrf.mxu1  ;;  %v6697_v44 = vpop.f32.mrf.mxu0 }
 0x1d7   : > { %v4548_v16 = vadd.f32 %v4547_v45, %v4546_v2  ;;  %v6700_v35 = vadd.f32 %v6630_v32, %v2513_v40 }
 0x1d8   : > { %v4549_v11 = vpop.f32.mrf.mxu1  ;;  %v6702_v3 = vpop.f32.mrf.mxu0 }
 0x1d9   : > { %v2518_v50 = vadd.f32 %v4548_v16, %v6556_v9 }
 0x1da   : > { %v4550_v17 = vpop.f32.mrf.mxu1  ;;  %v6705_v58 = vpop.f32.mrf.mxu0 }
 0x1db   : > { %v4551_v0 = vadd.f32 %v4550_v17, %v4549_v11  ;;  %v6708_v57 = vadd.f32 %v6639_v42, %v2518_v50 }
 0x1dc   : > { %v4552_v48 = vpop.f32.mrf.mxu1  ;;  %v6710_v52 = vpop.f32.mrf.mxu0 }
 0x1dd   : > { %v2521_v55 = vadd.f32 %v4551_v0, %v6561_v39 }
 0x1de   : > { %v4553_v2 = vpop.f32.mrf.mxu1  ;;  %v6713_v32 = vpop.f32.mrf.mxu0 }
 0x1df   : > { %v4554_v40 = vadd.f32 %v4553_v2, %v4552_v48  ;;  %v6716_v45 = vadd.f32 %v6646_v53, %v2521_v55 }
 0x1e0   : > { %v4555_v9 = vpop.f32.mrf.mxu1  ;;  %v6718_v16 = vpop.f32.mrf.mxu0 }
 0x1e1   : > { %7085 = vst [vmem:[#allocation3_spill] sm:$0xff] %v6716_v45  ;;  %v2526_v11 = vadd.f32 %v4554_v40, %v6566_v20 }
 0x1e2   : > { %v4556_v17 = vpop.f32.mrf.mxu1  ;;  %v6721_v42 = vpop.f32.mrf.mxu0 }
 0x1e3   : > { %v4557_v50 = vadd.f32 %v4556_v17, %v4555_v9  ;;  %v6724_v6 = vadd.f32 %v6635_v38, %v2526_v11 }
 0x1e4   : > { %v4558_v39 = vpop.f32.mrf.mxu1  ;;  %v6726_v0 = vpop.f32.mrf.mxu0 }
 0x1e5   : > { %v2529_v48 = vadd.f32 %v4557_v50, %v6571_v28 }
 0x1e6   : > { %v4559_v2 = vpop.f32.mrf.mxu1  ;;  %v6729_v53 = vpop.f32.mrf.mxu0 }
 0x1e7   : > { %v4560_v55 = vadd.f32 %v4559_v2, %v4558_v39  ;;  %v6732_v41 = vadd.f32 %v6642_v29, %v2529_v48 }
 0x1e8   : > { %v4561_v20 = vpop.f32.mrf.mxu1  ;;  %v6734_v40 = vpop.f32.mrf.mxu0 }
 0x1e9   : > { %7086 = vst [vmem:[#allocation2_spill] sm:$0xff] %v6732_v41  ;;  %v2534_v9 = vadd.f32 %v4560_v55, %v6581_v15 }
 0x1ea   : > { %v4562_v17 = vpop.f32.mrf.mxu1  ;;  %v6737_v38 = vpop.f32.mrf.mxu0 }
 0x1eb   : > { %v4563_v11 = vadd.f32 %v4562_v17, %v4561_v20  ;;  %v6740_v45 = vadd.f32 %v6653_v27, %v2534_v9 }
 0x1ec   : > { %v4564_v28 = vpop.f32.mrf.mxu1  ;;  %v6742_v50 = vpop.f32.mrf.mxu0 }
 0x1ed   : > { %7087 = vst [vmem:[#allocation5_spill] sm:$0xff] %v6740_v45  ;;  %v2537_v39 = vadd.f32 %v4563_v11, %v6591_v36 }
 0x1ee   : > { %v4565_v2 = vpop.f32.mrf.mxu1  ;;  %v6745_v29 = vpop.f32.mrf.mxu0 }
 0x1ef   : > { %v4566_v48 = vadd.f32 %v4565_v2, %v4564_v28  ;;  %v6748_v41 = vadd.f32 %v6660_v47, %v2537_v39 }
 0x1f0   : > { %v4567_v15 = vpop.f32.mrf.mxu1  ;;  %v6750_v55 = vpop.f32.mrf.mxu0 }
 0x1f1   : > { %7088 = vst [vmem:[#allocation4_spill] sm:$0xff] %v6748_v41  ;;  %v2542_v20 = vadd.f32 %v4566_v48, %v6599_v34 }
 0x1f2   : > { %v4568_v17 = vpop.f32.mrf.mxu1  ;;  %v6753_v27 = vpop.f32.mrf.mxu0 }
 0x1f3   : > { %v4569_v9 = vadd.f32 %v4568_v17, %v4567_v15  ;;  %v6756_v45 = vadd.f32 %v6649_v19, %v2542_v20 }
 0x1f4   : > { %v4570_v36 = vpop.f32.mrf.mxu1  ;;  %v6758_v11 = vpop.f32.mrf.mxu0 }
 0x1f5   : > { %7089 = vst [vmem:[#allocation7_spill] sm:$0xff] %v6756_v45  ;;  %v2545_v28 = vadd.f32 %v4569_v9, %v6607_v63 }
 0x1f6   : > { %v4571_v2 = vpop.f32.mrf.mxu1  ;;  %v6761_v47 = vpop.f32.mrf.mxu0 }
 0x1f7   : > { %v4572_v39 = vadd.f32 %v4571_v2, %v4570_v36  ;;  %v6764_v41 = vadd.f32 %v6656_v1, %v2545_v28 }
 0x1f8   : > { %v4573_v34 = vpop.f32.mrf.mxu1  ;;  %v6766_v48 = vpop.f32.mrf.mxu0 }
 0x1f9   : > { %7090 = vst [vmem:[#allocation6_spill] sm:$0xff] %v6764_v41  ;;  %v2550_v15 = vadd.f32 %v4572_v39, %v6584_v61 }
 0x1fa   : > { %v4574_v17 = vpop.f32.mrf.mxu1  ;;  %v6769_v19 = vpop.f32.mrf.mxu0 }
 0x1fb   : > { %v4575_v20 = vadd.f32 %v4574_v17, %v4573_v34  ;;  %v6772_v45 = vadd.f32 %v6667_v56, %v2550_v15 }
 0x1fc   : > { %v4576_v63 = vpop.f32.mrf.mxu1  ;;  %v6774_v9 = vpop.f32.mrf.mxu0 }
 0x1fd   : > { %7091 = vst [vmem:[#allocation10_spill] sm:$0xff] %v6772_v45  ;;  %v2553_v36 = vadd.f32 %v4575_v20, %v6593_v49 }
 0x1fe   : > { %v4577_v2 = vpop.f32.mrf.mxu1  ;;  %v6777_v1 = vpop.f32.mrf.mxu0 }
 0x1ff   : > { %v4578_v28 = vadd.f32 %v4577_v2, %v4576_v63  ;;  %v6780_v41 = vadd.f32 %v6674_v30, %v2553_v36 }
 0x200   : > { %v4579_v61 = vpop.f32.mrf.mxu1  ;;  %v6782_v39 = vpop.f32.mrf.mxu0 }
 0x201   : > { %7092 = vst [vmem:[#allocation9_spill] sm:$0xff] %v6780_v41  ;;  %v2558_v34 = vadd.f32 %v4578_v28, %v6576_v62 }
 0x202   : > { %v4580_v17 = vpop.f32.mrf.mxu1  ;;  %v6785_v56 = vpop.f32.mrf.mxu0 }
 0x203   : > { %v4581_v15 = vadd.f32 %v4580_v17, %v4579_v61  ;;  %v6788_v45 = vadd.f32 %v6663_v60, %v2558_v34 }
 0x204   : > { %v4582_v49 = vpop.f32.mrf.mxu1  ;;  %v6790_v20 = vpop.f32.mrf.mxu0 }
 0x205   : > { %7093 = vst [vmem:[#allocation13_spill] sm:$0xff] %v6788_v45  ;;  %v2561_v63 = vadd.f32 %v4581_v15, %v6588_v24 }
 0x206   : > { %v4583_v2 = vpop.f32.mrf.mxu1  ;;  %v6793_v30 = vpop.f32.mrf.mxu0 }
 0x207   : > { %v4584_v36 = vadd.f32 %v4583_v2, %v4582_v49  ;;  %v6796_v41 = vadd.f32 %v6670_v37, %v2561_v63 }
 0x208   : > { %v4585_v62 = vpop.f32.mrf.mxu1  ;;  %v6798_v28 = vpop.f32.mrf.mxu0 }
 0x209   : > { %7094 = vst [vmem:[#allocation14_spill] sm:$0xff] %v6796_v41  ;;  %v2566_v61 = vadd.f32 %v4584_v36, %v6602_v46 }
 0x20a   : > { %v4586_v17 = vpop.f32.mrf.mxu1  ;;  %v6801_v60 = vpop.f32.mrf.mxu0 }
 0x20b   : > { %v4587_v34 = vadd.f32 %v4586_v17, %v4585_v62  ;;  %v6804_v45 = vadd.f32 %v6681_v31, %v2566_v61 }
 0x20c   : > { %v4588_v24 = vpop.f32.mrf.mxu1  ;;  %v6806_v15 = vpop.f32.mrf.mxu0 }
 0x20d   : > { %7095 = vst [vmem:[#allocation15_spill] sm:$0xff] %v6804_v45  ;;  %v2569_v49 = vadd.f32 %v4587_v34, %v6610_v43  ;;  %v4642_v43 = vadd.f32 %v6710_v52, %v6705_v58  ;;  %v4639_v58 = vadd.f32 %v6702_v3, %v6697_v44  ;;  %v6844_v45 = vld [vmem:[%s319_s27] ss:$0 sm:$0xff] }
 0x20e   : > { %v4589_v2 = vpop.f32.mrf.mxu1  ;;  %v6809_v37 = vpop.f32.mrf.mxu0 }
 0x20f   : > { %v4590_v63 = vadd.f32 %v4589_v2, %v4588_v24  ;;  %v6812_v41 = vadd.f32 %v6688_v12, %v2569_v49  ;;  %v4645_v2 = vadd.f32 %v6718_v16, %v6713_v32 }
 0x210   : > { %v6814_v46 = vpop.f32.mrf.mxu1  ;;  %v6816_v36 = vpop.f32.mrf.mxu0 }
 0x211   : > { %7096 = vst [vmem:[#allocation16_spill] sm:$0xff] %v6812_v41  ;;  %7097 = vst [vmem:[#allocation17_spill] sm:$0xff] %v6814_v46  ;;  %v6819_v31 = vadd.f32 %v4590_v63, %v6597_v26 }
 0x212   : > { %v6821_v62 = vpop.f32.mrf.mxu1  ;;  %v6823_v61 = vpop.f32.mrf.mxu0 }
 0x213   : > { %7098 = vst [vmem:[#allocation18_spill] sm:$0xff] %v6819_v31  ;;  %7099 = vst [vmem:[#allocation19_spill] sm:$0xff] %v6821_v62 }
 0x214   : > { %v4868_v17 = vpop.f32.mrf.mxu1  ;;  %v6827_v34 = vpop.f32.mrf.mxu0 }
 0x215   : > { %v3157_v12 = vadd.f32 %v4868_v17, %v4642_v43 }
 0x216   : > { %v3148_v24 = vpop.f32.mrf.mxu1  ;;  %v6829_v49 = vpop.f32.mrf.mxu0 }
 0x217   : > { %v3149_v26 = vadd.f32 %v6695_v33, %v3148_v24  ;;  %v3277_v52 = vadd.f32 %v3157_v12, %v6619_v21  ;;  %v4654_v24 = vadd.f32 %v6742_v50, %v6737_v38  ;;  %v4648_v12 = vadd.f32 %v6726_v0, %v6721_v42 }
 0x218   : > { %v4869_v63 = vpop.f32.mrf.mxu1  ;;  %v6838_v41 = vpop.f32.mrf.mxu0 }
 0x219   : > { %v3275_v43 = vadd.f32 %v3149_v26, %v6613_v10  ;;  %v3160_v17 = vadd.f32 %v4869_v63, %v4645_v2  ;;  %v3316_v21 = vadd.f32 %v6844_v45, %v3277_v52 }
 0x21a   : > { %v3151_v32 = vpop.f32.mrf.mxu1  ;;  %v6846_v16 = vpop.f32.mrf.mxu0 }
 0x21b   : > { %v3278_v62 = vadd.f32 %v3160_v17, %v6622_v18  ;;  %v3152_v33 = vadd.f32 %v4639_v58, %v3151_v32  ;;  %v3314_v10 = vadd.f32 %v6844_v45, %v3275_v43 }
 0x21c   : > { %v4872_v46 = vpop.f32.mrf.mxu1  ;;  %v6852_v31 = vpop.f32.mrf.mxu0 }
 0x21d   : > { %v3317_v44 = vadd.f32 %v6844_v45, %v3278_v62  ;;  %v3276_v3 = vadd.f32 %v3152_v33, %v6616_v14  ;;  %v3173_v18 = vadd.f32 %v4872_v46, %v4654_v24  ;;  %v4651_v62 = vadd.f32 %v6734_v40, %v6729_v53 }
 0x21e   : > { %v3164_v38 = vpop.f32.mrf.mxu1  ;;  %v6865_v50 = vpop.f32.mrf.mxu0  ;;  %v4657_v14 = vadd.f32 %v6750_v55, %v6745_v29  ;;  %v3543_v58 = vmul.f32 %v3314_v10, %v3314_v10  ;;  %v3545_v40 = vmul.f32 %v3316_v21, %v3316_v21 }
 0x21f   : > { %v4251_v2 = vpack.c.bf16 %v3317_v44, %v3316_v21  ;;  %v3315_v26 = vadd.f32 %v6844_v45, %v3276_v3  ;;  %v3165_v42 = vadd.f32 %v4648_v12, %v3164_v38  ;;  %v3281_v17 = vadd.f32 %v3173_v18, %v6637_v22 }
 0x220   : > { %v4873_v0 = vpop.f32.mrf.mxu1  ;;  %v6872_v63 = vpop.f32.mrf.mxu0  ;;  %v4666_v12 = vadd.f32 %v6774_v9, %v6769_v19 }
 0x221   : > { %4331 = vst [vmem:[%s6863_s7 + $0x8] sm:$0xff] %v4251_v2   ;;  %v4246_v46 = vpack.c.bf16 %v3315_v26, %v3314_v10  ;;  %v3506_v52 = vadd.f32 %v3315_v26, %v3314_v10  ;;  %v3544_v43 = vmul.f32 %v3315_v26, %v3315_v26  ;;  %v3279_v32 = vadd.f32 %v3165_v42, %v6627_v54 }
 0x222   : > { %v3176_v33 = vadd.f32 %v4873_v0, %v4657_v14  ;;  %v3167_v24 = vpop.f32.mrf.mxu1  ;;  %v6877_v53 = vpop.f32.mrf.mxu0  ;;  %v3546_v54 = vmul.f32 %v3317_v44, %v3317_v44 }
 0x223   : > { %4247 = vst [vmem:[%s6863_s7] sm:$0xff] %v4246_v46   ;;  %v3507_v29 = vadd.f32 %v3506_v52, %v3316_v21  ;;  %v3575_v55 = vadd.f32 %v3544_v43, %v3543_v58  ;;  %v3168_v3 = vadd.f32 %v4651_v62, %v3167_v24  ;;  %v3318_v38 = vadd.f32 %v6844_v45, %v3279_v32 }
 0x224   : > { %v3282_v10 = vadd.f32 %v3176_v33, %v6644_v4  ;;  %v4876_v2 = vpop.f32.mrf.mxu1  ;;  %v6884_v22 = vpop.f32.mrf.mxu0  ;;  %v4660_v21 = vadd.f32 %v6758_v11, %v6753_v27  ;;  %v3320_v62 = vadd.f32 %v6844_v45, %v3281_v17  ;;  %v4669_v27 = vadd.f32 %v6782_v39, %v6777_v1 }
 0x225   : > { %v3576_v18 = vadd.f32 %v3575_v55, %v3545_v40  ;;  %v3508_v26 = vadd.f32 %v3507_v29, %v3317_v44  ;;  %v3280_v14 = vadd.f32 %v3168_v3, %v6632_v59  ;;  %v3189_v19 = vadd.f32 %v4876_v2, %v4666_v12 }
 0x226   : > { %v3321_v42 = vadd.f32 %v6844_v45, %v3282_v10  ;;  %v3180_v9 = vpop.f32.mrf.mxu1  ;;  %v6891_v0 = vpop.f32.mrf.mxu0  ;;  %v3547_v58 = vmul.f32 %v3318_v38, %v3318_v38  ;;  %v4663_v59 = vadd.f32 %v6766_v48, %v6761_v47  ;;  %v3549_v1 = vmul.f32 %v3320_v62, %v3320_v62 }
 0x227   : > { %v3509_v4 = vadd.f32 %v3508_v26, %v3318_v38  ;;  %v3577_v46 = vadd.f32 %v3576_v18, %v3546_v54  ;;  %v3319_v52 = vadd.f32 %v6844_v45, %v3280_v14  ;;  %v3181_v44 = vadd.f32 %v4660_v21, %v3180_v9 }
 0x228   : > { %v4261_v11 = vpack.c.bf16 %v3321_v42, %v3320_v62  ;;  %v4877_v43 = vpop.f32.mrf.mxu1  ;;  %v6898_v17 = vpop.f32.mrf.mxu0  ;;  %v3285_v29 = vadd.f32 %v3189_v19, %v6665_v25  ;;  %v4678_v2 = vadd.f32 %v6806_v15, %v6801_v60 }
 0x229   : > { %v3578_v32 = vadd.f32 %v3577_v46, %v3547_v58  ;;  %v4256_v33 = vpack.c.bf16 %v3319_v52, %v3318_v38  ;;  %v3510_v24 = vadd.f32 %v3509_v4, %v3319_v52  ;;  %v3548_v40 = vmul.f32 %v3319_v52, %v3319_v52 }
 0x22a   : > { %4333 = vst [vmem:[%s6863_s7 + $0x18] sm:$0xff] %v4261_v11   ;;  %v3283_v55 = vadd.f32 %v3181_v44, %v6651_v7  ;;  %v3192_v3 = vadd.f32 %v4877_v43, %v4669_v27  ;;  %v3183_v47 = vpop.f32.mrf.mxu1  ;;  %v6903_v48 = vpop.f32.mrf.mxu0  ;;  %v3550_v7 = vmul.f32 %v3321_v42, %v3321_v42  ;;  %v3324_v19 = vadd.f32 %v6844_v45, %v3285_v29 }
 0x22b   : > { %4332 = vst [vmem:[%s6863_s7 + $0x10] sm:$0xff] %v4256_v33   ;;  %v3511_v39 = vadd.f32 %v3510_v24, %v3320_v62  ;;  %v3579_v12 = vadd.f32 %v3578_v32, %v3548_v40  ;;  %v3184_v10 = vadd.f32 %v4663_v59, %v3183_v47  ;;  %v4672_v62 = vadd.f32 %v6790_v20, %v6785_v56 }
 0x22c   : > { %v3322_v38 = vadd.f32 %v6844_v45, %v3283_v55  ;;  %v3286_v54 = vadd.f32 %v3192_v3, %v6672_v23  ;;  %v4880_v18 = vpop.f32.mrf.mxu1  ;;  %v6910_v25 = vpop.f32.mrf.mxu0  ;;  %v4681_v56 = vadd.f32 %v6816_v36, %v6809_v37  ;;  %v3553_v37 = vmul.f32 %v3324_v19, %v3324_v19 }
 0x22d   : > { %v3580_v26 = vadd.f32 %v3579_v12, %v3549_v1  ;;  %v3512_v14 = vadd.f32 %v3511_v39, %v3321_v42  ;;  %v3284_v21 = vadd.f32 %v3184_v10, %v6658_v8  ;;  %v3205_v60 = vadd.f32 %v4880_v18, %v4678_v2 }
 0x22e   : > { %v3325_v9 = vadd.f32 %v6844_v45, %v3286_v54  ;;  %v3196_v15 = vpop.f32.mrf.mxu1  ;;  %v6917_v4 = vpop.f32.mrf.mxu0  ;;  %v3551_v58 = vmul.f32 %v3322_v38, %v3322_v38  ;;  %v4675_v8 = vadd.f32 %v6798_v28, %v6793_v30  ;;  %v4690_v3 = vadd.f32 %v6852_v31, %v6846_v16 }
 0x22f   : > { %v3513_v23 = vadd.f32 %v3512_v14, %v3322_v38  ;;  %v3581_v46 = vadd.f32 %v3580_v26, %v3550_v7  ;;  %v3323_v52 = vadd.f32 %v6844_v45, %v3284_v21  ;;  %v3197_v42 = vadd.f32 %v4672_v62, %v3196_v15 }
 0x230   : > { %v4271_v20 = vpack.c.bf16 %v3325_v9, %v3324_v19  ;;  %v4881_v59 = vpop.f32.mrf.mxu1  ;;  %v6924_v27 = vpop.f32.mrf.mxu0  ;;  %v3289_v33 = vadd.f32 %v3205_v60, %v6692_v5 }
 0x231   : > { %v3582_v11 = vadd.f32 %v3581_v46, %v3551_v58  ;;  %v4266_v44 = vpack.c.bf16 %v3323_v52, %v3322_v38  ;;  %v3514_v43 = vadd.f32 %v3513_v23, %v3323_v52  ;;  %v3552_v32 = vmul.f32 %v3323_v52, %v3323_v52 }
 0x232   : > { %4335 = vst [vmem:[%s6863_s7 + $0x28] sm:$0xff] %v4271_v20   ;;  %v3287_v24 = vadd.f32 %v3197_v42, %v6679_v51  ;;  %v3208_v40 = vadd.f32 %v4881_v59, %v4681_v56  ;;  %v3199_v30 = vpop.f32.mrf.mxu1  ;;  %v6929_v28 = vpop.f32.mrf.mxu0  ;;  %v3554_v51 = vmul.f32 %v3325_v9, %v3325_v9  ;;  %v4684_v38 = vadd.f32 %v6827_v34, %v6823_v61 }
 0x233   : > { %4334 = vst [vmem:[%s6863_s7 + $0x20] sm:$0xff] %v4266_v44   ;;  %v3515_v36 = vadd.f32 %v3514_v43, %v3324_v19  ;;  %v3583_v29 = vadd.f32 %v3582_v11, %v3552_v32  ;;  %v3200_v55 = vadd.f32 %v4675_v8, %v3199_v30  ;;  %v3328_v54 = vadd.f32 %v6844_v45, %v3289_v33  ;;  %v7100_v11 = vld [vmem:[#allocation2_spill] sm:$0xff] }
 0x234   : > { %v3326_v47 = vadd.f32 %v6844_v45, %v3287_v24  ;;  %v3290_v1 = vadd.f32 %v3208_v40, %v6700_v35  ;;  %v4884_v39 = vpop.f32.mrf.mxu1  ;;  %v6936_v5 = vpop.f32.mrf.mxu0  ;;  %v4693_v61 = vadd.f32 %v6872_v63, %v6865_v50  ;;  %v4702_v42 = vadd.f32 %v6910_v25, %v6903_v48  ;;  %v7101_v24 = vld [vmem:[#allocation3_spill] sm:$0xff] }
 0x235   : > { %v3584_v12 = vadd.f32 %v3583_v29, %v3553_v37  ;;  %v3516_v10 = vadd.f32 %v3515_v36, %v3325_v9  ;;  %v3288_v2 = vadd.f32 %v3200_v55, %v6686_v13  ;;  %v3221_v31 = vadd.f32 %v4884_v39, %v4690_v3 }
 0x236   : > { %v3329_v18 = vadd.f32 %v6844_v45, %v3290_v1  ;;  %v3212_v16 = vpop.f32.mrf.mxu1  ;;  %v6943_v7 = vpop.f32.mrf.mxu0  ;;  %v3555_v26 = vmul.f32 %v3326_v47, %v3326_v47  ;;  %v4687_v13 = vadd.f32 %v6838_v41, %v6829_v49  ;;  %v3557_v56 = vmul.f32 %v3328_v54, %v3328_v54 }
 0x237   : > { %v3517_v35 = vadd.f32 %v3516_v10, %v3326_v47  ;;  %v3585_v14 = vadd.f32 %v3584_v12, %v3554_v51  ;;  %v3327_v21 = vadd.f32 %v6844_v45, %v3288_v2  ;;  %v3213_v62 = vadd.f32 %v4684_v38, %v3212_v16 }
 0x238   : > { %v4281_v34 = vpack.c.bf16 %v3329_v18, %v3328_v54  ;;  %v4885_v19 = vpop.f32.mrf.mxu1  ;;  %v6950_v9 = vpop.f32.mrf.mxu0  ;;  %v3293_v46 = vadd.f32 %v3221_v31, %v6724_v6  ;;  %v3558_v6 = vmul.f32 %v3329_v18, %v3329_v18  ;;  %v4696_v30 = vadd.f32 %v6884_v22, %v6877_v53  ;;  %v7102_v31 = vld [vmem:[#allocation7_spill] sm:$0xff] }
 0x239   : > { %v3586_v60 = vadd.f32 %v3585_v14, %v3555_v26  ;;  %v4276_v15 = vpack.c.bf16 %v3327_v21, %v3326_v47  ;;  %v3518_v23 = vadd.f32 %v3517_v35, %v3327_v21  ;;  %v3556_v58 = vmul.f32 %v3327_v21, %v3327_v21  ;;  %v7103_v35 = vld [vmem:[#allocation5_spill] sm:$0xff] }
 0x23a   : > { %4337 = vst [vmem:[%s6863_s7 + $0x38] sm:$0xff] %v4281_v34   ;;  %v3291_v52 = vadd.f32 %v3213_v62, %v6708_v57  ;;  %v3224_v8 = vadd.f32 %v4885_v19, %v4693_v61  ;;  %v3215_v41 = vpop.f32.mrf.mxu1  ;;  %v4712_v49 = vpop.f32.mrf.mxu0  ;;  %v3332_v37 = vadd.f32 %v6844_v45, %v3293_v46  ;;  %v4699_v39 = vadd.f32 %v6898_v17, %v6891_v0  ;;  %v7104_v62 = vld [vmem:[#allocation6_spill] sm:$0xff] }
 0x23b   : > { %4336 = vst [vmem:[%s6863_s7 + $0x30] sm:$0xff] %v4276_v15   ;;  %v3519_v50 = vadd.f32 %v3518_v23, %v3328_v54  ;;  %v3587_v63 = vadd.f32 %v3586_v60, %v3556_v58  ;;  %v3216_v20 = vadd.f32 %v4687_v13, %v3215_v41  ;;  %v4705_v51 = vadd.f32 %v6924_v27, %v6917_v4 }
 0x23c   : > { %v3330_v59 = vadd.f32 %v6844_v45, %v3291_v52  ;;  %v3294_v44 = vadd.f32 %v3224_v8, %v7100_v11  ;;  %v4888_v43 = vpop.f32.mrf.mxu1  ;;  %v4713_v32 = vpop.f32.mrf.mxu0  ;;  %v3561_v17 = vmul.f32 %v3332_v37, %v3332_v37  ;;  %v7105_v52 = vld [vmem:[#allocation4_spill] sm:$0xff]  ;;  %v4708_v41 = vadd.f32 %v6936_v5, %v6929_v28 }
 0x23d   : > { %v3588_v33 = vadd.f32 %v3587_v63, %v3557_v56  ;;  %v3520_v57 = vadd.f32 %v3519_v50, %v3329_v18  ;;  %v3292_v40 = vadd.f32 %v3216_v20, %v7101_v24  ;;  %v3237_v29 = vadd.f32 %v4888_v43, %v4702_v42 }
 0x23e   : > { %v3333_v36 = vadd.f32 %v6844_v45, %v3294_v44  ;;  %v3228_v48 = vpop.f32.mrf.mxu1  ;;  %v4715_v25 = vpop.f32.mrf.mxu0  ;;  %v3559_v3 = vmul.f32 %v3330_v59, %v3330_v59  ;;  %v4714_v61 = vadd.f32 %v4713_v32, %v4712_v49  ;;  %v4711_v43 = vadd.f32 %v6950_v9, %v6943_v7 }
 0x23f   : > { %v3521_v55 = vadd.f32 %v3520_v57, %v3330_v59  ;;  %v3589_v47 = vadd.f32 %v3588_v33, %v3558_v6  ;;  %v3331_v1 = vadd.f32 %v6844_v45, %v3292_v40  ;;  %v3229_v22 = vadd.f32 %v4696_v30, %v3228_v48  ;;  %v7108_v48 = vld [vmem:[#allocation13_spill] sm:$0xff] }
 0x240   : > { %v4291_v53 = vpack.c.bf16 %v3333_v36, %v3332_v37  ;;  %v4889_v12 = vpop.f32.mrf.mxu1  ;;  %v4716_v10 = vpop.f32.mrf.mxu0  ;;  %v3297_v16 = vadd.f32 %v3237_v29, %v7102_v31  ;;  %v3562_v23 = vmul.f32 %v3333_v36, %v3333_v36 }
 0x241   : > { %v3590_v2 = vadd.f32 %v3589_v47, %v3559_v3  ;;  %v4286_v38 = vpack.c.bf16 %v3331_v1, %v3330_v59  ;;  %v3522_v54 = vadd.f32 %v3521_v55, %v3331_v1  ;;  %v3560_v18 = vmul.f32 %v3331_v1, %v3331_v1  ;;  %v7109_v3 = vld [vmem:[#allocation10_spill] sm:$0xff] }
 0x242   : > { %4339 = vst [vmem:[%s6863_s7 + $0x48] sm:$0xff] %v4291_v53   ;;  %v3295_v26 = vadd.f32 %v3229_v22, %v7103_v35  ;;  %v3240_v14 = vadd.f32 %v4889_v12, %v4705_v51  ;;  %v3231_v21 = vpop.f32.mrf.mxu1  ;;  %v4718_v0 = vpop.f32.mrf.mxu0  ;;  %v3336_v56 = vadd.f32 %v6844_v45, %v3297_v16  ;;  %v4717_v6 = vadd.f32 %v4716_v10, %v4715_v25  ;;  %v7110_v22 = vld [vmem:[#allocation17_spill] sm:$0xff]  ;;  %v7111_v12 = vld [vmem:[#allocation19_spill] sm:$0xff] }
 0x243   : > { %4338 = vst [vmem:[%s6863_s7 + $0x40] sm:$0xff] %v4286_v38   ;;  %v3523_v4 = vadd.f32 %v3522_v54, %v3332_v37  ;;  %v3591_v27 = vadd.f32 %v3590_v2, %v3560_v18  ;;  %v3232_v13 = vadd.f32 %v4699_v39, %v3231_v21  ;;  %v7106_v37 = vld [vmem:[#allocation18_spill] sm:$0xff]  ;;  %v4593_v10 = vadd.f32 %v7111_v12, %v7110_v22 }
 0x244   : > { %v3334_v34 = vadd.f32 %v6844_v45, %v3295_v26  ;;  %v3298_v19 = vadd.f32 %v3240_v14, %v7104_v62  ;;  %v4892_v60 = vpop.f32.mrf.mxu1  ;;  %v4719_v15 = vpop.f32.mrf.mxu0  ;;  %v3565_v25 = vmul.f32 %v3336_v56, %v3336_v56  ;;  %v7112_v54 = vld [vmem:[#allocation14_spill] sm:$0xff]  ;;  %v7113_v14 = vld [vmem:[#allocation9_spill] sm:$0xff] }
 0x245   : > { %v3592_v58 = vadd.f32 %v3591_v27, %v3561_v17  ;;  %v3524_v46 = vadd.f32 %v3523_v4, %v3333_v36  ;;  %v3296_v8 = vadd.f32 %v3232_v13, %v7105_v52  ;;  %v3253_v63 = vadd.f32 %v4892_v60, %v4714_v61  ;;  %v7107_v36 = vld [vmem:[#allocation11_spill] sm:$0xff] }
 0x246   : > { %v3337_v50 = vadd.f32 %v6844_v45, %v3298_v19  ;;  %v3244_v49 = vpop.f32.mrf.mxu1  ;;  %v4721_v20 = vpop.f32.mrf.mxu0  ;;  %v3563_v59 = vmul.f32 %v3334_v34, %v3334_v34  ;;  %v2735_v29 = vadd.f32 %v7107_v36, %v7106_v37  ;;  %v4720_v27 = vadd.f32 %v4719_v15, %v4718_v0 }
 0x247   : > { %v3525_v42 = vadd.f32 %v3524_v46, %v3334_v34  ;;  %v3593_v11 = vadd.f32 %v3592_v58, %v3562_v23  ;;  %v3335_v44 = vadd.f32 %v6844_v45, %v3296_v8  ;;  %v3245_v28 = vadd.f32 %v4708_v41, %v3244_v49  ;;  %v7114_v46 = vld [vmem:[#allocation8_spill] sm:$0xff] }
 0x248   : > { %v4301_v32 = vpack.c.bf16 %v3337_v50, %v3336_v56  ;;  %v4893_v5 = vpop.f32.mrf.mxu1  ;;  %v4722_v33 = vpop.f32.mrf.mxu0  ;;  %v3301_v55 = vadd.f32 %v3253_v63, %v7108_v48  ;;  %v3566_v2 = vmul.f32 %v3337_v50, %v3337_v50  ;;  %v2577_v52 = vadd.f32 %v4593_v10, %v7114_v46  ;;  %v7117_v48 = vld [vmem:[#allocation16_spill] sm:$0xff] }
 0x249   : > { %v3594_v57 = vadd.f32 %v3593_v11, %v3563_v59  ;;  %v4296_v24 = vpack.c.bf16 %v3335_v44, %v3334_v34  ;;  %v3526_v40 = vadd.f32 %v3525_v42, %v3335_v44  ;;  %v3564_v30 = vmul.f32 %v3335_v44, %v3335_v44  ;;  %v7115_v11 = vld [vmem:[#allocation15_spill] sm:$0xff] }
 0x24a   : > { %4341 = vst [vmem:[%s6863_s7 + $0x58] sm:$0xff] %v4301_v32   ;;  %v3299_v47 = vadd.f32 %v3245_v28, %v7109_v3  ;;  %v3256_v1 = vadd.f32 %v4893_v5, %v4717_v6  ;;  %v3247_v7 = vpop.f32.mrf.mxu1  ;;  %v4724_v9 = vpop.f32.mrf.mxu0  ;;  %v3340_v4 = vadd.f32 %v6844_v45, %v3301_v55  ;;  %v4723_v41 = vadd.f32 %v4722_v33, %v4721_v20 }
 0x24b   : > { %4340 = vst [vmem:[%s6863_s7 + $0x50] sm:$0xff] %v4296_v24   ;;  %v3527_v39 = vadd.f32 %v3526_v40, %v3336_v56  ;;  %v3595_v51 = vadd.f32 %v3594_v57, %v3564_v30  ;;  %v3248_v53 = vadd.f32 %v4711_v43, %v3247_v7  ;;  %v7116_v24 = vld [vmem:[#allocation12_spill] sm:$0xff] }
 0x24c   : > { %v3338_v38 = vadd.f32 %v6844_v45, %v3299_v47  ;;  %v3302_v18 = vadd.f32 %v3256_v1, %v7112_v54  ;;  %v4896_v31 = vpop.f32.mrf.mxu1  ;;  %v4725_v16 = vpop.f32.mrf.mxu0  ;;  %v3569_v6 = vmul.f32 %v3340_v4, %v3340_v4  ;;  %v2738_v20 = vadd.f32 %v7116_v24, %v2577_v52 }
 0x24d   : > { %v3596_v35 = vadd.f32 %v3595_v51, %v3565_v25  ;;  %v3528_v26 = vadd.f32 %v3527_v39, %v3337_v50  ;;  %v3300_v21 = vadd.f32 %v3248_v53, %v7113_v14  ;;  %v4726_v17 = vadd.f32 %v4725_v16, %v4724_v9 }
 0x24e   : > { %v3567_v13 = vmul.f32 %v3338_v38, %v3338_v38  ;;  %v3341_v61 = vadd.f32 %v6844_v45, %v3302_v18  ;;  %v3260_v34 = vpop.f32.mrf.mxu1  ;;  %v4727_v62 = vpop.f32.mrf.mxu0 }
 0x24f   : > { %v3529_v19 = vadd.f32 %v3528_v26, %v3338_v38  ;;  %v3597_v60 = vadd.f32 %v3596_v35, %v3566_v2  ;;  %v3339_v23 = vadd.f32 %v6844_v45, %v3300_v21  ;;  %v3269_v58 = vadd.f32 %v4896_v31, %v4726_v17 }
 0x250   : > { %v4311_v8 = vpack.c.bf16 %v3341_v61, %v3340_v4  ;;  %v3261_v56 = vadd.f32 %v4720_v27, %v3260_v34  ;;  %v4897_v50 = vpop.f32.mrf.mxu1  ;;  %v4728_v63 = vpop.f32.mrf.mxu0  ;;  %v3570_v30 = vmul.f32 %v3341_v61, %v3341_v61 }
 0x251   : > { %v3598_v0 = vadd.f32 %v3597_v60, %v3567_v13  ;;  %v4306_v15 = vpack.c.bf16 %v3339_v23, %v3338_v38  ;;  %v3530_v49 = vadd.f32 %v3529_v19, %v3339_v23  ;;  %v3568_v42 = vmul.f32 %v3339_v23, %v3339_v23 }
 0x252   : > { %4343 = vst [vmem:[%s6863_s7 + $0x68] sm:$0xff] %v4311_v8   ;;  %v3305_v59 = vadd.f32 %v3269_v58, %v2735_v29  ;;  %v3303_v44 = vadd.f32 %v3261_v56, %v7115_v11  ;;  %v4729_v43 = vadd.f32 %v4728_v63, %v4727_v62  ;;  %v3263_v32 = vpop.f32.mrf.mxu1 }
 0x253   : > { %4342 = vst [vmem:[%s6863_s7 + $0x60] sm:$0xff] %v4306_v15   ;;  %v3531_v28 = vadd.f32 %v3530_v49, %v3340_v4  ;;  %v3599_v5 = vadd.f32 %v3598_v0, %v3568_v42  ;;  %v3264_v57 = vadd.f32 %v4723_v41, %v3263_v32 }
 0x254   : > { %v3342_v33 = vadd.f32 %v6844_v45, %v3303_v44  ;;  %v3272_v40 = vadd.f32 %v4897_v50, %v4729_v43  ;;  %v3344_v55 = vadd.f32 %v6844_v45, %v3305_v59 }
 0x255   : > { %v3600_v37 = vadd.f32 %v3599_v5, %v3569_v6  ;;  %v3532_v36 = vadd.f32 %v3531_v28, %v3341_v61  ;;  %v3304_v29 = vadd.f32 %v3264_v57, %v7117_v48 }
 0x256   : > { %v3306_v3 = vadd.f32 %v3272_v40, %v2738_v20  ;;  %v3571_v1 = vmul.f32 %v3342_v33, %v3342_v33  ;;  %v3573_v10 = vmul.f32 %v3344_v55, %v3344_v55 }
 0x257   : > { %v3533_v47 = vadd.f32 %v3532_v36, %v3342_v33  ;;  %v3601_v7 = vadd.f32 %v3600_v37, %v3570_v30  ;;  %v3343_v9 = vadd.f32 %v6844_v45, %v3304_v29 }
 0x258   : > { %v3345_v25 = vadd.f32 %v6844_v45, %v3306_v3 }
 0x259   : > { %v3602_v39 = vadd.f32 %v3601_v7, %v3571_v1  ;;  %v4316_v51 = vpack.c.bf16 %v3343_v9, %v3342_v33  ;;  %v3534_v53 = vadd.f32 %v3533_v47, %v3343_v9  ;;  %v3572_v22 = vmul.f32 %v3343_v9, %v3343_v9 }
 0x25a   : > { %v4321_v12 = vpack.c.bf16 %v3345_v25, %v3344_v55  ;;  %v3574_v54 = vmul.f32 %v3345_v25, %v3345_v25 }
 0x25b   : > { %4344 = vst [vmem:[%s6863_s7 + $0x70] sm:$0xff] %v4316_v51   ;;  %v3535_v2 = vadd.f32 %v3534_v53, %v3344_v55  ;;  %v3603_v38 = vadd.f32 %v3602_v39, %v3572_v22 }
 0x25c   : > { %4345 = vst [vmem:[%s6863_s7 + $0x78] sm:$0xff] %v4321_v12  }
 0x25d   : > { %v3536_v18 = vadd.f32 %v3535_v2, %v3345_v25  ;;  %v3604_v31 = vadd.f32 %v3603_v38, %v3573_v10 }
 0x25f   : > { %v3537_v16 = vrot.slane %v3536_v18, 4  ;;  %v3605_v35 = vadd.f32 %v3604_v31, %v3574_v54 }
 0x261   : > { %v3538_v26 = vadd.f32 %v3537_v16, %v3536_v18  ;;  %v3606_v14 = vrot.slane %v3605_v35, 4 }
 0x263   : > { %v3539_v21 = vrot.slane %v3538_v26, 2  ;;  %v3607_v45 = vadd.f32 %v3606_v14, %v3605_v35 }
 0x265   : > { %v3540_v17 = vadd.f32 %v3539_v21, %v3538_v26  ;;  %v3608_v4 = vrot.slane %v3607_v45, 2 }
 0x267   : > { %v3541_v27 = vrot.slane %v3540_v17, 1  ;;  %v3609_v13 = vadd.f32 %v3608_v4, %v3607_v45 }
 0x269   : > { %v3610_v61 = vrot.slane %v3609_v13, 1  ;;  %v3542_v34 = vadd.f32 %v3541_v27, %v3540_v17 }
 0x26b   : > { %v3611_v62 = vadd.f32 %v3610_v61, %v3609_v13 }
 0x26d   : > { %v3613_v19 = vsel %vm3612_vm6, %v3542_v34, %v3611_v62 }
 0x26e   : > { %3614 = vst [vmem:[%s337_s12] sm:$0x3] %v3613_v19 }
 0x26f PF: > { %s17_s23 = sadd.s32 1, %s5230_s23   ;;  %s7118_s21 = smov %s5226_s22 }
 0x270   : > { %p14_p5 = scmp.ge.s32.totalorder %s17_s23, 4   ;;  %s7119_s22 = smov %s7121_s24 }
 0x272   :  { %16 = sbr.rel (!%p14_p5) target bundleno = 2 (0x2), region = 94 }

// kernel: _lambda_.7
= control target key start
LH: loop header
LB: loop body
LE: loop exit
PB: predicated region body
PF: predicated region fallthrough
CT: control target
= control target key end

     0   :  { %s5028_s21 = smov 0   ;;  %s5030_s22 = smov 0   ;;  %s6806_s0 = inlined_call_operand.vmem [shape: bf16[2,18,18,128], index: 0, kind: input, shape index: {}]   ;;  %s6807_s1 = inlined_call_operand.vmem [shape: f32[2,1,128], index: 1, kind: input, shape index: {}]   ;;  %s6808_s2 = inlined_call_operand.vmem [shape: f32[2,1,128], index: 2, kind: input, shape index: {}]   ;;  %s6809_s3 = inlined_call_operand.vmem [shape: f32[1,1,128], index: 3, kind: input, shape index: {}]   ;;  %s6810_s4 = inlined_call_operand.vmem [shape: bf16[3,384,128], index: 4, kind: input, shape index: {}]   ;;  %s6811_s5 = inlined_call_operand.vmem [shape: bf16[2,16,16,128], index: 5, kind: input, shape index: {}]   ;;  %s6812_s6 = inlined_call_operand.vmem [shape: f32[2,16,16,128], index: 6, kind: output, shape index: {}]  }
   0x1   :  { %s5032_s23 = smov 0  }
   0x2 LB: > { %s28_s24 = sadd.s32 1, %s4984_s22  ;;  %p3612_p0 = scmp.ge.s32.totalorder %s4988_s23, 1  ;;  %s4988_s23 = sphi %s5032_s23, %s16_s23   ;;  %s4984_s22 = sphi %s5030_s22, %s6907_s22   ;;  %s4980_s21 = sphi %s5028_s21, %s6906_s21  }
   0x3   : > { %p30_p1 = scmp.ge.s32.totalorder %s28_s24, 2  ;;  %p260_p2 = scmp.lt.s32.totalorder %s4988_s23, 3 }
   0x5   : > { %s6909_s24 = smov (%p30_p1, %s28_s24), 0  ;;  %p261_p3 = pnand %p3612_p0, %p260_p2 }
   0x7   : > { %264 = sbr.rel (%p261_p3) target bundleno = 604 (0x25c), region = 44 }
   0xc   : > { %v4700_v0 = vld [vmem:[%s6810_s4 + $0x138] sm:$0xff]   ;;  %p311_p4 = scmp.lt.s32.totalorder %s4980_s21, 1  ;;  %v4702_v2 = vld [vmem:[%s6810_s4 + $0x130] sm:$0xff]   ;;  %v4704_v4 = vld [vmem:[%s6810_s4 + $0x128] sm:$0xff]   ;;  %v975_v28 = vlaneseq  ;;  %vm1393_vm2 = vsmask.f32 7424 }
   0xd   : > { %v4701_v1 = vld [vmem:[%s6810_s4 + $0xf8] sm:$0xff]   ;;  %4104 = vmatprep.subr.bf16.mxu0 %v4700_v0  ;;  %4656 = vmatprep.subr.bf16.mxu1 %v4700_v0  ;;  %v4703_v3 = vld [vmem:[%s6810_s4 + $0xf0] sm:$0xff]   ;;  %v4705_v5 = vld [vmem:[%s6810_s4 + $0xe8] sm:$0xff]   ;;  %vm4990_vm3 = vmmov 1   ;;  %vm1634_vm5 = vcmask 1046528  }
   0xe   : > { %4105 = vmatpush3.bf16.msra.mxu0 %v4701_v1  ;;  %4664 = vmatpush3.bf16.msra.mxu1 %v4701_v1  ;;  %s6911_s21 = smov (!%p311_p4, %s4980_s21), 1  ;;  %v4706_v6 = vld [vmem:[%s6810_s4 + $0x120] sm:$0xff]   ;;  %v4708_v8 = vld [vmem:[%s6810_s4 + $0x118] sm:$0xff]   ;;  %v4710_v10 = vld [vmem:[%s6810_s4 + $0x110] sm:$0xff]  }
   0xf   : > { %4106 = vmatprep.subr.bf16.mxu0 %v4702_v2  ;;  %4657 = vmatprep.subr.bf16.mxu1 %v4702_v2  ;;  %s4672_s15 = smul.u32 216, %s6911_s21  ;;  %v4707_v7 = vld [vmem:[%s6810_s4 + $0xe0] sm:$0xff]   ;;  %s5085_s29 = scalar_lea.vmem %s6807_s1, %s6911_s21  ;;  %v4709_v9 = vld [vmem:[%s6810_s4 + $0xd8] sm:$0xff]   ;;  %v4711_v22 = vld [vmem:[%s6810_s4 + $0xd0] sm:$0xff]  }
  0x10   : > { %s5094_s10 = scalar_lea.vmem %s6808_s2, %s6911_s21  ;;  %v5102_v13 = vld [vmem:[%s5085_s29] ss:$0 sm:$0xff]  ;;  %v4712_v27 = vld [vmem:[%s6810_s4 + $0x108] sm:$0xff]   ;;  %v5167_v60 = vld [vmem:[%s6810_s4 + $0xb8] sm:$0xff]   ;;  %s3983_s20 = sshll.u32 %s6911_s21, 7 }
  0x11   : > { %s5079_s26 = scalar_lea.vmem %s6806_s0, %s4672_s15  ;;  %v5105_v17 = vld [vmem:[%s5094_s10] ss:$0 sm:$0xff]  ;;  %v4713_v31 = vld [vmem:[%s6810_s4 + $0xc8] sm:$0xff]   ;;  %v5177_v1 = vld [vmem:[%s6810_s4 + $0x178] sm:$0xff]   ;;  %s3984_s7 = sshll.u32 %s6911_s21, 8 }
  0x12   : > { %4107 = vmatpush3.bf16.msra.mxu0 %v4703_v3  ;;  %4665 = vmatpush3.bf16.msra.mxu1 %v4703_v3  ;;  %v352_v11 = vld [vmem:[%s5079_s26 + $0xc] sm:$0xff]   ;;  %v354_v12 = vld [vmem:[%s5079_s26 + $0x14] sm:$0x1]  ;;  %v388_v18 = vld [vmem:[%s5079_s26 + $0x9c] sm:$0xff]   ;;  %s6607_s9 = scalar_lea.vmem %s6812_s6, %s3984_s7 }
  0x13   : > { %4108 = vmatprep.subr.bf16.mxu0 %v4704_v4  ;;  %4658 = vmatprep.subr.bf16.mxu1 %v4704_v4  ;;  %v406_v14 = vunpack.c.l.bf16 %v352_v11  ;;  %v407_v15 = vunpack.c.h.bf16 %v352_v11  ;;  %v408_v16 = vunpack.c.l.bf16 %v354_v12  ;;  %v390_v19 = vld [vmem:[%s5079_s26 + $0xa4] sm:$0x1]  ;;  %v442_v20 = vunpack.c.l.bf16 %v388_v18  ;;  %v4081_v36 = vld [vmem:[%s5079_s26 + $0x18] sm:$0xff]   ;;  %v357_v37 = vld [vmem:[%s5079_s26 + $0x20] sm:$0x1] }
  0x14   : > { %v443_v21 = vunpack.c.h.bf16 %v388_v18  ;;  %v444_v26 = vunpack.c.l.bf16 %v390_v19  ;;  %v4714_v38 = vld [vmem:[%s6810_s4 + $0x100] sm:$0xff]   ;;  %v3987_v41 = vunpack.c.l.bf16 %v4081_v36  ;;  %v3988_v42 = vunpack.c.h.bf16 %v4081_v36  ;;  %v4087_v43 = vld [vmem:[%s5079_s26 + $0xa8] sm:$0xff]   ;;  %v393_v44 = vld [vmem:[%s5079_s26 + $0xb0] sm:$0x1] }
  0x15   : > { %v467_v23 = vmul.f32 %v5102_v13, %v406_v14  ;;  %v468_v24 = vmul.f32 %v5102_v13, %v407_v15  ;;  %v469_v25 = vmul.f32 %v5102_v13, %v408_v16  ;;  %v503_v29 = vmul.f32 %v5102_v13, %v442_v20  ;;  %v4715_v59 = vld [vmem:[%s6810_s4 + $0xc0] sm:$0xff]  }
  0x16   : > { %4109 = vmatpush3.bf16.msra.mxu0 %v4705_v5  ;;  %4666 = vmatpush3.bf16.msra.mxu1 %v4705_v5  ;;  %v504_v30 = vmul.f32 %v5102_v13, %v443_v21  ;;  %v505_v35 = vmul.f32 %v5102_v13, %v444_v26  ;;  %v411_v51 = vunpack.c.l.bf16 %v357_v37  ;;  %v470_v52 = vmul.f32 %v3987_v41, %v5102_v13  ;;  %v358_v0 = vld [vmem:[%s5079_s26 + $0x24] sm:$0xff]   ;;  %v360_v5 = vld [vmem:[%s5079_s26 + $0x2c] sm:$0x1]  ;;  %v396_v21 = vld [vmem:[%s5079_s26 + $0xbc] sm:$0x1] }
  0x17   : > { %4110 = vmatprep.subr.bf16.mxu0 %v4706_v6  ;;  %4659 = vmatprep.subr.bf16.mxu1 %v4706_v6  ;;  %v5124_v32 = vadd.f32 %v5105_v17, %v467_v23  ;;  %v5127_v33 = vadd.f32 %v5105_v17, %v468_v24  ;;  %v5130_v34 = vadd.f32 %v5105_v17, %v469_v25  ;;  %v4011_v55 = vunpack.c.l.bf16 %v4087_v43  ;;  %v394_v6 = vld [vmem:[%s5079_s26 + $0xb4] sm:$0xff]  }
  0x18   : > { %v5139_v39 = vadd.f32 %v5105_v17, %v503_v29  ;;  %v5142_v40 = vadd.f32 %v5105_v17, %v504_v30  ;;  %v5150_v48 = vadd.f32 %v5105_v17, %v505_v35  ;;  %v471_v54 = vmul.f32 %v3988_v42, %v5102_v13  ;;  %v4082_v29 = vld [vmem:[%s5079_s26 + $0x30] sm:$0xff]   ;;  %v363_v41 = vld [vmem:[%s5079_s26 + $0x38] sm:$0x1] }
  0x19   : > { %v3623_v45 = vmul.f32 -1.442695, %v5124_v32  ;;  %v3624_v46 = vmul.f32 -1.442695, %v5127_v33  ;;  %v3625_v47 = vmul.f32 -1.442695, %v5130_v34  ;;  %v472_v56 = vmul.f32 %v5102_v13, %v411_v51 }
  0x1a   : > { %4111 = vmatpush3.bf16.msra.mxu0 %v4707_v7  ;;  %4667 = vmatpush3.bf16.msra.mxu1 %v4707_v7  ;;  %v3659_v49 = vmul.f32 -1.442695, %v5139_v39  ;;  %v3660_v50 = vmul.f32 -1.442695, %v5142_v40  ;;  %v3661_v53 = vmul.f32 -1.442695, %v5150_v48  ;;  %v5159_v57 = vadd.f32 %v5105_v17, %v470_v52 }
  0x1b   : > { %4112 = vmatprep.subr.bf16.mxu0 %v4708_v8  ;;  %4660 = vmatprep.subr.bf16.mxu1 %v4708_v8  ;;  %4772 = vpow2.f32 %v3623_v45  ;;  %v4012_v58 = vunpack.c.h.bf16 %v4087_v43  ;;  %v5170_v61 = vadd.f32 %v5105_v17, %v471_v54  ;;  %v447_v62 = vunpack.c.l.bf16 %v393_v44 }
  0x1c   : > { %4774 = vpow2.f32 %v3624_v46  ;;  %v506_v63 = vmul.f32 %v4011_v55, %v5102_v13  ;;  %v5180_v2 = vadd.f32 %v5105_v17, %v472_v56  ;;  %v3626_v3 = vmul.f32 -1.442695, %v5159_v57 }
  0x1d   : > { %4776 = vpow2.f32 %v3625_v47  ;;  %v507_v4 = vmul.f32 %v4012_v58, %v5102_v13  ;;  %v3627_v7 = vmul.f32 -1.442695, %v5170_v61  ;;  %v508_v8 = vmul.f32 %v5102_v13, %v447_v62  ;;  %v4088_v62 = vld [vmem:[%s5079_s26 + $0xc0] sm:$0xff]  }
  0x1e   : > { %4113 = vmatpush3.bf16.msra.mxu0 %v4709_v9  ;;  %4668 = vmatpush3.bf16.msra.mxu1 %v4709_v9  ;;  %4778 = vpow2.f32 %v3659_v49  ;;  %v5189_v9 = vadd.f32 %v5105_v17, %v506_v63  ;;  %v412_v12 = vunpack.c.l.bf16 %v358_v0  ;;  %v413_v16 = vunpack.c.h.bf16 %v358_v0 }
  0x1f   : > { %4114 = vmatprep.subr.bf16.mxu0 %v4710_v10  ;;  %4661 = vmatprep.subr.bf16.mxu1 %v4710_v10  ;;  %4780 = vpow2.f32 %v3660_v50  ;;  %v3628_v10 = vmul.f32 -1.442695, %v5180_v2  ;;  %v5193_v11 = vadd.f32 %v5105_v17, %v507_v4  ;;  %v5196_v14 = vadd.f32 %v5105_v17, %v508_v8  ;;  %v399_v8 = vld [vmem:[%s5079_s26 + $0xc8] sm:$0x1] }
  0x20   : > { %4782 = vpow2.f32 %v3661_v53  ;;  %v3662_v15 = vmul.f32 -1.442695, %v5189_v9  ;;  %v414_v19 = vunpack.c.l.bf16 %v360_v5  ;;  %v473_v20 = vmul.f32 %v5102_v13, %v412_v12 }
  0x21   : > { %4784 = vpow2.f32 %v3626_v3  ;;  %v3663_v18 = vmul.f32 -1.442695, %v5193_v11  ;;  %v474_v23 = vmul.f32 %v5102_v13, %v413_v16  ;;  %v448_v24 = vunpack.c.l.bf16 %v394_v6 }
  0x22   : > { %4115 = vmatpush3.bf16.msra.mxu0 %v4711_v22  ;;  %4669 = vmatpush3.bf16.msra.mxu1 %v4711_v22  ;;  %4786 = vpow2.f32 %v3627_v7  ;;  %v3664_v22 = vmul.f32 -1.442695, %v5196_v14  ;;  %v475_v25 = vmul.f32 %v5102_v13, %v414_v19  ;;  %v5208_v26 = vadd.f32 %v5105_v17, %v473_v20 }
  0x23   : > { %4116 = vmatprep.subr.bf16.mxu0 %v4712_v27  ;;  %4662 = vmatprep.subr.bf16.mxu1 %v4712_v27  ;;  %4788 = vpow2.f32 %v3628_v10  ;;  %v449_v27 = vunpack.c.h.bf16 %v394_v6  ;;  %v5212_v30 = vadd.f32 %v5105_v17, %v474_v23  ;;  %v509_v35 = vmul.f32 %v5102_v13, %v448_v24 }
  0x24   : > { %4790 = vpow2.f32 %v3662_v15  ;;  %v5216_v36 = vadd.f32 %v5105_v17, %v475_v25  ;;  %v3629_v37 = vmul.f32 -1.442695, %v5208_v26  ;;  %v3991_v45 = vunpack.c.l.bf16 %v4082_v29  ;;  %v364_v25 = vld [vmem:[%s5079_s26 + $0x3c] sm:$0xff]  }
  0x25   : > { %4792 = vpow2.f32 %v3663_v18  ;;  %v3630_v42 = vmul.f32 -1.442695, %v5212_v30  ;;  %v5224_v44 = vadd.f32 %v5105_v17, %v509_v35  ;;  %v3992_v50 = vunpack.c.h.bf16 %v4082_v29 }
  0x26   : > { %4117 = vmatpush3.bf16.msra.mxu0 %v4713_v31  ;;  %4670 = vmatpush3.bf16.msra.mxu1 %v4713_v31  ;;  %v450_v31 = vunpack.c.l.bf16 %v396_v21  ;;  %4794 = vpow2.f32 %v3664_v22  ;;  %v3631_v47 = vmul.f32 -1.442695, %v5216_v36  ;;  %v5231_v53 = vshrl.u32 %v975_v28, 7 }
  0x27   : > { %4118 = vmatprep.subr.bf16.mxu0 %v4714_v38  ;;  %4663 = vmatprep.subr.bf16.mxu1 %v4714_v38  ;;  %v510_v38 = vmul.f32 %v5102_v13, %v449_v27  ;;  %4796 = vpow2.f32 %v3629_v37  ;;  %v5237_v58 = vmul.f32 -1.442695, %v5224_v44  ;;  %v476_v28 = vmul.f32 %v3991_v45, %v5102_v13  ;;  %v366_v37 = vld [vmem:[%s5079_s26 + $0x44] sm:$0x1] }
  0x28   : > { %v511_v43 = vmul.f32 %v5102_v13, %v450_v31  ;;  %v4773_v46 = vpop.eup %4772  ;;  %4798 = vpow2.f32 %v3630_v42  ;;  %v477_v6 = vmul.f32 %v3992_v50, %v5102_v13  ;;  %v4015_v15 = vunpack.c.l.bf16 %v4088_v62 }
  0x29   : > { %v5228_v49 = vadd.f32 %v5105_v17, %v510_v38  ;;  %v4775_v51 = vpop.eup %4774  ;;  %v744_v52 = vadd.f32 1.0, %v4773_v46  ;;  %4800 = vpow2.f32 %v3631_v47  ;;  %v5248_v18 = vadd.s32 16, %v5231_v53 }
  0x2a   : > { %4119 = vmatpush3.bf16.msra.mxu0 %v4715_v59  ;;  %4671 = vmatpush3.bf16.msra.mxu1 %v4715_v59  ;;  %v5234_v54 = vadd.f32 %v5105_v17, %v511_v43  ;;  %v4777_v55 = vpop.eup %4776  ;;  %v745_v56 = vadd.f32 1.0, %v4775_v51  ;;  %v417_v59 = vunpack.c.l.bf16 %v363_v41  ;;  %v5254_v23 = vadd.f32 %v5105_v17, %v476_v28 }
  0x2b   : > { %4560 = vmatprep.subr.bf16.mxu0 %v5167_v60  ;;  %4512 = vmatprep.subr.bf16.mxu1 %v5177_v1  ;;  %v4779_v63 = vpop.eup %4778  ;;  %v746_v0 = vadd.f32 1.0, %v4777_v55  ;;  %4802 = vrcp.f32 %v744_v52  ;;  %v5241_v3 = vmul.f32 -1.442695, %v5228_v49  ;;  %v4016_v24 = vunpack.c.h.bf16 %v4088_v62 }
  0x2c   : > { %v4781_v4 = vpop.eup %4780  ;;  %4804 = vrcp.f32 %v745_v56  ;;  %v780_v5 = vadd.f32 1.0, %v4779_v63  ;;  %v478_v7 = vmul.f32 %v5102_v13, %v417_v59  ;;  %v5251_v20 = vmul.f32 -1.442695, %v5234_v54 }
  0x2d   : > { %v4783_v10 = vpop.eup %4782  ;;  %4806 = vrcp.f32 %v746_v0  ;;  %v781_v12 = vadd.f32 1.0, %v4781_v4  ;;  %vm1033_vm0 = vcmp.ge.s32.totalorder %v5231_v53, 1  ;;  %v5259_v31 = vadd.f32 %v5105_v17, %v477_v6 }
  0x2e   : > { %v4785_v16 = vpop.eup %4784  ;;  %v782_v19 = vadd.f32 1.0, %v4783_v10  ;;  %4808 = vrcp.f32 %v780_v5  ;;  %v5262_v35 = vadd.f32 %v5105_v17, %v478_v7  ;;  %v453_v42 = vunpack.c.l.bf16 %v399_v8  ;;  %vm5350_vm4 = vmpackc.low %vm4990_vm3, %vm1033_vm0 }
  0x2f   : > { %v4787_v21 = vpop.eup %4786  ;;  %4810 = vrcp.f32 %v781_v12  ;;  %v747_v22 = vadd.f32 1.0, %v4785_v16  ;;  %v512_v43 = vmul.f32 %v4015_v15, %v5102_v13  ;;  %vm1134_vm1 = vcmp.le.s32.totalorder %v5248_v18, 16 }
  0x30   : > { %v4789_v27 = vpop.eup %4788  ;;  %4812 = vrcp.f32 %v782_v19  ;;  %v748_v29 = vadd.f32 1.0, %v4787_v21  ;;  %v513_v47 = vmul.f32 %v4016_v24, %v5102_v13  ;;  %v418_v50 = vunpack.c.l.bf16 %v364_v25 }
  0x31   : > { %v4791_v38 = vpop.eup %4790  ;;  %v749_v41 = vadd.f32 1.0, %v4789_v27  ;;  %4814 = vrcp.f32 %v747_v22  ;;  %v3632_v55 = vmul.f32 -1.442695, %v5254_v23  ;;  %v514_v56 = vmul.f32 %v5102_v13, %v453_v42  ;;  %v5291_v27 = vld [vmem:[%s5079_s26 + $0x48] sm:$0xff]  }
  0x32   : > { %v4793_v45 = vpop.eup %4792  ;;  %4816 = vrcp.f32 %v748_v29  ;;  %v783_v46 = vadd.f32 1.0, %v4791_v38  ;;  %v5271_v62 = vadd.f32 %v5105_v17, %v512_v43  ;;  %v419_v63 = vunpack.c.h.bf16 %v364_v25 }
  0x33   : > { %v4795_v51 = vpop.eup %4794  ;;  %4818 = vrcp.f32 %v749_v41  ;;  %v784_v52 = vadd.f32 1.0, %v4793_v45  ;;  %v3633_v28 = vmul.f32 -1.442695, %v5259_v31  ;;  %v5275_v4 = vadd.f32 %v5105_v17, %v513_v47 }
  0x34   : > { %v785_v59 = vadd.f32 1.0, %v4795_v51  ;;  %4820 = vrcp.f32 %v783_v46  ;;  %v4797_v0 = vpop.eup %4796  ;;  %v420_v5 = vunpack.c.l.bf16 %v366_v37  ;;  %v5278_v8 = vadd.f32 %v5105_v17, %v514_v56 }
  0x35   : > { %4822 = vrcp.f32 %v784_v52  ;;  %v4799_v6 = vpop.eup %4798  ;;  %v750_v7 = vadd.f32 1.0, %v4797_v0  ;;  %v479_v10 = vmul.f32 %v5102_v13, %v418_v50  ;;  %v5283_v16 = vmul.f32 -1.442695, %v5262_v35 }
  0x36   : > { %4824 = vrcp.f32 %v785_v59  ;;  %v4801_v12 = vpop.eup %4800  ;;  %v751_v15 = vadd.f32 1.0, %v4799_v6  ;;  %v480_v19 = vmul.f32 %v5102_v13, %v419_v63  ;;  %v5287_v24 = vmul.f32 -1.442695, %v5271_v62 }
  0x37   : > { %4826 = vpow2.f32 %v5237_v58  ;;  %v752_v22 = vadd.f32 1.0, %v4801_v12  ;;  %v481_v25 = vmul.f32 %v5102_v13, %v420_v5  ;;  %v5295_v58 = vmul.f32 -1.442695, %v5275_v4 }
  0x38   : > { %v4803_v21 = vpop.eup %4802  ;;  %4828 = vrcp.f32 %v750_v7  ;;  %v5298_v38 = vadd.f32 %v5105_v17, %v479_v10  ;;  %v5302_v43 = vmul.f32 -1.442695, %v5278_v8  ;;  %v5305_v45 = vadd.f32 %v5105_v17, %v480_v19 }
  0x39   : > { %v4805_v29 = vpop.eup %4804  ;;  %v906_v37 = vmul.f32 %v4803_v21, %v5124_v32  ;;  %4830 = vrcp.f32 %v751_v15  ;;  %v3995_v50 = vunpack.c.l.bf16 %v5291_v27  ;;  %v5317_v56 = vadd.f32 %v5105_v17, %v481_v25 }
  0x3a   : > { %v4807_v41 = vpop.eup %4806  ;;  %v907_v42 = vmul.f32 %v4805_v29, %v5127_v33  ;;  %4832 = vrcp.f32 %v752_v22 }
  0x3b   : > { %v4809_v46 = vpop.eup %4808  ;;  %v908_v32 = vmul.f32 %v4807_v41, %v5130_v34  ;;  %v1306_v47 = vsel %vm1033_vm0, %v906_v37, 0.0  ;;  %4834 = vpow2.f32 %v5241_v3  ;;  %v5323_v3 = vmul.f32 -1.442695, %v5298_v38 }
  0x3c   : > { %v4811_v51 = vpop.eup %4810  ;;  %v5312_v52 = vpack.c.bf16 %v907_v42, %v1306_v47  ;;  %v942_v33 = vmul.f32 %v4809_v46, %v5139_v39  ;;  %4836 = vpow2.f32 %v5251_v20  ;;  %v5332_v12 = vpack.c.bf16 %v907_v42, %v906_v37 }
  0x3d   : > { %v4813_v59 = vpop.eup %4812  ;;  %v1308_v34 = vsel %vm1134_vm1, %v908_v32, 0.0  ;;  %v943_v63 = vmul.f32 %v4811_v51, %v5142_v40  ;;  %4838 = vpow2.f32 %v3632_v55 }
  0x3e   : > { %v4815_v0 = vpop.eup %4814  ;;  %v5325_v5 = vpack.c.bf16 %v1308_v34, %v1308_v34  ;;  %v1407_v39 = vshrl.u32 %v5312_v52, 16  ;;  %v1409_v20 = vshll.u32 %v5312_v52, 16  ;;  %v944_v6 = vmul.f32 %v4813_v59, %v5150_v48 }
  0x3f   : > { %v4817_v7 = vpop.eup %4816  ;;  %v1342_v10 = vsel %vm1033_vm0, %v942_v33, 0.0  ;;  %v909_v40 = vmul.f32 %v4815_v0, %v5159_v57  ;;  %4840 = vpow2.f32 %v3633_v28 }
  0x40   : > { %v4819_v55 = vpop.eup %4818  ;;  %v1411_v15 = vrot.slane %v1409_v20, 1  ;;  %v1414_v19 = vshll.u32 %v5325_v5, 16  ;;  %v1344_v21 = vsel %vm1134_vm1, %v944_v6, 0.0  ;;  %v5338_v22 = vpack.c.bf16 %v943_v63, %v1342_v10  ;;  %v4720_v10 = vld [vmem:[%s6810_s4 + $0xb0] sm:$0xff]  }
  0x41   : > { %v4821_v25 = vpop.eup %4820  ;;  %v5340_v48 = vpack.c.bf16 %v1344_v21, %v1344_v21  ;;  %v910_v29 = vmul.f32 %v4817_v7, %v5170_v61  ;;  %v911_v37 = vmul.f32 %v4819_v55, %v5180_v2  ;;  %v1309_v57 = vsel %vm1033_vm0, %v909_v40, 0.0 }
  0x42   : > { %v4823_v28 = vpop.eup %4822  ;;  %v1412_v41 = vor.u32 %v1411_v15, %v1407_v39  ;;  %v1416_v42 = vrot.slane %v1414_v19, 1  ;;  %v1551_v46 = vshrl.u32 %v5338_v22, 16  ;;  %v1553_v32 = vshll.u32 %v5338_v22, 16 }
  0x43   : > { %v4825_v47 = vpop.eup %4824  ;;  %v1558_v61 = vshll.u32 %v5340_v48, 16  ;;  %v1311_v2 = vsel %vm1134_vm1, %v911_v37, 0.0  ;;  %v5357_v59 = vpack.c.bf16 %v910_v29, %v1309_v57  ;;  %v5360_v34 = vmul.f32 %v4821_v25, %v5189_v9  ;;  %v4718_v57 = vld [vmem:[%s6810_s4 + $0x170] sm:$0xff]  }
  0x44   : > { %v4827_v0 = vpop.eup %4826  ;;  %v5363_v39 = vsel %vm1393_vm2, %v1412_v41, %v1416_v42  ;;  %v1555_v20 = vrot.slane %v1553_v32, 1  ;;  %v5365_v6 = vpack.c.bf16 %v1311_v2, %v1311_v2  ;;  %v946_v7 = vmul.f32 %v4823_v28, %v5193_v11 }
  0x45   : > { %v4829_v55 = vpop.eup %4828  ;;  %1991 = vmatprep.mubr.bf16.mxu0 %v5363_v39  ;;  %v1560_v15 = vrot.slane %v1558_v61, 1  ;;  %v1419_v9 = vshrl.u32 %v5357_v59, 16  ;;  %v1421_v19 = vshll.u32 %v5357_v59, 16  ;;  %v947_v21 = vmul.f32 %v4825_v47, %v5196_v14 }
  0x46   : > { %v4831_v25 = vpop.eup %4830  ;;  %v1556_v37 = vor.u32 %v1555_v20, %v1551_v46  ;;  %3748 = vmatmul.mubr.msk.bf16.vlgmr.msra.gmra.mxu0 %vm5350_vm4, %v5332_v12  ;;  %v5378_v11 = vpack.c.bf16 %v943_v63, %v942_v33  ;;  %v1426_v28 = vshll.u32 %v5365_v6, 16  ;;  %v1345_v41 = vsel %vm1033_vm0, %v5360_v34, 0.0 }
  0x47   : > { %v4833_v42 = vpop.eup %4832  ;;  %4561 = vmatpush3.bf16.msra.mxu0 %v5167_v60  ;;  %v1423_v14 = vrot.slane %v1421_v19, 1  ;;  %v1347_v46 = vsel %vm1134_vm1, %v947_v21, 0.0  ;;  %v5390_v32 = vpack.c.bf16 %v946_v7, %v1345_v41  ;;  %v5392_v33 = vpack.c.bf16 %v910_v29, %v909_v40  ;;  %v4724_v60 = vld [vmem:[%s6810_s4 + $0xa8] sm:$0xff]  }
  0x48   : > { %6836 = vst [vmem:[#allocation2_spill] sm:$0xff] %v5378_v11  ;;  %v4835_v63 = vpop.eup %4834  ;;  %v5395_v47 = vsel %vm1393_vm2, %v1556_v37, %v1560_v15  ;;  %v1428_v61 = vrot.slane %v1426_v28, 1  ;;  %v5397_v2 = vpack.c.bf16 %v1347_v46, %v1347_v46  ;;  %4562 = vmatprep.subr.bf16.mxu0 %v4720_v10  ;;  %v912_v20 = vmul.f32 %v4829_v55, %v5208_v26 }
  0x49   : > { %6837 = vst [vmem:[#allocation3_spill] sm:$0xff] %v5395_v47  ;;  %v4837_v19 = vpop.eup %4836  ;;  %2087 = vmatprep.mubr.bf16.mxu1 %v5395_v47  ;;  %v1424_v21 = vor.u32 %v1423_v14, %v1419_v9  ;;  %v1563_v40 = vshrl.u32 %v5390_v32, 16  ;;  %v1565_v29 = vshll.u32 %v5390_v32, 16  ;;  %v913_v15 = vmul.f32 %v4831_v25, %v5212_v30  ;;  %v4719_v30 = vld [vmem:[%s6810_s4 + $0x168] sm:$0xff]  }
  0x4a   : > { %v4839_v37 = vpop.eup %4838  ;;  %3784 = vmatmul.mubr.msk.bf16.vlgmr.msra.gmra.mxu1 %vm5350_vm4, %v5378_v11  ;;  %v1570_v26 = vshll.u32 %v5397_v2, 16  ;;  %v914_v55 = vmul.f32 %v4833_v42, %v5216_v36  ;;  %v1312_v28 = vsel %vm1033_vm0, %v912_v20, 0.0  ;;  %v786_v41 = vadd.f32 1.0, %v4827_v0 }
  0x4b   : > { %4513 = vmatpush3.bf16.msra.mxu1 %v5177_v1  ;;  %v5416_v9 = vsel %vm1393_vm2, %v1424_v21, %v1428_v61  ;;  %v1567_v14 = vrot.slane %v1565_v29, 1  ;;  %4563 = vmatpush3.bf16.msra.mxu0 %v4720_v10  ;;  %v5421_v25 = vpack.c.bf16 %v913_v15, %v1312_v28  ;;  %v787_v46 = vadd.f32 1.0, %v4835_v63  ;;  %v4729_v61 = vld [vmem:[%s6810_s4 + $0xa0] sm:$0xff]   ;;  %v369_v28 = vld [vmem:[%s5079_s26 + $0x50] sm:$0x1] }
  0x4c   : > { %v4841_v36 = vpop.eup %4840  ;;  %4514 = vmatprep.subr.bf16.mxu1 %v4718_v57  ;;  %1999 = vmatprep.mubr.bf16.mxu0 %v5416_v9  ;;  %v1572_v0 = vrot.slane %v1570_v26, 1  ;;  %v1314_v1 = vsel %vm1134_vm1, %v914_v55, 0.0  ;;  %v788_v42 = vadd.f32 1.0, %v4837_v19  ;;  %4842 = vrcp.f32 %v786_v41  ;;  %v4721_v26 = vld [vmem:[%s6810_s4 + $0x160] sm:$0xff]  }
  0x4d   : > { %v1568_v21 = vor.u32 %v1567_v14, %v1563_v40  ;;  %v5429_v10 = vpack.c.bf16 %v1314_v1, %v1314_v1  ;;  %v1431_v29 = vshrl.u32 %v5421_v25, 16  ;;  %v1433_v63 = vshll.u32 %v5421_v25, 16  ;;  %4564 = vmatprep.subr.bf16.mxu0 %v4724_v60 }
  0x4e   : > { %3751 = vmatmul.mubr.msk.bf16.gmra.mxu0 %vm5350_vm4, %v5392_v33  ;;  %v5438_v19 = vpack.c.bf16 %v946_v7, %v5360_v34  ;;  %4844 = vrcp.f32 %v787_v46  ;;  %v753_v40 = vadd.f32 1.0, %v4839_v37  ;;  %v754_v55 = vadd.f32 1.0, %v4841_v36  ;;  %v4732_v34 = vld [vmem:[%s6810_s4 + $0x98] sm:$0xff]  }
  0x4f   : > { %4515 = vmatpush3.bf16.msra.mxu1 %v4718_v57  ;;  %v5444_v41 = vsel %vm1393_vm2, %v1568_v21, %v1572_v0  ;;  %v1435_v14 = vrot.slane %v1433_v63, 1  ;;  %v1438_v1 = vshll.u32 %v5429_v10, 16  ;;  %4846 = vrcp.f32 %v788_v42  ;;  %4565 = vmatpush3.bf16.msra.mxu0 %v4724_v60  ;;  %v370_v37 = vld [vmem:[%s5079_s26 + $0x54] sm:$0xff]  }
  0x50   : > { %6838 = vst [vmem:[#allocation4_spill] sm:$0xff] %v5438_v19  ;;  %6839 = vst [vmem:[#allocation5_spill] sm:$0xff] %v5444_v41  ;;  %2095 = vmatprep.mubr.bf16.mxu1 %v5444_v41  ;;  %4516 = vmatprep.subr.bf16.mxu1 %v4719_v30  ;;  %4848 = vpow2.f32 %v5283_v16  ;;  %v3636_v7 = vmul.f32 -1.442695, %v5305_v45  ;;  %v3637_v57 = vmul.f32 -1.442695, %v5317_v56  ;;  %v5459_v0 = vpack.c.bf16 %v913_v15, %v912_v20 }
  0x51   : > { %v1436_v46 = vor.u32 %v1435_v14, %v1431_v29  ;;  %v1440_v36 = vrot.slane %v1438_v1, 1  ;;  %4850 = vrcp.f32 %v753_v40  ;;  %v1638_v60 = vrot.slane %v5312_v52, 1  ;;  %4566 = vmatprep.subr.bf16.mxu0 %v4729_v61  ;;  %v4722_v29 = vld [vmem:[%s6810_s4 + $0x158] sm:$0xff]  }
  0x52   : > { %3787 = vmatmul.mubr.msk.bf16.gmra.mxu1 %vm5350_vm4, %v5438_v19  ;;  %4852 = vrcp.f32 %v754_v55  ;;  %v3996_v16 = vunpack.c.h.bf16 %v5291_v27  ;;  %v423_v42 = vunpack.c.l.bf16 %v369_v28  ;;  %v1639_v52 = vrot.slane %v5325_v5, 1  ;;  %v372_v15 = vld [vmem:[%s5079_s26 + $0x5c] sm:$0x1] }
  0x53   : > { %4517 = vmatpush3.bf16.msra.mxu1 %v4719_v30  ;;  %v5463_v21 = vsel %vm1393_vm2, %v1436_v46, %v1440_v36  ;;  %4854 = vpow2.f32 %v5287_v24  ;;  %4567 = vmatpush3.bf16.msra.mxu0 %v4729_v61  ;;  %v482_v20 = vmul.f32 %v3995_v50, %v5102_v13  ;;  %v1641_v30 = vrot.slane %v5357_v59, 1  ;;  %v4737_v24 = vld [vmem:[%s6810_s4 + $0x90] sm:$0xff]   ;;  %v4740_v61 = vld [vmem:[%s6810_s4 + $0x88] sm:$0xff]  }
  0x54   : > { %4518 = vmatprep.subr.bf16.mxu1 %v4721_v26  ;;  %2007 = vmatprep.mubr.bf16.mxu0 %v5463_v21  ;;  %4856 = vpow2.f32 %v5295_v58  ;;  %v483_v63 = vmul.f32 %v3996_v16, %v5102_v13  ;;  %v484_v28 = vmul.f32 %v5102_v13, %v423_v42  ;;  %v1642_v27 = vrot.slane %v5365_v6, 1  ;;  %v4723_v58 = vld [vmem:[%s6810_s4 + $0x150] sm:$0xff]   ;;  %v4725_v36 = vld [vmem:[%s6810_s4 + $0x148] sm:$0xff]  }
  0x55   : > { %4858 = vpow2.f32 %v5302_v43  ;;  %v5485_v50 = vadd.f32 %v5105_v17, %v482_v20  ;;  %v424_v5 = vunpack.c.l.bf16 %v370_v37  ;;  %4568 = vmatprep.subr.bf16.mxu0 %v4732_v34  ;;  %v425_v6 = vunpack.c.h.bf16 %v370_v37  ;;  %v5508_v37 = vld [vmem:[%s5079_s26 + $0x60] sm:$0xff]  }
  0x56   : > { %3754 = vmatmul.mubr.msk.bf16.gmra.mxu0 %vm5350_vm4, %v5459_v0  ;;  %4860 = vpow2.f32 %v5323_v3  ;;  %v5495_v43 = vadd.f32 %v5105_v17, %v483_v63  ;;  %v5498_v59 = vadd.f32 %v5105_v17, %v484_v28  ;;  %v426_v55 = vunpack.c.l.bf16 %v372_v15  ;;  %v5530_v20 = vld [vmem:[%s5094_s10] ss:$0 sm:$0xff] }
  0x57   : > { %4519 = vmatpush3.bf16.msra.mxu1 %v4721_v26  ;;  %4862 = vpow2.f32 %v3636_v7  ;;  %v3638_v40 = vmul.f32 -1.442695, %v5485_v50  ;;  %4569 = vmatpush3.bf16.msra.mxu0 %v4732_v34  ;;  %v485_v1 = vmul.f32 %v5102_v13, %v424_v5  ;;  %v5511_v26 = vsel %vm1634_vm5, %v1638_v60, %v1639_v52  ;;  %v5526_v60 = vld [vmem:[%s5079_s26 + $0x68] sm:$0x1] }
  0x58   : > { %4520 = vmatprep.subr.bf16.mxu1 %v4722_v29  ;;  %4864 = vpow2.f32 %v3637_v57  ;;  %v3639_v3 = vmul.f32 -1.442695, %v5495_v43  ;;  %v3640_v14 = vmul.f32 -1.442695, %v5498_v59  ;;  %4570 = vmatprep.subr.bf16.mxu0 %v4737_v24  ;;  %v486_v34 = vmul.f32 %v5102_v13, %v425_v6 }
  0x59   : > { %v4843_v46 = vpop.eup %4842  ;;  %4866 = vpow2.f32 %v3638_v40  ;;  %v487_v7 = vmul.f32 %v5102_v13, %v426_v55  ;;  %v5520_v16 = vsel %vm1634_vm5, %v1641_v30, %v1642_v27  ;;  %v5523_v42 = vadd.f32 %v5105_v17, %v485_v1  ;;  %v4745_v17 = vld [vmem:[%s6810_s4 + $0x80] sm:$0xff]  }
  0x5a   : > { %v948_v57 = vmul.f32 %v4843_v46, %v5224_v44  ;;  %4868 = vpow2.f32 %v3639_v3  ;;  %v5533_v44 = vadd.f32 %v5530_v20, %v486_v34  ;;  %v3999_v55 = vunpack.c.l.bf16 %v5508_v37  ;;  %v4726_v1 = vld [vmem:[%s6810_s4 + $0x140] sm:$0xff]  }
  0x5b   : > { %v4845_v52 = vpop.eup %4844  ;;  %4521 = vmatpush3.bf16.msra.mxu1 %v4722_v29  ;;  %4870 = vpow2.f32 %v3640_v14  ;;  %v5536_v15 = vadd.f32 %v5530_v20, %v487_v7  ;;  %4571 = vmatpush3.bf16.msra.mxu0 %v4737_v24  ;;  %v3641_v27 = vmul.f32 -1.442695, %v5523_v42  ;;  %v4000_v46 = vunpack.c.h.bf16 %v5508_v37  ;;  %v5575_v13 = vld [vmem:[%s5085_s29] ss:$0 sm:$0xff]  ;;  %s6574_s29 = scalar_lea.vmem %s6811_s5, %s3983_s20 }
  0x5c   : > { %v4847_v30 = vpop.eup %4846  ;;  %v949_v63 = vmul.f32 %v4845_v52, %v5228_v49  ;;  %v1348_v29 = vsel %vm1033_vm0, %v948_v57, 0.0  ;;  %4522 = vmatprep.subr.bf16.mxu1 %v4723_v58  ;;  %4572 = vmatprep.subr.bf16.mxu0 %v4740_v61  ;;  %v3642_v24 = vmul.f32 -1.442695, %v5533_v44  ;;  %v429_v52 = vunpack.c.l.bf16 %v5526_v60 }
  0x5d   : > { %v4849_v5 = vpop.eup %4848  ;;  %v950_v6 = vmul.f32 %v4847_v30, %v5234_v54  ;;  %v3643_v40 = vmul.f32 -1.442695, %v5536_v15  ;;  %4872 = vpow2.f32 %v3641_v27  ;;  %v4748_v30 = vld [vmem:[%s6810_s4 + $0x1f8] sm:$0xff]  }
  0x5e   : > { %v4851_v3 = vpop.eup %4850  ;;  %v5550_v49 = vpack.c.bf16 %v949_v63, %v1348_v29  ;;  %v755_v14 = vadd.f32 1.0, %v4849_v5  ;;  %4874 = vpow2.f32 %v3642_v24  ;;  %v5578_v19 = vpack.c.bf16 %v949_v63, %v948_v57 }
  0x5f   : > { %v4853_v34 = vpop.eup %4852  ;;  %v1350_v54 = vsel %vm1134_vm1, %v950_v6, 0.0  ;;  %4523 = vmatpush3.bf16.msra.mxu1 %v4723_v58  ;;  %v5559_v7 = vmul.f32 %v4851_v3, %v5254_v23  ;;  %4573 = vmatpush3.bf16.msra.mxu0 %v4740_v61 }
  0x60   : > { %v4855_v29 = vpop.eup %4854  ;;  %v5565_v27 = vpack.c.bf16 %v1350_v54, %v1350_v54  ;;  %v1575_v37 = vshrl.u32 %v5550_v49, 16  ;;  %v1577_v5 = vshll.u32 %v5550_v49, 16  ;;  %4876 = vrcp.f32 %v755_v14  ;;  %4524 = vmatprep.subr.bf16.mxu1 %v4725_v36  ;;  %4574 = vmatprep.subr.bf16.mxu0 %v4745_v17  ;;  %6840 = vst [vmem:[#allocation6_spill] sm:$0xff] %v5578_v19 }
  0x61   : > { %v4857_v23 = vpop.eup %4856  ;;  %v916_v58 = vmul.f32 %v4853_v34, %v5259_v31  ;;  %v1315_v61 = vsel %vm1033_vm0, %v5559_v7, 0.0  ;;  %v789_v60 = vadd.f32 1.0, %v4855_v29  ;;  %4878 = vpow2.f32 %v3643_v40 }
  0x62   : > { %v4859_v6 = vpop.eup %4858  ;;  %v1579_v24 = vrot.slane %v1577_v5, 1  ;;  %v1582_v3 = vshll.u32 %v5565_v27, 16  ;;  %v790_v54 = vadd.f32 1.0, %v4857_v23  ;;  %v488_v14 = vmul.f32 %v5575_v13, %v3999_v55  ;;  %v4727_v23 = vld [vmem:[%s6810_s4 + $0x78] sm:$0xff]  }
  0x63   : > { %v4861_v28 = vpop.eup %4860  ;;  %v5580_v41 = vpack.c.bf16 %v916_v58, %v1315_v61  ;;  %v791_v31 = vadd.f32 1.0, %v4859_v6  ;;  %4880 = vrcp.f32 %v789_v60  ;;  %4525 = vmatpush3.bf16.msra.mxu1 %v4725_v36  ;;  %4575 = vmatpush3.bf16.msra.mxu0 %v4745_v17  ;;  %v489_v36 = vmul.f32 %v5575_v13, %v4000_v46 }
  0x64   : > { %v4863_v34 = vpop.eup %4862  ;;  %v1580_v40 = vor.u32 %v1579_v24, %v1575_v37  ;;  %v1584_v29 = vrot.slane %v1582_v3, 1  ;;  %4882 = vrcp.f32 %v790_v54  ;;  %4526 = vmatprep.subr.bf16.mxu1 %v4726_v1  ;;  %v756_v5 = vadd.f32 1.0, %v4861_v28  ;;  %4376 = vmatprep.subr.bf16.mxu0 %v4748_v30  ;;  %v376_v54 = vld [vmem:[%s5079_s26 + $0x6c] sm:$0xff]  }
  0x65   : > { %v4865_v55 = vpop.eup %4864  ;;  %v1445_v57 = vshll.u32 %v5580_v41, 16  ;;  %4884 = vrcp.f32 %v791_v31  ;;  %v757_v63 = vadd.f32 1.0, %v4863_v34  ;;  %v6842_v28 = vrot.slane %v5429_v10, 1  ;;  %v378_v34 = vld [vmem:[%s5079_s26 + $0x74] sm:$0x1] }
  0x66   : > { %v4867_v17 = vpop.eup %4866  ;;  %v5588_v37 = vsel %vm1393_vm2, %v1580_v40, %v1584_v29  ;;  %v758_v61 = vadd.f32 1.0, %v4865_v55  ;;  %4886 = vrcp.f32 %v756_v5  ;;  %v6843_v60 = vrot.slane %v5421_v25, 1 }
  0x67   : > { %6841 = vst [vmem:[#allocation7_spill] sm:$0xff] %v5588_v37  ;;  %v4869_v6 = vpop.eup %4868  ;;  %2103 = vmatprep.mubr.bf16.mxu1 %v5588_v37  ;;  %4527 = vmatpush3.bf16.msra.mxu1 %v4726_v1  ;;  %4888 = vrcp.f32 %v757_v63  ;;  %v759_v46 = vadd.f32 1.0, %v4867_v17  ;;  %v490_v24 = vmul.f32 %v5575_v13, %v429_v52  ;;  %v5600_v3 = vadd.f32 %v5530_v20, %v488_v14  ;;  %v5616_v63 = vld [vmem:[%s5079_s26 + $0x78] sm:$0xff]  }
  0x68   : > { %v5595_v30 = vsel %vm1634_vm5, %v6843_v60, %v6842_v28  ;;  %v4871_v31 = vpop.eup %4870  ;;  %3790 = vmatmul.mubr.msk.bf16.gmra.mxu1 %vm5350_vm4, %v5578_v19  ;;  %v1443_v25 = vshrl.u32 %v5580_v41, 16  ;;  %v1447_v10 = vrot.slane %v1445_v57, 1  ;;  %4890 = vrcp.f32 %v758_v61  ;;  %4240 = vmatprep.subr.bf16.mxu1 %v4727_v23 }
  0x69   : > { %v760_v1 = vadd.f32 1.0, %v4869_v6  ;;  %v5609_v40 = vpack.c.bf16 %v916_v58, %v5559_v7  ;;  %v761_v52 = vadd.f32 1.0, %v4871_v31  ;;  %4892 = vrcp.f32 %v759_v46 }
  0x6a   : > { %v5612_v14 = vadd.f32 %v5530_v20, %v489_v36  ;;  %v430_v5 = vunpack.c.l.bf16 %v376_v54  ;;  %v431_v55 = vunpack.c.h.bf16 %v376_v54  ;;  %v4873_v57 = vpop.eup %4872  ;;  %v5619_v23 = vadd.f32 %v5530_v20, %v490_v24 }
  0x6b   : > { %6844 = vst [vmem:[#allocation8_spill] sm:$0xff] %v5609_v40  ;;  %4894 = vrcp.f32 %v760_v1  ;;  %v3644_v7 = vmul.f32 -1.442695, %v5600_v3  ;;  %v432_v58 = vunpack.c.l.bf16 %v378_v34  ;;  %v4875_v17 = vpop.eup %4874  ;;  %v1448_v61 = vor.u32 %v1447_v10, %v1443_v25 }
  0x6c   : > { %4896 = vrcp.f32 %v761_v52  ;;  %v762_v28 = vadd.f32 1.0, %v4873_v57  ;;  %v491_v36 = vmul.f32 %v5575_v13, %v430_v5  ;;  %v492_v60 = vmul.f32 %v5575_v13, %v431_v55  ;;  %v5637_v57 = vld [vmem:[%s5079_s26 + $0x80] sm:$0x1] }
  0x6d   : > { %v4877_v6 = vpop.eup %4876  ;;  %v763_v46 = vadd.f32 1.0, %v4875_v17  ;;  %v3645_v54 = vmul.f32 -1.442695, %v5612_v14  ;;  %v493_v31 = vmul.f32 %v5575_v13, %v432_v58  ;;  %v4003_v24 = vunpack.c.l.bf16 %v5616_v63 }
  0x6e   : > { %v4879_v1 = vpop.eup %4878  ;;  %v917_v52 = vmul.f32 %v4877_v6, %v5262_v35  ;;  %4898 = vrcp.f32 %v762_v28  ;;  %v5629_v25 = vadd.f32 %v5530_v20, %v491_v36  ;;  %v5632_v10 = vadd.f32 %v5530_v20, %v492_v60 }
  0x6f   : > { %v764_v34 = vadd.f32 1.0, %v4879_v1  ;;  %4900 = vrcp.f32 %v763_v46  ;;  %v3646_v5 = vmul.f32 -1.442695, %v5619_v23  ;;  %v5642_v35 = vadd.f32 %v5530_v20, %v493_v31 }
  0x70   : > { %v4881_v58 = vpop.eup %4880  ;;  %v1317_v17 = vsel %vm1134_vm1, %v917_v52, 0.0  ;;  %4902 = vpow2.f32 %v3644_v7  ;;  %v3647_v28 = vmul.f32 -1.442695, %v5629_v25  ;;  %v3648_v46 = vmul.f32 -1.442695, %v5632_v10 }
  0x71   : > { %v4883_v36 = vpop.eup %4882  ;;  %v5645_v60 = vpack.c.bf16 %v1317_v17, %v1317_v17  ;;  %v951_v6 = vmul.f32 %v4881_v58, %v5271_v62  ;;  %4904 = vrcp.f32 %v764_v34  ;;  %v5652_v7 = vmul.f32 %v5575_v13, %v4003_v24 }
  0x72   : > { %v4885_v1 = vpop.eup %4884  ;;  %v952_v29 = vmul.f32 %v4883_v36, %v5275_v4  ;;  %4906 = vpow2.f32 %v3645_v54  ;;  %v5662_v54 = vmul.f32 -1.442695, %v5642_v35 }
  0x73   : > { %v4887_v31 = vpop.eup %4886  ;;  %v1450_v55 = vshll.u32 %v5645_v60, 16  ;;  %v953_v17 = vmul.f32 %v4885_v1, %v5278_v8  ;;  %v1351_v62 = vsel %vm1033_vm0, %v951_v6, 0.0  ;;  %4908 = vpow2.f32 %v3646_v5 }
  0x74   : > { %v4889_v34 = vpop.eup %4888  ;;  %v5658_v58 = vpack.c.bf16 %v952_v29, %v1351_v62  ;;  %v918_v4 = vmul.f32 %v4887_v31, %v5298_v38  ;;  %4910 = vpow2.f32 %v3647_v28 }
  0x75   : > { %v4891_v24 = vpop.eup %4890  ;;  %v1452_v36 = vrot.slane %v1450_v55, 1  ;;  %v1353_v52 = vsel %vm1134_vm1, %v953_v17, 0.0  ;;  %v919_v8 = vmul.f32 %v4889_v34, %v5305_v45  ;;  %4912 = vpow2.f32 %v3648_v46 }
  0x76   : > { %v4893_v1 = vpop.eup %4892  ;;  %v5667_v19 = vpack.c.bf16 %v1353_v52, %v1353_v52  ;;  %v1748_v5 = vshrl.u32 %v5658_v58, 16  ;;  %v1750_v62 = vshll.u32 %v5658_v58, 16  ;;  %v920_v38 = vmul.f32 %v4891_v24, %v5317_v56 }
  0x77   : > { %v5673_v31 = vsel %vm1393_vm2, %v1448_v61, %v1452_v36  ;;  %v5675_v55 = vpack.c.bf16 %v952_v29, %v951_v6  ;;  %v1318_v17 = vsel %vm1033_vm0, %v918_v4, 0.0  ;;  %v5680_v45 = vmul.f32 %v4893_v1, %v5485_v50 }
  0x78   : > { %v4895_v28 = vpop.eup %4894  ;;  %2015 = vmatprep.mubr.bf16.mxu0 %v5673_v31  ;;  %v1752_v52 = vrot.slane %v1750_v62, 1  ;;  %v1755_v34 = vshll.u32 %v5667_v19, 16  ;;  %v1320_v56 = vsel %vm1134_vm1, %v920_v38, 0.0  ;;  %v5686_v24 = vpack.c.bf16 %v919_v8, %v1318_v17 }
  0x79   : > { %6845 = vst [vmem:[#allocation9_spill] sm:$0xff] %v5675_v55  ;;  %v4897_v46 = vpop.eup %4896  ;;  %3757 = vmatmul.mubr.msk.bf16.gmra.mxu0 %vm5350_vm4, %v5609_v40  ;;  %v5691_v29 = vpack.c.bf16 %v1320_v56, %v1320_v56  ;;  %v922_v50 = vmul.f32 %v4895_v28, %v5495_v43  ;;  %v1321_v6 = vsel %vm1033_vm0, %v5680_v45, 0.0  ;;  %v1648_v43 = vrot.slane %v5645_v60, 1 }
  0x7a   : > { %v923_v61 = vmul.f32 %v4897_v46, %v5498_v59  ;;  %v1753_v36 = vor.u32 %v1752_v52, %v1748_v5  ;;  %v1757_v1 = vrot.slane %v1755_v34, 1  ;;  %v1455_v62 = vshrl.u32 %v5686_v24, 16 }
  0x7b   : > { %v1457_v38 = vshll.u32 %v5686_v24, 16  ;;  %v4899_v17 = vpop.eup %4898  ;;  %v1462_v37 = vshll.u32 %v5691_v29, 16  ;;  %v5703_v11 = vpack.c.bf16 %v922_v50, %v1321_v6 }
  0x7c   : > { %v1323_v56 = vsel %vm1134_vm1, %v923_v61, 0.0  ;;  %v4901_v59 = vpop.eup %4900  ;;  %v5707_v28 = vsel %vm1393_vm2, %v1753_v36, %v1757_v1  ;;  %v924_v52 = vmul.f32 %v4899_v17, %v5523_v42  ;;  %v5719_v1 = vpack.c.bf16 %v919_v8, %v918_v4 }
  0x7d   : > { %6846 = vst [vmem:[#allocation10_spill] sm:$0xff] %v5707_v28  ;;  %v1459_v5 = vrot.slane %v1457_v38, 1  ;;  %v5709_v46 = vpack.c.bf16 %v1323_v56, %v1323_v56  ;;  %v4903_v34 = vpop.eup %4902  ;;  %2111 = vmatprep.mubr.bf16.mxu1 %v5707_v28  ;;  %v1464_v47 = vrot.slane %v1462_v37, 1  ;;  %v1467_v40 = vshrl.u32 %v5703_v11, 16 }
  0x7e   : > { %v1469_v61 = vshll.u32 %v5703_v11, 16  ;;  %v925_v6 = vmul.f32 %v4901_v59, %v5533_v44  ;;  %v4905_v60 = vpop.eup %4904  ;;  %3793 = vmatmul.mubr.msk.bf16.gmra.mxu1 %vm5350_vm4, %v5675_v55  ;;  %6847 = vst [vmem:[#allocation11_spill] sm:$0xff] %v5719_v1  ;;  %v1324_v38 = vsel %vm1033_vm0, %v924_v52, 0.0  ;;  %v6848_v59 = vunpack.c.h.bf16 %v5616_v63 }
  0x7f   : > { %v1460_v36 = vor.u32 %v1459_v5, %v1455_v62  ;;  %v1474_v42 = vshll.u32 %v5709_v46, 16  ;;  %v4907_v37 = vpop.eup %4906  ;;  %4528 = vmatprep.mubr.bf16.mxu1 %v5511_v26  ;;  %v926_v56 = vmul.f32 %v4905_v60, %v5536_v15  ;;  %v6849_v5 = vrot.slane %v5580_v41, 1 }
  0x80   : > { %v1471_v17 = vrot.slane %v1469_v61, 1  ;;  %v5726_v44 = vpack.c.bf16 %v925_v6, %v1324_v38  ;;  %v495_v55 = vmul.f32 %v5575_v13, %v6848_v59  ;;  %v4909_v62 = vpop.eup %4908  ;;  %v6850_v61 = vunpack.c.l.bf16 %v5637_v57 }
  0x81   : > { %v5732_v4 = vsel %vm1393_vm2, %v1460_v36, %v1464_v47  ;;  %v1476_v8 = vrot.slane %v1474_v42, 1  ;;  %v5737_v28 = vsel %vm1634_vm5, %v6849_v5, %v1648_v43  ;;  %v4911_v60 = vpop.eup %4910  ;;  %v1326_v38 = vsel %vm1134_vm1, %v926_v56, 0.0 }
  0x82   : > { %v496_v15 = vmul.f32 %v5575_v13, %v6850_v61  ;;  %2023 = vmatprep.mubr.bf16.mxu0 %v5732_v4  ;;  %v1472_v63 = vor.u32 %v1471_v17, %v1467_v40  ;;  %v1479_v47 = vshrl.u32 %v5726_v44, 16  ;;  %v1481_v36 = vshll.u32 %v5726_v44, 16  ;;  %v4913_v42 = vpop.eup %4912  ;;  %v4728_v40 = vld [vmem:[%s6810_s4 + $0x38] sm:$0xff]  }
  0x83   : > { %3760 = vmatmul.mubr.msk.bf16.gmra.mxu0 %vm5350_vm4, %v5719_v1  ;;  %v5750_v41 = vpack.c.bf16 %v1326_v38, %v1326_v38  ;;  %v1650_v57 = vrot.slane %v5686_v24, 1  ;;  %v1651_v43 = vrot.slane %v5691_v29, 1  ;;  %v765_v59 = vadd.f32 1.0, %v4903_v34  ;;  %v4730_v24 = vld [vmem:[%s6810_s4 + $0x70] sm:$0xff]  }
  0x84   : > { %v5758_v17 = vsel %vm1393_vm2, %v1472_v63, %v1476_v8  ;;  %v1483_v56 = vrot.slane %v1481_v36, 1  ;;  %v766_v5 = vadd.f32 1.0, %v4907_v37  ;;  %v767_v61 = vadd.f32 1.0, %v4909_v62  ;;  %v382_v62 = vld [vmem:[%s5079_s26 + $0x84] sm:$0xff]   ;;  %v4086_v36 = vld [vmem:[%s5079_s26 + $0x90] sm:$0xff]  }
  0x85   : > { %2031 = vmatprep.mubr.bf16.mxu0 %v5758_v17  ;;  %v5762_v38 = vpack.c.bf16 %v922_v50, %v5680_v45  ;;  %v1486_v29 = vshll.u32 %v5750_v41, 16  ;;  %v5768_v34 = vpack.c.bf16 %v925_v6, %v924_v52  ;;  %4914 = vrcp.f32 %v765_v59  ;;  %v4731_v52 = vld [vmem:[%s6810_s4 + $0x30] sm:$0xff]   ;;  %v4733_v59 = vld [vmem:[%s6810_s4 + $0x68] sm:$0xff]  }
  0x86   : > { %v1484_v1 = vor.u32 %v1483_v56, %v1479_v47  ;;  %v1653_v8 = vrot.slane %v5703_v11, 1  ;;  %4916 = vrcp.f32 %v766_v5  ;;  %v768_v37 = vadd.f32 1.0, %v4911_v60  ;;  %4529 = vmatmul.mubr.bf16.vlgmr.msra.gmra.mxu1 %v5520_v16 }
  0x87   : > { %6851 = vst [vmem:[#allocation12_spill] sm:$0xff] %v5768_v34  ;;  %v1488_v45 = vrot.slane %v1486_v29, 1  ;;  %4918 = vrcp.f32 %v767_v61  ;;  %v769_v50 = vadd.f32 1.0, %v4913_v42  ;;  %v5775_v63 = vadd.f32 %v5530_v20, %v5652_v7  ;;  %4241 = vmatpush3.bf16.msra.mxu1 %v4728_v40  ;;  %4532 = vmatprep.mubr.bf16.mxu1 %v5595_v30  ;;  %v384_v7 = vld [vmem:[%s5079_s26 + $0x8c] sm:$0x1] }
  0x88   : > { %v5782_v6 = vsel %vm1634_vm5, %v1650_v57, %v1651_v43  ;;  %4920 = vpow2.f32 %v5662_v54  ;;  %v5786_v60 = vadd.f32 %v5530_v20, %v495_v55  ;;  %v5789_v47 = vadd.f32 %v5530_v20, %v496_v15  ;;  %4242 = vmatprep.subr.bf16.mxu1 %v4730_v24  ;;  %v387_v43 = vld [vmem:[%s5079_s26 + $0x98] sm:$0x1]  ;;  %v4734_v61 = vld [vmem:[%s6810_s4 + $0x28] sm:$0xff]  }
  0x89   : > { %v5794_v42 = vsel %vm1393_vm2, %v1484_v1, %v1488_v45  ;;  %4922 = vrcp.f32 %v768_v37  ;;  %v3650_v57 = vmul.f32 -1.442695, %v5775_v63  ;;  %v436_v54 = vunpack.c.l.bf16 %v382_v62 }
  0x8a   : > { %4924 = vrcp.f32 %v769_v50  ;;  %v3651_v55 = vmul.f32 -1.442695, %v5786_v60  ;;  %v3652_v15 = vmul.f32 -1.442695, %v5789_v47  ;;  %v437_v40 = vunpack.c.h.bf16 %v382_v62  ;;  %v4735_v62 = vld [vmem:[%s6810_s4 + $0x60] sm:$0xff]  }
  0x8b   : > { %3763 = vmatmul.mubr.msk.bf16.gmra.mxu0 %vm5350_vm4, %v5762_v38  ;;  %4926 = vpow2.f32 %v3650_v57  ;;  %v438_v1 = vunpack.c.l.bf16 %v384_v7  ;;  %v497_v56 = vmul.f32 %v5575_v13, %v436_v54  ;;  %v4007_v5 = vunpack.c.l.bf16 %v4086_v36  ;;  %4243 = vmatpush3.bf16.msra.mxu1 %v4731_v52 }
  0x8c   : > { %2039 = vmatprep.mubr.bf16.mxu0 %v5794_v42  ;;  %4928 = vpow2.f32 %v3651_v55  ;;  %v498_v24 = vmul.f32 %v5575_v13, %v437_v40  ;;  %v4008_v29 = vunpack.c.h.bf16 %v4086_v36  ;;  %v441_v37 = vunpack.c.l.bf16 %v387_v43  ;;  %4244 = vmatprep.subr.bf16.mxu1 %v4733_v59 }
  0x8d   : > { %4930 = vpow2.f32 %v3652_v15  ;;  %v499_v45 = vmul.f32 %v5575_v13, %v438_v1  ;;  %v5817_v50 = vadd.f32 %v5530_v20, %v497_v56  ;;  %v500_v52 = vmul.f32 %v5575_v13, %v4007_v5  ;;  %v4738_v56 = vld [vmem:[%s6810_s4 + $0x58] sm:$0xff]  }
  0x8e   : > { %v1654_v7 = vrot.slane %v5709_v46, 1  ;;  %v5822_v57 = vadd.f32 %v5530_v20, %v498_v24  ;;  %v501_v36 = vmul.f32 %v5575_v13, %v4008_v29  ;;  %v502_v59 = vmul.f32 %v5575_v13, %v441_v37  ;;  %4533 = vmatmul.mubr.bf16.gmra.mxu1 %v5737_v28  ;;  %v4736_v13 = vld [vmem:[%s6810_s4 + $0x20] sm:$0xff]  }
  0x8f   : > { %v1656_v54 = vrot.slane %v5726_v44, 1  ;;  %v5829_v43 = vadd.f32 %v5530_v20, %v499_v45  ;;  %v3653_v55 = vmul.f32 -1.442695, %v5817_v50  ;;  %v5833_v15 = vadd.f32 %v5530_v20, %v500_v52  ;;  %4536 = vmatprep.mubr.bf16.mxu1 %v5782_v6  ;;  %4245 = vmatpush3.bf16.msra.mxu1 %v4734_v61 }
  0x90   : > { %v1657_v46 = vrot.slane %v5750_v41, 1  ;;  %v3654_v40 = vmul.f32 -1.442695, %v5822_v57  ;;  %v5842_v44 = vadd.f32 %v5530_v20, %v501_v36  ;;  %v5845_v1 = vadd.f32 %v5530_v20, %v502_v59  ;;  %4246 = vmatprep.subr.bf16.mxu1 %v4735_v62 }
  0x91   : > { %4932 = vpow2.f32 %v3653_v55  ;;  %v3655_v41 = vmul.f32 -1.442695, %v5829_v43  ;;  %v3656_v5 = vmul.f32 -1.442695, %v5833_v15  ;;  %v1680_v62 = vrot.slane %v5550_v49, 1 }
  0x92   : > { %v4915_v61 = vpop.eup %4914  ;;  %4934 = vpow2.f32 %v3654_v40  ;;  %v3657_v24 = vmul.f32 -1.442695, %v5842_v44  ;;  %v3658_v29 = vmul.f32 -1.442695, %v5845_v1  ;;  %v1681_v45 = vrot.slane %v5565_v27, 1 }
  0x93   : > { %v4917_v37 = vpop.eup %4916  ;;  %3766 = vmatmul.mubr.msk.bf16.gmra.mxu0 %vm5350_vm4, %v5768_v34  ;;  %v927_v20 = vmul.f32 %v4915_v61, %v5600_v3  ;;  %4936 = vpow2.f32 %v3655_v41  ;;  %v5863_v36 = vsel %vm1634_vm5, %v1653_v8, %v1654_v7  ;;  %v5867_v55 = vsel %vm1634_vm5, %v1656_v54, %v1657_v46  ;;  %4247 = vmatpush3.bf16.msra.mxu1 %v4736_v13  ;;  %v4739_v3 = vld [vmem:[%s6810_s4 + $0x18] sm:$0xff]  }
  0x94   : > { %v4919_v52 = vpop.eup %4918  ;;  %v928_v59 = vmul.f32 %v4917_v37, %v5612_v14  ;;  %4938 = vpow2.f32 %v3656_v5  ;;  %4248 = vmatprep.subr.bf16.mxu1 %v4738_v56  ;;  %v4741_v14 = vld [vmem:[%s6810_s4 + $0x50] sm:$0xff]   ;;  %v5879_v8 = vsel %vm1634_vm5, %v1680_v62, %v1681_v45  ;;  %v1762_v40 = vrot.slane %v5658_v58, 1  ;;  %v4743_v58 = vld [vmem:[%s6810_s4 + $0x48] sm:$0xff]  }
  0x95   : > { %v4921_v49 = vpop.eup %4920  ;;  %v929_v27 = vmul.f32 %v4919_v52, %v5619_v23  ;;  %v1327_v11 = vsel %vm1033_vm0, %v927_v20, 0.0  ;;  %4940 = vpow2.f32 %v3657_v24  ;;  %v1763_v52 = vrot.slane %v5667_v19, 1  ;;  %v4744_v19 = vld [vmem:[%s6810_s4 + $0x8] sm:$0xff]  }
  0x96   : > { %v4923_v7 = vpop.eup %4922  ;;  %v1373_v54 = vpack.c.bf16 %v928_v59, %v1327_v11  ;;  %v770_v46 = vadd.f32 1.0, %v4921_v49  ;;  %4942 = vpow2.f32 %v3658_v29  ;;  %4537 = vmatmul.mubr.bf16.gmra.mxu1 %v5863_v36  ;;  %v4742_v29 = vld [vmem:[%s6810_s4 + $0x10] sm:$0xff]  }
  0x97   : > { %v4925_v13 = vpop.eup %4924  ;;  %v1329_v23 = vsel %vm1134_vm1, %v929_v27, 0.0  ;;  %4540 = vmatprep.mubr.bf16.mxu1 %v5867_v55  ;;  %4249 = vmatpush3.bf16.msra.mxu1 %v4739_v3  ;;  %v5890_v62 = vmul.f32 %v4923_v7, %v5629_v25 }
  0x98   : > { %v4927_v56 = vpop.eup %4926  ;;  %v1374_v41 = vpack.c.bf16 %v1329_v23, %v1329_v23  ;;  %v1491_v5 = vshrl.u32 %v1373_v54, 16  ;;  %v1493_v61 = vshll.u32 %v1373_v54, 16  ;;  %v1659_v24 = vrot.slane %v1373_v54, 1  ;;  %4250 = vmatprep.subr.bf16.mxu1 %v4741_v14 }
  0x99   : > { %v4929_v37 = vpop.eup %4928  ;;  %4944 = vrcp.f32 %v770_v46  ;;  %v771_v45 = vadd.f32 1.0, %v4927_v56  ;;  %v5896_v23 = vpack.c.bf16 %v928_v59, %v927_v20  ;;  %v931_v46 = vmul.f32 %v4925_v13, %v5632_v10  ;;  %v4746_v10 = vld [vmem:[%s6810_s4 + $0x40] sm:$0xff]  }
  0x9a   : > { %v4931_v49 = vpop.eup %4930  ;;  %v1495_v27 = vrot.slane %v1493_v61, 1  ;;  %v1498_v3 = vshll.u32 %v1374_v41, 16  ;;  %v1660_v11 = vrot.slane %v1374_v41, 1  ;;  %v772_v54 = vadd.f32 1.0, %v4929_v37 }
  0x9b   : > { %v773_v34 = vadd.f32 1.0, %v4931_v49  ;;  %4946 = vrcp.f32 %v771_v45  ;;  %4251 = vmatpush3.bf16.msra.mxu1 %v4742_v29  ;;  %v1330_v20 = vsel %vm1033_vm0, %v5890_v62, 0.0  ;;  %v5915_v56 = vsel %vm1634_vm5, %v1762_v40, %v1763_v52  ;;  %v4747_v29 = vld [vmem:[%s6810_s4] sm:$0xff]   ;;  %v5928_v45 = vld [vmem:[%s6810_s4 + $0x238] sm:$0xff]  }
  0x9c   : > { %v1496_v25 = vor.u32 %v1495_v27, %v1491_v5  ;;  %v1500_v7 = vrot.slane %v1498_v3, 1  ;;  %v5900_v14 = vsel %vm1634_vm5, %v1659_v24, %v1660_v11  ;;  %4948 = vrcp.f32 %v772_v54  ;;  %4252 = vmatprep.subr.bf16.mxu1 %v4743_v58 }
  0x9d   : > { %4950 = vrcp.f32 %v773_v34  ;;  %v1375_v34 = vpack.c.bf16 %v931_v46, %v1330_v20 }
  0x9e   : > { %v4933_v59 = vpop.eup %4932  ;;  %v5912_v13 = vsel %vm1393_vm2, %v1496_v25, %v1500_v7  ;;  %4541 = vmatmul.mubr.bf16.gmra.mxu1 %v5900_v14 }
  0x9f   : > { %v4935_v41 = vpop.eup %4934  ;;  %2047 = vmatprep.mubr.bf16.mxu0 %v5912_v13  ;;  %v774_v5 = vadd.f32 1.0, %v4933_v59  ;;  %4253 = vmatpush3.bf16.msra.mxu1 %v4744_v19  ;;  %v1505_v3 = vshll.u32 %v1375_v34, 16  ;;  %v1503_v19 = vshrl.u32 %v1375_v34, 16 }
  0xa0   : > { %v4937_v61 = vpop.eup %4936  ;;  %3769 = vmatmul.mubr.msk.bf16.gmra.mxu0 %vm5350_vm4, %v5896_v23  ;;  %v775_v24 = vadd.f32 1.0, %v4935_v41  ;;  %4254 = vmatprep.subr.bf16.mxu1 %v4746_v10 }
  0xa1   : > { %v4939_v40 = vpop.eup %4938  ;;  %v776_v37 = vadd.f32 1.0, %v4937_v61  ;;  %4952 = vrcp.f32 %v774_v5  ;;  %v1507_v20 = vrot.slane %v1505_v3, 1 }
  0xa2   : > { %v4941_v58 = vpop.eup %4940  ;;  %4954 = vrcp.f32 %v775_v24  ;;  %v777_v52 = vadd.f32 1.0, %v4939_v40  ;;  %v1662_v24 = vrot.slane %v1375_v34, 1 }
  0xa3   : > { %v4943_v49 = vpop.eup %4942  ;;  %4956 = vrcp.f32 %v776_v37  ;;  %v778_v27 = vadd.f32 1.0, %v4941_v58  ;;  %4255 = vmatpush3.bf16.msra.mxu1 %v4747_v29 }
  0xa4   : > { %v779_v11 = vadd.f32 1.0, %v4943_v49  ;;  %4958 = vrcp.f32 %v777_v52  ;;  %4608 = vmatprep.subr.bf16.mxu1 %v5928_v45 }
  0xa5   : > { %4960 = vrcp.f32 %v778_v27  ;;  %v5940_v27 = vpack.c.bf16 %v931_v46, %v5890_v62 }
  0xa6   : > { %v4945_v54 = vpop.eup %4944  ;;  %4962 = vrcp.f32 %v779_v11 }
  0xa7   : > { %v932_v25 = vmul.f32 %v4945_v54, %v5642_v35  ;;  %v1508_v35 = vor.u32 %v1507_v20, %v1503_v19 }
  0xa8   : > { %v4947_v7 = vpop.eup %4946 }
  0xa9   : > { %v4949_v10 = vpop.eup %4948  ;;  %v1332_v59 = vsel %vm1134_vm1, %v932_v25, 0.0  ;;  %v933_v41 = vmul.f32 %v4947_v7, %v5775_v63 }
  0xaa   : > { %v4951_v5 = vpop.eup %4950  ;;  %v1376_v61 = vpack.c.bf16 %v1332_v59, %v1332_v59  ;;  %v934_v29 = vmul.f32 %v4949_v10, %v5786_v60 }
  0xab   : > { %v935_v40 = vmul.f32 %v4951_v5, %v5789_v47  ;;  %v1333_v37 = vsel %vm1033_vm0, %v933_v41, 0.0 }
  0xac   : > { %v1510_v58 = vshll.u32 %v1376_v61, 16  ;;  %v1663_v52 = vrot.slane %v1376_v61, 1  ;;  %v1377_v49 = vpack.c.bf16 %v934_v29, %v1333_v37  ;;  %v1674_v37 = vrot.slane %v5338_v22, 1 }
  0xad   : > { %v1335_v63 = vsel %vm1134_vm1, %v935_v40, 0.0 }
  0xae   : > { %v4953_v3 = vpop.eup %4952  ;;  %v1512_v11 = vrot.slane %v1510_v58, 1  ;;  %v5945_v34 = vsel %vm1634_vm5, %v1662_v24, %v1663_v52  ;;  %v1378_v60 = vpack.c.bf16 %v1335_v63, %v1335_v63  ;;  %v1665_v47 = vrot.slane %v1377_v49, 1 }
  0xaf   : > { %v4955_v54 = vpop.eup %4954  ;;  %4544 = vmatprep.mubr.bf16.mxu1 %v5945_v34  ;;  %v1515_v25 = vshrl.u32 %v1377_v49, 16  ;;  %v1517_v7 = vshll.u32 %v1377_v49, 16  ;;  %v936_v19 = vmul.f32 %v4953_v3, %v5817_v50  ;;  %v1675_v3 = vrot.slane %v5340_v48, 1 }
  0xb0   : > { %v4957_v20 = vpop.eup %4956  ;;  %v5950_v62 = vsel %vm1393_vm2, %v1508_v35, %v1512_v11  ;;  %v1666_v46 = vrot.slane %v1378_v60, 1  ;;  %v1522_v10 = vshll.u32 %v1378_v60, 16  ;;  %v937_v59 = vmul.f32 %v4955_v54, %v5822_v57 }
  0xb1   : > { %v4959_v5 = vpop.eup %4958  ;;  %2055 = vmatprep.mubr.bf16.mxu0 %v5950_v62  ;;  %v1519_v61 = vrot.slane %v1517_v7, 1  ;;  %v938_v24 = vmul.f32 %v4957_v20, %v5829_v43  ;;  %v1336_v40 = vsel %vm1033_vm0, %v936_v19, 0.0  ;;  %v5989_v18 = vsel %vm1634_vm5, %v1674_v37, %v1675_v3 }
  0xb2   : > { %v4961_v50 = vpop.eup %4960  ;;  %3772 = vmatmul.mubr.msk.bf16.gmra.mxu0 %vm5350_vm4, %v5940_v27  ;;  %v5962_v35 = vsel %vm1634_vm5, %v1665_v47, %v1666_v46  ;;  %v1524_v57 = vrot.slane %v1522_v10, 1  ;;  %v1379_v58 = vpack.c.bf16 %v937_v59, %v1336_v40  ;;  %v939_v52 = vmul.f32 %v4959_v5, %v5833_v15 }
  0xb3   : > { %v4963_v49 = vpop.eup %4962  ;;  %4545 = vmatmul.mubr.bf16.gmra.mxu1 %v5962_v35  ;;  %v1520_v43 = vor.u32 %v1519_v61, %v1515_v25  ;;  %v1338_v63 = vsel %vm1134_vm1, %v938_v24, 0.0  ;;  %v940_v22 = vmul.f32 %v4961_v50, %v5842_v44  ;;  %v5977_v10 = vpack.c.bf16 %v934_v29, %v933_v41 }
  0xb4   : > { %v1380_v11 = vpack.c.bf16 %v1338_v63, %v1338_v63  ;;  %v1668_v60 = vrot.slane %v1379_v58, 1  ;;  %v941_v47 = vmul.f32 %v4963_v49, %v5845_v1  ;;  %v1339_v54 = vsel %vm1033_vm0, %v939_v52, 0.0 }
  0xb5   : > { %v5974_v15 = vsel %vm1393_vm2, %v1520_v43, %v1524_v57  ;;  %v1381_v7 = vpack.c.bf16 %v940_v22, %v1339_v54  ;;  %v1527_v20 = vshrl.u32 %v1379_v58, 16  ;;  %v1529_v25 = vshll.u32 %v1379_v58, 16 }
  0xb6   : > { %2063 = vmatprep.mubr.bf16.mxu0 %v5974_v15  ;;  %v1669_v46 = vrot.slane %v1380_v11, 1  ;;  %v1341_v48 = vsel %vm1134_vm1, %v941_v47, 0.0  ;;  %v1534_v44 = vshll.u32 %v1380_v11, 16  ;;  %v1678_v37 = vrot.slane %v5397_v2, 1 }
  0xb7   : > { %v1382_v5 = vpack.c.bf16 %v1341_v48, %v1341_v48  ;;  %v1671_v1 = vrot.slane %v1381_v7, 1  ;;  %v1531_v61 = vrot.slane %v1529_v25, 1  ;;  %v1539_v40 = vshrl.u32 %v1381_v7, 16  ;;  %v4752_v25 = vld [vmem:[%s6810_s4 + $0x1b0] sm:$0xff]   ;;  %v4754_v48 = vld [vmem:[%s6810_s4 + $0x1a8] sm:$0xff]  }
  0xb8   : > { %v5982_v53 = vsel %vm1634_vm5, %v1668_v60, %v1669_v46  ;;  %v1536_v24 = vrot.slane %v1534_v44, 1  ;;  %v1541_v50 = vshll.u32 %v1381_v7, 16  ;;  %v1677_v60 = vrot.slane %v5390_v32, 1  ;;  %v4753_v46 = vld [vmem:[%s6810_s4 + $0x1e8] sm:$0xff]   ;;  %v4756_v44 = vld [vmem:[%s6810_s4 + $0x1e0] sm:$0xff]  }
  0xb9   : > { %4548 = vmatprep.mubr.bf16.mxu1 %v5982_v53  ;;  %v1672_v57 = vrot.slane %v1382_v5, 1  ;;  %v1532_v58 = vor.u32 %v1531_v61, %v1527_v20  ;;  %v1546_v49 = vshll.u32 %v1382_v5, 16  ;;  %v6002_v3 = vpack.c.bf16 %v937_v59, %v936_v19  ;;  %v4755_v20 = vld [vmem:[%s6810_s4 + $0x230] sm:$0xff]   ;;  %v4758_v5 = vld [vmem:[%s6810_s4 + $0x1d8] sm:$0xff]  }
  0xba   : > { %3775 = vmatmul.mubr.msk.bf16.gmra.mxu0 %vm5350_vm4, %v5977_v10  ;;  %v1543_v41 = vrot.slane %v1541_v50, 1  ;;  %v6008_v54 = vsel %vm1634_vm5, %v1677_v60, %v1678_v37  ;;  %v6016_v32 = vpack.c.bf16 %v940_v22, %v939_v52  ;;  %v6833_v2 = vmov 0.0|0.0   ;;  %v4749_v52 = vld [vmem:[%s6810_s4 + $0x1b8] sm:$0xff]   ;;  %v4751_v22 = vld [vmem:[%s6810_s4 + $0x1f0] sm:$0xff]   ;;  %v4763_v50 = vld [vmem:[%s6810_s4 + $0x1c8] sm:$0xff]  }
  0xbb   : > { %v5992_v29 = vsel %vm1634_vm5, %v1671_v1, %v1672_v57  ;;  %v5995_v43 = vsel %vm1393_vm2, %v1532_v58, %v1536_v24  ;;  %v1548_v11 = vrot.slane %v1546_v49, 1  ;;  %v6019_v19 = vrot.slane %v6833_v2, 1  ;;  %v4768_v1 = vld [vmem:[%s6810_s4 + $0x218] sm:$0xff]   ;;  %v4769_v24 = vld [vmem:[%s6810_s4 + $0x210] sm:$0xff]   ;;  %v4770_v57 = vld [vmem:[%s6810_s4 + $0x208] sm:$0xff]  }
  0xbc   : > { %4549 = vmatmul.mubr.bf16.gmra.mxu1 %v5992_v29  ;;  %2071 = vmatprep.mubr.bf16.mxu0 %v5995_v43  ;;  %v1544_v63 = vor.u32 %v1543_v41, %v1539_v40  ;;  %v4992_v59 = vmov 0   ;;  %v4759_v61 = vld [vmem:[%s6810_s4 + $0x198] sm:$0xff]   ;;  %v4762_v40 = vld [vmem:[%s6810_s4 + $0x190] sm:$0xff]   ;;  %v4764_v58 = vld [vmem:[%s6810_s4 + $0x188] sm:$0xff]  }
  0xbd   : > { %4552 = vmatprep.mubr.bf16.mxu1 %v5989_v18  ;;  %v6021_v7 = vrot.slane %v4992_v59, 1  ;;  %v4766_v49 = vld [vmem:[%s6810_s4 + $0x1c0] sm:$0xff]   ;;  %v6853_v60 = vld [vmem:[#allocation11_spill] sm:$0xff] }
  0xbe   : > { %v6005_v47 = vsel %vm1393_vm2, %v1544_v63, %v1548_v11  ;;  %v4771_v41 = vld [vmem:[%s6810_s4 + $0x200] sm:$0xff]   ;;  %v6852_v11 = vld [vmem:[#allocation8_spill] sm:$0xff] }
  0xbf   : > { %v4767_v63 = vld [vmem:[%s6810_s4 + $0x180] sm:$0xff]  }
  0xc2   : > { %3778 = vmatmul.mubr.msk.bf16.gmra.mxu0 %vm5350_vm4, %v6002_v3 }
  0xc3   : > { %2079 = vmatprep.mubr.bf16.mxu0 %v6005_v47 }
  0xc4   : > { %4553 = vmatmul.mubr.bf16.gmra.mxu1 %v6008_v54 }
  0xc5   : > { %4556 = vmatprep.mubr.bf16.mxu1 %v5879_v8 }
  0xca   : > { %3781 = vmatmul.mubr.msk.bf16.gmra.mxu0 %vm5350_vm4, %v6016_v32 }
  0xcb   : > { %4576 = vmatprep.mubr.bf16.mxu0 %v6019_v19 }
  0xcc   : > { %4557 = vmatmul.mubr.bf16.gmra.mxu1 %v5915_v56 }
  0xcd   : > { %2457 = vmatprep.mubr.bf16.mxu1 %v6021_v7 }
  0xd2   : > { %4577 = vmatmul.mubr.bf16.vlgmr.msra.gmra.mxu0 %v5511_v26  ;;  %v4760_v26 = vld [vmem:[%s6810_s4 + $0x228] sm:$0xff]  }
  0xd3   : > { %4377 = vmatpush3.bf16.msra.mxu0 %v4749_v52  ;;  %4580 = vmatprep.mubr.bf16.mxu0 %v5520_v16 }
  0xd4   : > { %2458 = vmatmul.mubr.bf16.vlgmr.msra.gmra.mxu1 %v6833_v2  ;;  %4378 = vmatprep.subr.bf16.mxu0 %v4751_v22 }
  0xd5   : > { %4609 = vmatpush3.bf16.msra.mxu1 %v5928_v45  ;;  %2465 = vmatprep.mubr.bf16.mxu1 %v5363_v39  ;;  %v4765_v39 = vld [vmem:[%s6810_s4 + $0x220] sm:$0xff]  }
  0xd6   : > { %4610 = vmatprep.subr.bf16.mxu1 %v4755_v20  ;;  %v4757_v45 = vld [vmem:[%s6810_s4 + $0x1a0] sm:$0xff]  }
  0xd7   : > { %4379 = vmatpush3.bf16.msra.mxu0 %v4752_v25  ;;  %v6854_v25 = vld [vmem:[#allocation12_spill] sm:$0xff] }
  0xd8   : > { %4380 = vmatprep.subr.bf16.mxu0 %v4753_v46 }
  0xd9   : > { %4611 = vmatpush3.bf16.msra.mxu1 %v4755_v20 }
  0xda   : > { %4581 = vmatmul.mubr.bf16.gmra.mxu0 %v5595_v30  ;;  %4612 = vmatprep.subr.bf16.mxu1 %v4760_v26 }
  0xdb   : > { %4584 = vmatprep.mubr.bf16.mxu0 %v5737_v28  ;;  %4381 = vmatpush3.bf16.msra.mxu0 %v4754_v48 }
  0xdc   : > { %3820 = vmatmul.mubr.msk.bf16.gmra.mxu1 %vm5350_vm4, %v5332_v12  ;;  %4382 = vmatprep.subr.bf16.mxu0 %v4756_v44  ;;  %v4761_v12 = vld [vmem:[%s6810_s4 + $0x1d0] sm:$0xff]  }
  0xdd   : > { %2473 = vmatprep.mubr.bf16.mxu1 %v5416_v9  ;;  %4613 = vmatpush3.bf16.msra.mxu1 %v4760_v26 }
  0xde   : > { %4614 = vmatprep.subr.bf16.mxu1 %v4765_v39 }
  0xdf   : > { %4383 = vmatpush3.bf16.msra.mxu0 %v4757_v45 }
  0xe0   : > { %4384 = vmatprep.subr.bf16.mxu0 %v4758_v5 }
  0xe1   : > { %4615 = vmatpush3.bf16.msra.mxu1 %v4765_v39 }
  0xe2   : > { %4585 = vmatmul.mubr.bf16.gmra.mxu0 %v5782_v6  ;;  %4616 = vmatprep.subr.bf16.mxu1 %v4768_v1 }
  0xe3   : > { %4588 = vmatprep.mubr.bf16.mxu0 %v5863_v36  ;;  %4385 = vmatpush3.bf16.msra.mxu0 %v4759_v61 }
  0xe4   : > { %3823 = vmatmul.mubr.msk.bf16.gmra.mxu1 %vm5350_vm4, %v5392_v33  ;;  %4386 = vmatprep.subr.bf16.mxu0 %v4761_v12 }
  0xe5   : > { %2481 = vmatprep.mubr.bf16.mxu1 %v5463_v21  ;;  %4617 = vmatpush3.bf16.msra.mxu1 %v4768_v1 }
  0xe6   : > { %4618 = vmatprep.subr.bf16.mxu1 %v4769_v24 }
  0xe7   : > { %4387 = vmatpush3.bf16.msra.mxu0 %v4762_v40 }
  0xe8   : > { %4388 = vmatprep.subr.bf16.mxu0 %v4763_v50 }
  0xe9   : > { %4619 = vmatpush3.bf16.msra.mxu1 %v4769_v24 }
  0xea   : > { %4589 = vmatmul.mubr.bf16.gmra.mxu0 %v5867_v55  ;;  %4620 = vmatprep.subr.bf16.mxu1 %v4770_v57 }
  0xeb   : > { %4592 = vmatprep.mubr.bf16.mxu0 %v5900_v14  ;;  %4389 = vmatpush3.bf16.msra.mxu0 %v4764_v58 }
  0xec   : > { %3826 = vmatmul.mubr.msk.bf16.gmra.mxu1 %vm5350_vm4, %v5459_v0  ;;  %4390 = vmatprep.subr.bf16.mxu0 %v4766_v49 }
  0xed   : > { %2489 = vmatprep.mubr.bf16.mxu1 %v5673_v31  ;;  %4621 = vmatpush3.bf16.msra.mxu1 %v4770_v57 }
  0xee   : > { %4622 = vmatprep.subr.bf16.mxu1 %v4771_v41 }
  0xef   : > { %4391 = vmatpush3.bf16.msra.mxu0 %v4767_v63 }
  0xf1   : > { %4623 = vmatpush3.bf16.msra.mxu1 %v4771_v41 }
  0xf2   : > { %4593 = vmatmul.mubr.bf16.gmra.mxu0 %v5945_v34 }
  0xf3   : > { %4596 = vmatprep.mubr.bf16.mxu0 %v5962_v35 }
  0xf4   : > { %3829 = vmatmul.mubr.msk.bf16.gmra.mxu1 %vm5350_vm4, %v6852_v11 }
  0xf5   : > { %2497 = vmatprep.mubr.bf16.mxu1 %v5732_v4 }
  0xfa   : > { %4597 = vmatmul.mubr.bf16.gmra.mxu0 %v5982_v53 }
  0xfb   : > { %4600 = vmatprep.mubr.bf16.mxu0 %v5992_v29 }
  0xfc   : > { %3832 = vmatmul.mubr.msk.bf16.gmra.mxu1 %vm5350_vm4, %v6853_v60 }
  0xfd   : > { %2505 = vmatprep.mubr.bf16.mxu1 %v5758_v17 }
 0x102   : > { %4601 = vmatmul.mubr.bf16.gmra.mxu0 %v5989_v18 }
 0x103   : > { %4604 = vmatprep.mubr.bf16.mxu0 %v6008_v54 }
 0x104   : > { %3835 = vmatmul.mubr.msk.bf16.gmra.mxu1 %vm5350_vm4, %v5762_v38 }
 0x105   : > { %2513 = vmatprep.mubr.bf16.mxu1 %v5794_v42 }
 0x106   : > { %v4120_v37 = vpop.f32.mrf.mxu0 }
 0x108   : > { %v4121_v59 = vpop.f32.mrf.mxu0 }
 0x109   : > { %v6137_v52 = vadd.f32 %v4121_v59, %v4120_v37  ;;  %v6856_v59 = vld [vmem:[#allocation2_spill] sm:$0xff] }
 0x10a   : > { %4605 = vmatmul.mubr.bf16.gmra.mxu0 %v5879_v8  ;;  %v4192_v22 = vpop.f32.mrf.mxu1  ;;  %v6140_v20 = vpop.f32.mrf.mxu0 }
 0x10b   : > { %2991 = vmatprep.mubr.bf16.mxu0 %v5416_v9 }
 0x10c   : > { %3838 = vmatmul.mubr.msk.bf16.gmra.mxu1 %vm5350_vm4, %v6854_v25  ;;  %v4193_v46 = vpop.f32.mrf.mxu1  ;;  %v6146_v26 = vpop.f32.mrf.mxu0 }
 0x10d   : > { %2521 = vmatprep.mubr.bf16.mxu1 %v5912_v13  ;;  %v6148_v48 = vadd.f32 %v4193_v46, %v4192_v22 }
 0x10e   : > { %v6150_v44 = vpop.f32.mrf.mxu1  ;;  %v4126_v39 = vpop.f32.mrf.mxu0 }
 0x110   : > { %v6152_v45 = vpop.f32.mrf.mxu1  ;;  %v4127_v9 = vpop.f32.mrf.mxu0 }
 0x111   : > { %v6157_v5 = vadd.f32 %v4127_v9, %v4126_v39 }
 0x112   : > { %3937 = vmatmul.mubr.msk.bf16.vlgmr.msra.gmra.mxu0 %vm5350_vm4, %v5392_v33  ;;  %v4198_v1 = vpop.f32.mrf.mxu1  ;;  %v6160_v61 = vpop.f32.mrf.mxu0 }
 0x113   : > { %2999 = vmatprep.mubr.bf16.mxu0 %v5463_v21 }
 0x114   : > { %3841 = vmatmul.mubr.msk.bf16.gmra.mxu1 %vm5350_vm4, %v5896_v23  ;;  %v4199_v12 = vpop.f32.mrf.mxu1  ;;  %v4130_v24 = vpop.f32.mrf.mxu0 }
 0x115   : > { %2529 = vmatprep.mubr.bf16.mxu1 %v5950_v62  ;;  %v6166_v40 = vadd.f32 %v4199_v12, %v4198_v1 }
 0x116   : > { %v4132_v50 = vpop.f32.mrf.mxu0  ;;  %v6178_v21 = vpop.f32.mrf.mxu1 }
 0x118   : > { %v4133_v57 = vpop.f32.mrf.mxu0 }
 0x119   : > { %v6171_v33 = vadd.f32 %v4133_v57, %v4132_v50  ;;  %v6858_v57 = vld [vmem:[#allocation4_spill] sm:$0xff] }
 0x11a   : > { %3940 = vmatmul.mubr.msk.bf16.gmra.mxu0 %vm5350_vm4, %v5459_v0  ;;  %v6188_v0 = vpop.f32.mrf.mxu1 }
 0x11b   : > { %3007 = vmatprep.mubr.bf16.mxu0 %v5673_v31  ;;  %v4203_v51 = vadd.f32 %v6188_v0, %v6178_v21 }
 0x11c   : > { %3844 = vmatmul.mubr.msk.bf16.gmra.mxu1 %vm5350_vm4, %v5940_v27 }
 0x11d   : > { %2537 = vmatprep.mubr.bf16.mxu1 %v5974_v15 }
 0x122   : > { %3943 = vmatmul.mubr.msk.bf16.gmra.mxu0 %vm5350_vm4, %v6852_v11  ;;  %v4135_v11 = vpop.f32.mrf.mxu0 }
 0x123   : > { %3015 = vmatprep.mubr.bf16.mxu0 %v5732_v4 }
 0x124   : > { %3847 = vmatmul.mubr.msk.bf16.gmra.mxu1 %vm5350_vm4, %v5977_v10 }
 0x125   : > { %2545 = vmatprep.mubr.bf16.mxu1 %v5995_v43 }
 0x128   : > { %v4204_v31 = vpop.f32.mrf.mxu1 }
 0x12a   : > { %3946 = vmatmul.mubr.msk.bf16.gmra.mxu0 %vm5350_vm4, %v6853_v60  ;;  %v4205_v58 = vpop.f32.mrf.mxu1  ;;  %v4136_v60 = vpop.f32.mrf.mxu0 }
 0x12b   : > { %3023 = vmatprep.mubr.bf16.mxu0 %v5758_v17  ;;  %v6197_v4 = vadd.f32 %v4205_v58, %v4204_v31  ;;  %v6855_v17 = vld [vmem:[#allocation3_spill] sm:$0xff] }
 0x12c   : > { %3850 = vmatmul.mubr.msk.bf16.gmra.mxu1 %vm5350_vm4, %v6002_v3  ;;  %v4207_v49 = vpop.f32.mrf.mxu1  ;;  %v6859_v31 = vld [vmem:[#allocation7_spill] sm:$0xff] }
 0x12d   : > { %2553 = vmatprep.mubr.bf16.mxu1 %v6005_v47 }
 0x12e   : > { %v4208_v41 = vpop.f32.mrf.mxu1 }
 0x12f   : > { %v6200_v63 = vadd.f32 %v4208_v41, %v4207_v49 }
 0x132   : > { %3949 = vmatmul.mubr.msk.bf16.gmra.mxu0 %vm5350_vm4, %v5762_v38 }
 0x133   : > { %3031 = vmatprep.mubr.bf16.mxu0 %v5794_v42  ;;  %v6857_v42 = vld [vmem:[#allocation5_spill] sm:$0xff] }
 0x134   : > { %3853 = vmatmul.mubr.msk.bf16.gmra.mxu1 %vm5350_vm4, %v6016_v32 }
 0x135   : > { %2561 = vmatprep.mubr.bf16.mxu1 %v6855_v17 }
 0x139   : > { %v4138_v37 = vpop.f32.mrf.mxu0 }
 0x13a   : > { %3952 = vmatmul.mubr.msk.bf16.gmra.mxu0 %vm5350_vm4, %v6854_v25 }
 0x13b   : > { %3039 = vmatprep.mubr.bf16.mxu0 %v5912_v13  ;;  %v4139_v38 = vpop.f32.mrf.mxu0 }
 0x13c   : > { %3856 = vmatmul.mubr.msk.bf16.gmra.mxu1 %vm5350_vm4, %v6856_v59  ;;  %v4140_v22 = vadd.f32 %v4139_v38, %v4138_v37 }
 0x13d   : > { %2569 = vmatprep.mubr.bf16.mxu1 %v6857_v42  ;;  %v4141_v46 = vpop.f32.mrf.mxu0 }
 0x13e   : > { %v4210_v39 = vpop.f32.mrf.mxu1 }
 0x13f   : > { %v4142_v9 = vpop.f32.mrf.mxu0 }
 0x140   : > { %v4211_v1 = vpop.f32.mrf.mxu1  ;;  %v4143_v12 = vadd.f32 %v4142_v9, %v4141_v46  ;;  %v4131_v9 = vadd.f32 %v4130_v24, %v6160_v61 }
 0x141   : > { %v6221_v25 = vadd.f32 %v4211_v1, %v4210_v39 }
 0x142   : > { %3955 = vmatmul.mubr.msk.bf16.gmra.mxu0 %vm5350_vm4, %v5896_v23  ;;  %v4213_v13 = vpop.f32.mrf.mxu1 }
 0x143   : > { %3047 = vmatprep.mubr.bf16.mxu0 %v5950_v62  ;;  %v4144_v50 = vpop.f32.mrf.mxu0 }
 0x144   : > { %3859 = vmatmul.mubr.msk.bf16.gmra.mxu1 %vm5350_vm4, %v6858_v57  ;;  %v4214_v58 = vpop.f32.mrf.mxu1 }
 0x145   : > { %2577 = vmatprep.mubr.bf16.mxu1 %v6859_v31  ;;  %v4145_v49 = vpop.f32.mrf.mxu0  ;;  %v6228_v41 = vadd.f32 %v4214_v58, %v4213_v13  ;;  %v6860_v58 = vld [vmem:[#allocation6_spill] sm:$0xff] }
 0x146   : > { %v4146_v37 = vadd.f32 %v4145_v49, %v4144_v50  ;;  %v4530_v38 = vpop.f32.mrf.mxu1 }
 0x147   : > { %v4147_v46 = vpop.f32.mrf.mxu0  ;;  %v6231_v23 = vadd.f32 %v4530_v38, %v6157_v5  ;;  %v4125_v5 = vadd.f32 %v6146_v26, %v6140_v20 }
 0x148   : > { %v2154_v39 = vpop.f32.mrf.mxu1 }
 0x149   : > { %v4148_v62 = vpop.f32.mrf.mxu0  ;;  %v6238_v1 = vadd.f32 %v6137_v52, %v2154_v39 }
 0x14a   : > { %3958 = vmatmul.mubr.msk.bf16.gmra.mxu0 %vm5350_vm4, %v5940_v27  ;;  %v4149_v2 = vadd.f32 %v4148_v62, %v4147_v46  ;;  %v4531_v13 = vpop.f32.mrf.mxu1 }
 0x14b   : > { %3055 = vmatprep.mubr.bf16.mxu0 %v5974_v15  ;;  %v4150_v50 = vpop.f32.mrf.mxu0  ;;  %v6246_v61 = vadd.f32 %v4531_v13, %v4131_v9  ;;  %v4137_v13 = vadd.f32 %v4136_v60, %v4135_v11 }
 0x14c   : > { %3862 = vmatmul.mubr.msk.bf16.gmra.mxu1 %vm5350_vm4, %v6860_v58  ;;  %v2157_v27 = vpop.f32.mrf.mxu1 }
 0x14d   : > { %4624 = vmatprep.mubr.bf16.mxu1 %v5520_v16  ;;  %v4151_v24 = vpop.f32.mrf.mxu0  ;;  %v6249_v52 = vadd.f32 %v4125_v5, %v2157_v27 }
 0x14e   : > { %v4152_v49 = vadd.f32 %v4151_v24, %v4150_v50  ;;  %v4534_v38 = vpop.f32.mrf.mxu1 }
 0x14f   : > { %v4153_v15 = vpop.f32.mrf.mxu0  ;;  %v6251_v46 = vadd.f32 %v4534_v38, %v4140_v22 }
 0x150   : > { %v2170_v39 = vpop.f32.mrf.mxu1 }
 0x151   : > { %v4154_v62 = vpop.f32.mrf.mxu0  ;;  %v6257_v20 = vadd.f32 %v6171_v33, %v2170_v39 }
 0x152   : > { %3961 = vmatmul.mubr.msk.bf16.gmra.mxu0 %vm5350_vm4, %v5977_v10  ;;  %v4155_v26 = vadd.f32 %v4154_v62, %v4153_v15  ;;  %v4535_v16 = vpop.f32.mrf.mxu1 }
 0x153   : > { %3063 = vmatprep.mubr.bf16.mxu0 %v5995_v43  ;;  %v4156_v9 = vpop.f32.mrf.mxu0  ;;  %v6261_v50 = vadd.f32 %v4535_v16, %v4143_v12 }
 0x154   : > { %4625 = vmatmul.mubr.bf16.vlgmr.msra.gmra.mxu1 %v5595_v30  ;;  %v2173_v22 = vpop.f32.mrf.mxu1 }
 0x155   : > { %4628 = vmatprep.mubr.bf16.mxu1 %v5737_v28  ;;  %v4157_v5 = vpop.f32.mrf.mxu0  ;;  %v6264_v27 = vadd.f32 %v4137_v13, %v2173_v22 }
 0x156   : > { %v4158_v10 = vadd.f32 %v4157_v5, %v4156_v9  ;;  %v4538_v24 = vpop.f32.mrf.mxu1 }
 0x157   : > { %v4159_v33 = vpop.f32.mrf.mxu0  ;;  %v6266_v38 = vadd.f32 %v4538_v24, %v4152_v49 }
 0x158   : > { %v2186_v15 = vpop.f32.mrf.mxu1 }
 0x159   : > { %v4160_v43 = vpop.f32.mrf.mxu0  ;;  %v6271_v30 = vadd.f32 %v4146_v37, %v2186_v15 }
 0x15a   : > { %3964 = vmatmul.mubr.msk.bf16.gmra.mxu0 %vm5350_vm4, %v6002_v3  ;;  %v4161_v11 = vadd.f32 %v4160_v43, %v4159_v33  ;;  %v4539_v28 = vpop.f32.mrf.mxu1 }
 0x15b   : > { %3071 = vmatprep.mubr.bf16.mxu0 %v6005_v47  ;;  %v6275_v60 = vadd.f32 %v4539_v28, %v4155_v26 }
 0x15c   : > { %4629 = vmatmul.mubr.bf16.gmra.mxu1 %v5782_v6  ;;  %v2189_v12 = vpop.f32.mrf.mxu1 }
 0x15d   : > { %4632 = vmatprep.mubr.bf16.mxu1 %v5863_v36  ;;  %v6278_v49 = vadd.f32 %v4149_v2, %v2189_v12 }
 0x15e   : > { %v4542_v39 = vpop.f32.mrf.mxu1 }
 0x160   : > { %v4162_v62 = vpop.f32.mrf.mxu0  ;;  %v2202_v16 = vpop.f32.mrf.mxu1 }
 0x161   : > { %v6283_v37 = vadd.f32 %v4158_v10, %v2202_v16 }
 0x162   : > { %3967 = vmatmul.mubr.msk.bf16.gmra.mxu0 %vm5350_vm4, %v6016_v32  ;;  %v4163_v3 = vpop.f32.mrf.mxu0  ;;  %v4543_v47 = vpop.f32.mrf.mxu1 }
 0x163   : > { %3079 = vmatprep.mubr.bf16.mxu0 %v6855_v17  ;;  %v4164_v6 = vadd.f32 %v4163_v3, %v4162_v62 }
 0x164   : > { %4633 = vmatmul.mubr.bf16.gmra.mxu1 %v5867_v55  ;;  %v4165_v36 = vpop.f32.mrf.mxu0  ;;  %v2205_v26 = vpop.f32.mrf.mxu1 }
 0x165   : > { %4636 = vmatprep.mubr.bf16.mxu1 %v5900_v14  ;;  %v6288_v2 = vadd.f32 %v4542_v39, %v4164_v6  ;;  %v6290_v13 = vadd.f32 %v4161_v11, %v2205_v26  ;;  %v6862_v6 = vld [vmem:[#allocation9_spill] sm:$0xff] }
 0x166   : > { %v4166_v9 = vpop.f32.mrf.mxu0 }
 0x167   : > { %v4167_v22 = vadd.f32 %v4166_v9, %v4165_v36 }
 0x169   : > { %v6292_v32 = vadd.f32 %v4543_v47, %v4167_v22 }
 0x16a   : > { %3970 = vmatmul.mubr.msk.bf16.gmra.mxu0 %vm5350_vm4, %v6856_v59 }
 0x16b   : > { %3087 = vmatprep.mubr.bf16.mxu0 %v6857_v42 }
 0x16c   : > { %4637 = vmatmul.mubr.bf16.gmra.mxu1 %v5945_v34 }
 0x16d   : > { %4640 = vmatprep.mubr.bf16.mxu1 %v5962_v35 }
 0x172   : > { %v4168_v55 = vpop.f32.mrf.mxu0  ;;  %3973 = vmatmul.mubr.msk.bf16.gmra.mxu0 %vm5350_vm4, %v6858_v57 }
 0x173   : > { %v4546_v14 = vpop.f32.mrf.mxu1  ;;  %3095 = vmatprep.mubr.bf16.mxu0 %v6859_v31 }
 0x174   : > { %4641 = vmatmul.mubr.bf16.gmra.mxu1 %v5982_v53  ;;  %v4169_v17 = vpop.f32.mrf.mxu0  ;;  %v6861_v53 = vld [vmem:[#allocation10_spill] sm:$0xff] }
 0x175   : > { %v4170_v5 = vadd.f32 %v4169_v17, %v4168_v55  ;;  %v2218_v10 = vpop.f32.mrf.mxu1  ;;  %4644 = vmatprep.mubr.bf16.mxu1 %v5992_v29 }
 0x176   : > { %v4171_v59 = vpop.f32.mrf.mxu0 }
 0x177   : > { %v6306_v42 = vadd.f32 %v4170_v5, %v2218_v10  ;;  %v4547_v34 = vpop.f32.mrf.mxu1 }
 0x178   : > { %v4172_v35 = vpop.f32.mrf.mxu0 }
 0x179   : > { %v4173_v24 = vadd.f32 %v4172_v35, %v4171_v59  ;;  %v2221_v33 = vpop.f32.mrf.mxu1  ;;  %v6863_v59 = vmov 0.0|0.0  }
 0x17a   : > { %v4174_v15 = vpop.f32.mrf.mxu0  ;;  %3976 = vmatmul.mubr.msk.bf16.gmra.mxu0 %vm5350_vm4, %v6860_v58 }
 0x17b   : > { %v6311_v57 = vadd.f32 %v4173_v24, %v2221_v33  ;;  %3103 = vmatprep.mubr.bf16.mxu0 %v6861_v53 }
 0x17c   : > { %v4550_v31 = vpop.f32.mrf.mxu1  ;;  %4645 = vmatmul.mubr.bf16.gmra.mxu1 %v5989_v18  ;;  %v4175_v29 = vpop.f32.mrf.mxu0 }
 0x17d   : > { %v4176_v43 = vadd.f32 %v4175_v29, %v4174_v15  ;;  %4648 = vmatprep.mubr.bf16.mxu1 %v6008_v54 }
 0x17e   : > { %v2234_v11 = vpop.f32.mrf.mxu1  ;;  %v4177_v28 = vpop.f32.mrf.mxu0 }
 0x17f   : > { %v6316_v12 = vadd.f32 %v4546_v14, %v4176_v43 }
 0x180   : > { %v4551_v39 = vpop.f32.mrf.mxu1  ;;  %v4178_v62 = vpop.f32.mrf.mxu0 }
 0x181   : > { %v4179_v16 = vadd.f32 %v4178_v62, %v4177_v28 }
 0x182   : > { %v2237_v3 = vpop.f32.mrf.mxu1  ;;  %v4180_v58 = vpop.f32.mrf.mxu0  ;;  %3979 = vmatmul.mubr.msk.bf16.gmra.mxu0 %vm5350_vm4, %v6862_v6 }
 0x183   : > { %v6321_v47 = vadd.f32 %v4547_v34, %v4179_v16  ;;  %3111 = vmatprep.mubr.bf16.mxu0 %v6021_v7 }
 0x184   : > { %v4554_v18 = vpop.f32.mrf.mxu1  ;;  %4649 = vmatmul.mubr.bf16.gmra.mxu1 %v5879_v8  ;;  %v4181_v54 = vpop.f32.mrf.mxu0  ;;  %v4197_v8 = vadd.f32 %v6152_v45, %v6150_v44 }
 0x185   : > { %v6326_v36 = vadd.f32 %v4554_v18, %v6166_v40  ;;  %v4182_v26 = vadd.f32 %v4181_v54, %v4180_v58  ;;  %4652 = vmatprep.mubr.bf16.mxu1 %v5915_v56 }
 0x186   : > { %v2250_v9 = vpop.f32.mrf.mxu1  ;;  %v4183_v22 = vpop.f32.mrf.mxu0 }
 0x187   : > { %v6331_v55 = vadd.f32 %v4182_v26, %v2234_v11  ;;  %v6334_v14 = vadd.f32 %v6148_v48, %v2250_v9 }
 0x188   : > { %v4555_v7 = vpop.f32.mrf.mxu1  ;;  %v4184_v17 = vpop.f32.mrf.mxu0 }
 0x189   : > { %v6338_v40 = vadd.f32 %v4555_v7, %v4203_v51  ;;  %v4185_v5 = vadd.f32 %v4184_v17, %v4183_v22 }
 0x18a   : > { %v2253_v10 = vpop.f32.mrf.mxu1  ;;  %v4186_v56 = vpop.f32.mrf.mxu0  ;;  %3112 = vmatmul.mubr.bf16.gmra.mxu0 %v6863_v59 }
 0x18b   : > { %v6341_v34 = vadd.f32 %v4185_v5, %v2237_v3  ;;  %v6343_v21 = vadd.f32 %v4197_v8, %v2253_v10 }
 0x18c   : > { %v4558_v0 = vpop.f32.mrf.mxu1  ;;  %4653 = vmatmul.mubr.bf16.gmra.mxu1 %v6019_v19  ;;  %v4187_v48 = vpop.f32.mrf.mxu0 }
 0x18d   : > { %v6347_v35 = vadd.f32 %v4558_v0, %v6221_v25  ;;  %v4188_v24 = vadd.f32 %v4187_v48, %v4186_v56 }
 0x18e   : > { %v2266_v44 = vpop.f32.mrf.mxu1  ;;  %v4189_v45 = vpop.f32.mrf.mxu0 }
 0x18f   : > { %6864 = vst [vmem:[#allocation8_spill] sm:$0xff] %v6347_v35  ;;  %v6349_v33 = vadd.f32 %v4550_v31, %v4188_v24  ;;  %v6352_v15 = vadd.f32 %v6197_v4, %v2266_v44 }
 0x190   : > { %v4559_v53 = vpop.f32.mrf.mxu1  ;;  %v4190_v29 = vpop.f32.mrf.mxu0 }
 0x191   : > { %v6355_v43 = vadd.f32 %v4559_v53, %v6228_v41  ;;  %v4191_v11 = vadd.f32 %v4190_v29, %v4189_v45 }
 0x192   : > { %v2269_v28 = vpop.f32.mrf.mxu1  ;;  %v4578_v19 = vpop.f32.mrf.mxu0 }
 0x193   : > { %6865 = vst [vmem:[#allocation11_spill] sm:$0xff] %v6355_v43  ;;  %v6357_v62 = vadd.f32 %v4551_v39, %v4191_v11  ;;  %v6360_v25 = vadd.f32 %v6200_v63, %v2269_v28 }
 0x194   : > { %v4256_v16 = vpop.f32.mrf.mxu1  ;;  %v2620_v3 = vpop.f32.mrf.mxu0 }
 0x196   : > { %v4257_v31 = vpop.f32.mrf.mxu1  ;;  %v4579_v58 = vpop.f32.mrf.mxu0 }
 0x197   : > { %v4258_v6 = vadd.f32 %v4257_v31, %v4256_v16 }
 0x198   : > { %v4259_v4 = vpop.f32.mrf.mxu1  ;;  %v2623_v18 = vpop.f32.mrf.mxu0 }
 0x199   : > { %v2460_v54 = vadd.f32 %v4258_v6, %v6238_v1 }
 0x19a   : > { %v4260_v26 = vpop.f32.mrf.mxu1  ;;  %v4582_v41 = vpop.f32.mrf.mxu0 }
 0x19b   : > { %v6363_v9 = vadd.f32 %v2620_v3, %v2460_v54  ;;  %v4261_v22 = vadd.f32 %v4260_v26, %v4259_v4 }
 0x19c   : > { %v4262_v51 = vpop.f32.mrf.mxu1  ;;  %v2636_v39 = vpop.f32.mrf.mxu0 }
 0x19d   : > { %v2463_v7 = vadd.f32 %v4261_v22, %v6249_v52 }
 0x19e   : > { %v4263_v63 = vpop.f32.mrf.mxu1  ;;  %v4583_v17 = vpop.f32.mrf.mxu0 }
 0x19f   : > { %v6366_v8 = vadd.f32 %v2623_v18, %v2463_v7  ;;  %v4264_v5 = vadd.f32 %v4263_v63, %v4262_v51 }
 0x1a0   : > { %v4265_v10 = vpop.f32.mrf.mxu1  ;;  %v2639_v56 = vpop.f32.mrf.mxu0 }
 0x1a1   : > { %v2468_v59 = vadd.f32 %v4264_v5, %v6231_v23 }
 0x1a2   : > { %v4266_v0 = vpop.f32.mrf.mxu1  ;;  %v4586_v1 = vpop.f32.mrf.mxu0 }
 0x1a3   : > { %v4267_v48 = vadd.f32 %v4266_v0, %v4265_v10  ;;  %v6369_v24 = vadd.f32 %v4578_v19, %v2468_v59 }
 0x1a4   : > { %v4268_v44 = vpop.f32.mrf.mxu1  ;;  %v2652_v45 = vpop.f32.mrf.mxu0 }
 0x1a5   : > { %v2471_v53 = vadd.f32 %v4267_v48, %v6246_v61 }
 0x1a6   : > { %v4269_v29 = vpop.f32.mrf.mxu1  ;;  %v4587_v52 = vpop.f32.mrf.mxu0 }
 0x1a7   : > { %v4270_v11 = vadd.f32 %v4269_v29, %v4268_v44  ;;  %v6372_v28 = vadd.f32 %v4579_v58, %v2471_v53 }
 0x1a8   : > { %v4271_v16 = vpop.f32.mrf.mxu1  ;;  %v2655_v3 = vpop.f32.mrf.mxu0 }
 0x1a9   : > { %v2476_v31 = vadd.f32 %v4270_v11, %v6257_v20 }
 0x1aa   : > { %v4272_v6 = vpop.f32.mrf.mxu1  ;;  %v6375_v23 = vpop.f32.mrf.mxu0 }
 0x1ab   : > { %v4273_v4 = vadd.f32 %v4272_v6, %v4271_v16  ;;  %v6377_v18 = vadd.f32 %v2636_v39, %v2476_v31 }
 0x1ac   : > { %v4274_v19 = vpop.f32.mrf.mxu1  ;;  %v2668_v54 = vpop.f32.mrf.mxu0 }
 0x1ad   : > { %v2479_v26 = vadd.f32 %v4273_v4, %v6264_v27 }
 0x1ae   : > { %v4275_v61 = vpop.f32.mrf.mxu1  ;;  %v6380_v22 = vpop.f32.mrf.mxu0 }
 0x1af   : > { %v4276_v51 = vadd.f32 %v4275_v61, %v4274_v19  ;;  %v6382_v58 = vadd.f32 %v2639_v56, %v2479_v26 }
 0x1b0   : > { %v4277_v7 = vpop.f32.mrf.mxu1  ;;  %v2671_v63 = vpop.f32.mrf.mxu0 }
 0x1b1   : > { %v2484_v20 = vadd.f32 %v4276_v51, %v6251_v46 }
 0x1b2   : > { %v4278_v5 = vpop.f32.mrf.mxu1  ;;  %v6385_v10 = vpop.f32.mrf.mxu0 }
 0x1b3   : > { %v4279_v59 = vadd.f32 %v4278_v5, %v4277_v7  ;;  %v6387_v39 = vadd.f32 %v4582_v41, %v2484_v20 }
 0x1b4   : > { %v4280_v0 = vpop.f32.mrf.mxu1  ;;  %v6389_v48 = vpop.f32.mrf.mxu0 }
 0x1b5   : > { %v2487_v27 = vadd.f32 %v4279_v59, %v6261_v50 }
 0x1b6   : > { %v4281_v44 = vpop.f32.mrf.mxu1  ;;  %v6392_v53 = vpop.f32.mrf.mxu0 }
 0x1b7   : > { %v4282_v56 = vadd.f32 %v4281_v44, %v4280_v0  ;;  %v6394_v29 = vadd.f32 %v4583_v17, %v2487_v27 }
 0x1b8   : > { %v4283_v11 = vpop.f32.mrf.mxu1  ;;  %v6396_v16 = vpop.f32.mrf.mxu0 }
 0x1b9   : > { %v2492_v46 = vadd.f32 %v4282_v56, %v6271_v30 }
 0x1ba   : > { %v4284_v31 = vpop.f32.mrf.mxu1  ;;  %v6399_v6 = vpop.f32.mrf.mxu0 }
 0x1bb   : > { %v4285_v41 = vadd.f32 %v4284_v31, %v4283_v11  ;;  %v6401_v4 = vadd.f32 %v2652_v45, %v2492_v46 }
 0x1bc   : > { %v4286_v19 = vpop.f32.mrf.mxu1  ;;  %v6403_v26 = vpop.f32.mrf.mxu0 }
 0x1bd   : > { %v2495_v50 = vadd.f32 %v4285_v41, %v6278_v49 }
 0x1be   : > { %v4287_v61 = vpop.f32.mrf.mxu1  ;;  %v6406_v51 = vpop.f32.mrf.mxu0 }
 0x1bf   : > { %v4288_v17 = vadd.f32 %v4287_v61, %v4286_v19  ;;  %v6408_v7 = vadd.f32 %v2655_v3, %v2495_v50 }
 0x1c0   : > { %v4289_v20 = vpop.f32.mrf.mxu1  ;;  %v6410_v5 = vpop.f32.mrf.mxu0 }
 0x1c1   : > { %v2500_v30 = vadd.f32 %v4288_v17, %v6266_v38 }
 0x1c2   : > { %v4290_v59 = vpop.f32.mrf.mxu1  ;;  %v6413_v0 = vpop.f32.mrf.mxu0 }
 0x1c3   : > { %v4291_v45 = vadd.f32 %v4290_v59, %v4289_v20  ;;  %v6415_v27 = vadd.f32 %v4586_v1, %v2500_v30 }
 0x1c4   : > { %v4292_v44 = vpop.f32.mrf.mxu1  ;;  %v6417_v56 = vpop.f32.mrf.mxu0 }
 0x1c5   : > { %v2503_v49 = vadd.f32 %v4291_v45, %v6275_v60 }
 0x1c6   : > { %v4293_v11 = vpop.f32.mrf.mxu1  ;;  %v6420_v46 = vpop.f32.mrf.mxu0 }
 0x1c7   : > { %v4294_v3 = vadd.f32 %v4293_v11, %v4292_v44  ;;  %v6422_v31 = vadd.f32 %v4587_v52, %v2503_v49 }
 0x1c8   : > { %v4295_v41 = vpop.f32.mrf.mxu1  ;;  %v6424_v19 = vpop.f32.mrf.mxu0 }
 0x1c9   : > { %v2508_v38 = vadd.f32 %v4294_v3, %v6283_v37 }
 0x1ca   : > { %v4296_v50 = vpop.f32.mrf.mxu1  ;;  %v6427_v61 = vpop.f32.mrf.mxu0 }
 0x1cb   : > { %6866 = vst [vmem:[#allocation12_spill] sm:$0xff] %v6427_v61  ;;  %v4297_v1 = vadd.f32 %v4296_v50, %v4295_v41  ;;  %v6429_v17 = vadd.f32 %v2668_v54, %v2508_v38 }
 0x1cc   : > { %v4298_v20 = vpop.f32.mrf.mxu1  ;;  %v6431_v30 = vpop.f32.mrf.mxu0 }
 0x1cd   : > { %v2511_v60 = vadd.f32 %v4297_v1, %v6290_v13 }
 0x1ce   : > { %v4299_v59 = vpop.f32.mrf.mxu1  ;;  %v6434_v45 = vpop.f32.mrf.mxu0 }
 0x1cf   : > { %6867 = vst [vmem:[#allocation3_spill] sm:$0xff] %v6434_v45  ;;  %v4300_v52 = vadd.f32 %v4299_v59, %v4298_v20  ;;  %v6436_v44 = vadd.f32 %v2671_v63, %v2511_v60 }
 0x1d0   : > { %v4301_v49 = vpop.f32.mrf.mxu1  ;;  %v6438_v11 = vpop.f32.mrf.mxu0 }
 0x1d1   : > { %v2516_v37 = vadd.f32 %v4300_v52, %v6288_v2 }
 0x1d2   : > { %v4302_v3 = vpop.f32.mrf.mxu1  ;;  %v4392_v41 = vpop.f32.mrf.mxu0 }
 0x1d3   : > { %v4303_v54 = vadd.f32 %v4302_v3, %v4301_v49  ;;  %v6442_v38 = vadd.f32 %v6375_v23, %v2516_v37 }
 0x1d4   : > { %v4304_v50 = vpop.f32.mrf.mxu1  ;;  %v4393_v43 = vpop.f32.mrf.mxu0 }
 0x1d5   : > { %v2519_v13 = vadd.f32 %v4303_v54, %v6292_v32  ;;  %v6445_v1 = vadd.f32 %v4393_v43, %v4392_v41 }
 0x1d6   : > { %v4305_v20 = vpop.f32.mrf.mxu1  ;;  %v4395_v63 = vpop.f32.mrf.mxu0 }
 0x1d7   : > { %v4306_v60 = vadd.f32 %v4305_v20, %v4304_v50  ;;  %v6448_v59 = vadd.f32 %v6380_v22, %v2519_v13 }
 0x1d8   : > { %v4307_v45 = vpop.f32.mrf.mxu1  ;;  %v4396_v2 = vpop.f32.mrf.mxu0 }
 0x1d9   : > { %v2524_v52 = vadd.f32 %v4306_v60, %v6306_v42  ;;  %v6451_v49 = vadd.f32 %v4396_v2, %v4395_v63 }
 0x1da   : > { %v4308_v23 = vpop.f32.mrf.mxu1  ;;  %v6453_v37 = vpop.f32.mrf.mxu0 }
 0x1db   : > { %v4309_v3 = vadd.f32 %v4308_v23, %v4307_v45  ;;  %v6456_v32 = vadd.f32 %v6389_v48, %v2524_v52 }
 0x1dc   : > { %v4310_v43 = vpop.f32.mrf.mxu1  ;;  %v6458_v41 = vpop.f32.mrf.mxu0 }
 0x1dd   : > { %6868 = vst [vmem:[#allocation2_spill] sm:$0xff] %v6456_v32  ;;  %v2527_v54 = vadd.f32 %v4309_v3, %v6311_v57 }
 0x1de   : > { %v4311_v22 = vpop.f32.mrf.mxu1  ;;  %v6461_v50 = vpop.f32.mrf.mxu0 }
 0x1df   : > { %v4312_v13 = vadd.f32 %v4311_v22, %v4310_v43  ;;  %v6464_v42 = vadd.f32 %v6396_v16, %v2527_v54 }
 0x1e0   : > { %v4313_v20 = vpop.f32.mrf.mxu1  ;;  %v6466_v63 = vpop.f32.mrf.mxu0 }
 0x1e1   : > { %6869 = vst [vmem:[#allocation5_spill] sm:$0xff] %v6464_v42  ;;  %v2532_v45 = vadd.f32 %v4312_v13, %v6316_v12 }
 0x1e2   : > { %v4314_v60 = vpop.f32.mrf.mxu1  ;;  %v6469_v48 = vpop.f32.mrf.mxu0 }
 0x1e3   : > { %v4315_v2 = vadd.f32 %v4314_v60, %v4313_v20  ;;  %v6472_v52 = vadd.f32 %v6385_v10, %v2532_v45 }
 0x1e4   : > { %v4316_v57 = vpop.f32.mrf.mxu1  ;;  %v6474_v23 = vpop.f32.mrf.mxu0 }
 0x1e5   : > { %v2535_v3 = vadd.f32 %v4315_v2, %v6321_v47 }
 0x1e6   : > { %v4317_v43 = vpop.f32.mrf.mxu1  ;;  %v6477_v16 = vpop.f32.mrf.mxu0 }
 0x1e7   : > { %v4318_v54 = vadd.f32 %v4317_v43, %v4316_v57  ;;  %v6480_v22 = vadd.f32 %v6392_v53, %v2535_v3 }
 0x1e8   : > { %v4319_v12 = vpop.f32.mrf.mxu1  ;;  %v6482_v13 = vpop.f32.mrf.mxu0 }
 0x1e9   : > { %6870 = vst [vmem:[#allocation4_spill] sm:$0xff] %v6480_v22  ;;  %v2540_v20 = vadd.f32 %v4318_v54, %v6331_v55 }
 0x1ea   : > { %v4320_v60 = vpop.f32.mrf.mxu1  ;;  %v6485_v10 = vpop.f32.mrf.mxu0 }
 0x1eb   : > { %v4321_v45 = vadd.f32 %v4320_v60, %v4319_v12  ;;  %v6488_v61 = vadd.f32 %v6403_v26, %v2540_v20 }
 0x1ec   : > { %v4322_v47 = vpop.f32.mrf.mxu1  ;;  %v6490_v2 = vpop.f32.mrf.mxu0 }
 0x1ed   : > { %6871 = vst [vmem:[#allocation7_spill] sm:$0xff] %v6488_v61  ;;  %v2543_v57 = vadd.f32 %v4321_v45, %v6341_v34  ;;  %v4412_v32 = vadd.f32 %v6490_v2, %v6485_v10  ;;  %v4091_v10 = vld [vmem:[%s6574_s29 + $0x18] sm:$0xff]   ;;  %v4406_v2 = vadd.f32 %v6474_v23, %v6469_v48 }
 0x1ee   : > { %v4323_v43 = vpop.f32.mrf.mxu1  ;;  %v6493_v53 = vpop.f32.mrf.mxu0 }
 0x1ef   : > { %v4324_v3 = vadd.f32 %v4323_v43, %v4322_v47  ;;  %v6496_v35 = vadd.f32 %v6410_v5, %v2543_v57 }
 0x1f0   : > { %v4325_v55 = vpop.f32.mrf.mxu1  ;;  %v6498_v54 = vpop.f32.mrf.mxu0 }
 0x1f1   : > { %6872 = vst [vmem:[#allocation6_spill] sm:$0xff] %v6496_v35  ;;  %v2548_v12 = vadd.f32 %v4324_v3, %v6349_v33 }
 0x1f2   : > { %v4326_v60 = vpop.f32.mrf.mxu1  ;;  %v6501_v26 = vpop.f32.mrf.mxu0 }
 0x1f3   : > { %v4327_v20 = vadd.f32 %v4326_v60, %v4325_v55  ;;  %v6504_v61 = vadd.f32 %v6399_v6, %v2548_v12 }
 0x1f4   : > { %v4328_v34 = vpop.f32.mrf.mxu1  ;;  %v6506_v45 = vpop.f32.mrf.mxu0 }
 0x1f5   : > { %6873 = vst [vmem:[#allocation10_spill] sm:$0xff] %v6504_v61  ;;  %v2551_v47 = vadd.f32 %v4327_v20, %v6357_v62 }
 0x1f6   : > { %v4329_v43 = vpop.f32.mrf.mxu1  ;;  %v6509_v5 = vpop.f32.mrf.mxu0 }
 0x1f7   : > { %v4330_v57 = vadd.f32 %v4329_v43, %v4328_v34  ;;  %v6512_v35 = vadd.f32 %v6406_v51, %v2551_v47 }
 0x1f8   : > { %v4331_v33 = vpop.f32.mrf.mxu1  ;;  %v6514_v3 = vpop.f32.mrf.mxu0 }
 0x1f9   : > { %6874 = vst [vmem:[#allocation9_spill] sm:$0xff] %v6512_v35  ;;  %v2556_v55 = vadd.f32 %v4330_v57, %v6334_v14 }
 0x1fa   : > { %v4332_v60 = vpop.f32.mrf.mxu1  ;;  %v6517_v6 = vpop.f32.mrf.mxu0 }
 0x1fb   : > { %v4333_v12 = vadd.f32 %v4332_v60, %v4331_v33  ;;  %v6520_v61 = vadd.f32 %v6417_v56, %v2556_v55 }
 0x1fc   : > { %v4334_v62 = vpop.f32.mrf.mxu1  ;;  %v6522_v20 = vpop.f32.mrf.mxu0 }
 0x1fd   : > { %6875 = vst [vmem:[#allocation13_spill] sm:$0xff] %v6520_v61  ;;  %v2559_v34 = vadd.f32 %v4333_v12, %v6343_v21 }
 0x1fe   : > { %v4335_v43 = vpop.f32.mrf.mxu1  ;;  %v6525_v51 = vpop.f32.mrf.mxu0 }
 0x1ff   : > { %v4336_v47 = vadd.f32 %v4335_v43, %v4334_v62  ;;  %v6528_v35 = vadd.f32 %v6424_v19, %v2559_v34 }
 0x200   : > { %v4337_v14 = vpop.f32.mrf.mxu1  ;;  %v6530_v57 = vpop.f32.mrf.mxu0 }
 0x201   : > { %6876 = vst [vmem:[#allocation14_spill] sm:$0xff] %v6528_v35  ;;  %v2564_v33 = vadd.f32 %v4336_v47, %v6326_v36 }
 0x202   : > { %v4338_v60 = vpop.f32.mrf.mxu1  ;;  %v6533_v56 = vpop.f32.mrf.mxu0 }
 0x203   : > { %v4339_v55 = vadd.f32 %v4338_v60, %v4337_v14  ;;  %v6536_v61 = vadd.f32 %v6413_v0, %v2564_v33 }
 0x204   : > { %v4340_v21 = vpop.f32.mrf.mxu1  ;;  %v6538_v12 = vpop.f32.mrf.mxu0 }
 0x205   : > { %6877 = vst [vmem:[#allocation15_spill] sm:$0xff] %v6536_v61  ;;  %v2567_v62 = vadd.f32 %v4339_v55, %v6338_v40 }
 0x206   : > { %v4341_v43 = vpop.f32.mrf.mxu1  ;;  %v6541_v19 = vpop.f32.mrf.mxu0 }
 0x207   : > { %v4342_v34 = vadd.f32 %v4341_v43, %v4340_v21  ;;  %v6544_v35 = vadd.f32 %v6420_v46, %v2567_v62 }
 0x208   : > { %v4343_v36 = vpop.f32.mrf.mxu1  ;;  %v6546_v47 = vpop.f32.mrf.mxu0 }
 0x209   : > { %6878 = vst [vmem:[#allocation16_spill] sm:$0xff] %v6544_v35  ;;  %v2572_v14 = vadd.f32 %v4342_v34, %v6352_v15 }
 0x20a   : > { %v4344_v0 = vpop.f32.mrf.mxu1  ;;  %v6549_v33 = vpop.f32.mrf.mxu0 }
 0x20b   : > { %v4345_v60 = vadd.f32 %v4344_v0, %v4343_v36  ;;  %v6552_v61 = vadd.f32 %v6431_v30, %v2572_v14  ;;  %v4089_v14 = vld [vmem:[%s6574_s29 + $0x8] sm:$0xff]  }
 0x20c   : > { %v6554_v40 = vpop.f32.mrf.mxu1  ;;  %v6556_v55 = vpop.f32.mrf.mxu0 }
 0x20d   : > { %6879 = vst [vmem:[#allocation17_spill] sm:$0xff] %v6552_v61  ;;  %6880 = vst [vmem:[#allocation18_spill] sm:$0xff] %v6554_v40  ;;  %v2575_v21 = vadd.f32 %v4345_v60, %v6360_v25  ;;  %v4018_v61 = vld [vmem:[%s6574_s29] sm:$0xff]  }
 0x20e   : > { %v6559_v46 = vpop.f32.mrf.mxu1  ;;  %v6561_v62 = vpop.f32.mrf.mxu0  ;;  %v4019_v42 = vunpack.c.l.bf16 %v4018_v61 }
 0x20f   : > { %6881 = vst [vmem:[#allocation19_spill] sm:$0xff] %v6559_v46  ;;  %v6565_v15 = vadd.f32 %v6438_v11, %v2575_v21  ;;  %v4400_v11 = vadd.f32 %v6458_v41, %v6453_v37  ;;  %v6588_v21 = vld [vmem:[%s6809_s3] ss:$0 sm:$0xff]  ;;  %v4023_v41 = vunpack.c.l.bf16 %v4089_v14 }
 0x210   : > { %v6567_v43 = vpop.f32.mrf.mxu1  ;;  %v6569_v34 = vpop.f32.mrf.mxu0 }
 0x211   : > { %6882 = vst [vmem:[#allocation20_spill] sm:$0xff] %v6565_v15  ;;  %6883 = vst [vmem:[#allocation21_spill] sm:$0xff] %v6567_v43 }
 0x212   : > { %v6576_v25 = vpop.f32.mrf.mxu1  ;;  %v6578_v30 = vpop.f32.mrf.mxu0 }
 0x213   : > { %6884 = vst [vmem:[#allocation22_spill] sm:$0xff] %v6576_v25  ;;  %v4403_v25 = vadd.f32 %v6466_v63, %v6461_v50 }
 0x214   : > { %v4626_v36 = vpop.f32.mrf.mxu1  ;;  %v6583_v0 = vpop.f32.mrf.mxu0 }
 0x215   : > { %v3163_v60 = vadd.f32 %v4626_v36, %v4400_v11 }
 0x216   : > { %v3154_v15 = vpop.f32.mrf.mxu1  ;;  %v6591_v35 = vpop.f32.mrf.mxu0 }
 0x217   : > { %v3283_v37 = vadd.f32 %v3163_v60, %v6369_v24  ;;  %v3155_v43 = vadd.f32 %v6445_v1, %v3154_v15  ;;  %v4024_v24 = vunpack.c.h.bf16 %v4089_v14 }
 0x218   : > { %v4627_v11 = vpop.f32.mrf.mxu1  ;;  %v6598_v36 = vpop.f32.mrf.mxu0 }
 0x219   : > { %v3322_v46 = vadd.f32 %v6588_v21, %v3283_v37  ;;  %v3281_v40 = vadd.f32 %v3155_v43, %v6363_v9  ;;  %v3166_v22 = vadd.f32 %v4627_v11, %v4403_v25  ;;  %v4020_v25 = vunpack.c.h.bf16 %v4018_v61 }
 0x21a   : > { %v3157_v1 = vpop.f32.mrf.mxu1  ;;  %v6609_v50 = vpop.f32.mrf.mxu0 }
 0x21b   : > { %v3418_v63 = vadd.f32 %v4023_v41, %v3322_v46  ;;  %v3320_v15 = vadd.f32 %v6588_v21, %v3281_v40  ;;  %v3284_v9 = vadd.f32 %v3166_v22, %v6372_v28  ;;  %v3158_v43 = vadd.f32 %v6451_v49, %v3157_v1  ;;  %v4090_v28 = vld [vmem:[%s6574_s29 + $0x10] sm:$0xff]  }
 0x21c   : > { %v4630_v60 = vpop.f32.mrf.mxu1  ;;  %v6617_v37 = vpop.f32.mrf.mxu0  ;;  %v4415_v49 = vadd.f32 %v6498_v54, %v6493_v53  ;;  %v4031_v22 = vunpack.c.l.bf16 %v4091_v10 }
 0x21d   : > { %3450 = vst [vmem:[%s6607_s9 + $0x10] sm:$0xff] %v3418_v63  ;;  %v3416_v14 = vadd.f32 %v4019_v42, %v3320_v15  ;;  %v3323_v11 = vadd.f32 %v6588_v21, %v3284_v9  ;;  %v3282_v46 = vadd.f32 %v3158_v43, %v6366_v8  ;;  %v3179_v40 = vadd.f32 %v4630_v60, %v4412_v32 }
 0x21e   : > { %v3170_v41 = vpop.f32.mrf.mxu1  ;;  %v6625_v1 = vpop.f32.mrf.mxu0  ;;  %v4409_v8 = vadd.f32 %v6482_v13, %v6477_v16  ;;  %v4027_v32 = vunpack.c.l.bf16 %v4090_v28  ;;  %v4032_v43 = vunpack.c.h.bf16 %v4091_v10 }
 0x21f   : > { %3448 = vst [vmem:[%s6607_s9] sm:$0xff] %v3416_v14  ;;  %v3419_v61 = vadd.f32 %v4024_v24, %v3323_v11  ;;  %v3321_v48 = vadd.f32 %v6588_v21, %v3282_v46  ;;  %v3287_v42 = vadd.f32 %v3179_v40, %v6387_v39  ;;  %v3171_v23 = vadd.f32 %v4406_v2, %v3170_v41  ;;  %v4093_v11 = vld [vmem:[%s6574_s29 + $0x28] sm:$0xff]   ;;  %v4092_v41 = vld [vmem:[%s6574_s29 + $0x20] sm:$0xff]  }
 0x220   : > { %v4631_v63 = vpop.f32.mrf.mxu1  ;;  %v6632_v15 = vpop.f32.mrf.mxu0  ;;  %v4424_v39 = vadd.f32 %v6522_v20, %v6517_v6  ;;  %v4028_v46 = vunpack.c.h.bf16 %v4090_v28 }
 0x221   : > { %3451 = vst [vmem:[%s6607_s9 + $0x18] sm:$0xff] %v3419_v61  ;;  %v3417_v53 = vadd.f32 %v4020_v25, %v3321_v48  ;;  %v3326_v54 = vadd.f32 %v6588_v21, %v3287_v42  ;;  %v3285_v24 = vadd.f32 %v3171_v23, %v6377_v18  ;;  %v3182_v9 = vadd.f32 %v4631_v63, %v4415_v49 }
 0x222   : > { %v3173_v2 = vpop.f32.mrf.mxu1  ;;  %v6639_v60 = vpop.f32.mrf.mxu0  ;;  %v4418_v18 = vadd.f32 %v6506_v45, %v6501_v26  ;;  %v4039_v61 = vunpack.c.l.bf16 %v4093_v11 }
 0x223   : > { %3449 = vst [vmem:[%s6607_s9 + $0x8] sm:$0xff] %v3417_v53  ;;  %v3422_v16 = vadd.f32 %v4031_v22, %v3326_v54  ;;  %v3324_v13 = vadd.f32 %v6588_v21, %v3285_v24  ;;  %v3288_v25 = vadd.f32 %v3182_v9, %v6394_v29  ;;  %v3174_v14 = vadd.f32 %v4409_v8, %v3173_v2 }
 0x224   : > { %v4634_v40 = vpop.f32.mrf.mxu1  ;;  %v6647_v6 = vpop.f32.mrf.mxu0  ;;  %v4427_v29 = vadd.f32 %v6530_v57, %v6525_v51  ;;  %v4035_v8 = vunpack.c.l.bf16 %v4092_v41  ;;  %v4040_v24 = vunpack.c.h.bf16 %v4093_v11 }
 0x225   : > { %3454 = vst [vmem:[%s6607_s9 + $0x30] sm:$0xff] %v3422_v16  ;;  %v3420_v20 = vadd.f32 %v4027_v32, %v3324_v13  ;;  %v3327_v10 = vadd.f32 %v6588_v21, %v3288_v25  ;;  %v3286_v49 = vadd.f32 %v3174_v14, %v6382_v58  ;;  %v3195_v22 = vadd.f32 %v4634_v40, %v4424_v39  ;;  %v4095_v16 = vld [vmem:[%s6574_s29 + $0x38] sm:$0xff]  }
 0x226   : > { %v3186_v48 = vpop.f32.mrf.mxu1  ;;  %v6655_v42 = vpop.f32.mrf.mxu0  ;;  %v4421_v58 = vadd.f32 %v6514_v3, %v6509_v5  ;;  %v4036_v13 = vunpack.c.h.bf16 %v4092_v41  ;;  %v4047_v40 = vunpack.c.l.bf16 %v4095_v16 }
 0x227   : > { %3452 = vst [vmem:[%s6607_s9 + $0x20] sm:$0xff] %v3420_v20  ;;  %v3423_v26 = vadd.f32 %v4032_v43, %v3327_v10  ;;  %v3325_v45 = vadd.f32 %v6588_v21, %v3286_v49  ;;  %v3291_v28 = vadd.f32 %v3195_v22, %v6415_v27  ;;  %v3187_v23 = vadd.f32 %v4418_v18, %v3186_v48 }
 0x228   : > { %v4635_v32 = vpop.f32.mrf.mxu1  ;;  %v6662_v63 = vpop.f32.mrf.mxu0  ;;  %v4436_v27 = vadd.f32 %v6556_v55, %v6549_v33 }
 0x229   : > { %3455 = vst [vmem:[%s6607_s9 + $0x38] sm:$0xff] %v3423_v26  ;;  %v3421_v51 = vadd.f32 %v4028_v46, %v3325_v45  ;;  %v3330_v57 = vadd.f32 %v6588_v21, %v3291_v28  ;;  %v3289_v53 = vadd.f32 %v3187_v23, %v6401_v4  ;;  %v3198_v54 = vadd.f32 %v4635_v32, %v4427_v29  ;;  %v4094_v46 = vld [vmem:[%s6574_s29 + $0x30] sm:$0xff]   ;;  %v4097_v32 = vld [vmem:[%s6574_s29 + $0x48] sm:$0xff]  }
 0x22a   : > { %v3189_v9 = vpop.f32.mrf.mxu1  ;;  %v6669_v39 = vpop.f32.mrf.mxu0  ;;  %v4430_v4 = vadd.f32 %v6538_v12, %v6533_v56  ;;  %v4043_v41 = vunpack.c.l.bf16 %v4094_v46  ;;  %v4048_v45 = vunpack.c.h.bf16 %v4095_v16 }
 0x22b   : > { %3453 = vst [vmem:[%s6607_s9 + $0x28] sm:$0xff] %v3421_v51  ;;  %v3426_v5 = vadd.f32 %v4039_v61, %v3330_v57  ;;  %v3328_v3 = vadd.f32 %v6588_v21, %v3289_v53  ;;  %v3292_v43 = vadd.f32 %v3198_v54, %v6422_v31  ;;  %v3190_v2 = vadd.f32 %v4421_v58, %v3189_v9 }
 0x22c   : > { %v4638_v25 = vpop.f32.mrf.mxu1  ;;  %v6677_v33 = vpop.f32.mrf.mxu0  ;;  %v4439_v31 = vadd.f32 %v6569_v34, %v6561_v62  ;;  %v4044_v51 = vunpack.c.h.bf16 %v4094_v46  ;;  %v4055_v9 = vunpack.c.l.bf16 %v4097_v32 }
 0x22d   : > { %3458 = vst [vmem:[%s6607_s9 + $0x50] sm:$0xff] %v3426_v5  ;;  %v3424_v55 = vadd.f32 %v4035_v8, %v3328_v3  ;;  %v3331_v14 = vadd.f32 %v6588_v21, %v3292_v43  ;;  %v3290_v11 = vadd.f32 %v3190_v2, %v6408_v7  ;;  %v3211_v18 = vadd.f32 %v4638_v25, %v4436_v27  ;;  %v6885_v25 = vld [vmem:[#allocation2_spill] sm:$0xff] }
 0x22e   : > { %v3202_v20 = vpop.f32.mrf.mxu1  ;;  %v6685_v10 = vpop.f32.mrf.mxu0  ;;  %v4433_v7 = vadd.f32 %v6546_v47, %v6541_v19 }
 0x22f   : > { %3456 = vst [vmem:[%s6607_s9 + $0x40] sm:$0xff] %v3424_v55  ;;  %v3427_v56 = vadd.f32 %v4040_v24, %v3331_v14  ;;  %v3329_v12 = vadd.f32 %v6588_v21, %v3290_v11  ;;  %v3295_v49 = vadd.f32 %v3211_v18, %v6442_v38  ;;  %v3203_v22 = vadd.f32 %v4430_v4, %v3202_v20  ;;  %v4096_v24 = vld [vmem:[%s6574_s29 + $0x40] sm:$0xff]  }
 0x230   : > { %v4639_v29 = vpop.f32.mrf.mxu1  ;;  %v6692_v61 = vpop.f32.mrf.mxu0  ;;  %v4448_v38 = vadd.f32 %v6617_v37, %v6609_v50  ;;  %v4051_v16 = vunpack.c.l.bf16 %v4096_v24  ;;  %v4056_v11 = vunpack.c.h.bf16 %v4097_v32 }
 0x231   : > { %3459 = vst [vmem:[%s6607_s9 + $0x58] sm:$0xff] %v3427_v56  ;;  %v3425_v62 = vadd.f32 %v4036_v13, %v3329_v12  ;;  %v3334_v34 = vadd.f32 %v6588_v21, %v3295_v49  ;;  %v3293_v48 = vadd.f32 %v3203_v22, %v6429_v17  ;;  %v3214_v26 = vadd.f32 %v4639_v29, %v4439_v31  ;;  %v6886_v31 = vld [vmem:[#allocation4_spill] sm:$0xff]  ;;  %v4099_v56 = vld [vmem:[%s6574_s29 + $0x58] sm:$0xff]  }
 0x232   : > { %v3205_v28 = vpop.f32.mrf.mxu1  ;;  %v6699_v23 = vpop.f32.mrf.mxu0  ;;  %v4442_v17 = vadd.f32 %v6583_v0, %v6578_v30  ;;  %v4454_v12 = vadd.f32 %v6647_v6, %v6639_v60  ;;  %v4052_v49 = vunpack.c.h.bf16 %v4096_v24 }
 0x233   : > { %3457 = vst [vmem:[%s6607_s9 + $0x48] sm:$0xff] %v3425_v62  ;;  %v3430_v19 = vadd.f32 %v4047_v40, %v3334_v34  ;;  %v3332_v47 = vadd.f32 %v6588_v21, %v3293_v48  ;;  %v3296_v58 = vadd.f32 %v3214_v26, %v6448_v59  ;;  %v3206_v8 = vadd.f32 %v4433_v7, %v3205_v28  ;;  %v4098_v34 = vld [vmem:[%s6574_s29 + $0x50] sm:$0xff]   ;;  %v6888_v28 = vld [vmem:[#allocation10_spill] sm:$0xff] }
 0x234   : > { %v4642_v57 = vpop.f32.mrf.mxu1  ;;  %v6707_v50 = vpop.f32.mrf.mxu0  ;;  %v4451_v59 = vadd.f32 %v6632_v15, %v6625_v1  ;;  %v4463_v48 = vadd.f32 %v6692_v61, %v6685_v10  ;;  %v4063_v26 = vunpack.c.l.bf16 %v4099_v56 }
 0x235   : > { %3462 = vst [vmem:[%s6607_s9 + $0x70] sm:$0xff] %v3430_v19  ;;  %v3428_v37 = vadd.f32 %v4043_v41, %v3332_v47  ;;  %v3335_v53 = vadd.f32 %v6588_v21, %v3296_v58  ;;  %v3294_v54 = vadd.f32 %v3206_v8, %v6436_v44  ;;  %v3227_v27 = vadd.f32 %v4642_v57, %v4448_v38  ;;  %v6887_v41 = vld [vmem:[#allocation5_spill] sm:$0xff] }
 0x236   : > { %v3218_v5 = vpop.f32.mrf.mxu1  ;;  %v6715_v3 = vpop.f32.mrf.mxu0  ;;  %v4445_v44 = vadd.f32 %v6598_v36, %v6591_v35  ;;  %v4457_v58 = vadd.f32 %v6662_v63, %v6655_v42  ;;  %v4059_v8 = vunpack.c.l.bf16 %v4098_v34  ;;  %v6890_v63 = vld [vmem:[#allocation9_spill] sm:$0xff] }
 0x237   : > { %3460 = vst [vmem:[%s6607_s9 + $0x60] sm:$0xff] %v3428_v37  ;;  %v3431_v30 = vadd.f32 %v4048_v45, %v3335_v53  ;;  %v3333_v0 = vadd.f32 %v6588_v21, %v3294_v54  ;;  %v3299_v43 = vadd.f32 %v3227_v27, %v6472_v52  ;;  %v3219_v2 = vadd.f32 %v4442_v17, %v3218_v5 }
 0x238   : > { %v4643_v4 = vpop.f32.mrf.mxu1  ;;  %v6722_v13 = vpop.f32.mrf.mxu0  ;;  %v4460_v52 = vadd.f32 %v6677_v33, %v6669_v39  ;;  %v4064_v54 = vunpack.c.h.bf16 %v4099_v56 }
 0x239   : > { %3463 = vst [vmem:[%s6607_s9 + $0x78] sm:$0xff] %v3431_v30  ;;  %v3429_v1 = vadd.f32 %v4044_v51, %v3333_v0  ;;  %v3338_v15 = vadd.f32 %v6588_v21, %v3299_v43  ;;  %v3297_v55 = vadd.f32 %v3219_v2, %v6885_v25  ;;  %v3230_v14 = vadd.f32 %v4643_v4, %v4451_v59  ;;  %v6889_v51 = vld [vmem:[#allocation7_spill] sm:$0xff] }
 0x23a   : > { %v3221_v18 = vpop.f32.mrf.mxu1  ;;  %v4470_v46 = vpop.f32.mrf.mxu0  ;;  %v4101_v30 = vld [vmem:[%s6574_s29 + $0x68] sm:$0xff]   ;;  %v4466_v0 = vadd.f32 %v6707_v50, %v6699_v23  ;;  %v4060_v43 = vunpack.c.h.bf16 %v4098_v34  ;;  %v4469_v56 = vadd.f32 %v6722_v13, %v6715_v3 }
 0x23b   : > { %3461 = vst [vmem:[%s6607_s9 + $0x68] sm:$0xff] %v3429_v1  ;;  %v3434_v35 = vadd.f32 %v4055_v9, %v3338_v15  ;;  %v3336_v36 = vadd.f32 %v6588_v21, %v3297_v55  ;;  %v3300_v40 = vadd.f32 %v3230_v14, %v6886_v31  ;;  %v3222_v20 = vadd.f32 %v4445_v44, %v3221_v18  ;;  %v6891_v1 = vld [vmem:[#allocation6_spill] sm:$0xff]  ;;  %v6894_v31 = vld [vmem:[#allocation15_spill] sm:$0xff] }
 0x23c   : > { %v4646_v22 = vpop.f32.mrf.mxu1  ;;  %v4471_v7 = vpop.f32.mrf.mxu0  ;;  %v4100_v55 = vld [vmem:[%s6574_s29 + $0x60] sm:$0xff]  }
 0x23d   : > { %3466 = vst [vmem:[%s6607_s9 + $0x90] sm:$0xff] %v3434_v35  ;;  %v3432_v39 = vadd.f32 %v4051_v16, %v3336_v36  ;;  %v3339_v33 = vadd.f32 %v6588_v21, %v3300_v40  ;;  %v3298_v29 = vadd.f32 %v3222_v20, %v6887_v41  ;;  %v3243_v62 = vadd.f32 %v4646_v22, %v4460_v52  ;;  %v6892_v14 = vld [vmem:[#allocation18_spill] sm:$0xff]  ;;  %v6893_v52 = vld [vmem:[#allocation19_spill] sm:$0xff] }
 0x23e   : > { %v3234_v38 = vpop.f32.mrf.mxu1  ;;  %v4473_v45 = vpop.f32.mrf.mxu0  ;;  %v4472_v53 = vadd.f32 %v4471_v7, %v4470_v46  ;;  %v4071_v46 = vunpack.c.l.bf16 %v4101_v30 }
 0x23f   : > { %3464 = vst [vmem:[%s6607_s9 + $0x80] sm:$0xff] %v3432_v39  ;;  %v3435_v60 = vadd.f32 %v4056_v11, %v3339_v33  ;;  %v3337_v6 = vadd.f32 %v6588_v21, %v3298_v29  ;;  %v3303_v19 = vadd.f32 %v3243_v62, %v6888_v28  ;;  %v3235_v47 = vadd.f32 %v4454_v12, %v3234_v38  ;;  %v6895_v33 = vld [vmem:[#allocation13_spill] sm:$0xff]  ;;  %v6896_v62 = vld [vmem:[#allocation8_spill] sm:$0xff] }
 0x240   : > { %v4647_v32 = vpop.f32.mrf.mxu1  ;;  %v4474_v17 = vpop.f32.mrf.mxu0  ;;  %v4348_v11 = vadd.f32 %v6893_v52, %v6892_v14  ;;  %v4067_v12 = vunpack.c.l.bf16 %v4100_v55  ;;  %v6899_v28 = vld [vmem:[#allocation16_spill] sm:$0xff] }
 0x241   : > { %3467 = vst [vmem:[%s6607_s9 + $0x98] sm:$0xff] %v3435_v60  ;;  %v3433_v10 = vadd.f32 %v4052_v49, %v3337_v6  ;;  %v3342_v61 = vadd.f32 %v6588_v21, %v3303_v19  ;;  %v3301_v57 = vadd.f32 %v3235_v47, %v6889_v51  ;;  %v3246_v37 = vadd.f32 %v4647_v32, %v4463_v48  ;;  %v6897_v48 = vld [vmem:[#allocation21_spill] sm:$0xff]  ;;  %v6900_v51 = vld [vmem:[#allocation14_spill] sm:$0xff] }
 0x242   : > { %v3237_v27 = vpop.f32.mrf.mxu1  ;;  %v4476_v24 = vpop.f32.mrf.mxu0  ;;  %v4475_v18 = vadd.f32 %v4474_v17, %v4473_v45  ;;  %v2580_v34 = vadd.f32 %v4348_v11, %v6896_v62  ;;  %v4072_v45 = vunpack.c.h.bf16 %v4101_v30  ;;  %v6904_v11 = vld [vmem:[#allocation3_spill] sm:$0xff] }
 0x243   : > { %3465 = vst [vmem:[%s6607_s9 + $0x88] sm:$0xff] %v3433_v10  ;;  %v3438_v59 = vadd.f32 %v4063_v26, %v3342_v61  ;;  %v3340_v42 = vadd.f32 %v6588_v21, %v3301_v57  ;;  %v3304_v9 = vadd.f32 %v3246_v37, %v6890_v63  ;;  %v3238_v5 = vadd.f32 %v4457_v58, %v3237_v27  ;;  %v6898_v26 = vld [vmem:[#allocation22_spill] sm:$0xff]  ;;  %v6901_v27 = vld [vmem:[#allocation12_spill] sm:$0xff] }
 0x244   : > { %v4650_v2 = vpop.f32.mrf.mxu1  ;;  %v4477_v44 = vpop.f32.mrf.mxu0  ;;  %v4351_v38 = vadd.f32 %v6898_v26, %v6897_v48 }
 0x245   : > { %3470 = vst [vmem:[%s6607_s9 + $0xb0] sm:$0xff] %v3438_v59  ;;  %v3436_v16 = vadd.f32 %v4059_v8, %v3340_v42  ;;  %v3343_v4 = vadd.f32 %v6588_v21, %v3304_v9  ;;  %v3302_v15 = vadd.f32 %v3238_v5, %v6891_v1  ;;  %v3259_v25 = vadd.f32 %v4650_v2, %v4472_v53  ;;  %v4103_v53 = vld [vmem:[%s6574_s29 + $0x78] sm:$0xff]   ;;  %v6902_v42 = vld [vmem:[#allocation11_spill] sm:$0xff] }
 0x246   : > { %v3250_v35 = vpop.f32.mrf.mxu1  ;;  %v4479_v36 = vpop.f32.mrf.mxu0  ;;  %v4478_v58 = vadd.f32 %v4477_v44, %v4476_v24  ;;  %v4068_v8 = vunpack.c.h.bf16 %v4100_v55  ;;  %v2741_v59 = vadd.f32 %v6901_v27, %v2580_v34  ;;  %v2583_v63 = vadd.f32 %v4351_v38, %v6902_v42  ;;  %v6903_v55 = vld [vmem:[#allocation17_spill] sm:$0xff] }
 0x247   : > { %3468 = vst [vmem:[%s6607_s9 + $0xa0] sm:$0xff] %v3436_v16  ;;  %v3439_v23 = vadd.f32 %v4064_v54, %v3343_v4  ;;  %v3341_v50 = vadd.f32 %v6588_v21, %v3302_v15  ;;  %v3307_v40 = vadd.f32 %v3259_v25, %v6894_v31  ;;  %v3251_v20 = vadd.f32 %v4466_v0, %v3250_v35  ;;  %v4102_v54 = vld [vmem:[%s6574_s29 + $0x70] sm:$0xff]  }
 0x248   : > { %v4651_v49 = vpop.f32.mrf.mxu1  ;;  %v4480_v22 = vpop.f32.mrf.mxu0  ;;  %v4079_v44 = vunpack.c.l.bf16 %v4103_v53  ;;  %v4075_v16 = vunpack.c.l.bf16 %v4102_v54  ;;  %v4080_v31 = vunpack.c.h.bf16 %v4103_v53 }
 0x249   : > { %3471 = vst [vmem:[%s6607_s9 + $0xb8] sm:$0xff] %v3439_v23  ;;  %v3437_v7 = vadd.f32 %v4060_v43, %v3341_v50  ;;  %v3346_v39 = vadd.f32 %v6588_v21, %v3307_v40  ;;  %v3305_v41 = vadd.f32 %v3251_v20, %v6895_v33  ;;  %v3262_v29 = vadd.f32 %v4651_v49, %v4475_v18  ;;  %v6905_v49 = vld [vmem:[#allocation20_spill] sm:$0xff] }
 0x24a   : > { %v3253_v60 = vpop.f32.mrf.mxu1  ;;  %v4482_v3 = vpop.f32.mrf.mxu0  ;;  %v4481_v2 = vadd.f32 %v4480_v22, %v4479_v36  ;;  %v2744_v18 = vadd.f32 %v6904_v11, %v2583_v63  ;;  %v4076_v40 = vunpack.c.h.bf16 %v4102_v54 }
 0x24b   : > { %3469 = vst [vmem:[%s6607_s9 + $0xa8] sm:$0xff] %v3437_v7  ;;  %v3442_v13 = vadd.f32 %v4071_v46, %v3346_v39  ;;  %v3344_v6 = vadd.f32 %v6588_v21, %v3305_v41  ;;  %v3308_v19 = vadd.f32 %v3262_v29, %v6899_v28  ;;  %v3254_v47 = vadd.f32 %v4469_v56, %v3253_v60 }
 0x24c   : > { %v4654_v32 = vpop.f32.mrf.mxu1  ;;  %v4483_v17 = vpop.f32.mrf.mxu0 }
 0x24d   : > { %3474 = vst [vmem:[%s6607_s9 + $0xd0] sm:$0xff] %v3442_v13  ;;  %v3440_v10 = vadd.f32 %v4067_v12, %v3344_v6  ;;  %v3347_v61 = vadd.f32 %v6588_v21, %v3308_v19  ;;  %v3306_v57 = vadd.f32 %v3254_v47, %v6900_v51  ;;  %v4484_v37 = vadd.f32 %v4483_v17, %v4482_v3 }
 0x24e   : > { %v3266_v9 = vpop.f32.mrf.mxu1  ;;  %v4485_v5 = vpop.f32.mrf.mxu0 }
 0x24f   : > { %3472 = vst [vmem:[%s6607_s9 + $0xc0] sm:$0xff] %v3440_v10  ;;  %v3443_v24 = vadd.f32 %v4072_v45, %v3347_v61  ;;  %v3345_v30 = vadd.f32 %v6588_v21, %v3306_v57  ;;  %v3275_v0 = vadd.f32 %v4654_v32, %v4484_v37  ;;  %v3267_v43 = vadd.f32 %v4478_v58, %v3266_v9 }
 0x250   : > { %v4655_v4 = vpop.f32.mrf.mxu1  ;;  %v4486_v1 = vpop.f32.mrf.mxu0 }
 0x251   : > { %3475 = vst [vmem:[%s6607_s9 + $0xd8] sm:$0xff] %v3443_v24  ;;  %v3441_v15 = vadd.f32 %v4068_v8, %v3345_v30  ;;  %v3311_v25 = vadd.f32 %v3275_v0, %v2741_v59  ;;  %v3309_v14 = vadd.f32 %v3267_v43, %v6903_v55  ;;  %v4487_v52 = vadd.f32 %v4486_v1, %v4485_v5 }
 0x252   : > { %v3269_v46 = vpop.f32.mrf.mxu1 }
 0x253   : > { %3473 = vst [vmem:[%s6607_s9 + $0xc8] sm:$0xff] %v3441_v15  ;;  %v3350_v35 = vadd.f32 %v6588_v21, %v3311_v25  ;;  %v3348_v36 = vadd.f32 %v6588_v21, %v3309_v14  ;;  %v3278_v23 = vadd.f32 %v4655_v4, %v4487_v52  ;;  %v3270_v50 = vadd.f32 %v4481_v2, %v3269_v46 }
 0x255   : > { %v3446_v20 = vadd.f32 %v4079_v44, %v3350_v35  ;;  %v3444_v56 = vadd.f32 %v4075_v16, %v3348_v36  ;;  %v3312_v12 = vadd.f32 %v3278_v23, %v2744_v18  ;;  %v3310_v22 = vadd.f32 %v3270_v50, %v6905_v49 }
 0x257   : > { %3478 = vst [vmem:[%s6607_s9 + $0xf0] sm:$0xff] %v3446_v20  ;;  %3476 = vst [vmem:[%s6607_s9 + $0xe0] sm:$0xff] %v3444_v56  ;;  %v3351_v7 = vadd.f32 %v6588_v21, %v3312_v12  ;;  %v3349_v39 = vadd.f32 %v6588_v21, %v3310_v22 }
 0x259   : > { %v3447_v33 = vadd.f32 %v4080_v31, %v3351_v7  ;;  %v3445_v41 = vadd.f32 %v4076_v40, %v3349_v39 }
 0x25b   : > { %3479 = vst [vmem:[%s6607_s9 + $0xf8] sm:$0xff] %v3447_v33  ;;  %3477 = vst [vmem:[%s6607_s9 + $0xe8] sm:$0xff] %v3445_v41 }
 0x25c PF: > { %s16_s23 = sadd.s32 1, %s4988_s23   ;;  %s6906_s21 = smov %s4984_s22 }
 0x25d   : > { %p13_p5 = scmp.ge.s32.totalorder %s16_s23, 4   ;;  %s6907_s22 = smov %s6909_s24 }
 0x25f   :  { %15 = sbr.rel (!%p13_p5) target bundleno = 2 (0x2), region = 86 }

</bundles_post_ra>
